<compile_context>
chip_gen: v7x
topology: tpu7x:2x2x1
jax: 0.10.0
libtpu: 0.0.40
codegen_flags: <defaults>
</compile_context>

<pallas_src>
import math

import jax
import jax.numpy as jnp
from jax.experimental import pallas as pl
from jax.experimental.pallas import tpu as pltpu

# ----------------------- model configuration (small) -----------------------
D_MODEL = 32
N_HEADS = 4
HEAD_DIM = D_MODEL // N_HEADS
N_LAYERS = 2
DIM_FF = 64
SRC_VOCAB = 50
TGT_VOCAB = 60
EMB_PAD = 64          # vocab rows padded to 64 (one table-slab segment)
PE_ROWS = 64          # positional-encoding rows kept resident (max supported seq len)
V_PAD = 128           # lane-dense padded logit width (sliced back to TGT_VOCAB outside)
NEG = -1e9            # additive mask value (stand-in for -inf; avoids NaN rows)
LN_EPS = 1e-5         # PyTorch LayerNorm default
SCALE = 1.0 / math.sqrt(HEAD_DIM)
SQRT_D = math.sqrt(D_MODEL)

# ---------------- canonical packing orders (init + kernel must agree) ----------------
ENC_PROJS = ("wq", "wk", "wv", "wo")
DEC_PROJS = ("swq", "swk", "swv", "swo", "cwq", "cwk", "cwv", "cwo")
WDD_NAMES = tuple(f"e{l}_{p}" for l in range(N_LAYERS) for p in ENC_PROJS) + \
            tuple(f"d{l}_{p}" for l in range(N_LAYERS) for p in DEC_PROJS)
WDD_IDX = {n: i for i, n in enumerate(WDD_NAMES)}

ENC_VECS = ("bq", "bk", "bv", "bo", "ln1g", "ln1b", "b1", "b2", "ln2g", "ln2b")
DEC_VECS = ("sbq", "sbk", "sbv", "sbo", "ln1g", "ln1b",
            "cbq", "cbk", "cbv", "cbo", "ln2g", "ln2b",
            "b1", "b2", "ln3g", "ln3b")
VEC_NAMES = tuple(f"e{l}_{v}" for l in range(N_LAYERS) for v in ENC_VECS) + \
            ("encn_g", "encn_b") + \
            tuple(f"d{l}_{v}" for l in range(N_LAYERS) for v in DEC_VECS) + \
            ("decn_g", "decn_b", "fcb")
VEC_IDX = {n: i for i, n in enumerate(VEC_NAMES)}


# -------------------------- fused whole-model kernel --------------------------
def _make_kernel(B, Ss, St):
    Rs, Rt = B * Ss, B * St
    f32 = jnp.float32

    def kernel(sid_ref, tid_ref, tab_ref, wdd_ref, wff1_ref, wff2_ref,
               fcw_ref, vec_ref, out_ref):

        def vec(name, width=D_MODEL):
            return vec_ref[VEC_IDX[name], :width]

        def dense(x, w, bname):
            return jnp.dot(x, w, preferred_element_type=f32) + vec(bname, w.shape[1])

        def ln(x, gname, bname):
            mu = jnp.mean(x, axis=-1, keepdims=True)
            var = jnp.mean(jnp.square(x - mu), axis=-1, keepdims=True)
            return (x - mu) * jax.lax.rsqrt(var + LN_EPS) * vec(gname) + vec(bname)

        def heads(x2):
            # (R, D) -> (H, R, HD): lane slices stacked on a leading axis
            return jnp.stack(
                [x2[:, h * HEAD_DIM:(h + 1) * HEAD_DIM] for h in range(N_HEADS)], axis=0)

        def mha(q2, k2, v2, bias):
            # all heads batched: one score einsum, one mask add, one softmax, one PV einsum
            qh, kh, vh = heads(q2), heads(k2), heads(v2)
            s = jnp.einsum("hqd,hkd->hqk", qh, kh, preferred_element_type=f32) * SCALE
            s = s + bias[None, :, :]
            s = s - jnp.max(s, axis=-1, keepdims=True)
            p = jnp.exp(s)
            p = p * pl.reciprocal(jnp.sum(p, axis=-1, keepdims=True), approx=True)
            o = jnp.einsum("hqk,hkd->hqd", p, vh, preferred_element_type=f32)
            return jnp.concatenate([o[h] for h in range(N_HEADS)], axis=-1)

        def batch_block_mask(Rq, Sq, Rk, Sk):
            # additive NEG wherever the flattened query row and key row belong to
            # different batch elements
            iq = jax.lax.broadcasted_iota(jnp.int32, (Rq, Rk), 0)
            ik = jax.lax.broadcasted_iota(jnp.int32, (Rq, Rk), 1)
            same = jnp.zeros((Rq, Rk), jnp.bool_)
            for b in range(B):
                same = same | (((iq >= b * Sq) & (iq < (b + 1) * Sq)) &
                               ((ik >= b * Sk) & (ik < (b + 1) * Sk)))
            return jnp.where(same, 0.0, NEG).astype(f32)

        # ------------- embeddings + positional encoding (in-kernel glue) -------------
        oh_s = (sid_ref[...] ==
                jax.lax.broadcasted_iota(jnp.int32, (Rs, EMB_PAD), 1)).astype(f32)
        oh_t = (tid_ref[...] ==
                jax.lax.broadcasted_iota(jnp.int32, (Rt, EMB_PAD), 1)).astype(f32)
        emb_s = jnp.dot(oh_s, tab_ref[0:EMB_PAD], preferred_element_type=f32)
        emb_t = jnp.dot(oh_t, tab_ref[EMB_PAD:2 * EMB_PAD], preferred_element_type=f32)
        pe_s = jnp.concatenate([tab_ref[2 * EMB_PAD:2 * EMB_PAD + Ss]] * B, axis=0)
        pe_t = jnp.concatenate([tab_ref[2 * EMB_PAD:2 * EMB_PAD + St]] * B, axis=0)
        # matches reference: pos_encoder(embedding(x)) * sqrt(d_model) == (emb + PE)*sqrt(d)
        x = (emb_s + pe_s) * SQRT_D                        # (Rs, D)
        y = (emb_t + pe_t) * SQRT_D                        # (Rt, D)

        # ---------------- additive attention biases (built once) ----------------
        # key-padding rows recovered from the one-hots with a tiny matmul
        # (avoids transposing a column vector inside the kernel)
        sel_pad = (jax.lax.broadcasted_iota(jnp.int32, (1, EMB_PAD), 1) == 0).astype(f32)
        sp_row = jnp.einsum("qv,kv->qk", sel_pad, oh_s, preferred_element_type=f32)  # (1, Rs)
        tp_row = jnp.einsum("qv,kv->qk", sel_pad, oh_t, preferred_element_type=f32)  # (1, Rt)

        iq = jax.lax.broadcasted_iota(jnp.int32, (Rt, Rt), 0)
        ik = jax.lax.broadcasted_iota(jnp.int32, (Rt, Rt), 1)
        causal = jnp.where(ik > iq, NEG, 0.0).astype(f32)   # flattened causal is still valid

        bias_enc = batch_block_mask(Rs, Ss, Rs, Ss) + sp_row * NEG            # (Rs, Rs)
        bias_dec = batch_block_mask(Rt, St, Rt, St) + causal + tp_row * NEG   # (Rt, Rt)
        bias_mem = batch_block_mask(Rt, St, Rs, Ss) + sp_row * NEG            # (Rt, Rs)

        # --------------------------------- encoder ---------------------------------
        for l in range(N_LAYERS):
            q = dense(x, wdd_ref[WDD_IDX[f"e{l}_wq"]], f"e{l}_bq")
            k = dense(x, wdd_ref[WDD_IDX[f"e{l}_wk"]], f"e{l}_bk")
            v = dense(x, wdd_ref[WDD_IDX[f"e{l}_wv"]], f"e{l}_bv")
            a = dense(mha(q, k, v, bias_enc), wdd_ref[WDD_IDX[f"e{l}_wo"]], f"e{l}_bo")
            x = ln(x + a, f"e{l}_ln1g", f"e{l}_ln1b")        # post-norm (norm_first=False)
            h = jnp.maximum(dense(x, wff1_ref[l], f"e{l}_b1"), 0.0)
            ff = dense(h, wff2_ref[l], f"e{l}_b2")
            x = ln(x + ff, f"e{l}_ln2g", f"e{l}_ln2b")
        mem = ln(x, "encn_g", "encn_b")                      # encoder memory (Rs, D)

        # --------------------------------- decoder ---------------------------------
        for l in range(N_LAYERS):
            # masked self-attention
            q = dense(y, wdd_ref[WDD_IDX[f"d{l}_swq"]], f"d{l}_sbq")
            k = dense(y, wdd_ref[WDD_IDX[f"d{l}_swk"]], f"d{l}_sbk")
            v = dense(y, wdd_ref[WDD_IDX[f"d{l}_swv"]], f"d{l}_sbv")
            a = dense(mha(q, k, v, bias_dec), wdd_ref[WDD_IDX[f"d{l}_swo"]], f"d{l}_sbo")
            y = ln(y + a, f"d{l}_ln1g", f"d{l}_ln1b")
            # cross-attention over encoder memory
            q = dense(y, wdd_ref[WDD_IDX[f"d{l}_cwq"]], f"d{l}_cbq")
            k = dense(mem, wdd_ref[WDD_IDX[f"d{l}_cwk"]], f"d{l}_cbk")
            v = dense(mem, wdd_ref[WDD_IDX[f"d{l}_cwv"]], f"d{l}_cbv")
            a = dense(mha(q, k, v, bias_mem), wdd_ref[WDD_IDX[f"d{l}_cwo"]], f"d{l}_cbo")
            y = ln(y + a, f"d{l}_ln2g", f"d{l}_ln2b")
            # feed-forward
            h = jnp.maximum(dense(y, wff1_ref[N_LAYERS + l], f"d{l}_b1"), 0.0)
            ff = dense(h, wff2_ref[N_LAYERS + l], f"d{l}_b2")
            y = ln(y + ff, f"d{l}_ln3g", f"d{l}_ln3b")
        y = ln(y, "decn_g", "decn_b")

        # lane-dense (128-wide) padded logits
        out_ref[...] = (jnp.dot(y, fcw_ref[...], preferred_element_type=f32)
                        + vec("fcb", V_PAD))

    return kernel


# -------------------------------- forward glue --------------------------------
def forward(params, src, tgt):
    B, Ss = src.shape
    _, St = tgt.shape
    assert Ss <= PE_ROWS and St <= PE_ROWS
    Rt = B * St

    inputs = [
        src.reshape(B * Ss, 1).astype(jnp.int32),
        tgt.reshape(B * St, 1).astype(jnp.int32),
        params["tab"], params["wdd"], params["wff1"], params["wff2"],
        params["fc_w"], params["vec"],
    ]
    out = pl.pallas_call(
        _make_kernel(B, Ss, St),
        out_shape=jax.ShapeDtypeStruct((Rt, V_PAD), jnp.float32),
        in_specs=[pl.BlockSpec(memory_space=pltpu.MemorySpace.VMEM)] * len(inputs),
        out_specs=pl.BlockSpec(memory_space=pltpu.MemorySpace.VMEM),
    )(*inputs)
    return out.reshape(B, St, V_PAD)[:, :, :TGT_VOCAB]


# ------------------------------- parameter init -------------------------------
def positional_encoding(max_len, d_model):
    position = jnp.arange(max_len, dtype=jnp.float32)[:, None]
    div_term = jnp.exp(jnp.arange(0, d_model, 2, dtype=jnp.float32)
                       * (-math.log(10000.0) / d_model))
    ang = position * div_term
    # interleave -> pe[:, 0::2] = sin, pe[:, 1::2] = cos
    return jnp.stack([jnp.sin(ang), jnp.cos(ang)], axis=-1).reshape(max_len, d_model)


def _linear(key, fan_in, fan_out):
    kw, kb = jax.random.split(key)
    lim = 1.0 / math.sqrt(fan_in)
    w = jax.random.uniform(kw, (fan_in, fan_out), jnp.float32, -lim, lim)
    b = jax.random.uniform(kb, (fan_out,), jnp.float32, -lim, lim)
    return w, b


def init_params(key):
    kit = iter(jax.random.split(key, 64))
    ones_d = jnp.ones((D_MODEL,), jnp.float32)
    zeros_d = jnp.zeros((D_MODEL,), jnp.float32)
    wdd, vecs, wff1, wff2 = {}, {}, [], []

    # encoder layers
    for l in range(N_LAYERS):
        for wn, bn in (("wq", "bq"), ("wk", "bk"), ("wv", "bv"), ("wo", "bo")):
            w, b = _linear(next(kit), D_MODEL, D_MODEL)
            wdd[f"e{l}_{wn}"] = w
            vecs[f"e{l}_{bn}"] = b
        w1, b1 = _linear(next(kit), D_MODEL, DIM_FF)
        w2, b2 = _linear(next(kit), DIM_FF, D_MODEL)
        wff1.append(w1); wff2.append(w2)
        vecs[f"e{l}_b1"] = b1; vecs[f"e{l}_b2"] = b2
        for n in ("ln1g", "ln2g"):
            vecs[f"e{l}_{n}"] = ones_d
        for n in ("ln1b", "ln2b"):
            vecs[f"e{l}_{n}"] = zeros_d
    vecs["encn_g"] = ones_d; vecs["encn_b"] = zeros_d

    # decoder layers
    for l in range(N_LAYERS):
        for wn, bn in (("swq", "sbq"), ("swk", "sbk"), ("swv", "sbv"), ("swo", "sbo"),
                       ("cwq", "cbq"), ("cwk", "cbk"), ("cwv", "cbv"), ("cwo", "cbo")):
            w, b = _linear(next(kit), D_MODEL, D_MODEL)
            wdd[f"d{l}_{wn}"] = w
            vecs[f"d{l}_{bn}"] = b
        w1, b1 = _linear(next(kit), D_MODEL, DIM_FF)
        w2, b2 = _linear(next(kit), DIM_FF, D_MODEL)
        wff1.append(w1); wff2.append(w2)
        vecs[f"d{l}_b1"] = b1; vecs[f"d{l}_b2"] = b2
        for n in ("ln1g", "ln2g", "ln3g"):
            vecs[f"d{l}_{n}"] = ones_d
        for n in ("ln1b", "ln2b", "ln3b"):
            vecs[f"d{l}_{n}"] = zeros_d
    vecs["decn_g"] = ones_d; vecs["decn_b"] = zeros_d

    # output projection (lane-dense 128-wide pad)
    fc_w, fc_b = _linear(next(kit), D_MODEL, TGT_VOCAB)
    fc_w = jnp.pad(fc_w, ((0, 0), (0, V_PAD - TGT_VOCAB)))
    vecs["fcb"] = jnp.pad(fc_b, (0, V_PAD - TGT_VOCAB))

    # embedding / positional-encoding table slab: [src_emb | tgt_emb | PE]
    emb_src = jax.random.normal(next(kit), (SRC_VOCAB, D_MODEL), jnp.float32)
    emb_tgt = jax.random.normal(next(kit), (TGT_VOCAB, D_MODEL), jnp.float32)
    tab = jnp.concatenate([
        jnp.pad(emb_src, ((0, EMB_PAD - SRC_VOCAB), (0, 0))),
        jnp.pad(emb_tgt, ((0, EMB_PAD - TGT_VOCAB), (0, 0))),
        positional_encoding(PE_ROWS, D_MODEL),
    ], axis=0)                                                      # (192, 32)

    vec_slab = jnp.stack(
        [jnp.pad(vecs[n], (0, V_PAD - vecs[n].shape[0])) for n in VEC_NAMES])  # (57, 128)

    return dict(
        tab=tab,                                                    # (192, 32)
        wdd=jnp.stack([wdd[n] for n in WDD_NAMES]),                 # (24, 32, 32)
        wff1=jnp.stack(wff1),                                       # (4, 32, 64)
        wff2=jnp.stack(wff2),                                       # (4, 64, 32)
        fc_w=fc_w,                                                  # (32, 128)
        vec=vec_slab,                                               # (57, 128)
    )


# ------------------------------------ main ------------------------------------
if __name__ == "__main__":
    key = jax.random.PRNGKey(0)
    kp, ks, kt = jax.random.split(key, 3)
    params = init_params(kp)

    B, S_SRC, S_TGT = 2, 8, 6
    src = jax.random.randint(ks, (B, S_SRC), 0, SRC_VOCAB, dtype=jnp.int32)
    tgt = jax.random.randint(kt, (B, S_TGT), 0, TGT_VOCAB, dtype=jnp.int32)
    # make sure sequences are not entirely padding (token 0 = pad)
    src = src.at[:, 0].set(1)
    tgt = tgt.at[:, 0].set(1)

    out = jax.jit(forward)(params, src, tgt)
    jax.block_until_ready(out)

    assert out.shape == (B, S_TGT, TGT_VOCAB), out.shape
    assert bool(jnp.all(jnp.isfinite(out)))
    # TODO(synk): dropout (p=0.1) modeled as identity (inference semantics);
    # training-mode stochastic dropout is not reproduced.
    print("KERNEL_OK")
</pallas_src>

<mosaic_0001>
module attributes {stable_mosaic.version = 11 : i64} {
  func.func @kernel(%arg0: memref<16x1xi32, #tpu.memory_space<vmem>>, %arg1: memref<12x1xi32, #tpu.memory_space<vmem>>, %arg2: memref<192x32xf32, #tpu.memory_space<vmem>>, %arg3: memref<24x32x32xf32, #tpu.memory_space<vmem>>, %arg4: memref<4x32x64xf32, #tpu.memory_space<vmem>>, %arg5: memref<4x64x32xf32, #tpu.memory_space<vmem>>, %arg6: memref<32x128xf32, #tpu.memory_space<vmem>>, %arg7: memref<57x128xf32, #tpu.memory_space<vmem>>, %arg8: memref<12x128xf32, #tpu.memory_space<vmem>>) attributes {dimension_semantics = [], scalar_prefetch = 0 : i64, scratch_operands = 0 : i64, tpu.core_type = #tpu.core_type<tc>} {
    %c0 = arith.constant 0 : index
    %c0_0 = arith.constant 0 : index
    %0 = vector.load %arg0[%c0, %c0_0] : memref<16x1xi32, #tpu.memory_space<vmem>>, vector<16x1xi32>
    %1 = tpu.iota {dimensions = array<i32: 1>} : vector<16x64xi32>
    %2 = vector.broadcast %0 : vector<16x1xi32> to vector<16x64xi32>
    %3 = arith.cmpi eq, %2, %1 : vector<16x64xi32>
    %4 = arith.extui %3 : vector<16x64xi1> to vector<16x64xi32>
    %5 = arith.sitofp %4 : vector<16x64xi32> to vector<16x64xf32>
    %c0_1 = arith.constant 0 : index
    %c0_2 = arith.constant 0 : index
    %6 = vector.load %arg1[%c0_1, %c0_2] : memref<12x1xi32, #tpu.memory_space<vmem>>, vector<12x1xi32>
    %7 = tpu.iota {dimensions = array<i32: 1>} : vector<12x64xi32>
    %8 = vector.broadcast %6 : vector<12x1xi32> to vector<12x64xi32>
    %9 = arith.cmpi eq, %8, %7 : vector<12x64xi32>
    %10 = arith.extui %9 : vector<12x64xi1> to vector<12x64xi32>
    %11 = arith.sitofp %10 : vector<12x64xi32> to vector<12x64xf32>
    %c0_3 = arith.constant 0 : index
    %c0_4 = arith.constant 0 : index
    %12 = vector.load %arg2[%c0_3, %c0_4] : memref<192x32xf32, #tpu.memory_space<vmem>>, vector<64x32xf32>
    %cst = arith.constant dense<0.000000e+00> : vector<16x32xf32>
    %13 = tpu.matmul %5, %12, %cst {dimension_numbers = #tpu.dot_dimension_numbers<[1], [0], [0], [1], [0, 0, 1, 1], [], []>} : vector<16x64xf32>, vector<64x32xf32>, vector<16x32xf32> -> vector<16x32xf32>
    %c64 = arith.constant 64 : index
    %c0_5 = arith.constant 0 : index
    %14 = vector.load %arg2[%c64, %c0_5] : memref<192x32xf32, #tpu.memory_space<vmem>>, vector<64x32xf32>
    %cst_6 = arith.constant dense<0.000000e+00> : vector<12x32xf32>
    %15 = tpu.matmul %11, %14, %cst_6 {dimension_numbers = #tpu.dot_dimension_numbers<[1], [0], [0], [1], [0, 0, 1, 1], [], []>} : vector<12x64xf32>, vector<64x32xf32>, vector<12x32xf32> -> vector<12x32xf32>
    %c128 = arith.constant 128 : index
    %c0_7 = arith.constant 0 : index
    %16 = vector.load %arg2[%c128, %c0_7] : memref<192x32xf32, #tpu.memory_space<vmem>>, vector<8x32xf32>
    %17 = tpu.concatenate %16, %16 in 0 : vector<8x32xf32>, vector<8x32xf32> -> vector<16x32xf32>
    %c128_8 = arith.constant 128 : index
    %c0_9 = arith.constant 0 : index
    %18 = vector.load %arg2[%c128_8, %c0_9] : memref<192x32xf32, #tpu.memory_space<vmem>>, vector<6x32xf32>
    %19 = tpu.concatenate %18, %18 in 0 : vector<6x32xf32>, vector<6x32xf32> -> vector<12x32xf32>
    %20 = arith.addf %13, %17 : vector<16x32xf32>
    %cst_10 = arith.constant 5.65685415 : f32
    %21 = vector.broadcast %cst_10 : f32 to vector<16x32xf32>
    %22 = arith.mulf %20, %21 : vector<16x32xf32>
    %23 = arith.addf %15, %19 : vector<12x32xf32>
    %cst_11 = arith.constant 5.65685415 : f32
    %24 = vector.broadcast %cst_11 : f32 to vector<12x32xf32>
    %25 = arith.mulf %23, %24 : vector<12x32xf32>
    %26 = tpu.iota {dimensions = array<i32: 1>} : vector<1x64xi32>
    %c0_i32 = arith.constant 0 : i32
    %27 = vector.broadcast %c0_i32 : i32 to vector<1x64xi32>
    %28 = arith.cmpi eq, %26, %27 : vector<1x64xi32>
    %29 = arith.extui %28 : vector<1x64xi1> to vector<1x64xi32>
    %30 = arith.sitofp %29 : vector<1x64xi32> to vector<1x64xf32>
    "tpu.trace_start"() <{level = 10 : i32, message = "qv,kv->qk"}> : () -> ()
    %cst_12 = arith.constant dense<0.000000e+00> : vector<1x16xf32>
    %31 = tpu.matmul %30, %5, %cst_12 {dimension_numbers = #tpu.dot_dimension_numbers<[1], [1], [0], [0], [0, 0, 1, 0], [], []>} : vector<1x64xf32>, vector<16x64xf32>, vector<1x16xf32> -> vector<1x16xf32>
    %cst_13 = arith.constant dense<0.000000e+00> : vector<1x12xf32>
    %32 = tpu.matmul %30, %11, %cst_13 {dimension_numbers = #tpu.dot_dimension_numbers<[1], [1], [0], [0], [0, 0, 1, 0], [], []>} : vector<1x64xf32>, vector<12x64xf32>, vector<1x12xf32> -> vector<1x12xf32>
    "tpu.trace_stop"() : () -> ()
    %33 = tpu.iota {dimensions = array<i32: 0>} : vector<12x12xi32>
    %34 = tpu.iota {dimensions = array<i32: 1>} : vector<12x12xi32>
    %35 = arith.cmpi sgt, %34, %33 : vector<12x12xi32>
    %cst_14 = arith.constant -1.000000e+09 : f32
    %cst_15 = arith.constant 0.000000e+00 : f32
    %36 = vector.broadcast %cst_14 : f32 to vector<12x12xf32>
    %37 = vector.broadcast %cst_15 : f32 to vector<12x12xf32>
    %38 = arith.select %35, %36, %37 : vector<12x12xi1>, vector<12x12xf32>
    %39 = tpu.iota {dimensions = array<i32: 0>} : vector<16x16xi32>
    %40 = tpu.iota {dimensions = array<i32: 1>} : vector<16x16xi32>
    %false = arith.constant false
    %41 = vector.broadcast %false : i1 to vector<16x16xi1>
    %c0_i32_16 = arith.constant 0 : i32
    %42 = vector.broadcast %c0_i32_16 : i32 to vector<16x16xi32>
    %43 = arith.cmpi sge, %39, %42 : vector<16x16xi32>
    %c8_i32 = arith.constant 8 : i32
    %44 = vector.broadcast %c8_i32 : i32 to vector<16x16xi32>
    %45 = arith.cmpi slt, %39, %44 : vector<16x16xi32>
    %46 = arith.andi %43, %45 : vector<16x16xi1>
    %c0_i32_17 = arith.constant 0 : i32
    %47 = vector.broadcast %c0_i32_17 : i32 to vector<16x16xi32>
    %48 = arith.cmpi sge, %40, %47 : vector<16x16xi32>
    %c8_i32_18 = arith.constant 8 : i32
    %49 = vector.broadcast %c8_i32_18 : i32 to vector<16x16xi32>
    %50 = arith.cmpi slt, %40, %49 : vector<16x16xi32>
    %51 = arith.andi %48, %50 : vector<16x16xi1>
    %52 = arith.andi %46, %51 : vector<16x16xi1>
    %53 = arith.ori %41, %52 : vector<16x16xi1>
    %c8_i32_19 = arith.constant 8 : i32
    %54 = vector.broadcast %c8_i32_19 : i32 to vector<16x16xi32>
    %55 = arith.cmpi sge, %39, %54 : vector<16x16xi32>
    %c16_i32 = arith.constant 16 : i32
    %56 = vector.broadcast %c16_i32 : i32 to vector<16x16xi32>
    %57 = arith.cmpi slt, %39, %56 : vector<16x16xi32>
    %58 = arith.andi %55, %57 : vector<16x16xi1>
    %c8_i32_20 = arith.constant 8 : i32
    %59 = vector.broadcast %c8_i32_20 : i32 to vector<16x16xi32>
    %60 = arith.cmpi sge, %40, %59 : vector<16x16xi32>
    %c16_i32_21 = arith.constant 16 : i32
    %61 = vector.broadcast %c16_i32_21 : i32 to vector<16x16xi32>
    %62 = arith.cmpi slt, %40, %61 : vector<16x16xi32>
    %63 = arith.andi %60, %62 : vector<16x16xi1>
    %64 = arith.andi %58, %63 : vector<16x16xi1>
    %65 = arith.ori %53, %64 : vector<16x16xi1>
    %cst_22 = arith.constant 0.000000e+00 : f32
    %cst_23 = arith.constant -1.000000e+09 : f32
    %66 = vector.broadcast %cst_22 : f32 to vector<16x16xf32>
    %67 = vector.broadcast %cst_23 : f32 to vector<16x16xf32>
    %68 = arith.select %65, %66, %67 : vector<16x16xi1>, vector<16x16xf32>
    %cst_24 = arith.constant -1.000000e+09 : f32
    %69 = vector.broadcast %cst_24 : f32 to vector<1x16xf32>
    %70 = arith.mulf %31, %69 : vector<1x16xf32>
    %71 = vector.broadcast %70 : vector<1x16xf32> to vector<16x16xf32>
    %72 = arith.addf %68, %71 : vector<16x16xf32>
    %73 = tpu.iota {dimensions = array<i32: 0>} : vector<12x12xi32>
    %74 = tpu.iota {dimensions = array<i32: 1>} : vector<12x12xi32>
    %false_25 = arith.constant false
    %75 = vector.broadcast %false_25 : i1 to vector<12x12xi1>
    %c0_i32_26 = arith.constant 0 : i32
    %76 = vector.broadcast %c0_i32_26 : i32 to vector<12x12xi32>
    %77 = arith.cmpi sge, %73, %76 : vector<12x12xi32>
    %c6_i32 = arith.constant 6 : i32
    %78 = vector.broadcast %c6_i32 : i32 to vector<12x12xi32>
    %79 = arith.cmpi slt, %73, %78 : vector<12x12xi32>
    %80 = arith.andi %77, %79 : vector<12x12xi1>
    %c0_i32_27 = arith.constant 0 : i32
    %81 = vector.broadcast %c0_i32_27 : i32 to vector<12x12xi32>
    %82 = arith.cmpi sge, %74, %81 : vector<12x12xi32>
    %c6_i32_28 = arith.constant 6 : i32
    %83 = vector.broadcast %c6_i32_28 : i32 to vector<12x12xi32>
    %84 = arith.cmpi slt, %74, %83 : vector<12x12xi32>
    %85 = arith.andi %82, %84 : vector<12x12xi1>
    %86 = arith.andi %80, %85 : vector<12x12xi1>
    %87 = arith.ori %75, %86 : vector<12x12xi1>
    %c6_i32_29 = arith.constant 6 : i32
    %88 = vector.broadcast %c6_i32_29 : i32 to vector<12x12xi32>
    %89 = arith.cmpi sge, %73, %88 : vector<12x12xi32>
    %c12_i32 = arith.constant 12 : i32
    %90 = vector.broadcast %c12_i32 : i32 to vector<12x12xi32>
    %91 = arith.cmpi slt, %73, %90 : vector<12x12xi32>
    %92 = arith.andi %89, %91 : vector<12x12xi1>
    %c6_i32_30 = arith.constant 6 : i32
    %93 = vector.broadcast %c6_i32_30 : i32 to vector<12x12xi32>
    %94 = arith.cmpi sge, %74, %93 : vector<12x12xi32>
    %c12_i32_31 = arith.constant 12 : i32
    %95 = vector.broadcast %c12_i32_31 : i32 to vector<12x12xi32>
    %96 = arith.cmpi slt, %74, %95 : vector<12x12xi32>
    %97 = arith.andi %94, %96 : vector<12x12xi1>
    %98 = arith.andi %92, %97 : vector<12x12xi1>
    %99 = arith.ori %87, %98 : vector<12x12xi1>
    %cst_32 = arith.constant 0.000000e+00 : f32
    %cst_33 = arith.constant -1.000000e+09 : f32
    %100 = vector.broadcast %cst_32 : f32 to vector<12x12xf32>
    %101 = vector.broadcast %cst_33 : f32 to vector<12x12xf32>
    %102 = arith.select %99, %100, %101 : vector<12x12xi1>, vector<12x12xf32>
    %103 = arith.addf %102, %38 : vector<12x12xf32>
    %cst_34 = arith.constant -1.000000e+09 : f32
    %104 = vector.broadcast %cst_34 : f32 to vector<1x12xf32>
    %105 = arith.mulf %32, %104 : vector<1x12xf32>
    %106 = vector.broadcast %105 : vector<1x12xf32> to vector<12x12xf32>
    %107 = arith.addf %103, %106 : vector<12x12xf32>
    %108 = tpu.iota {dimensions = array<i32: 0>} : vector<12x16xi32>
    %109 = tpu.iota {dimensions = array<i32: 1>} : vector<12x16xi32>
    %false_35 = arith.constant false
    %110 = vector.broadcast %false_35 : i1 to vector<12x16xi1>
    %c0_i32_36 = arith.constant 0 : i32
    %111 = vector.broadcast %c0_i32_36 : i32 to vector<12x16xi32>
    %112 = arith.cmpi sge, %108, %111 : vector<12x16xi32>
    %c6_i32_37 = arith.constant 6 : i32
    %113 = vector.broadcast %c6_i32_37 : i32 to vector<12x16xi32>
    %114 = arith.cmpi slt, %108, %113 : vector<12x16xi32>
    %115 = arith.andi %112, %114 : vector<12x16xi1>
    %c0_i32_38 = arith.constant 0 : i32
    %116 = vector.broadcast %c0_i32_38 : i32 to vector<12x16xi32>
    %117 = arith.cmpi sge, %109, %116 : vector<12x16xi32>
    %c8_i32_39 = arith.constant 8 : i32
    %118 = vector.broadcast %c8_i32_39 : i32 to vector<12x16xi32>
    %119 = arith.cmpi slt, %109, %118 : vector<12x16xi32>
    %120 = arith.andi %117, %119 : vector<12x16xi1>
    %121 = arith.andi %115, %120 : vector<12x16xi1>
    %122 = arith.ori %110, %121 : vector<12x16xi1>
    %c6_i32_40 = arith.constant 6 : i32
    %123 = vector.broadcast %c6_i32_40 : i32 to vector<12x16xi32>
    %124 = arith.cmpi sge, %108, %123 : vector<12x16xi32>
    %c12_i32_41 = arith.constant 12 : i32
    %125 = vector.broadcast %c12_i32_41 : i32 to vector<12x16xi32>
    %126 = arith.cmpi slt, %108, %125 : vector<12x16xi32>
    %127 = arith.andi %124, %126 : vector<12x16xi1>
    %c8_i32_42 = arith.constant 8 : i32
    %128 = vector.broadcast %c8_i32_42 : i32 to vector<12x16xi32>
    %129 = arith.cmpi sge, %109, %128 : vector<12x16xi32>
    %c16_i32_43 = arith.constant 16 : i32
    %130 = vector.broadcast %c16_i32_43 : i32 to vector<12x16xi32>
    %131 = arith.cmpi slt, %109, %130 : vector<12x16xi32>
    %132 = arith.andi %129, %131 : vector<12x16xi1>
    %133 = arith.andi %127, %132 : vector<12x16xi1>
    %134 = arith.ori %122, %133 : vector<12x16xi1>
    %cst_44 = arith.constant 0.000000e+00 : f32
    %cst_45 = arith.constant -1.000000e+09 : f32
    %135 = vector.broadcast %cst_44 : f32 to vector<12x16xf32>
    %136 = vector.broadcast %cst_45 : f32 to vector<12x16xf32>
    %137 = arith.select %134, %135, %136 : vector<12x16xi1>, vector<12x16xf32>
    %cst_46 = arith.constant -1.000000e+09 : f32
    %138 = vector.broadcast %cst_46 : f32 to vector<1x16xf32>
    %139 = arith.mulf %31, %138 : vector<1x16xf32>
    %140 = vector.broadcast %139 : vector<1x16xf32> to vector<12x16xf32>
    %141 = arith.addf %137, %140 : vector<12x16xf32>
    %c0_47 = arith.constant 0 : index
    %c0_48 = arith.constant 0 : index
    %c0_49 = arith.constant 0 : index
    %142 = vector.load %arg3[%c0_47, %c0_48, %c0_49] : memref<24x32x32xf32, #tpu.memory_space<vmem>>, vector<1x32x32xf32>
    %143 = vector.shape_cast %142 : vector<1x32x32xf32> to vector<32x32xf32>
    %cst_50 = arith.constant dense<0.000000e+00> : vector<16x32xf32>
    %144 = tpu.matmul %22, %143, %cst_50 {dimension_numbers = #tpu.dot_dimension_numbers<[1], [0], [0], [1], [0, 0, 1, 1], [], []>} : vector<16x32xf32>, vector<32x32xf32>, vector<16x32xf32> -> vector<16x32xf32>
    %c0_51 = arith.constant 0 : index
    %c0_52 = arith.constant 0 : index
    %145 = vector.load %arg7[%c0_51, %c0_52] : memref<57x128xf32, #tpu.memory_space<vmem>>, vector<1x32xf32>
    %146 = vector.shape_cast %145 : vector<1x32xf32> to vector<32xf32>
    %147 = vector.shape_cast %146 : vector<32xf32> to vector<1x32xf32>
    %148 = vector.broadcast %147 : vector<1x32xf32> to vector<16x32xf32>
    %149 = arith.addf %144, %148 : vector<16x32xf32>
    %c1 = arith.constant 1 : index
    %c0_53 = arith.constant 0 : index
    %c0_54 = arith.constant 0 : index
    %150 = vector.load %arg3[%c1, %c0_53, %c0_54] : memref<24x32x32xf32, #tpu.memory_space<vmem>>, vector<1x32x32xf32>
    %151 = vector.shape_cast %150 : vector<1x32x32xf32> to vector<32x32xf32>
    %cst_55 = arith.constant dense<0.000000e+00> : vector<16x32xf32>
    %152 = tpu.matmul %22, %151, %cst_55 {dimension_numbers = #tpu.dot_dimension_numbers<[1], [0], [0], [1], [0, 0, 1, 1], [], []>} : vector<16x32xf32>, vector<32x32xf32>, vector<16x32xf32> -> vector<16x32xf32>
    %c1_56 = arith.constant 1 : index
    %c0_57 = arith.constant 0 : index
    %153 = vector.load %arg7[%c1_56, %c0_57] : memref<57x128xf32, #tpu.memory_space<vmem>>, vector<1x32xf32>
    %154 = vector.shape_cast %153 : vector<1x32xf32> to vector<32xf32>
    %155 = vector.shape_cast %154 : vector<32xf32> to vector<1x32xf32>
    %156 = vector.broadcast %155 : vector<1x32xf32> to vector<16x32xf32>
    %157 = arith.addf %152, %156 : vector<16x32xf32>
    %c2 = arith.constant 2 : index
    %c0_58 = arith.constant 0 : index
    %c0_59 = arith.constant 0 : index
    %158 = vector.load %arg3[%c2, %c0_58, %c0_59] : memref<24x32x32xf32, #tpu.memory_space<vmem>>, vector<1x32x32xf32>
    %159 = vector.shape_cast %158 : vector<1x32x32xf32> to vector<32x32xf32>
    %cst_60 = arith.constant dense<0.000000e+00> : vector<16x32xf32>
    %160 = tpu.matmul %22, %159, %cst_60 {dimension_numbers = #tpu.dot_dimension_numbers<[1], [0], [0], [1], [0, 0, 1, 1], [], []>} : vector<16x32xf32>, vector<32x32xf32>, vector<16x32xf32> -> vector<16x32xf32>
    %c2_61 = arith.constant 2 : index
    %c0_62 = arith.constant 0 : index
    %161 = vector.load %arg7[%c2_61, %c0_62] : memref<57x128xf32, #tpu.memory_space<vmem>>, vector<1x32xf32>
    %162 = vector.shape_cast %161 : vector<1x32xf32> to vector<32xf32>
    %163 = vector.shape_cast %162 : vector<32xf32> to vector<1x32xf32>
    %164 = vector.broadcast %163 : vector<1x32xf32> to vector<16x32xf32>
    %165 = arith.addf %160, %164 : vector<16x32xf32>
    %166 = vector.extract_strided_slice %149 {offsets = [0, 0], sizes = [16, 8], strides = [1, 1]} : vector<16x32xf32> to vector<16x8xf32>
    %167 = vector.extract_strided_slice %149 {offsets = [0, 8], sizes = [16, 8], strides = [1, 1]} : vector<16x32xf32> to vector<16x8xf32>
    %168 = vector.extract_strided_slice %149 {offsets = [0, 16], sizes = [16, 8], strides = [1, 1]} : vector<16x32xf32> to vector<16x8xf32>
    %169 = vector.extract_strided_slice %149 {offsets = [0, 24], sizes = [16, 8], strides = [1, 1]} : vector<16x32xf32> to vector<16x8xf32>
    %170 = vector.shape_cast %166 : vector<16x8xf32> to vector<1x16x8xf32>
    %171 = vector.shape_cast %167 : vector<16x8xf32> to vector<1x16x8xf32>
    %172 = vector.shape_cast %168 : vector<16x8xf32> to vector<1x16x8xf32>
    %173 = vector.shape_cast %169 : vector<16x8xf32> to vector<1x16x8xf32>
    %174 = tpu.concatenate %170, %171, %172, %173 in 0 : vector<1x16x8xf32>, vector<1x16x8xf32>, vector<1x16x8xf32>, vector<1x16x8xf32> -> vector<4x16x8xf32>
    %175 = vector.extract_strided_slice %157 {offsets = [0, 0], sizes = [16, 8], strides = [1, 1]} : vector<16x32xf32> to vector<16x8xf32>
    %176 = vector.extract_strided_slice %157 {offsets = [0, 8], sizes = [16, 8], strides = [1, 1]} : vector<16x32xf32> to vector<16x8xf32>
    %177 = vector.extract_strided_slice %157 {offsets = [0, 16], sizes = [16, 8], strides = [1, 1]} : vector<16x32xf32> to vector<16x8xf32>
    %178 = vector.extract_strided_slice %157 {offsets = [0, 24], sizes = [16, 8], strides = [1, 1]} : vector<16x32xf32> to vector<16x8xf32>
    %179 = vector.shape_cast %175 : vector<16x8xf32> to vector<1x16x8xf32>
    %180 = vector.shape_cast %176 : vector<16x8xf32> to vector<1x16x8xf32>
    %181 = vector.shape_cast %177 : vector<16x8xf32> to vector<1x16x8xf32>
    %182 = vector.shape_cast %178 : vector<16x8xf32> to vector<1x16x8xf32>
    %183 = tpu.concatenate %179, %180, %181, %182 in 0 : vector<1x16x8xf32>, vector<1x16x8xf32>, vector<1x16x8xf32>, vector<1x16x8xf32> -> vector<4x16x8xf32>
    %184 = vector.extract_strided_slice %165 {offsets = [0, 0], sizes = [16, 8], strides = [1, 1]} : vector<16x32xf32> to vector<16x8xf32>
    %185 = vector.extract_strided_slice %165 {offsets = [0, 8], sizes = [16, 8], strides = [1, 1]} : vector<16x32xf32> to vector<16x8xf32>
    %186 = vector.extract_strided_slice %165 {offsets = [0, 16], sizes = [16, 8], strides = [1, 1]} : vector<16x32xf32> to vector<16x8xf32>
    %187 = vector.extract_strided_slice %165 {offsets = [0, 24], sizes = [16, 8], strides = [1, 1]} : vector<16x32xf32> to vector<16x8xf32>
    %188 = vector.shape_cast %184 : vector<16x8xf32> to vector<1x16x8xf32>
    %189 = vector.shape_cast %185 : vector<16x8xf32> to vector<1x16x8xf32>
    %190 = vector.shape_cast %186 : vector<16x8xf32> to vector<1x16x8xf32>
    %191 = vector.shape_cast %187 : vector<16x8xf32> to vector<1x16x8xf32>
    %192 = tpu.concatenate %188, %189, %190, %191 in 0 : vector<1x16x8xf32>, vector<1x16x8xf32>, vector<1x16x8xf32>, vector<1x16x8xf32> -> vector<4x16x8xf32>
    "tpu.trace_start"() <{level = 10 : i32, message = "hqd,hkd->hqk"}> : () -> ()
    %cst_63 = arith.constant dense<0.000000e+00> : vector<4x16x16xf32>
    %193 = tpu.matmul %174, %183, %cst_63 {dimension_numbers = #tpu.dot_dimension_numbers<[2], [2], [1], [1], [0, 0, 0, 1, 1, 1], [0], [0]>} : vector<4x16x8xf32>, vector<4x16x8xf32>, vector<4x16x16xf32> -> vector<4x16x16xf32>
    "tpu.trace_stop"() : () -> ()
    %cst_64 = arith.constant 0.353553385 : f32
    %194 = vector.broadcast %cst_64 : f32 to vector<4x16x16xf32>
    %195 = arith.mulf %193, %194 : vector<4x16x16xf32>
    %196 = vector.shape_cast %72 : vector<16x16xf32> to vector<1x16x16xf32>
    %197 = vector.broadcast %196 : vector<1x16x16xf32> to vector<4x16x16xf32>
    %198 = arith.addf %195, %197 : vector<4x16x16xf32>
    %cst_65 = arith.constant dense<0xFF800000> : vector<4x16xf32>
    %199 = vector.multi_reduction <maximumf>, %198, %cst_65 [2] : vector<4x16x16xf32> to vector<4x16xf32>
    %200 = vector.shape_cast %199 : vector<4x16xf32> to vector<4x16x1xf32>
    %201 = vector.broadcast %200 : vector<4x16x1xf32> to vector<4x16x16xf32>
    %202 = arith.subf %198, %201 : vector<4x16x16xf32>
    %203 = math.exp %202 : vector<4x16x16xf32>
    %cst_66 = arith.constant dense<0.000000e+00> : vector<4x16xf32>
    %204 = vector.multi_reduction <add>, %203, %cst_66 [2] : vector<4x16x16xf32> to vector<4x16xf32>
    %205 = vector.shape_cast %204 : vector<4x16xf32> to vector<4x16x1xf32>
    %206 = tpu.reciprocal %205 {approx = true} : vector<4x16x1xf32> -> vector<4x16x1xf32>
    %207 = vector.broadcast %206 : vector<4x16x1xf32> to vector<4x16x16xf32>
    %208 = arith.mulf %203, %207 : vector<4x16x16xf32>
    "tpu.trace_start"() <{level = 10 : i32, message = "hqk,hkd->hqd"}> : () -> ()
    %cst_67 = arith.constant dense<0.000000e+00> : vector<4x16x8xf32>
    %209 = tpu.matmul %208, %192, %cst_67 {dimension_numbers = #tpu.dot_dimension_numbers<[2], [1], [1], [2], [0, 0, 0, 1, 1, 2], [0], [0]>} : vector<4x16x16xf32>, vector<4x16x8xf32>, vector<4x16x8xf32> -> vector<4x16x8xf32>
    "tpu.trace_stop"() : () -> ()
    %210 = vector.extract_strided_slice %209 {offsets = [0, 0, 0], sizes = [1, 16, 8], strides = [1, 1, 1]} : vector<4x16x8xf32> to vector<1x16x8xf32>
    %211 = vector.shape_cast %210 : vector<1x16x8xf32> to vector<16x8xf32>
    %212 = vector.extract_strided_slice %209 {offsets = [1, 0, 0], sizes = [1, 16, 8], strides = [1, 1, 1]} : vector<4x16x8xf32> to vector<1x16x8xf32>
    %213 = vector.shape_cast %212 : vector<1x16x8xf32> to vector<16x8xf32>
    %214 = vector.extract_strided_slice %209 {offsets = [2, 0, 0], sizes = [1, 16, 8], strides = [1, 1, 1]} : vector<4x16x8xf32> to vector<1x16x8xf32>
    %215 = vector.shape_cast %214 : vector<1x16x8xf32> to vector<16x8xf32>
    %216 = vector.extract_strided_slice %209 {offsets = [3, 0, 0], sizes = [1, 16, 8], strides = [1, 1, 1]} : vector<4x16x8xf32> to vector<1x16x8xf32>
    %217 = vector.shape_cast %216 : vector<1x16x8xf32> to vector<16x8xf32>
    %218 = tpu.concatenate %211, %213, %215, %217 in 1 : vector<16x8xf32>, vector<16x8xf32>, vector<16x8xf32>, vector<16x8xf32> -> vector<16x32xf32>
    %c3 = arith.constant 3 : index
    %c0_68 = arith.constant 0 : index
    %c0_69 = arith.constant 0 : index
    %219 = vector.load %arg3[%c3, %c0_68, %c0_69] : memref<24x32x32xf32, #tpu.memory_space<vmem>>, vector<1x32x32xf32>
    %220 = vector.shape_cast %219 : vector<1x32x32xf32> to vector<32x32xf32>
    %cst_70 = arith.constant dense<0.000000e+00> : vector<16x32xf32>
    %221 = tpu.matmul %218, %220, %cst_70 {dimension_numbers = #tpu.dot_dimension_numbers<[1], [0], [0], [1], [0, 0, 1, 1], [], []>} : vector<16x32xf32>, vector<32x32xf32>, vector<16x32xf32> -> vector<16x32xf32>
    %c3_71 = arith.constant 3 : index
    %c0_72 = arith.constant 0 : index
    %222 = vector.load %arg7[%c3_71, %c0_72] : memref<57x128xf32, #tpu.memory_space<vmem>>, vector<1x32xf32>
    %223 = vector.shape_cast %222 : vector<1x32xf32> to vector<32xf32>
    %224 = vector.shape_cast %223 : vector<32xf32> to vector<1x32xf32>
    %225 = vector.broadcast %224 : vector<1x32xf32> to vector<16x32xf32>
    %226 = arith.addf %221, %225 : vector<16x32xf32>
    %227 = arith.addf %22, %226 : vector<16x32xf32>
    %cst_73 = arith.constant dense<0.000000e+00> : vector<16xf32>
    %228 = vector.multi_reduction <add>, %227, %cst_73 [1] : vector<16x32xf32> to vector<16xf32>
    %229 = vector.shape_cast %228 : vector<16xf32> to vector<16x1xf32>
    %cst_74 = arith.constant 3.200000e+01 : f32
    %230 = vector.broadcast %cst_74 : f32 to vector<16x1xf32>
    %231 = arith.divf %229, %230 : vector<16x1xf32>
    %232 = vector.broadcast %231 : vector<16x1xf32> to vector<16x32xf32>
    %233 = arith.subf %227, %232 : vector<16x32xf32>
    %234 = arith.mulf %233, %233 : vector<16x32xf32>
    %cst_75 = arith.constant dense<0.000000e+00> : vector<16xf32>
    %235 = vector.multi_reduction <add>, %234, %cst_75 [1] : vector<16x32xf32> to vector<16xf32>
    %236 = vector.shape_cast %235 : vector<16xf32> to vector<16x1xf32>
    %cst_76 = arith.constant 3.200000e+01 : f32
    %237 = vector.broadcast %cst_76 : f32 to vector<16x1xf32>
    %238 = arith.divf %236, %237 : vector<16x1xf32>
    %239 = vector.broadcast %231 : vector<16x1xf32> to vector<16x32xf32>
    %240 = arith.subf %227, %239 : vector<16x32xf32>
    %cst_77 = arith.constant 9.99999974E-6 : f32
    %241 = vector.broadcast %cst_77 : f32 to vector<16x1xf32>
    %242 = arith.addf %238, %241 : vector<16x1xf32>
    %243 = math.rsqrt %242 : vector<16x1xf32>
    %244 = vector.broadcast %243 : vector<16x1xf32> to vector<16x32xf32>
    %245 = arith.mulf %240, %244 : vector<16x32xf32>
    %c4 = arith.constant 4 : index
    %c0_78 = arith.constant 0 : index
    %246 = vector.load %arg7[%c4, %c0_78] : memref<57x128xf32, #tpu.memory_space<vmem>>, vector<1x32xf32>
    %247 = vector.shape_cast %246 : vector<1x32xf32> to vector<32xf32>
    %248 = vector.shape_cast %247 : vector<32xf32> to vector<1x32xf32>
    %249 = vector.broadcast %248 : vector<1x32xf32> to vector<16x32xf32>
    %250 = arith.mulf %245, %249 : vector<16x32xf32>
    %c5 = arith.constant 5 : index
    %c0_79 = arith.constant 0 : index
    %251 = vector.load %arg7[%c5, %c0_79] : memref<57x128xf32, #tpu.memory_space<vmem>>, vector<1x32xf32>
    %252 = vector.shape_cast %251 : vector<1x32xf32> to vector<32xf32>
    %253 = vector.shape_cast %252 : vector<32xf32> to vector<1x32xf32>
    %254 = vector.broadcast %253 : vector<1x32xf32> to vector<16x32xf32>
    %255 = arith.addf %250, %254 : vector<16x32xf32>
    %c0_80 = arith.constant 0 : index
    %c0_81 = arith.constant 0 : index
    %c0_82 = arith.constant 0 : index
    %256 = vector.load %arg4[%c0_80, %c0_81, %c0_82] : memref<4x32x64xf32, #tpu.memory_space<vmem>>, vector<1x32x64xf32>
    %257 = vector.shape_cast %256 : vector<1x32x64xf32> to vector<32x64xf32>
    %cst_83 = arith.constant dense<0.000000e+00> : vector<16x64xf32>
    %258 = tpu.matmul %255, %257, %cst_83 {dimension_numbers = #tpu.dot_dimension_numbers<[1], [0], [0], [1], [0, 0, 1, 1], [], []>} : vector<16x32xf32>, vector<32x64xf32>, vector<16x64xf32> -> vector<16x64xf32>
    %c6 = arith.constant 6 : index
    %c0_84 = arith.constant 0 : index
    %259 = vector.load %arg7[%c6, %c0_84] : memref<57x128xf32, #tpu.memory_space<vmem>>, vector<1x64xf32>
    %260 = vector.shape_cast %259 : vector<1x64xf32> to vector<64xf32>
    %261 = vector.shape_cast %260 : vector<64xf32> to vector<1x64xf32>
    %262 = vector.broadcast %261 : vector<1x64xf32> to vector<16x64xf32>
    %263 = arith.addf %258, %262 : vector<16x64xf32>
    %cst_85 = arith.constant 0.000000e+00 : f32
    %264 = vector.broadcast %cst_85 : f32 to vector<16x64xf32>
    %265 = arith.maximumf %263, %264 : vector<16x64xf32>
    %c0_86 = arith.constant 0 : index
    %c0_87 = arith.constant 0 : index
    %c0_88 = arith.constant 0 : index
    %266 = vector.load %arg5[%c0_86, %c0_87, %c0_88] : memref<4x64x32xf32, #tpu.memory_space<vmem>>, vector<1x64x32xf32>
    %267 = vector.shape_cast %266 : vector<1x64x32xf32> to vector<64x32xf32>
    %cst_89 = arith.constant dense<0.000000e+00> : vector<16x32xf32>
    %268 = tpu.matmul %265, %267, %cst_89 {dimension_numbers = #tpu.dot_dimension_numbers<[1], [0], [0], [1], [0, 0, 1, 1], [], []>} : vector<16x64xf32>, vector<64x32xf32>, vector<16x32xf32> -> vector<16x32xf32>
    %c7 = arith.constant 7 : index
    %c0_90 = arith.constant 0 : index
    %269 = vector.load %arg7[%c7, %c0_90] : memref<57x128xf32, #tpu.memory_space<vmem>>, vector<1x32xf32>
    %270 = vector.shape_cast %269 : vector<1x32xf32> to vector<32xf32>
    %271 = vector.shape_cast %270 : vector<32xf32> to vector<1x32xf32>
    %272 = vector.broadcast %271 : vector<1x32xf32> to vector<16x32xf32>
    %273 = arith.addf %268, %272 : vector<16x32xf32>
    %274 = arith.addf %255, %273 : vector<16x32xf32>
    %cst_91 = arith.constant dense<0.000000e+00> : vector<16xf32>
    %275 = vector.multi_reduction <add>, %274, %cst_91 [1] : vector<16x32xf32> to vector<16xf32>
    %276 = vector.shape_cast %275 : vector<16xf32> to vector<16x1xf32>
    %cst_92 = arith.constant 3.200000e+01 : f32
    %277 = vector.broadcast %cst_92 : f32 to vector<16x1xf32>
    %278 = arith.divf %276, %277 : vector<16x1xf32>
    %279 = vector.broadcast %278 : vector<16x1xf32> to vector<16x32xf32>
    %280 = arith.subf %274, %279 : vector<16x32xf32>
    %281 = arith.mulf %280, %280 : vector<16x32xf32>
    %cst_93 = arith.constant dense<0.000000e+00> : vector<16xf32>
    %282 = vector.multi_reduction <add>, %281, %cst_93 [1] : vector<16x32xf32> to vector<16xf32>
    %283 = vector.shape_cast %282 : vector<16xf32> to vector<16x1xf32>
    %cst_94 = arith.constant 3.200000e+01 : f32
    %284 = vector.broadcast %cst_94 : f32 to vector<16x1xf32>
    %285 = arith.divf %283, %284 : vector<16x1xf32>
    %286 = vector.broadcast %278 : vector<16x1xf32> to vector<16x32xf32>
    %287 = arith.subf %274, %286 : vector<16x32xf32>
    %cst_95 = arith.constant 9.99999974E-6 : f32
    %288 = vector.broadcast %cst_95 : f32 to vector<16x1xf32>
    %289 = arith.addf %285, %288 : vector<16x1xf32>
    %290 = math.rsqrt %289 : vector<16x1xf32>
    %291 = vector.broadcast %290 : vector<16x1xf32> to vector<16x32xf32>
    %292 = arith.mulf %287, %291 : vector<16x32xf32>
    %c8 = arith.constant 8 : index
    %c0_96 = arith.constant 0 : index
    %293 = vector.load %arg7[%c8, %c0_96] : memref<57x128xf32, #tpu.memory_space<vmem>>, vector<1x32xf32>
    %294 = vector.shape_cast %293 : vector<1x32xf32> to vector<32xf32>
    %295 = vector.shape_cast %294 : vector<32xf32> to vector<1x32xf32>
    %296 = vector.broadcast %295 : vector<1x32xf32> to vector<16x32xf32>
    %297 = arith.mulf %292, %296 : vector<16x32xf32>
    %c9 = arith.constant 9 : index
    %c0_97 = arith.constant 0 : index
    %298 = vector.load %arg7[%c9, %c0_97] : memref<57x128xf32, #tpu.memory_space<vmem>>, vector<1x32xf32>
    %299 = vector.shape_cast %298 : vector<1x32xf32> to vector<32xf32>
    %300 = vector.shape_cast %299 : vector<32xf32> to vector<1x32xf32>
    %301 = vector.broadcast %300 : vector<1x32xf32> to vector<16x32xf32>
    %302 = arith.addf %297, %301 : vector<16x32xf32>
    %c4_98 = arith.constant 4 : index
    %c0_99 = arith.constant 0 : index
    %c0_100 = arith.constant 0 : index
    %303 = vector.load %arg3[%c4_98, %c0_99, %c0_100] : memref<24x32x32xf32, #tpu.memory_space<vmem>>, vector<1x32x32xf32>
    %304 = vector.shape_cast %303 : vector<1x32x32xf32> to vector<32x32xf32>
    %cst_101 = arith.constant dense<0.000000e+00> : vector<16x32xf32>
    %305 = tpu.matmul %302, %304, %cst_101 {dimension_numbers = #tpu.dot_dimension_numbers<[1], [0], [0], [1], [0, 0, 1, 1], [], []>} : vector<16x32xf32>, vector<32x32xf32>, vector<16x32xf32> -> vector<16x32xf32>
    %c10 = arith.constant 10 : index
    %c0_102 = arith.constant 0 : index
    %306 = vector.load %arg7[%c10, %c0_102] : memref<57x128xf32, #tpu.memory_space<vmem>>, vector<1x32xf32>
    %307 = vector.shape_cast %306 : vector<1x32xf32> to vector<32xf32>
    %308 = vector.shape_cast %307 : vector<32xf32> to vector<1x32xf32>
    %309 = vector.broadcast %308 : vector<1x32xf32> to vector<16x32xf32>
    %310 = arith.addf %305, %309 : vector<16x32xf32>
    %c5_103 = arith.constant 5 : index
    %c0_104 = arith.constant 0 : index
    %c0_105 = arith.constant 0 : index
    %311 = vector.load %arg3[%c5_103, %c0_104, %c0_105] : memref<24x32x32xf32, #tpu.memory_space<vmem>>, vector<1x32x32xf32>
    %312 = vector.shape_cast %311 : vector<1x32x32xf32> to vector<32x32xf32>
    %cst_106 = arith.constant dense<0.000000e+00> : vector<16x32xf32>
    %313 = tpu.matmul %302, %312, %cst_106 {dimension_numbers = #tpu.dot_dimension_numbers<[1], [0], [0], [1], [0, 0, 1, 1], [], []>} : vector<16x32xf32>, vector<32x32xf32>, vector<16x32xf32> -> vector<16x32xf32>
    %c11 = arith.constant 11 : index
    %c0_107 = arith.constant 0 : index
    %314 = vector.load %arg7[%c11, %c0_107] : memref<57x128xf32, #tpu.memory_space<vmem>>, vector<1x32xf32>
    %315 = vector.shape_cast %314 : vector<1x32xf32> to vector<32xf32>
    %316 = vector.shape_cast %315 : vector<32xf32> to vector<1x32xf32>
    %317 = vector.broadcast %316 : vector<1x32xf32> to vector<16x32xf32>
    %318 = arith.addf %313, %317 : vector<16x32xf32>
    %c6_108 = arith.constant 6 : index
    %c0_109 = arith.constant 0 : index
    %c0_110 = arith.constant 0 : index
    %319 = vector.load %arg3[%c6_108, %c0_109, %c0_110] : memref<24x32x32xf32, #tpu.memory_space<vmem>>, vector<1x32x32xf32>
    %320 = vector.shape_cast %319 : vector<1x32x32xf32> to vector<32x32xf32>
    %cst_111 = arith.constant dense<0.000000e+00> : vector<16x32xf32>
    %321 = tpu.matmul %302, %320, %cst_111 {dimension_numbers = #tpu.dot_dimension_numbers<[1], [0], [0], [1], [0, 0, 1, 1], [], []>} : vector<16x32xf32>, vector<32x32xf32>, vector<16x32xf32> -> vector<16x32xf32>
    %c12 = arith.constant 12 : index
    %c0_112 = arith.constant 0 : index
    %322 = vector.load %arg7[%c12, %c0_112] : memref<57x128xf32, #tpu.memory_space<vmem>>, vector<1x32xf32>
    %323 = vector.shape_cast %322 : vector<1x32xf32> to vector<32xf32>
    %324 = vector.shape_cast %323 : vector<32xf32> to vector<1x32xf32>
    %325 = vector.broadcast %324 : vector<1x32xf32> to vector<16x32xf32>
    %326 = arith.addf %321, %325 : vector<16x32xf32>
    %327 = vector.extract_strided_slice %310 {offsets = [0, 0], sizes = [16, 8], strides = [1, 1]} : vector<16x32xf32> to vector<16x8xf32>
    %328 = vector.extract_strided_slice %310 {offsets = [0, 8], sizes = [16, 8], strides = [1, 1]} : vector<16x32xf32> to vector<16x8xf32>
    %329 = vector.extract_strided_slice %310 {offsets = [0, 16], sizes = [16, 8], strides = [1, 1]} : vector<16x32xf32> to vector<16x8xf32>
    %330 = vector.extract_strided_slice %310 {offsets = [0, 24], sizes = [16, 8], strides = [1, 1]} : vector<16x32xf32> to vector<16x8xf32>
    %331 = vector.shape_cast %327 : vector<16x8xf32> to vector<1x16x8xf32>
    %332 = vector.shape_cast %328 : vector<16x8xf32> to vector<1x16x8xf32>
    %333 = vector.shape_cast %329 : vector<16x8xf32> to vector<1x16x8xf32>
    %334 = vector.shape_cast %330 : vector<16x8xf32> to vector<1x16x8xf32>
    %335 = tpu.concatenate %331, %332, %333, %334 in 0 : vector<1x16x8xf32>, vector<1x16x8xf32>, vector<1x16x8xf32>, vector<1x16x8xf32> -> vector<4x16x8xf32>
    %336 = vector.extract_strided_slice %318 {offsets = [0, 0], sizes = [16, 8], strides = [1, 1]} : vector<16x32xf32> to vector<16x8xf32>
    %337 = vector.extract_strided_slice %318 {offsets = [0, 8], sizes = [16, 8], strides = [1, 1]} : vector<16x32xf32> to vector<16x8xf32>
    %338 = vector.extract_strided_slice %318 {offsets = [0, 16], sizes = [16, 8], strides = [1, 1]} : vector<16x32xf32> to vector<16x8xf32>
    %339 = vector.extract_strided_slice %318 {offsets = [0, 24], sizes = [16, 8], strides = [1, 1]} : vector<16x32xf32> to vector<16x8xf32>
    %340 = vector.shape_cast %336 : vector<16x8xf32> to vector<1x16x8xf32>
    %341 = vector.shape_cast %337 : vector<16x8xf32> to vector<1x16x8xf32>
    %342 = vector.shape_cast %338 : vector<16x8xf32> to vector<1x16x8xf32>
    %343 = vector.shape_cast %339 : vector<16x8xf32> to vector<1x16x8xf32>
    %344 = tpu.concatenate %340, %341, %342, %343 in 0 : vector<1x16x8xf32>, vector<1x16x8xf32>, vector<1x16x8xf32>, vector<1x16x8xf32> -> vector<4x16x8xf32>
    %345 = vector.extract_strided_slice %326 {offsets = [0, 0], sizes = [16, 8], strides = [1, 1]} : vector<16x32xf32> to vector<16x8xf32>
    %346 = vector.extract_strided_slice %326 {offsets = [0, 8], sizes = [16, 8], strides = [1, 1]} : vector<16x32xf32> to vector<16x8xf32>
    %347 = vector.extract_strided_slice %326 {offsets = [0, 16], sizes = [16, 8], strides = [1, 1]} : vector<16x32xf32> to vector<16x8xf32>
    %348 = vector.extract_strided_slice %326 {offsets = [0, 24], sizes = [16, 8], strides = [1, 1]} : vector<16x32xf32> to vector<16x8xf32>
    %349 = vector.shape_cast %345 : vector<16x8xf32> to vector<1x16x8xf32>
    %350 = vector.shape_cast %346 : vector<16x8xf32> to vector<1x16x8xf32>
    %351 = vector.shape_cast %347 : vector<16x8xf32> to vector<1x16x8xf32>
    %352 = vector.shape_cast %348 : vector<16x8xf32> to vector<1x16x8xf32>
    %353 = tpu.concatenate %349, %350, %351, %352 in 0 : vector<1x16x8xf32>, vector<1x16x8xf32>, vector<1x16x8xf32>, vector<1x16x8xf32> -> vector<4x16x8xf32>
    "tpu.trace_start"() <{level = 10 : i32, message = "hqd,hkd->hqk"}> : () -> ()
    %cst_113 = arith.constant dense<0.000000e+00> : vector<4x16x16xf32>
    %354 = tpu.matmul %335, %344, %cst_113 {dimension_numbers = #tpu.dot_dimension_numbers<[2], [2], [1], [1], [0, 0, 0, 1, 1, 1], [0], [0]>} : vector<4x16x8xf32>, vector<4x16x8xf32>, vector<4x16x16xf32> -> vector<4x16x16xf32>
    "tpu.trace_stop"() : () -> ()
    %cst_114 = arith.constant 0.353553385 : f32
    %355 = vector.broadcast %cst_114 : f32 to vector<4x16x16xf32>
    %356 = arith.mulf %354, %355 : vector<4x16x16xf32>
    %357 = vector.shape_cast %72 : vector<16x16xf32> to vector<1x16x16xf32>
    %358 = vector.broadcast %357 : vector<1x16x16xf32> to vector<4x16x16xf32>
    %359 = arith.addf %356, %358 : vector<4x16x16xf32>
    %cst_115 = arith.constant dense<0xFF800000> : vector<4x16xf32>
    %360 = vector.multi_reduction <maximumf>, %359, %cst_115 [2] : vector<4x16x16xf32> to vector<4x16xf32>
    %361 = vector.shape_cast %360 : vector<4x16xf32> to vector<4x16x1xf32>
    %362 = vector.broadcast %361 : vector<4x16x1xf32> to vector<4x16x16xf32>
    %363 = arith.subf %359, %362 : vector<4x16x16xf32>
    %364 = math.exp %363 : vector<4x16x16xf32>
    %cst_116 = arith.constant dense<0.000000e+00> : vector<4x16xf32>
    %365 = vector.multi_reduction <add>, %364, %cst_116 [2] : vector<4x16x16xf32> to vector<4x16xf32>
    %366 = vector.shape_cast %365 : vector<4x16xf32> to vector<4x16x1xf32>
    %367 = tpu.reciprocal %366 {approx = true} : vector<4x16x1xf32> -> vector<4x16x1xf32>
    %368 = vector.broadcast %367 : vector<4x16x1xf32> to vector<4x16x16xf32>
    %369 = arith.mulf %364, %368 : vector<4x16x16xf32>
    "tpu.trace_start"() <{level = 10 : i32, message = "hqk,hkd->hqd"}> : () -> ()
    %cst_117 = arith.constant dense<0.000000e+00> : vector<4x16x8xf32>
    %370 = tpu.matmul %369, %353, %cst_117 {dimension_numbers = #tpu.dot_dimension_numbers<[2], [1], [1], [2], [0, 0, 0, 1, 1, 2], [0], [0]>} : vector<4x16x16xf32>, vector<4x16x8xf32>, vector<4x16x8xf32> -> vector<4x16x8xf32>
    "tpu.trace_stop"() : () -> ()
    %371 = vector.extract_strided_slice %370 {offsets = [0, 0, 0], sizes = [1, 16, 8], strides = [1, 1, 1]} : vector<4x16x8xf32> to vector<1x16x8xf32>
    %372 = vector.shape_cast %371 : vector<1x16x8xf32> to vector<16x8xf32>
    %373 = vector.extract_strided_slice %370 {offsets = [1, 0, 0], sizes = [1, 16, 8], strides = [1, 1, 1]} : vector<4x16x8xf32> to vector<1x16x8xf32>
    %374 = vector.shape_cast %373 : vector<1x16x8xf32> to vector<16x8xf32>
    %375 = vector.extract_strided_slice %370 {offsets = [2, 0, 0], sizes = [1, 16, 8], strides = [1, 1, 1]} : vector<4x16x8xf32> to vector<1x16x8xf32>
    %376 = vector.shape_cast %375 : vector<1x16x8xf32> to vector<16x8xf32>
    %377 = vector.extract_strided_slice %370 {offsets = [3, 0, 0], sizes = [1, 16, 8], strides = [1, 1, 1]} : vector<4x16x8xf32> to vector<1x16x8xf32>
    %378 = vector.shape_cast %377 : vector<1x16x8xf32> to vector<16x8xf32>
    %379 = tpu.concatenate %372, %374, %376, %378 in 1 : vector<16x8xf32>, vector<16x8xf32>, vector<16x8xf32>, vector<16x8xf32> -> vector<16x32xf32>
    %c7_118 = arith.constant 7 : index
    %c0_119 = arith.constant 0 : index
    %c0_120 = arith.constant 0 : index
    %380 = vector.load %arg3[%c7_118, %c0_119, %c0_120] : memref<24x32x32xf32, #tpu.memory_space<vmem>>, vector<1x32x32xf32>
    %381 = vector.shape_cast %380 : vector<1x32x32xf32> to vector<32x32xf32>
    %cst_121 = arith.constant dense<0.000000e+00> : vector<16x32xf32>
    %382 = tpu.matmul %379, %381, %cst_121 {dimension_numbers = #tpu.dot_dimension_numbers<[1], [0], [0], [1], [0, 0, 1, 1], [], []>} : vector<16x32xf32>, vector<32x32xf32>, vector<16x32xf32> -> vector<16x32xf32>
    %c13 = arith.constant 13 : index
    %c0_122 = arith.constant 0 : index
    %383 = vector.load %arg7[%c13, %c0_122] : memref<57x128xf32, #tpu.memory_space<vmem>>, vector<1x32xf32>
    %384 = vector.shape_cast %383 : vector<1x32xf32> to vector<32xf32>
    %385 = vector.shape_cast %384 : vector<32xf32> to vector<1x32xf32>
    %386 = vector.broadcast %385 : vector<1x32xf32> to vector<16x32xf32>
    %387 = arith.addf %382, %386 : vector<16x32xf32>
    %388 = arith.addf %302, %387 : vector<16x32xf32>
    %cst_123 = arith.constant dense<0.000000e+00> : vector<16xf32>
    %389 = vector.multi_reduction <add>, %388, %cst_123 [1] : vector<16x32xf32> to vector<16xf32>
    %390 = vector.shape_cast %389 : vector<16xf32> to vector<16x1xf32>
    %cst_124 = arith.constant 3.200000e+01 : f32
    %391 = vector.broadcast %cst_124 : f32 to vector<16x1xf32>
    %392 = arith.divf %390, %391 : vector<16x1xf32>
    %393 = vector.broadcast %392 : vector<16x1xf32> to vector<16x32xf32>
    %394 = arith.subf %388, %393 : vector<16x32xf32>
    %395 = arith.mulf %394, %394 : vector<16x32xf32>
    %cst_125 = arith.constant dense<0.000000e+00> : vector<16xf32>
    %396 = vector.multi_reduction <add>, %395, %cst_125 [1] : vector<16x32xf32> to vector<16xf32>
    %397 = vector.shape_cast %396 : vector<16xf32> to vector<16x1xf32>
    %cst_126 = arith.constant 3.200000e+01 : f32
    %398 = vector.broadcast %cst_126 : f32 to vector<16x1xf32>
    %399 = arith.divf %397, %398 : vector<16x1xf32>
    %400 = vector.broadcast %392 : vector<16x1xf32> to vector<16x32xf32>
    %401 = arith.subf %388, %400 : vector<16x32xf32>
    %cst_127 = arith.constant 9.99999974E-6 : f32
    %402 = vector.broadcast %cst_127 : f32 to vector<16x1xf32>
    %403 = arith.addf %399, %402 : vector<16x1xf32>
    %404 = math.rsqrt %403 : vector<16x1xf32>
    %405 = vector.broadcast %404 : vector<16x1xf32> to vector<16x32xf32>
    %406 = arith.mulf %401, %405 : vector<16x32xf32>
    %c14 = arith.constant 14 : index
    %c0_128 = arith.constant 0 : index
    %407 = vector.load %arg7[%c14, %c0_128] : memref<57x128xf32, #tpu.memory_space<vmem>>, vector<1x32xf32>
    %408 = vector.shape_cast %407 : vector<1x32xf32> to vector<32xf32>
    %409 = vector.shape_cast %408 : vector<32xf32> to vector<1x32xf32>
    %410 = vector.broadcast %409 : vector<1x32xf32> to vector<16x32xf32>
    %411 = arith.mulf %406, %410 : vector<16x32xf32>
    %c15 = arith.constant 15 : index
    %c0_129 = arith.constant 0 : index
    %412 = vector.load %arg7[%c15, %c0_129] : memref<57x128xf32, #tpu.memory_space<vmem>>, vector<1x32xf32>
    %413 = vector.shape_cast %412 : vector<1x32xf32> to vector<32xf32>
    %414 = vector.shape_cast %413 : vector<32xf32> to vector<1x32xf32>
    %415 = vector.broadcast %414 : vector<1x32xf32> to vector<16x32xf32>
    %416 = arith.addf %411, %415 : vector<16x32xf32>
    %c1_130 = arith.constant 1 : index
    %c0_131 = arith.constant 0 : index
    %c0_132 = arith.constant 0 : index
    %417 = vector.load %arg4[%c1_130, %c0_131, %c0_132] : memref<4x32x64xf32, #tpu.memory_space<vmem>>, vector<1x32x64xf32>
    %418 = vector.shape_cast %417 : vector<1x32x64xf32> to vector<32x64xf32>
    %cst_133 = arith.constant dense<0.000000e+00> : vector<16x64xf32>
    %419 = tpu.matmul %416, %418, %cst_133 {dimension_numbers = #tpu.dot_dimension_numbers<[1], [0], [0], [1], [0, 0, 1, 1], [], []>} : vector<16x32xf32>, vector<32x64xf32>, vector<16x64xf32> -> vector<16x64xf32>
    %c16 = arith.constant 16 : index
    %c0_134 = arith.constant 0 : index
    %420 = vector.load %arg7[%c16, %c0_134] : memref<57x128xf32, #tpu.memory_space<vmem>>, vector<1x64xf32>
    %421 = vector.shape_cast %420 : vector<1x64xf32> to vector<64xf32>
    %422 = vector.shape_cast %421 : vector<64xf32> to vector<1x64xf32>
    %423 = vector.broadcast %422 : vector<1x64xf32> to vector<16x64xf32>
    %424 = arith.addf %419, %423 : vector<16x64xf32>
    %cst_135 = arith.constant 0.000000e+00 : f32
    %425 = vector.broadcast %cst_135 : f32 to vector<16x64xf32>
    %426 = arith.maximumf %424, %425 : vector<16x64xf32>
    %c1_136 = arith.constant 1 : index
    %c0_137 = arith.constant 0 : index
    %c0_138 = arith.constant 0 : index
    %427 = vector.load %arg5[%c1_136, %c0_137, %c0_138] : memref<4x64x32xf32, #tpu.memory_space<vmem>>, vector<1x64x32xf32>
    %428 = vector.shape_cast %427 : vector<1x64x32xf32> to vector<64x32xf32>
    %cst_139 = arith.constant dense<0.000000e+00> : vector<16x32xf32>
    %429 = tpu.matmul %426, %428, %cst_139 {dimension_numbers = #tpu.dot_dimension_numbers<[1], [0], [0], [1], [0, 0, 1, 1], [], []>} : vector<16x64xf32>, vector<64x32xf32>, vector<16x32xf32> -> vector<16x32xf32>
    %c17 = arith.constant 17 : index
    %c0_140 = arith.constant 0 : index
    %430 = vector.load %arg7[%c17, %c0_140] : memref<57x128xf32, #tpu.memory_space<vmem>>, vector<1x32xf32>
    %431 = vector.shape_cast %430 : vector<1x32xf32> to vector<32xf32>
    %432 = vector.shape_cast %431 : vector<32xf32> to vector<1x32xf32>
    %433 = vector.broadcast %432 : vector<1x32xf32> to vector<16x32xf32>
    %434 = arith.addf %429, %433 : vector<16x32xf32>
    %435 = arith.addf %416, %434 : vector<16x32xf32>
    %cst_141 = arith.constant dense<0.000000e+00> : vector<16xf32>
    %436 = vector.multi_reduction <add>, %435, %cst_141 [1] : vector<16x32xf32> to vector<16xf32>
    %437 = vector.shape_cast %436 : vector<16xf32> to vector<16x1xf32>
    %cst_142 = arith.constant 3.200000e+01 : f32
    %438 = vector.broadcast %cst_142 : f32 to vector<16x1xf32>
    %439 = arith.divf %437, %438 : vector<16x1xf32>
    %440 = vector.broadcast %439 : vector<16x1xf32> to vector<16x32xf32>
    %441 = arith.subf %435, %440 : vector<16x32xf32>
    %442 = arith.mulf %441, %441 : vector<16x32xf32>
    %cst_143 = arith.constant dense<0.000000e+00> : vector<16xf32>
    %443 = vector.multi_reduction <add>, %442, %cst_143 [1] : vector<16x32xf32> to vector<16xf32>
    %444 = vector.shape_cast %443 : vector<16xf32> to vector<16x1xf32>
    %cst_144 = arith.constant 3.200000e+01 : f32
    %445 = vector.broadcast %cst_144 : f32 to vector<16x1xf32>
    %446 = arith.divf %444, %445 : vector<16x1xf32>
    %447 = vector.broadcast %439 : vector<16x1xf32> to vector<16x32xf32>
    %448 = arith.subf %435, %447 : vector<16x32xf32>
    %cst_145 = arith.constant 9.99999974E-6 : f32
    %449 = vector.broadcast %cst_145 : f32 to vector<16x1xf32>
    %450 = arith.addf %446, %449 : vector<16x1xf32>
    %451 = math.rsqrt %450 : vector<16x1xf32>
    %452 = vector.broadcast %451 : vector<16x1xf32> to vector<16x32xf32>
    %453 = arith.mulf %448, %452 : vector<16x32xf32>
    %c18 = arith.constant 18 : index
    %c0_146 = arith.constant 0 : index
    %454 = vector.load %arg7[%c18, %c0_146] : memref<57x128xf32, #tpu.memory_space<vmem>>, vector<1x32xf32>
    %455 = vector.shape_cast %454 : vector<1x32xf32> to vector<32xf32>
    %456 = vector.shape_cast %455 : vector<32xf32> to vector<1x32xf32>
    %457 = vector.broadcast %456 : vector<1x32xf32> to vector<16x32xf32>
    %458 = arith.mulf %453, %457 : vector<16x32xf32>
    %c19 = arith.constant 19 : index
    %c0_147 = arith.constant 0 : index
    %459 = vector.load %arg7[%c19, %c0_147] : memref<57x128xf32, #tpu.memory_space<vmem>>, vector<1x32xf32>
    %460 = vector.shape_cast %459 : vector<1x32xf32> to vector<32xf32>
    %461 = vector.shape_cast %460 : vector<32xf32> to vector<1x32xf32>
    %462 = vector.broadcast %461 : vector<1x32xf32> to vector<16x32xf32>
    %463 = arith.addf %458, %462 : vector<16x32xf32>
    %cst_148 = arith.constant dense<0.000000e+00> : vector<16xf32>
    %464 = vector.multi_reduction <add>, %463, %cst_148 [1] : vector<16x32xf32> to vector<16xf32>
    %465 = vector.shape_cast %464 : vector<16xf32> to vector<16x1xf32>
    %cst_149 = arith.constant 3.200000e+01 : f32
    %466 = vector.broadcast %cst_149 : f32 to vector<16x1xf32>
    %467 = arith.divf %465, %466 : vector<16x1xf32>
    %468 = vector.broadcast %467 : vector<16x1xf32> to vector<16x32xf32>
    %469 = arith.subf %463, %468 : vector<16x32xf32>
    %470 = arith.mulf %469, %469 : vector<16x32xf32>
    %cst_150 = arith.constant dense<0.000000e+00> : vector<16xf32>
    %471 = vector.multi_reduction <add>, %470, %cst_150 [1] : vector<16x32xf32> to vector<16xf32>
    %472 = vector.shape_cast %471 : vector<16xf32> to vector<16x1xf32>
    %cst_151 = arith.constant 3.200000e+01 : f32
    %473 = vector.broadcast %cst_151 : f32 to vector<16x1xf32>
    %474 = arith.divf %472, %473 : vector<16x1xf32>
    %475 = vector.broadcast %467 : vector<16x1xf32> to vector<16x32xf32>
    %476 = arith.subf %463, %475 : vector<16x32xf32>
    %cst_152 = arith.constant 9.99999974E-6 : f32
    %477 = vector.broadcast %cst_152 : f32 to vector<16x1xf32>
    %478 = arith.addf %474, %477 : vector<16x1xf32>
    %479 = math.rsqrt %478 : vector<16x1xf32>
    %480 = vector.broadcast %479 : vector<16x1xf32> to vector<16x32xf32>
    %481 = arith.mulf %476, %480 : vector<16x32xf32>
    %c20 = arith.constant 20 : index
    %c0_153 = arith.constant 0 : index
    %482 = vector.load %arg7[%c20, %c0_153] : memref<57x128xf32, #tpu.memory_space<vmem>>, vector<1x32xf32>
    %483 = vector.shape_cast %482 : vector<1x32xf32> to vector<32xf32>
    %484 = vector.shape_cast %483 : vector<32xf32> to vector<1x32xf32>
    %485 = vector.broadcast %484 : vector<1x32xf32> to vector<16x32xf32>
    %486 = arith.mulf %481, %485 : vector<16x32xf32>
    %c21 = arith.constant 21 : index
    %c0_154 = arith.constant 0 : index
    %487 = vector.load %arg7[%c21, %c0_154] : memref<57x128xf32, #tpu.memory_space<vmem>>, vector<1x32xf32>
    %488 = vector.shape_cast %487 : vector<1x32xf32> to vector<32xf32>
    %489 = vector.shape_cast %488 : vector<32xf32> to vector<1x32xf32>
    %490 = vector.broadcast %489 : vector<1x32xf32> to vector<16x32xf32>
    %491 = arith.addf %486, %490 : vector<16x32xf32>
    %c8_155 = arith.constant 8 : index
    %c0_156 = arith.constant 0 : index
    %c0_157 = arith.constant 0 : index
    %492 = vector.load %arg3[%c8_155, %c0_156, %c0_157] : memref<24x32x32xf32, #tpu.memory_space<vmem>>, vector<1x32x32xf32>
    %493 = vector.shape_cast %492 : vector<1x32x32xf32> to vector<32x32xf32>
    %cst_158 = arith.constant dense<0.000000e+00> : vector<12x32xf32>
    %494 = tpu.matmul %25, %493, %cst_158 {dimension_numbers = #tpu.dot_dimension_numbers<[1], [0], [0], [1], [0, 0, 1, 1], [], []>} : vector<12x32xf32>, vector<32x32xf32>, vector<12x32xf32> -> vector<12x32xf32>
    %c22 = arith.constant 22 : index
    %c0_159 = arith.constant 0 : index
    %495 = vector.load %arg7[%c22, %c0_159] : memref<57x128xf32, #tpu.memory_space<vmem>>, vector<1x32xf32>
    %496 = vector.shape_cast %495 : vector<1x32xf32> to vector<32xf32>
    %497 = vector.shape_cast %496 : vector<32xf32> to vector<1x32xf32>
    %498 = vector.broadcast %497 : vector<1x32xf32> to vector<12x32xf32>
    %499 = arith.addf %494, %498 : vector<12x32xf32>
    %c9_160 = arith.constant 9 : index
    %c0_161 = arith.constant 0 : index
    %c0_162 = arith.constant 0 : index
    %500 = vector.load %arg3[%c9_160, %c0_161, %c0_162] : memref<24x32x32xf32, #tpu.memory_space<vmem>>, vector<1x32x32xf32>
    %501 = vector.shape_cast %500 : vector<1x32x32xf32> to vector<32x32xf32>
    %cst_163 = arith.constant dense<0.000000e+00> : vector<12x32xf32>
    %502 = tpu.matmul %25, %501, %cst_163 {dimension_numbers = #tpu.dot_dimension_numbers<[1], [0], [0], [1], [0, 0, 1, 1], [], []>} : vector<12x32xf32>, vector<32x32xf32>, vector<12x32xf32> -> vector<12x32xf32>
    %c23 = arith.constant 23 : index
    %c0_164 = arith.constant 0 : index
    %503 = vector.load %arg7[%c23, %c0_164] : memref<57x128xf32, #tpu.memory_space<vmem>>, vector<1x32xf32>
    %504 = vector.shape_cast %503 : vector<1x32xf32> to vector<32xf32>
    %505 = vector.shape_cast %504 : vector<32xf32> to vector<1x32xf32>
    %506 = vector.broadcast %505 : vector<1x32xf32> to vector<12x32xf32>
    %507 = arith.addf %502, %506 : vector<12x32xf32>
    %c10_165 = arith.constant 10 : index
    %c0_166 = arith.constant 0 : index
    %c0_167 = arith.constant 0 : index
    %508 = vector.load %arg3[%c10_165, %c0_166, %c0_167] : memref<24x32x32xf32, #tpu.memory_space<vmem>>, vector<1x32x32xf32>
    %509 = vector.shape_cast %508 : vector<1x32x32xf32> to vector<32x32xf32>
    %cst_168 = arith.constant dense<0.000000e+00> : vector<12x32xf32>
    %510 = tpu.matmul %25, %509, %cst_168 {dimension_numbers = #tpu.dot_dimension_numbers<[1], [0], [0], [1], [0, 0, 1, 1], [], []>} : vector<12x32xf32>, vector<32x32xf32>, vector<12x32xf32> -> vector<12x32xf32>
    %c24 = arith.constant 24 : index
    %c0_169 = arith.constant 0 : index
    %511 = vector.load %arg7[%c24, %c0_169] : memref<57x128xf32, #tpu.memory_space<vmem>>, vector<1x32xf32>
    %512 = vector.shape_cast %511 : vector<1x32xf32> to vector<32xf32>
    %513 = vector.shape_cast %512 : vector<32xf32> to vector<1x32xf32>
    %514 = vector.broadcast %513 : vector<1x32xf32> to vector<12x32xf32>
    %515 = arith.addf %510, %514 : vector<12x32xf32>
    %516 = vector.extract_strided_slice %499 {offsets = [0, 0], sizes = [12, 8], strides = [1, 1]} : vector<12x32xf32> to vector<12x8xf32>
    %517 = vector.extract_strided_slice %499 {offsets = [0, 8], sizes = [12, 8], strides = [1, 1]} : vector<12x32xf32> to vector<12x8xf32>
    %518 = vector.extract_strided_slice %499 {offsets = [0, 16], sizes = [12, 8], strides = [1, 1]} : vector<12x32xf32> to vector<12x8xf32>
    %519 = vector.extract_strided_slice %499 {offsets = [0, 24], sizes = [12, 8], strides = [1, 1]} : vector<12x32xf32> to vector<12x8xf32>
    %520 = vector.shape_cast %516 : vector<12x8xf32> to vector<1x12x8xf32>
    %521 = vector.shape_cast %517 : vector<12x8xf32> to vector<1x12x8xf32>
    %522 = vector.shape_cast %518 : vector<12x8xf32> to vector<1x12x8xf32>
    %523 = vector.shape_cast %519 : vector<12x8xf32> to vector<1x12x8xf32>
    %524 = tpu.concatenate %520, %521, %522, %523 in 0 : vector<1x12x8xf32>, vector<1x12x8xf32>, vector<1x12x8xf32>, vector<1x12x8xf32> -> vector<4x12x8xf32>
    %525 = vector.extract_strided_slice %507 {offsets = [0, 0], sizes = [12, 8], strides = [1, 1]} : vector<12x32xf32> to vector<12x8xf32>
    %526 = vector.extract_strided_slice %507 {offsets = [0, 8], sizes = [12, 8], strides = [1, 1]} : vector<12x32xf32> to vector<12x8xf32>
    %527 = vector.extract_strided_slice %507 {offsets = [0, 16], sizes = [12, 8], strides = [1, 1]} : vector<12x32xf32> to vector<12x8xf32>
    %528 = vector.extract_strided_slice %507 {offsets = [0, 24], sizes = [12, 8], strides = [1, 1]} : vector<12x32xf32> to vector<12x8xf32>
    %529 = vector.shape_cast %525 : vector<12x8xf32> to vector<1x12x8xf32>
    %530 = vector.shape_cast %526 : vector<12x8xf32> to vector<1x12x8xf32>
    %531 = vector.shape_cast %527 : vector<12x8xf32> to vector<1x12x8xf32>
    %532 = vector.shape_cast %528 : vector<12x8xf32> to vector<1x12x8xf32>
    %533 = tpu.concatenate %529, %530, %531, %532 in 0 : vector<1x12x8xf32>, vector<1x12x8xf32>, vector<1x12x8xf32>, vector<1x12x8xf32> -> vector<4x12x8xf32>
    %534 = vector.extract_strided_slice %515 {offsets = [0, 0], sizes = [12, 8], strides = [1, 1]} : vector<12x32xf32> to vector<12x8xf32>
    %535 = vector.extract_strided_slice %515 {offsets = [0, 8], sizes = [12, 8], strides = [1, 1]} : vector<12x32xf32> to vector<12x8xf32>
    %536 = vector.extract_strided_slice %515 {offsets = [0, 16], sizes = [12, 8], strides = [1, 1]} : vector<12x32xf32> to vector<12x8xf32>
    %537 = vector.extract_strided_slice %515 {offsets = [0, 24], sizes = [12, 8], strides = [1, 1]} : vector<12x32xf32> to vector<12x8xf32>
    %538 = vector.shape_cast %534 : vector<12x8xf32> to vector<1x12x8xf32>
    %539 = vector.shape_cast %535 : vector<12x8xf32> to vector<1x12x8xf32>
    %540 = vector.shape_cast %536 : vector<12x8xf32> to vector<1x12x8xf32>
    %541 = vector.shape_cast %537 : vector<12x8xf32> to vector<1x12x8xf32>
    %542 = tpu.concatenate %538, %539, %540, %541 in 0 : vector<1x12x8xf32>, vector<1x12x8xf32>, vector<1x12x8xf32>, vector<1x12x8xf32> -> vector<4x12x8xf32>
    "tpu.trace_start"() <{level = 10 : i32, message = "hqd,hkd->hqk"}> : () -> ()
    %cst_170 = arith.constant dense<0.000000e+00> : vector<4x12x12xf32>
    %543 = tpu.matmul %524, %533, %cst_170 {dimension_numbers = #tpu.dot_dimension_numbers<[2], [2], [1], [1], [0, 0, 0, 1, 1, 1], [0], [0]>} : vector<4x12x8xf32>, vector<4x12x8xf32>, vector<4x12x12xf32> -> vector<4x12x12xf32>
    "tpu.trace_stop"() : () -> ()
    %cst_171 = arith.constant 0.353553385 : f32
    %544 = vector.broadcast %cst_171 : f32 to vector<4x12x12xf32>
    %545 = arith.mulf %543, %544 : vector<4x12x12xf32>
    %546 = vector.shape_cast %107 : vector<12x12xf32> to vector<1x12x12xf32>
    %547 = vector.broadcast %546 : vector<1x12x12xf32> to vector<4x12x12xf32>
    %548 = arith.addf %545, %547 : vector<4x12x12xf32>
    %cst_172 = arith.constant dense<0xFF800000> : vector<4x12xf32>
    %549 = vector.multi_reduction <maximumf>, %548, %cst_172 [2] : vector<4x12x12xf32> to vector<4x12xf32>
    %550 = vector.shape_cast %549 : vector<4x12xf32> to vector<4x12x1xf32>
    %551 = vector.broadcast %550 : vector<4x12x1xf32> to vector<4x12x12xf32>
    %552 = arith.subf %548, %551 : vector<4x12x12xf32>
    %553 = math.exp %552 : vector<4x12x12xf32>
    %cst_173 = arith.constant dense<0.000000e+00> : vector<4x12xf32>
    %554 = vector.multi_reduction <add>, %553, %cst_173 [2] : vector<4x12x12xf32> to vector<4x12xf32>
    %555 = vector.shape_cast %554 : vector<4x12xf32> to vector<4x12x1xf32>
    %556 = tpu.reciprocal %555 {approx = true} : vector<4x12x1xf32> -> vector<4x12x1xf32>
    %557 = vector.broadcast %556 : vector<4x12x1xf32> to vector<4x12x12xf32>
    %558 = arith.mulf %553, %557 : vector<4x12x12xf32>
    "tpu.trace_start"() <{level = 10 : i32, message = "hqk,hkd->hqd"}> : () -> ()
    %cst_174 = arith.constant dense<0.000000e+00> : vector<4x12x8xf32>
    %559 = tpu.matmul %558, %542, %cst_174 {dimension_numbers = #tpu.dot_dimension_numbers<[2], [1], [1], [2], [0, 0, 0, 1, 1, 2], [0], [0]>} : vector<4x12x12xf32>, vector<4x12x8xf32>, vector<4x12x8xf32> -> vector<4x12x8xf32>
    "tpu.trace_stop"() : () -> ()
    %560 = vector.extract_strided_slice %559 {offsets = [0, 0, 0], sizes = [1, 12, 8], strides = [1, 1, 1]} : vector<4x12x8xf32> to vector<1x12x8xf32>
    %561 = vector.shape_cast %560 : vector<1x12x8xf32> to vector<12x8xf32>
    %562 = vector.extract_strided_slice %559 {offsets = [1, 0, 0], sizes = [1, 12, 8], strides = [1, 1, 1]} : vector<4x12x8xf32> to vector<1x12x8xf32>
    %563 = vector.shape_cast %562 : vector<1x12x8xf32> to vector<12x8xf32>
    %564 = vector.extract_strided_slice %559 {offsets = [2, 0, 0], sizes = [1, 12, 8], strides = [1, 1, 1]} : vector<4x12x8xf32> to vector<1x12x8xf32>
    %565 = vector.shape_cast %564 : vector<1x12x8xf32> to vector<12x8xf32>
    %566 = vector.extract_strided_slice %559 {offsets = [3, 0, 0], sizes = [1, 12, 8], strides = [1, 1, 1]} : vector<4x12x8xf32> to vector<1x12x8xf32>
    %567 = vector.shape_cast %566 : vector<1x12x8xf32> to vector<12x8xf32>
    %568 = tpu.concatenate %561, %563, %565, %567 in 1 : vector<12x8xf32>, vector<12x8xf32>, vector<12x8xf32>, vector<12x8xf32> -> vector<12x32xf32>
    %c11_175 = arith.constant 11 : index
    %c0_176 = arith.constant 0 : index
    %c0_177 = arith.constant 0 : index
    %569 = vector.load %arg3[%c11_175, %c0_176, %c0_177] : memref<24x32x32xf32, #tpu.memory_space<vmem>>, vector<1x32x32xf32>
    %570 = vector.shape_cast %569 : vector<1x32x32xf32> to vector<32x32xf32>
    %cst_178 = arith.constant dense<0.000000e+00> : vector<12x32xf32>
    %571 = tpu.matmul %568, %570, %cst_178 {dimension_numbers = #tpu.dot_dimension_numbers<[1], [0], [0], [1], [0, 0, 1, 1], [], []>} : vector<12x32xf32>, vector<32x32xf32>, vector<12x32xf32> -> vector<12x32xf32>
    %c25 = arith.constant 25 : index
    %c0_179 = arith.constant 0 : index
    %572 = vector.load %arg7[%c25, %c0_179] : memref<57x128xf32, #tpu.memory_space<vmem>>, vector<1x32xf32>
    %573 = vector.shape_cast %572 : vector<1x32xf32> to vector<32xf32>
    %574 = vector.shape_cast %573 : vector<32xf32> to vector<1x32xf32>
    %575 = vector.broadcast %574 : vector<1x32xf32> to vector<12x32xf32>
    %576 = arith.addf %571, %575 : vector<12x32xf32>
    %577 = arith.addf %25, %576 : vector<12x32xf32>
    %cst_180 = arith.constant dense<0.000000e+00> : vector<12xf32>
    %578 = vector.multi_reduction <add>, %577, %cst_180 [1] : vector<12x32xf32> to vector<12xf32>
    %579 = vector.shape_cast %578 : vector<12xf32> to vector<12x1xf32>
    %cst_181 = arith.constant 3.200000e+01 : f32
    %580 = vector.broadcast %cst_181 : f32 to vector<12x1xf32>
    %581 = arith.divf %579, %580 : vector<12x1xf32>
    %582 = vector.broadcast %581 : vector<12x1xf32> to vector<12x32xf32>
    %583 = arith.subf %577, %582 : vector<12x32xf32>
    %584 = arith.mulf %583, %583 : vector<12x32xf32>
    %cst_182 = arith.constant dense<0.000000e+00> : vector<12xf32>
    %585 = vector.multi_reduction <add>, %584, %cst_182 [1] : vector<12x32xf32> to vector<12xf32>
    %586 = vector.shape_cast %585 : vector<12xf32> to vector<12x1xf32>
    %cst_183 = arith.constant 3.200000e+01 : f32
    %587 = vector.broadcast %cst_183 : f32 to vector<12x1xf32>
    %588 = arith.divf %586, %587 : vector<12x1xf32>
    %589 = vector.broadcast %581 : vector<12x1xf32> to vector<12x32xf32>
    %590 = arith.subf %577, %589 : vector<12x32xf32>
    %cst_184 = arith.constant 9.99999974E-6 : f32
    %591 = vector.broadcast %cst_184 : f32 to vector<12x1xf32>
    %592 = arith.addf %588, %591 : vector<12x1xf32>
    %593 = math.rsqrt %592 : vector<12x1xf32>
    %594 = vector.broadcast %593 : vector<12x1xf32> to vector<12x32xf32>
    %595 = arith.mulf %590, %594 : vector<12x32xf32>
    %c26 = arith.constant 26 : index
    %c0_185 = arith.constant 0 : index
    %596 = vector.load %arg7[%c26, %c0_185] : memref<57x128xf32, #tpu.memory_space<vmem>>, vector<1x32xf32>
    %597 = vector.shape_cast %596 : vector<1x32xf32> to vector<32xf32>
    %598 = vector.shape_cast %597 : vector<32xf32> to vector<1x32xf32>
    %599 = vector.broadcast %598 : vector<1x32xf32> to vector<12x32xf32>
    %600 = arith.mulf %595, %599 : vector<12x32xf32>
    %c27 = arith.constant 27 : index
    %c0_186 = arith.constant 0 : index
    %601 = vector.load %arg7[%c27, %c0_186] : memref<57x128xf32, #tpu.memory_space<vmem>>, vector<1x32xf32>
    %602 = vector.shape_cast %601 : vector<1x32xf32> to vector<32xf32>
    %603 = vector.shape_cast %602 : vector<32xf32> to vector<1x32xf32>
    %604 = vector.broadcast %603 : vector<1x32xf32> to vector<12x32xf32>
    %605 = arith.addf %600, %604 : vector<12x32xf32>
    %c12_187 = arith.constant 12 : index
    %c0_188 = arith.constant 0 : index
    %c0_189 = arith.constant 0 : index
    %606 = vector.load %arg3[%c12_187, %c0_188, %c0_189] : memref<24x32x32xf32, #tpu.memory_space<vmem>>, vector<1x32x32xf32>
    %607 = vector.shape_cast %606 : vector<1x32x32xf32> to vector<32x32xf32>
    %cst_190 = arith.constant dense<0.000000e+00> : vector<12x32xf32>
    %608 = tpu.matmul %605, %607, %cst_190 {dimension_numbers = #tpu.dot_dimension_numbers<[1], [0], [0], [1], [0, 0, 1, 1], [], []>} : vector<12x32xf32>, vector<32x32xf32>, vector<12x32xf32> -> vector<12x32xf32>
    %c28 = arith.constant 28 : index
    %c0_191 = arith.constant 0 : index
    %609 = vector.load %arg7[%c28, %c0_191] : memref<57x128xf32, #tpu.memory_space<vmem>>, vector<1x32xf32>
    %610 = vector.shape_cast %609 : vector<1x32xf32> to vector<32xf32>
    %611 = vector.shape_cast %610 : vector<32xf32> to vector<1x32xf32>
    %612 = vector.broadcast %611 : vector<1x32xf32> to vector<12x32xf32>
    %613 = arith.addf %608, %612 : vector<12x32xf32>
    %c13_192 = arith.constant 13 : index
    %c0_193 = arith.constant 0 : index
    %c0_194 = arith.constant 0 : index
    %614 = vector.load %arg3[%c13_192, %c0_193, %c0_194] : memref<24x32x32xf32, #tpu.memory_space<vmem>>, vector<1x32x32xf32>
    %615 = vector.shape_cast %614 : vector<1x32x32xf32> to vector<32x32xf32>
    %cst_195 = arith.constant dense<0.000000e+00> : vector<16x32xf32>
    %616 = tpu.matmul %491, %615, %cst_195 {dimension_numbers = #tpu.dot_dimension_numbers<[1], [0], [0], [1], [0, 0, 1, 1], [], []>} : vector<16x32xf32>, vector<32x32xf32>, vector<16x32xf32> -> vector<16x32xf32>
    %c29 = arith.constant 29 : index
    %c0_196 = arith.constant 0 : index
    %617 = vector.load %arg7[%c29, %c0_196] : memref<57x128xf32, #tpu.memory_space<vmem>>, vector<1x32xf32>
    %618 = vector.shape_cast %617 : vector<1x32xf32> to vector<32xf32>
    %619 = vector.shape_cast %618 : vector<32xf32> to vector<1x32xf32>
    %620 = vector.broadcast %619 : vector<1x32xf32> to vector<16x32xf32>
    %621 = arith.addf %616, %620 : vector<16x32xf32>
    %c14_197 = arith.constant 14 : index
    %c0_198 = arith.constant 0 : index
    %c0_199 = arith.constant 0 : index
    %622 = vector.load %arg3[%c14_197, %c0_198, %c0_199] : memref<24x32x32xf32, #tpu.memory_space<vmem>>, vector<1x32x32xf32>
    %623 = vector.shape_cast %622 : vector<1x32x32xf32> to vector<32x32xf32>
    %cst_200 = arith.constant dense<0.000000e+00> : vector<16x32xf32>
    %624 = tpu.matmul %491, %623, %cst_200 {dimension_numbers = #tpu.dot_dimension_numbers<[1], [0], [0], [1], [0, 0, 1, 1], [], []>} : vector<16x32xf32>, vector<32x32xf32>, vector<16x32xf32> -> vector<16x32xf32>
    %c30 = arith.constant 30 : index
    %c0_201 = arith.constant 0 : index
    %625 = vector.load %arg7[%c30, %c0_201] : memref<57x128xf32, #tpu.memory_space<vmem>>, vector<1x32xf32>
    %626 = vector.shape_cast %625 : vector<1x32xf32> to vector<32xf32>
    %627 = vector.shape_cast %626 : vector<32xf32> to vector<1x32xf32>
    %628 = vector.broadcast %627 : vector<1x32xf32> to vector<16x32xf32>
    %629 = arith.addf %624, %628 : vector<16x32xf32>
    %630 = vector.extract_strided_slice %613 {offsets = [0, 0], sizes = [12, 8], strides = [1, 1]} : vector<12x32xf32> to vector<12x8xf32>
    %631 = vector.extract_strided_slice %613 {offsets = [0, 8], sizes = [12, 8], strides = [1, 1]} : vector<12x32xf32> to vector<12x8xf32>
    %632 = vector.extract_strided_slice %613 {offsets = [0, 16], sizes = [12, 8], strides = [1, 1]} : vector<12x32xf32> to vector<12x8xf32>
    %633 = vector.extract_strided_slice %613 {offsets = [0, 24], sizes = [12, 8], strides = [1, 1]} : vector<12x32xf32> to vector<12x8xf32>
    %634 = vector.shape_cast %630 : vector<12x8xf32> to vector<1x12x8xf32>
    %635 = vector.shape_cast %631 : vector<12x8xf32> to vector<1x12x8xf32>
    %636 = vector.shape_cast %632 : vector<12x8xf32> to vector<1x12x8xf32>
    %637 = vector.shape_cast %633 : vector<12x8xf32> to vector<1x12x8xf32>
    %638 = tpu.concatenate %634, %635, %636, %637 in 0 : vector<1x12x8xf32>, vector<1x12x8xf32>, vector<1x12x8xf32>, vector<1x12x8xf32> -> vector<4x12x8xf32>
    %639 = vector.extract_strided_slice %621 {offsets = [0, 0], sizes = [16, 8], strides = [1, 1]} : vector<16x32xf32> to vector<16x8xf32>
    %640 = vector.extract_strided_slice %621 {offsets = [0, 8], sizes = [16, 8], strides = [1, 1]} : vector<16x32xf32> to vector<16x8xf32>
    %641 = vector.extract_strided_slice %621 {offsets = [0, 16], sizes = [16, 8], strides = [1, 1]} : vector<16x32xf32> to vector<16x8xf32>
    %642 = vector.extract_strided_slice %621 {offsets = [0, 24], sizes = [16, 8], strides = [1, 1]} : vector<16x32xf32> to vector<16x8xf32>
    %643 = vector.shape_cast %639 : vector<16x8xf32> to vector<1x16x8xf32>
    %644 = vector.shape_cast %640 : vector<16x8xf32> to vector<1x16x8xf32>
    %645 = vector.shape_cast %641 : vector<16x8xf32> to vector<1x16x8xf32>
    %646 = vector.shape_cast %642 : vector<16x8xf32> to vector<1x16x8xf32>
    %647 = tpu.concatenate %643, %644, %645, %646 in 0 : vector<1x16x8xf32>, vector<1x16x8xf32>, vector<1x16x8xf32>, vector<1x16x8xf32> -> vector<4x16x8xf32>
    %648 = vector.extract_strided_slice %629 {offsets = [0, 0], sizes = [16, 8], strides = [1, 1]} : vector<16x32xf32> to vector<16x8xf32>
    %649 = vector.extract_strided_slice %629 {offsets = [0, 8], sizes = [16, 8], strides = [1, 1]} : vector<16x32xf32> to vector<16x8xf32>
    %650 = vector.extract_strided_slice %629 {offsets = [0, 16], sizes = [16, 8], strides = [1, 1]} : vector<16x32xf32> to vector<16x8xf32>
    %651 = vector.extract_strided_slice %629 {offsets = [0, 24], sizes = [16, 8], strides = [1, 1]} : vector<16x32xf32> to vector<16x8xf32>
    %652 = vector.shape_cast %648 : vector<16x8xf32> to vector<1x16x8xf32>
    %653 = vector.shape_cast %649 : vector<16x8xf32> to vector<1x16x8xf32>
    %654 = vector.shape_cast %650 : vector<16x8xf32> to vector<1x16x8xf32>
    %655 = vector.shape_cast %651 : vector<16x8xf32> to vector<1x16x8xf32>
    %656 = tpu.concatenate %652, %653, %654, %655 in 0 : vector<1x16x8xf32>, vector<1x16x8xf32>, vector<1x16x8xf32>, vector<1x16x8xf32> -> vector<4x16x8xf32>
    "tpu.trace_start"() <{level = 10 : i32, message = "hqd,hkd->hqk"}> : () -> ()
    %cst_202 = arith.constant dense<0.000000e+00> : vector<4x12x16xf32>
    %657 = tpu.matmul %638, %647, %cst_202 {dimension_numbers = #tpu.dot_dimension_numbers<[2], [2], [1], [1], [0, 0, 0, 1, 1, 1], [0], [0]>} : vector<4x12x8xf32>, vector<4x16x8xf32>, vector<4x12x16xf32> -> vector<4x12x16xf32>
    "tpu.trace_stop"() : () -> ()
    %cst_203 = arith.constant 0.353553385 : f32
    %658 = vector.broadcast %cst_203 : f32 to vector<4x12x16xf32>
    %659 = arith.mulf %657, %658 : vector<4x12x16xf32>
    %660 = vector.shape_cast %141 : vector<12x16xf32> to vector<1x12x16xf32>
    %661 = vector.broadcast %660 : vector<1x12x16xf32> to vector<4x12x16xf32>
    %662 = arith.addf %659, %661 : vector<4x12x16xf32>
    %cst_204 = arith.constant dense<0xFF800000> : vector<4x12xf32>
    %663 = vector.multi_reduction <maximumf>, %662, %cst_204 [2] : vector<4x12x16xf32> to vector<4x12xf32>
    %664 = vector.shape_cast %663 : vector<4x12xf32> to vector<4x12x1xf32>
    %665 = vector.broadcast %664 : vector<4x12x1xf32> to vector<4x12x16xf32>
    %666 = arith.subf %662, %665 : vector<4x12x16xf32>
    %667 = math.exp %666 : vector<4x12x16xf32>
    %cst_205 = arith.constant dense<0.000000e+00> : vector<4x12xf32>
    %668 = vector.multi_reduction <add>, %667, %cst_205 [2] : vector<4x12x16xf32> to vector<4x12xf32>
    %669 = vector.shape_cast %668 : vector<4x12xf32> to vector<4x12x1xf32>
    %670 = tpu.reciprocal %669 {approx = true} : vector<4x12x1xf32> -> vector<4x12x1xf32>
    %671 = vector.broadcast %670 : vector<4x12x1xf32> to vector<4x12x16xf32>
    %672 = arith.mulf %667, %671 : vector<4x12x16xf32>
    "tpu.trace_start"() <{level = 10 : i32, message = "hqk,hkd->hqd"}> : () -> ()
    %cst_206 = arith.constant dense<0.000000e+00> : vector<4x12x8xf32>
    %673 = tpu.matmul %672, %656, %cst_206 {dimension_numbers = #tpu.dot_dimension_numbers<[2], [1], [1], [2], [0, 0, 0, 1, 1, 2], [0], [0]>} : vector<4x12x16xf32>, vector<4x16x8xf32>, vector<4x12x8xf32> -> vector<4x12x8xf32>
    "tpu.trace_stop"() : () -> ()
    %674 = vector.extract_strided_slice %673 {offsets = [0, 0, 0], sizes = [1, 12, 8], strides = [1, 1, 1]} : vector<4x12x8xf32> to vector<1x12x8xf32>
    %675 = vector.shape_cast %674 : vector<1x12x8xf32> to vector<12x8xf32>
    %676 = vector.extract_strided_slice %673 {offsets = [1, 0, 0], sizes = [1, 12, 8], strides = [1, 1, 1]} : vector<4x12x8xf32> to vector<1x12x8xf32>
    %677 = vector.shape_cast %676 : vector<1x12x8xf32> to vector<12x8xf32>
    %678 = vector.extract_strided_slice %673 {offsets = [2, 0, 0], sizes = [1, 12, 8], strides = [1, 1, 1]} : vector<4x12x8xf32> to vector<1x12x8xf32>
    %679 = vector.shape_cast %678 : vector<1x12x8xf32> to vector<12x8xf32>
    %680 = vector.extract_strided_slice %673 {offsets = [3, 0, 0], sizes = [1, 12, 8], strides = [1, 1, 1]} : vector<4x12x8xf32> to vector<1x12x8xf32>
    %681 = vector.shape_cast %680 : vector<1x12x8xf32> to vector<12x8xf32>
    %682 = tpu.concatenate %675, %677, %679, %681 in 1 : vector<12x8xf32>, vector<12x8xf32>, vector<12x8xf32>, vector<12x8xf32> -> vector<12x32xf32>
    %c15_207 = arith.constant 15 : index
    %c0_208 = arith.constant 0 : index
    %c0_209 = arith.constant 0 : index
    %683 = vector.load %arg3[%c15_207, %c0_208, %c0_209] : memref<24x32x32xf32, #tpu.memory_space<vmem>>, vector<1x32x32xf32>
    %684 = vector.shape_cast %683 : vector<1x32x32xf32> to vector<32x32xf32>
    %cst_210 = arith.constant dense<0.000000e+00> : vector<12x32xf32>
    %685 = tpu.matmul %682, %684, %cst_210 {dimension_numbers = #tpu.dot_dimension_numbers<[1], [0], [0], [1], [0, 0, 1, 1], [], []>} : vector<12x32xf32>, vector<32x32xf32>, vector<12x32xf32> -> vector<12x32xf32>
    %c31 = arith.constant 31 : index
    %c0_211 = arith.constant 0 : index
    %686 = vector.load %arg7[%c31, %c0_211] : memref<57x128xf32, #tpu.memory_space<vmem>>, vector<1x32xf32>
    %687 = vector.shape_cast %686 : vector<1x32xf32> to vector<32xf32>
    %688 = vector.shape_cast %687 : vector<32xf32> to vector<1x32xf32>
    %689 = vector.broadcast %688 : vector<1x32xf32> to vector<12x32xf32>
    %690 = arith.addf %685, %689 : vector<12x32xf32>
    %691 = arith.addf %605, %690 : vector<12x32xf32>
    %cst_212 = arith.constant dense<0.000000e+00> : vector<12xf32>
    %692 = vector.multi_reduction <add>, %691, %cst_212 [1] : vector<12x32xf32> to vector<12xf32>
    %693 = vector.shape_cast %692 : vector<12xf32> to vector<12x1xf32>
    %cst_213 = arith.constant 3.200000e+01 : f32
    %694 = vector.broadcast %cst_213 : f32 to vector<12x1xf32>
    %695 = arith.divf %693, %694 : vector<12x1xf32>
    %696 = vector.broadcast %695 : vector<12x1xf32> to vector<12x32xf32>
    %697 = arith.subf %691, %696 : vector<12x32xf32>
    %698 = arith.mulf %697, %697 : vector<12x32xf32>
    %cst_214 = arith.constant dense<0.000000e+00> : vector<12xf32>
    %699 = vector.multi_reduction <add>, %698, %cst_214 [1] : vector<12x32xf32> to vector<12xf32>
    %700 = vector.shape_cast %699 : vector<12xf32> to vector<12x1xf32>
    %cst_215 = arith.constant 3.200000e+01 : f32
    %701 = vector.broadcast %cst_215 : f32 to vector<12x1xf32>
    %702 = arith.divf %700, %701 : vector<12x1xf32>
    %703 = vector.broadcast %695 : vector<12x1xf32> to vector<12x32xf32>
    %704 = arith.subf %691, %703 : vector<12x32xf32>
    %cst_216 = arith.constant 9.99999974E-6 : f32
    %705 = vector.broadcast %cst_216 : f32 to vector<12x1xf32>
    %706 = arith.addf %702, %705 : vector<12x1xf32>
    %707 = math.rsqrt %706 : vector<12x1xf32>
    %708 = vector.broadcast %707 : vector<12x1xf32> to vector<12x32xf32>
    %709 = arith.mulf %704, %708 : vector<12x32xf32>
    %c32 = arith.constant 32 : index
    %c0_217 = arith.constant 0 : index
    %710 = vector.load %arg7[%c32, %c0_217] : memref<57x128xf32, #tpu.memory_space<vmem>>, vector<1x32xf32>
    %711 = vector.shape_cast %710 : vector<1x32xf32> to vector<32xf32>
    %712 = vector.shape_cast %711 : vector<32xf32> to vector<1x32xf32>
    %713 = vector.broadcast %712 : vector<1x32xf32> to vector<12x32xf32>
    %714 = arith.mulf %709, %713 : vector<12x32xf32>
    %c33 = arith.constant 33 : index
    %c0_218 = arith.constant 0 : index
    %715 = vector.load %arg7[%c33, %c0_218] : memref<57x128xf32, #tpu.memory_space<vmem>>, vector<1x32xf32>
    %716 = vector.shape_cast %715 : vector<1x32xf32> to vector<32xf32>
    %717 = vector.shape_cast %716 : vector<32xf32> to vector<1x32xf32>
    %718 = vector.broadcast %717 : vector<1x32xf32> to vector<12x32xf32>
    %719 = arith.addf %714, %718 : vector<12x32xf32>
    %c2_219 = arith.constant 2 : index
    %c0_220 = arith.constant 0 : index
    %c0_221 = arith.constant 0 : index
    %720 = vector.load %arg4[%c2_219, %c0_220, %c0_221] : memref<4x32x64xf32, #tpu.memory_space<vmem>>, vector<1x32x64xf32>
    %721 = vector.shape_cast %720 : vector<1x32x64xf32> to vector<32x64xf32>
    %cst_222 = arith.constant dense<0.000000e+00> : vector<12x64xf32>
    %722 = tpu.matmul %719, %721, %cst_222 {dimension_numbers = #tpu.dot_dimension_numbers<[1], [0], [0], [1], [0, 0, 1, 1], [], []>} : vector<12x32xf32>, vector<32x64xf32>, vector<12x64xf32> -> vector<12x64xf32>
    %c34 = arith.constant 34 : index
    %c0_223 = arith.constant 0 : index
    %723 = vector.load %arg7[%c34, %c0_223] : memref<57x128xf32, #tpu.memory_space<vmem>>, vector<1x64xf32>
    %724 = vector.shape_cast %723 : vector<1x64xf32> to vector<64xf32>
    %725 = vector.shape_cast %724 : vector<64xf32> to vector<1x64xf32>
    %726 = vector.broadcast %725 : vector<1x64xf32> to vector<12x64xf32>
    %727 = arith.addf %722, %726 : vector<12x64xf32>
    %cst_224 = arith.constant 0.000000e+00 : f32
    %728 = vector.broadcast %cst_224 : f32 to vector<12x64xf32>
    %729 = arith.maximumf %727, %728 : vector<12x64xf32>
    %c2_225 = arith.constant 2 : index
    %c0_226 = arith.constant 0 : index
    %c0_227 = arith.constant 0 : index
    %730 = vector.load %arg5[%c2_225, %c0_226, %c0_227] : memref<4x64x32xf32, #tpu.memory_space<vmem>>, vector<1x64x32xf32>
    %731 = vector.shape_cast %730 : vector<1x64x32xf32> to vector<64x32xf32>
    %cst_228 = arith.constant dense<0.000000e+00> : vector<12x32xf32>
    %732 = tpu.matmul %729, %731, %cst_228 {dimension_numbers = #tpu.dot_dimension_numbers<[1], [0], [0], [1], [0, 0, 1, 1], [], []>} : vector<12x64xf32>, vector<64x32xf32>, vector<12x32xf32> -> vector<12x32xf32>
    %c35 = arith.constant 35 : index
    %c0_229 = arith.constant 0 : index
    %733 = vector.load %arg7[%c35, %c0_229] : memref<57x128xf32, #tpu.memory_space<vmem>>, vector<1x32xf32>
    %734 = vector.shape_cast %733 : vector<1x32xf32> to vector<32xf32>
    %735 = vector.shape_cast %734 : vector<32xf32> to vector<1x32xf32>
    %736 = vector.broadcast %735 : vector<1x32xf32> to vector<12x32xf32>
    %737 = arith.addf %732, %736 : vector<12x32xf32>
    %738 = arith.addf %719, %737 : vector<12x32xf32>
    %cst_230 = arith.constant dense<0.000000e+00> : vector<12xf32>
    %739 = vector.multi_reduction <add>, %738, %cst_230 [1] : vector<12x32xf32> to vector<12xf32>
    %740 = vector.shape_cast %739 : vector<12xf32> to vector<12x1xf32>
    %cst_231 = arith.constant 3.200000e+01 : f32
    %741 = vector.broadcast %cst_231 : f32 to vector<12x1xf32>
    %742 = arith.divf %740, %741 : vector<12x1xf32>
    %743 = vector.broadcast %742 : vector<12x1xf32> to vector<12x32xf32>
    %744 = arith.subf %738, %743 : vector<12x32xf32>
    %745 = arith.mulf %744, %744 : vector<12x32xf32>
    %cst_232 = arith.constant dense<0.000000e+00> : vector<12xf32>
    %746 = vector.multi_reduction <add>, %745, %cst_232 [1] : vector<12x32xf32> to vector<12xf32>
    %747 = vector.shape_cast %746 : vector<12xf32> to vector<12x1xf32>
    %cst_233 = arith.constant 3.200000e+01 : f32
    %748 = vector.broadcast %cst_233 : f32 to vector<12x1xf32>
    %749 = arith.divf %747, %748 : vector<12x1xf32>
    %750 = vector.broadcast %742 : vector<12x1xf32> to vector<12x32xf32>
    %751 = arith.subf %738, %750 : vector<12x32xf32>
    %cst_234 = arith.constant 9.99999974E-6 : f32
    %752 = vector.broadcast %cst_234 : f32 to vector<12x1xf32>
    %753 = arith.addf %749, %752 : vector<12x1xf32>
    %754 = math.rsqrt %753 : vector<12x1xf32>
    %755 = vector.broadcast %754 : vector<12x1xf32> to vector<12x32xf32>
    %756 = arith.mulf %751, %755 : vector<12x32xf32>
    %c36 = arith.constant 36 : index
    %c0_235 = arith.constant 0 : index
    %757 = vector.load %arg7[%c36, %c0_235] : memref<57x128xf32, #tpu.memory_space<vmem>>, vector<1x32xf32>
    %758 = vector.shape_cast %757 : vector<1x32xf32> to vector<32xf32>
    %759 = vector.shape_cast %758 : vector<32xf32> to vector<1x32xf32>
    %760 = vector.broadcast %759 : vector<1x32xf32> to vector<12x32xf32>
    %761 = arith.mulf %756, %760 : vector<12x32xf32>
    %c37 = arith.constant 37 : index
    %c0_236 = arith.constant 0 : index
    %762 = vector.load %arg7[%c37, %c0_236] : memref<57x128xf32, #tpu.memory_space<vmem>>, vector<1x32xf32>
    %763 = vector.shape_cast %762 : vector<1x32xf32> to vector<32xf32>
    %764 = vector.shape_cast %763 : vector<32xf32> to vector<1x32xf32>
    %765 = vector.broadcast %764 : vector<1x32xf32> to vector<12x32xf32>
    %766 = arith.addf %761, %765 : vector<12x32xf32>
    %c16_237 = arith.constant 16 : index
    %c0_238 = arith.constant 0 : index
    %c0_239 = arith.constant 0 : index
    %767 = vector.load %arg3[%c16_237, %c0_238, %c0_239] : memref<24x32x32xf32, #tpu.memory_space<vmem>>, vector<1x32x32xf32>
    %768 = vector.shape_cast %767 : vector<1x32x32xf32> to vector<32x32xf32>
    %cst_240 = arith.constant dense<0.000000e+00> : vector<12x32xf32>
    %769 = tpu.matmul %766, %768, %cst_240 {dimension_numbers = #tpu.dot_dimension_numbers<[1], [0], [0], [1], [0, 0, 1, 1], [], []>} : vector<12x32xf32>, vector<32x32xf32>, vector<12x32xf32> -> vector<12x32xf32>
    %c38 = arith.constant 38 : index
    %c0_241 = arith.constant 0 : index
    %770 = vector.load %arg7[%c38, %c0_241] : memref<57x128xf32, #tpu.memory_space<vmem>>, vector<1x32xf32>
    %771 = vector.shape_cast %770 : vector<1x32xf32> to vector<32xf32>
    %772 = vector.shape_cast %771 : vector<32xf32> to vector<1x32xf32>
    %773 = vector.broadcast %772 : vector<1x32xf32> to vector<12x32xf32>
    %774 = arith.addf %769, %773 : vector<12x32xf32>
    %c17_242 = arith.constant 17 : index
    %c0_243 = arith.constant 0 : index
    %c0_244 = arith.constant 0 : index
    %775 = vector.load %arg3[%c17_242, %c0_243, %c0_244] : memref<24x32x32xf32, #tpu.memory_space<vmem>>, vector<1x32x32xf32>
    %776 = vector.shape_cast %775 : vector<1x32x32xf32> to vector<32x32xf32>
    %cst_245 = arith.constant dense<0.000000e+00> : vector<12x32xf32>
    %777 = tpu.matmul %766, %776, %cst_245 {dimension_numbers = #tpu.dot_dimension_numbers<[1], [0], [0], [1], [0, 0, 1, 1], [], []>} : vector<12x32xf32>, vector<32x32xf32>, vector<12x32xf32> -> vector<12x32xf32>
    %c39 = arith.constant 39 : index
    %c0_246 = arith.constant 0 : index
    %778 = vector.load %arg7[%c39, %c0_246] : memref<57x128xf32, #tpu.memory_space<vmem>>, vector<1x32xf32>
    %779 = vector.shape_cast %778 : vector<1x32xf32> to vector<32xf32>
    %780 = vector.shape_cast %779 : vector<32xf32> to vector<1x32xf32>
    %781 = vector.broadcast %780 : vector<1x32xf32> to vector<12x32xf32>
    %782 = arith.addf %777, %781 : vector<12x32xf32>
    %c18_247 = arith.constant 18 : index
    %c0_248 = arith.constant 0 : index
    %c0_249 = arith.constant 0 : index
    %783 = vector.load %arg3[%c18_247, %c0_248, %c0_249] : memref<24x32x32xf32, #tpu.memory_space<vmem>>, vector<1x32x32xf32>
    %784 = vector.shape_cast %783 : vector<1x32x32xf32> to vector<32x32xf32>
    %cst_250 = arith.constant dense<0.000000e+00> : vector<12x32xf32>
    %785 = tpu.matmul %766, %784, %cst_250 {dimension_numbers = #tpu.dot_dimension_numbers<[1], [0], [0], [1], [0, 0, 1, 1], [], []>} : vector<12x32xf32>, vector<32x32xf32>, vector<12x32xf32> -> vector<12x32xf32>
    %c40 = arith.constant 40 : index
    %c0_251 = arith.constant 0 : index
    %786 = vector.load %arg7[%c40, %c0_251] : memref<57x128xf32, #tpu.memory_space<vmem>>, vector<1x32xf32>
    %787 = vector.shape_cast %786 : vector<1x32xf32> to vector<32xf32>
    %788 = vector.shape_cast %787 : vector<32xf32> to vector<1x32xf32>
    %789 = vector.broadcast %788 : vector<1x32xf32> to vector<12x32xf32>
    %790 = arith.addf %785, %789 : vector<12x32xf32>
    %791 = vector.extract_strided_slice %774 {offsets = [0, 0], sizes = [12, 8], strides = [1, 1]} : vector<12x32xf32> to vector<12x8xf32>
    %792 = vector.extract_strided_slice %774 {offsets = [0, 8], sizes = [12, 8], strides = [1, 1]} : vector<12x32xf32> to vector<12x8xf32>
    %793 = vector.extract_strided_slice %774 {offsets = [0, 16], sizes = [12, 8], strides = [1, 1]} : vector<12x32xf32> to vector<12x8xf32>
    %794 = vector.extract_strided_slice %774 {offsets = [0, 24], sizes = [12, 8], strides = [1, 1]} : vector<12x32xf32> to vector<12x8xf32>
    %795 = vector.shape_cast %791 : vector<12x8xf32> to vector<1x12x8xf32>
    %796 = vector.shape_cast %792 : vector<12x8xf32> to vector<1x12x8xf32>
    %797 = vector.shape_cast %793 : vector<12x8xf32> to vector<1x12x8xf32>
    %798 = vector.shape_cast %794 : vector<12x8xf32> to vector<1x12x8xf32>
    %799 = tpu.concatenate %795, %796, %797, %798 in 0 : vector<1x12x8xf32>, vector<1x12x8xf32>, vector<1x12x8xf32>, vector<1x12x8xf32> -> vector<4x12x8xf32>
    %800 = vector.extract_strided_slice %782 {offsets = [0, 0], sizes = [12, 8], strides = [1, 1]} : vector<12x32xf32> to vector<12x8xf32>
    %801 = vector.extract_strided_slice %782 {offsets = [0, 8], sizes = [12, 8], strides = [1, 1]} : vector<12x32xf32> to vector<12x8xf32>
    %802 = vector.extract_strided_slice %782 {offsets = [0, 16], sizes = [12, 8], strides = [1, 1]} : vector<12x32xf32> to vector<12x8xf32>
    %803 = vector.extract_strided_slice %782 {offsets = [0, 24], sizes = [12, 8], strides = [1, 1]} : vector<12x32xf32> to vector<12x8xf32>
    %804 = vector.shape_cast %800 : vector<12x8xf32> to vector<1x12x8xf32>
    %805 = vector.shape_cast %801 : vector<12x8xf32> to vector<1x12x8xf32>
    %806 = vector.shape_cast %802 : vector<12x8xf32> to vector<1x12x8xf32>
    %807 = vector.shape_cast %803 : vector<12x8xf32> to vector<1x12x8xf32>
    %808 = tpu.concatenate %804, %805, %806, %807 in 0 : vector<1x12x8xf32>, vector<1x12x8xf32>, vector<1x12x8xf32>, vector<1x12x8xf32> -> vector<4x12x8xf32>
    %809 = vector.extract_strided_slice %790 {offsets = [0, 0], sizes = [12, 8], strides = [1, 1]} : vector<12x32xf32> to vector<12x8xf32>
    %810 = vector.extract_strided_slice %790 {offsets = [0, 8], sizes = [12, 8], strides = [1, 1]} : vector<12x32xf32> to vector<12x8xf32>
    %811 = vector.extract_strided_slice %790 {offsets = [0, 16], sizes = [12, 8], strides = [1, 1]} : vector<12x32xf32> to vector<12x8xf32>
    %812 = vector.extract_strided_slice %790 {offsets = [0, 24], sizes = [12, 8], strides = [1, 1]} : vector<12x32xf32> to vector<12x8xf32>
    %813 = vector.shape_cast %809 : vector<12x8xf32> to vector<1x12x8xf32>
    %814 = vector.shape_cast %810 : vector<12x8xf32> to vector<1x12x8xf32>
    %815 = vector.shape_cast %811 : vector<12x8xf32> to vector<1x12x8xf32>
    %816 = vector.shape_cast %812 : vector<12x8xf32> to vector<1x12x8xf32>
    %817 = tpu.concatenate %813, %814, %815, %816 in 0 : vector<1x12x8xf32>, vector<1x12x8xf32>, vector<1x12x8xf32>, vector<1x12x8xf32> -> vector<4x12x8xf32>
    "tpu.trace_start"() <{level = 10 : i32, message = "hqd,hkd->hqk"}> : () -> ()
    %cst_252 = arith.constant dense<0.000000e+00> : vector<4x12x12xf32>
    %818 = tpu.matmul %799, %808, %cst_252 {dimension_numbers = #tpu.dot_dimension_numbers<[2], [2], [1], [1], [0, 0, 0, 1, 1, 1], [0], [0]>} : vector<4x12x8xf32>, vector<4x12x8xf32>, vector<4x12x12xf32> -> vector<4x12x12xf32>
    "tpu.trace_stop"() : () -> ()
    %cst_253 = arith.constant 0.353553385 : f32
    %819 = vector.broadcast %cst_253 : f32 to vector<4x12x12xf32>
    %820 = arith.mulf %818, %819 : vector<4x12x12xf32>
    %821 = vector.shape_cast %107 : vector<12x12xf32> to vector<1x12x12xf32>
    %822 = vector.broadcast %821 : vector<1x12x12xf32> to vector<4x12x12xf32>
    %823 = arith.addf %820, %822 : vector<4x12x12xf32>
    %cst_254 = arith.constant dense<0xFF800000> : vector<4x12xf32>
    %824 = vector.multi_reduction <maximumf>, %823, %cst_254 [2] : vector<4x12x12xf32> to vector<4x12xf32>
    %825 = vector.shape_cast %824 : vector<4x12xf32> to vector<4x12x1xf32>
    %826 = vector.broadcast %825 : vector<4x12x1xf32> to vector<4x12x12xf32>
    %827 = arith.subf %823, %826 : vector<4x12x12xf32>
    %828 = math.exp %827 : vector<4x12x12xf32>
    %cst_255 = arith.constant dense<0.000000e+00> : vector<4x12xf32>
    %829 = vector.multi_reduction <add>, %828, %cst_255 [2] : vector<4x12x12xf32> to vector<4x12xf32>
    %830 = vector.shape_cast %829 : vector<4x12xf32> to vector<4x12x1xf32>
    %831 = tpu.reciprocal %830 {approx = true} : vector<4x12x1xf32> -> vector<4x12x1xf32>
    %832 = vector.broadcast %831 : vector<4x12x1xf32> to vector<4x12x12xf32>
    %833 = arith.mulf %828, %832 : vector<4x12x12xf32>
    "tpu.trace_start"() <{level = 10 : i32, message = "hqk,hkd->hqd"}> : () -> ()
    %cst_256 = arith.constant dense<0.000000e+00> : vector<4x12x8xf32>
    %834 = tpu.matmul %833, %817, %cst_256 {dimension_numbers = #tpu.dot_dimension_numbers<[2], [1], [1], [2], [0, 0, 0, 1, 1, 2], [0], [0]>} : vector<4x12x12xf32>, vector<4x12x8xf32>, vector<4x12x8xf32> -> vector<4x12x8xf32>
    "tpu.trace_stop"() : () -> ()
    %835 = vector.extract_strided_slice %834 {offsets = [0, 0, 0], sizes = [1, 12, 8], strides = [1, 1, 1]} : vector<4x12x8xf32> to vector<1x12x8xf32>
    %836 = vector.shape_cast %835 : vector<1x12x8xf32> to vector<12x8xf32>
    %837 = vector.extract_strided_slice %834 {offsets = [1, 0, 0], sizes = [1, 12, 8], strides = [1, 1, 1]} : vector<4x12x8xf32> to vector<1x12x8xf32>
    %838 = vector.shape_cast %837 : vector<1x12x8xf32> to vector<12x8xf32>
    %839 = vector.extract_strided_slice %834 {offsets = [2, 0, 0], sizes = [1, 12, 8], strides = [1, 1, 1]} : vector<4x12x8xf32> to vector<1x12x8xf32>
    %840 = vector.shape_cast %839 : vector<1x12x8xf32> to vector<12x8xf32>
    %841 = vector.extract_strided_slice %834 {offsets = [3, 0, 0], sizes = [1, 12, 8], strides = [1, 1, 1]} : vector<4x12x8xf32> to vector<1x12x8xf32>
    %842 = vector.shape_cast %841 : vector<1x12x8xf32> to vector<12x8xf32>
    %843 = tpu.concatenate %836, %838, %840, %842 in 1 : vector<12x8xf32>, vector<12x8xf32>, vector<12x8xf32>, vector<12x8xf32> -> vector<12x32xf32>
    %c19_257 = arith.constant 19 : index
    %c0_258 = arith.constant 0 : index
    %c0_259 = arith.constant 0 : index
    %844 = vector.load %arg3[%c19_257, %c0_258, %c0_259] : memref<24x32x32xf32, #tpu.memory_space<vmem>>, vector<1x32x32xf32>
    %845 = vector.shape_cast %844 : vector<1x32x32xf32> to vector<32x32xf32>
    %cst_260 = arith.constant dense<0.000000e+00> : vector<12x32xf32>
    %846 = tpu.matmul %843, %845, %cst_260 {dimension_numbers = #tpu.dot_dimension_numbers<[1], [0], [0], [1], [0, 0, 1, 1], [], []>} : vector<12x32xf32>, vector<32x32xf32>, vector<12x32xf32> -> vector<12x32xf32>
    %c41 = arith.constant 41 : index
    %c0_261 = arith.constant 0 : index
    %847 = vector.load %arg7[%c41, %c0_261] : memref<57x128xf32, #tpu.memory_space<vmem>>, vector<1x32xf32>
    %848 = vector.shape_cast %847 : vector<1x32xf32> to vector<32xf32>
    %849 = vector.shape_cast %848 : vector<32xf32> to vector<1x32xf32>
    %850 = vector.broadcast %849 : vector<1x32xf32> to vector<12x32xf32>
    %851 = arith.addf %846, %850 : vector<12x32xf32>
    %852 = arith.addf %766, %851 : vector<12x32xf32>
    %cst_262 = arith.constant dense<0.000000e+00> : vector<12xf32>
    %853 = vector.multi_reduction <add>, %852, %cst_262 [1] : vector<12x32xf32> to vector<12xf32>
    %854 = vector.shape_cast %853 : vector<12xf32> to vector<12x1xf32>
    %cst_263 = arith.constant 3.200000e+01 : f32
    %855 = vector.broadcast %cst_263 : f32 to vector<12x1xf32>
    %856 = arith.divf %854, %855 : vector<12x1xf32>
    %857 = vector.broadcast %856 : vector<12x1xf32> to vector<12x32xf32>
    %858 = arith.subf %852, %857 : vector<12x32xf32>
    %859 = arith.mulf %858, %858 : vector<12x32xf32>
    %cst_264 = arith.constant dense<0.000000e+00> : vector<12xf32>
    %860 = vector.multi_reduction <add>, %859, %cst_264 [1] : vector<12x32xf32> to vector<12xf32>
    %861 = vector.shape_cast %860 : vector<12xf32> to vector<12x1xf32>
    %cst_265 = arith.constant 3.200000e+01 : f32
    %862 = vector.broadcast %cst_265 : f32 to vector<12x1xf32>
    %863 = arith.divf %861, %862 : vector<12x1xf32>
    %864 = vector.broadcast %856 : vector<12x1xf32> to vector<12x32xf32>
    %865 = arith.subf %852, %864 : vector<12x32xf32>
    %cst_266 = arith.constant 9.99999974E-6 : f32
    %866 = vector.broadcast %cst_266 : f32 to vector<12x1xf32>
    %867 = arith.addf %863, %866 : vector<12x1xf32>
    %868 = math.rsqrt %867 : vector<12x1xf32>
    %869 = vector.broadcast %868 : vector<12x1xf32> to vector<12x32xf32>
    %870 = arith.mulf %865, %869 : vector<12x32xf32>
    %c42 = arith.constant 42 : index
    %c0_267 = arith.constant 0 : index
    %871 = vector.load %arg7[%c42, %c0_267] : memref<57x128xf32, #tpu.memory_space<vmem>>, vector<1x32xf32>
    %872 = vector.shape_cast %871 : vector<1x32xf32> to vector<32xf32>
    %873 = vector.shape_cast %872 : vector<32xf32> to vector<1x32xf32>
    %874 = vector.broadcast %873 : vector<1x32xf32> to vector<12x32xf32>
    %875 = arith.mulf %870, %874 : vector<12x32xf32>
    %c43 = arith.constant 43 : index
    %c0_268 = arith.constant 0 : index
    %876 = vector.load %arg7[%c43, %c0_268] : memref<57x128xf32, #tpu.memory_space<vmem>>, vector<1x32xf32>
    %877 = vector.shape_cast %876 : vector<1x32xf32> to vector<32xf32>
    %878 = vector.shape_cast %877 : vector<32xf32> to vector<1x32xf32>
    %879 = vector.broadcast %878 : vector<1x32xf32> to vector<12x32xf32>
    %880 = arith.addf %875, %879 : vector<12x32xf32>
    %c20_269 = arith.constant 20 : index
    %c0_270 = arith.constant 0 : index
    %c0_271 = arith.constant 0 : index
    %881 = vector.load %arg3[%c20_269, %c0_270, %c0_271] : memref<24x32x32xf32, #tpu.memory_space<vmem>>, vector<1x32x32xf32>
    %882 = vector.shape_cast %881 : vector<1x32x32xf32> to vector<32x32xf32>
    %cst_272 = arith.constant dense<0.000000e+00> : vector<12x32xf32>
    %883 = tpu.matmul %880, %882, %cst_272 {dimension_numbers = #tpu.dot_dimension_numbers<[1], [0], [0], [1], [0, 0, 1, 1], [], []>} : vector<12x32xf32>, vector<32x32xf32>, vector<12x32xf32> -> vector<12x32xf32>
    %c44 = arith.constant 44 : index
    %c0_273 = arith.constant 0 : index
    %884 = vector.load %arg7[%c44, %c0_273] : memref<57x128xf32, #tpu.memory_space<vmem>>, vector<1x32xf32>
    %885 = vector.shape_cast %884 : vector<1x32xf32> to vector<32xf32>
    %886 = vector.shape_cast %885 : vector<32xf32> to vector<1x32xf32>
    %887 = vector.broadcast %886 : vector<1x32xf32> to vector<12x32xf32>
    %888 = arith.addf %883, %887 : vector<12x32xf32>
    %c21_274 = arith.constant 21 : index
    %c0_275 = arith.constant 0 : index
    %c0_276 = arith.constant 0 : index
    %889 = vector.load %arg3[%c21_274, %c0_275, %c0_276] : memref<24x32x32xf32, #tpu.memory_space<vmem>>, vector<1x32x32xf32>
    %890 = vector.shape_cast %889 : vector<1x32x32xf32> to vector<32x32xf32>
    %cst_277 = arith.constant dense<0.000000e+00> : vector<16x32xf32>
    %891 = tpu.matmul %491, %890, %cst_277 {dimension_numbers = #tpu.dot_dimension_numbers<[1], [0], [0], [1], [0, 0, 1, 1], [], []>} : vector<16x32xf32>, vector<32x32xf32>, vector<16x32xf32> -> vector<16x32xf32>
    %c45 = arith.constant 45 : index
    %c0_278 = arith.constant 0 : index
    %892 = vector.load %arg7[%c45, %c0_278] : memref<57x128xf32, #tpu.memory_space<vmem>>, vector<1x32xf32>
    %893 = vector.shape_cast %892 : vector<1x32xf32> to vector<32xf32>
    %894 = vector.shape_cast %893 : vector<32xf32> to vector<1x32xf32>
    %895 = vector.broadcast %894 : vector<1x32xf32> to vector<16x32xf32>
    %896 = arith.addf %891, %895 : vector<16x32xf32>
    %c22_279 = arith.constant 22 : index
    %c0_280 = arith.constant 0 : index
    %c0_281 = arith.constant 0 : index
    %897 = vector.load %arg3[%c22_279, %c0_280, %c0_281] : memref<24x32x32xf32, #tpu.memory_space<vmem>>, vector<1x32x32xf32>
    %898 = vector.shape_cast %897 : vector<1x32x32xf32> to vector<32x32xf32>
    %cst_282 = arith.constant dense<0.000000e+00> : vector<16x32xf32>
    %899 = tpu.matmul %491, %898, %cst_282 {dimension_numbers = #tpu.dot_dimension_numbers<[1], [0], [0], [1], [0, 0, 1, 1], [], []>} : vector<16x32xf32>, vector<32x32xf32>, vector<16x32xf32> -> vector<16x32xf32>
    %c46 = arith.constant 46 : index
    %c0_283 = arith.constant 0 : index
    %900 = vector.load %arg7[%c46, %c0_283] : memref<57x128xf32, #tpu.memory_space<vmem>>, vector<1x32xf32>
    %901 = vector.shape_cast %900 : vector<1x32xf32> to vector<32xf32>
    %902 = vector.shape_cast %901 : vector<32xf32> to vector<1x32xf32>
    %903 = vector.broadcast %902 : vector<1x32xf32> to vector<16x32xf32>
    %904 = arith.addf %899, %903 : vector<16x32xf32>
    %905 = vector.extract_strided_slice %888 {offsets = [0, 0], sizes = [12, 8], strides = [1, 1]} : vector<12x32xf32> to vector<12x8xf32>
    %906 = vector.extract_strided_slice %888 {offsets = [0, 8], sizes = [12, 8], strides = [1, 1]} : vector<12x32xf32> to vector<12x8xf32>
    %907 = vector.extract_strided_slice %888 {offsets = [0, 16], sizes = [12, 8], strides = [1, 1]} : vector<12x32xf32> to vector<12x8xf32>
    %908 = vector.extract_strided_slice %888 {offsets = [0, 24], sizes = [12, 8], strides = [1, 1]} : vector<12x32xf32> to vector<12x8xf32>
    %909 = vector.shape_cast %905 : vector<12x8xf32> to vector<1x12x8xf32>
    %910 = vector.shape_cast %906 : vector<12x8xf32> to vector<1x12x8xf32>
    %911 = vector.shape_cast %907 : vector<12x8xf32> to vector<1x12x8xf32>
    %912 = vector.shape_cast %908 : vector<12x8xf32> to vector<1x12x8xf32>
    %913 = tpu.concatenate %909, %910, %911, %912 in 0 : vector<1x12x8xf32>, vector<1x12x8xf32>, vector<1x12x8xf32>, vector<1x12x8xf32> -> vector<4x12x8xf32>
    %914 = vector.extract_strided_slice %896 {offsets = [0, 0], sizes = [16, 8], strides = [1, 1]} : vector<16x32xf32> to vector<16x8xf32>
    %915 = vector.extract_strided_slice %896 {offsets = [0, 8], sizes = [16, 8], strides = [1, 1]} : vector<16x32xf32> to vector<16x8xf32>
    %916 = vector.extract_strided_slice %896 {offsets = [0, 16], sizes = [16, 8], strides = [1, 1]} : vector<16x32xf32> to vector<16x8xf32>
    %917 = vector.extract_strided_slice %896 {offsets = [0, 24], sizes = [16, 8], strides = [1, 1]} : vector<16x32xf32> to vector<16x8xf32>
    %918 = vector.shape_cast %914 : vector<16x8xf32> to vector<1x16x8xf32>
    %919 = vector.shape_cast %915 : vector<16x8xf32> to vector<1x16x8xf32>
    %920 = vector.shape_cast %916 : vector<16x8xf32> to vector<1x16x8xf32>
    %921 = vector.shape_cast %917 : vector<16x8xf32> to vector<1x16x8xf32>
    %922 = tpu.concatenate %918, %919, %920, %921 in 0 : vector<1x16x8xf32>, vector<1x16x8xf32>, vector<1x16x8xf32>, vector<1x16x8xf32> -> vector<4x16x8xf32>
    %923 = vector.extract_strided_slice %904 {offsets = [0, 0], sizes = [16, 8], strides = [1, 1]} : vector<16x32xf32> to vector<16x8xf32>
    %924 = vector.extract_strided_slice %904 {offsets = [0, 8], sizes = [16, 8], strides = [1, 1]} : vector<16x32xf32> to vector<16x8xf32>
    %925 = vector.extract_strided_slice %904 {offsets = [0, 16], sizes = [16, 8], strides = [1, 1]} : vector<16x32xf32> to vector<16x8xf32>
    %926 = vector.extract_strided_slice %904 {offsets = [0, 24], sizes = [16, 8], strides = [1, 1]} : vector<16x32xf32> to vector<16x8xf32>
    %927 = vector.shape_cast %923 : vector<16x8xf32> to vector<1x16x8xf32>
    %928 = vector.shape_cast %924 : vector<16x8xf32> to vector<1x16x8xf32>
    %929 = vector.shape_cast %925 : vector<16x8xf32> to vector<1x16x8xf32>
    %930 = vector.shape_cast %926 : vector<16x8xf32> to vector<1x16x8xf32>
    %931 = tpu.concatenate %927, %928, %929, %930 in 0 : vector<1x16x8xf32>, vector<1x16x8xf32>, vector<1x16x8xf32>, vector<1x16x8xf32> -> vector<4x16x8xf32>
    "tpu.trace_start"() <{level = 10 : i32, message = "hqd,hkd->hqk"}> : () -> ()
    %cst_284 = arith.constant dense<0.000000e+00> : vector<4x12x16xf32>
    %932 = tpu.matmul %913, %922, %cst_284 {dimension_numbers = #tpu.dot_dimension_numbers<[2], [2], [1], [1], [0, 0, 0, 1, 1, 1], [0], [0]>} : vector<4x12x8xf32>, vector<4x16x8xf32>, vector<4x12x16xf32> -> vector<4x12x16xf32>
    "tpu.trace_stop"() : () -> ()
    %cst_285 = arith.constant 0.353553385 : f32
    %933 = vector.broadcast %cst_285 : f32 to vector<4x12x16xf32>
    %934 = arith.mulf %932, %933 : vector<4x12x16xf32>
    %935 = vector.shape_cast %141 : vector<12x16xf32> to vector<1x12x16xf32>
    %936 = vector.broadcast %935 : vector<1x12x16xf32> to vector<4x12x16xf32>
    %937 = arith.addf %934, %936 : vector<4x12x16xf32>
    %cst_286 = arith.constant dense<0xFF800000> : vector<4x12xf32>
    %938 = vector.multi_reduction <maximumf>, %937, %cst_286 [2] : vector<4x12x16xf32> to vector<4x12xf32>
    %939 = vector.shape_cast %938 : vector<4x12xf32> to vector<4x12x1xf32>
    %940 = vector.broadcast %939 : vector<4x12x1xf32> to vector<4x12x16xf32>
    %941 = arith.subf %937, %940 : vector<4x12x16xf32>
    %942 = math.exp %941 : vector<4x12x16xf32>
    %cst_287 = arith.constant dense<0.000000e+00> : vector<4x12xf32>
    %943 = vector.multi_reduction <add>, %942, %cst_287 [2] : vector<4x12x16xf32> to vector<4x12xf32>
    %944 = vector.shape_cast %943 : vector<4x12xf32> to vector<4x12x1xf32>
    %945 = tpu.reciprocal %944 {approx = true} : vector<4x12x1xf32> -> vector<4x12x1xf32>
    %946 = vector.broadcast %945 : vector<4x12x1xf32> to vector<4x12x16xf32>
    %947 = arith.mulf %942, %946 : vector<4x12x16xf32>
    "tpu.trace_start"() <{level = 10 : i32, message = "hqk,hkd->hqd"}> : () -> ()
    %cst_288 = arith.constant dense<0.000000e+00> : vector<4x12x8xf32>
    %948 = tpu.matmul %947, %931, %cst_288 {dimension_numbers = #tpu.dot_dimension_numbers<[2], [1], [1], [2], [0, 0, 0, 1, 1, 2], [0], [0]>} : vector<4x12x16xf32>, vector<4x16x8xf32>, vector<4x12x8xf32> -> vector<4x12x8xf32>
    "tpu.trace_stop"() : () -> ()
    %949 = vector.extract_strided_slice %948 {offsets = [0, 0, 0], sizes = [1, 12, 8], strides = [1, 1, 1]} : vector<4x12x8xf32> to vector<1x12x8xf32>
    %950 = vector.shape_cast %949 : vector<1x12x8xf32> to vector<12x8xf32>
    %951 = vector.extract_strided_slice %948 {offsets = [1, 0, 0], sizes = [1, 12, 8], strides = [1, 1, 1]} : vector<4x12x8xf32> to vector<1x12x8xf32>
    %952 = vector.shape_cast %951 : vector<1x12x8xf32> to vector<12x8xf32>
    %953 = vector.extract_strided_slice %948 {offsets = [2, 0, 0], sizes = [1, 12, 8], strides = [1, 1, 1]} : vector<4x12x8xf32> to vector<1x12x8xf32>
    %954 = vector.shape_cast %953 : vector<1x12x8xf32> to vector<12x8xf32>
    %955 = vector.extract_strided_slice %948 {offsets = [3, 0, 0], sizes = [1, 12, 8], strides = [1, 1, 1]} : vector<4x12x8xf32> to vector<1x12x8xf32>
    %956 = vector.shape_cast %955 : vector<1x12x8xf32> to vector<12x8xf32>
    %957 = tpu.concatenate %950, %952, %954, %956 in 1 : vector<12x8xf32>, vector<12x8xf32>, vector<12x8xf32>, vector<12x8xf32> -> vector<12x32xf32>
    %c23_289 = arith.constant 23 : index
    %c0_290 = arith.constant 0 : index
    %c0_291 = arith.constant 0 : index
    %958 = vector.load %arg3[%c23_289, %c0_290, %c0_291] : memref<24x32x32xf32, #tpu.memory_space<vmem>>, vector<1x32x32xf32>
    %959 = vector.shape_cast %958 : vector<1x32x32xf32> to vector<32x32xf32>
    %cst_292 = arith.constant dense<0.000000e+00> : vector<12x32xf32>
    %960 = tpu.matmul %957, %959, %cst_292 {dimension_numbers = #tpu.dot_dimension_numbers<[1], [0], [0], [1], [0, 0, 1, 1], [], []>} : vector<12x32xf32>, vector<32x32xf32>, vector<12x32xf32> -> vector<12x32xf32>
    %c47 = arith.constant 47 : index
    %c0_293 = arith.constant 0 : index
    %961 = vector.load %arg7[%c47, %c0_293] : memref<57x128xf32, #tpu.memory_space<vmem>>, vector<1x32xf32>
    %962 = vector.shape_cast %961 : vector<1x32xf32> to vector<32xf32>
    %963 = vector.shape_cast %962 : vector<32xf32> to vector<1x32xf32>
    %964 = vector.broadcast %963 : vector<1x32xf32> to vector<12x32xf32>
    %965 = arith.addf %960, %964 : vector<12x32xf32>
    %966 = arith.addf %880, %965 : vector<12x32xf32>
    %cst_294 = arith.constant dense<0.000000e+00> : vector<12xf32>
    %967 = vector.multi_reduction <add>, %966, %cst_294 [1] : vector<12x32xf32> to vector<12xf32>
    %968 = vector.shape_cast %967 : vector<12xf32> to vector<12x1xf32>
    %cst_295 = arith.constant 3.200000e+01 : f32
    %969 = vector.broadcast %cst_295 : f32 to vector<12x1xf32>
    %970 = arith.divf %968, %969 : vector<12x1xf32>
    %971 = vector.broadcast %970 : vector<12x1xf32> to vector<12x32xf32>
    %972 = arith.subf %966, %971 : vector<12x32xf32>
    %973 = arith.mulf %972, %972 : vector<12x32xf32>
    %cst_296 = arith.constant dense<0.000000e+00> : vector<12xf32>
    %974 = vector.multi_reduction <add>, %973, %cst_296 [1] : vector<12x32xf32> to vector<12xf32>
    %975 = vector.shape_cast %974 : vector<12xf32> to vector<12x1xf32>
    %cst_297 = arith.constant 3.200000e+01 : f32
    %976 = vector.broadcast %cst_297 : f32 to vector<12x1xf32>
    %977 = arith.divf %975, %976 : vector<12x1xf32>
    %978 = vector.broadcast %970 : vector<12x1xf32> to vector<12x32xf32>
    %979 = arith.subf %966, %978 : vector<12x32xf32>
    %cst_298 = arith.constant 9.99999974E-6 : f32
    %980 = vector.broadcast %cst_298 : f32 to vector<12x1xf32>
    %981 = arith.addf %977, %980 : vector<12x1xf32>
    %982 = math.rsqrt %981 : vector<12x1xf32>
    %983 = vector.broadcast %982 : vector<12x1xf32> to vector<12x32xf32>
    %984 = arith.mulf %979, %983 : vector<12x32xf32>
    %c48 = arith.constant 48 : index
    %c0_299 = arith.constant 0 : index
    %985 = vector.load %arg7[%c48, %c0_299] : memref<57x128xf32, #tpu.memory_space<vmem>>, vector<1x32xf32>
    %986 = vector.shape_cast %985 : vector<1x32xf32> to vector<32xf32>
    %987 = vector.shape_cast %986 : vector<32xf32> to vector<1x32xf32>
    %988 = vector.broadcast %987 : vector<1x32xf32> to vector<12x32xf32>
    %989 = arith.mulf %984, %988 : vector<12x32xf32>
    %c49 = arith.constant 49 : index
    %c0_300 = arith.constant 0 : index
    %990 = vector.load %arg7[%c49, %c0_300] : memref<57x128xf32, #tpu.memory_space<vmem>>, vector<1x32xf32>
    %991 = vector.shape_cast %990 : vector<1x32xf32> to vector<32xf32>
    %992 = vector.shape_cast %991 : vector<32xf32> to vector<1x32xf32>
    %993 = vector.broadcast %992 : vector<1x32xf32> to vector<12x32xf32>
    %994 = arith.addf %989, %993 : vector<12x32xf32>
    %c3_301 = arith.constant 3 : index
    %c0_302 = arith.constant 0 : index
    %c0_303 = arith.constant 0 : index
    %995 = vector.load %arg4[%c3_301, %c0_302, %c0_303] : memref<4x32x64xf32, #tpu.memory_space<vmem>>, vector<1x32x64xf32>
    %996 = vector.shape_cast %995 : vector<1x32x64xf32> to vector<32x64xf32>
    %cst_304 = arith.constant dense<0.000000e+00> : vector<12x64xf32>
    %997 = tpu.matmul %994, %996, %cst_304 {dimension_numbers = #tpu.dot_dimension_numbers<[1], [0], [0], [1], [0, 0, 1, 1], [], []>} : vector<12x32xf32>, vector<32x64xf32>, vector<12x64xf32> -> vector<12x64xf32>
    %c50 = arith.constant 50 : index
    %c0_305 = arith.constant 0 : index
    %998 = vector.load %arg7[%c50, %c0_305] : memref<57x128xf32, #tpu.memory_space<vmem>>, vector<1x64xf32>
    %999 = vector.shape_cast %998 : vector<1x64xf32> to vector<64xf32>
    %1000 = vector.shape_cast %999 : vector<64xf32> to vector<1x64xf32>
    %1001 = vector.broadcast %1000 : vector<1x64xf32> to vector<12x64xf32>
    %1002 = arith.addf %997, %1001 : vector<12x64xf32>
    %cst_306 = arith.constant 0.000000e+00 : f32
    %1003 = vector.broadcast %cst_306 : f32 to vector<12x64xf32>
    %1004 = arith.maximumf %1002, %1003 : vector<12x64xf32>
    %c3_307 = arith.constant 3 : index
    %c0_308 = arith.constant 0 : index
    %c0_309 = arith.constant 0 : index
    %1005 = vector.load %arg5[%c3_307, %c0_308, %c0_309] : memref<4x64x32xf32, #tpu.memory_space<vmem>>, vector<1x64x32xf32>
    %1006 = vector.shape_cast %1005 : vector<1x64x32xf32> to vector<64x32xf32>
    %cst_310 = arith.constant dense<0.000000e+00> : vector<12x32xf32>
    %1007 = tpu.matmul %1004, %1006, %cst_310 {dimension_numbers = #tpu.dot_dimension_numbers<[1], [0], [0], [1], [0, 0, 1, 1], [], []>} : vector<12x64xf32>, vector<64x32xf32>, vector<12x32xf32> -> vector<12x32xf32>
    %c51 = arith.constant 51 : index
    %c0_311 = arith.constant 0 : index
    %1008 = vector.load %arg7[%c51, %c0_311] : memref<57x128xf32, #tpu.memory_space<vmem>>, vector<1x32xf32>
    %1009 = vector.shape_cast %1008 : vector<1x32xf32> to vector<32xf32>
    %1010 = vector.shape_cast %1009 : vector<32xf32> to vector<1x32xf32>
    %1011 = vector.broadcast %1010 : vector<1x32xf32> to vector<12x32xf32>
    %1012 = arith.addf %1007, %1011 : vector<12x32xf32>
    %1013 = arith.addf %994, %1012 : vector<12x32xf32>
    %cst_312 = arith.constant dense<0.000000e+00> : vector<12xf32>
    %1014 = vector.multi_reduction <add>, %1013, %cst_312 [1] : vector<12x32xf32> to vector<12xf32>
    %1015 = vector.shape_cast %1014 : vector<12xf32> to vector<12x1xf32>
    %cst_313 = arith.constant 3.200000e+01 : f32
    %1016 = vector.broadcast %cst_313 : f32 to vector<12x1xf32>
    %1017 = arith.divf %1015, %1016 : vector<12x1xf32>
    %1018 = vector.broadcast %1017 : vector<12x1xf32> to vector<12x32xf32>
    %1019 = arith.subf %1013, %1018 : vector<12x32xf32>
    %1020 = arith.mulf %1019, %1019 : vector<12x32xf32>
    %cst_314 = arith.constant dense<0.000000e+00> : vector<12xf32>
    %1021 = vector.multi_reduction <add>, %1020, %cst_314 [1] : vector<12x32xf32> to vector<12xf32>
    %1022 = vector.shape_cast %1021 : vector<12xf32> to vector<12x1xf32>
    %cst_315 = arith.constant 3.200000e+01 : f32
    %1023 = vector.broadcast %cst_315 : f32 to vector<12x1xf32>
    %1024 = arith.divf %1022, %1023 : vector<12x1xf32>
    %1025 = vector.broadcast %1017 : vector<12x1xf32> to vector<12x32xf32>
    %1026 = arith.subf %1013, %1025 : vector<12x32xf32>
    %cst_316 = arith.constant 9.99999974E-6 : f32
    %1027 = vector.broadcast %cst_316 : f32 to vector<12x1xf32>
    %1028 = arith.addf %1024, %1027 : vector<12x1xf32>
    %1029 = math.rsqrt %1028 : vector<12x1xf32>
    %1030 = vector.broadcast %1029 : vector<12x1xf32> to vector<12x32xf32>
    %1031 = arith.mulf %1026, %1030 : vector<12x32xf32>
    %c52 = arith.constant 52 : index
    %c0_317 = arith.constant 0 : index
    %1032 = vector.load %arg7[%c52, %c0_317] : memref<57x128xf32, #tpu.memory_space<vmem>>, vector<1x32xf32>
    %1033 = vector.shape_cast %1032 : vector<1x32xf32> to vector<32xf32>
    %1034 = vector.shape_cast %1033 : vector<32xf32> to vector<1x32xf32>
    %1035 = vector.broadcast %1034 : vector<1x32xf32> to vector<12x32xf32>
    %1036 = arith.mulf %1031, %1035 : vector<12x32xf32>
    %c53 = arith.constant 53 : index
    %c0_318 = arith.constant 0 : index
    %1037 = vector.load %arg7[%c53, %c0_318] : memref<57x128xf32, #tpu.memory_space<vmem>>, vector<1x32xf32>
    %1038 = vector.shape_cast %1037 : vector<1x32xf32> to vector<32xf32>
    %1039 = vector.shape_cast %1038 : vector<32xf32> to vector<1x32xf32>
    %1040 = vector.broadcast %1039 : vector<1x32xf32> to vector<12x32xf32>
    %1041 = arith.addf %1036, %1040 : vector<12x32xf32>
    %cst_319 = arith.constant dense<0.000000e+00> : vector<12xf32>
    %1042 = vector.multi_reduction <add>, %1041, %cst_319 [1] : vector<12x32xf32> to vector<12xf32>
    %1043 = vector.shape_cast %1042 : vector<12xf32> to vector<12x1xf32>
    %cst_320 = arith.constant 3.200000e+01 : f32
    %1044 = vector.broadcast %cst_320 : f32 to vector<12x1xf32>
    %1045 = arith.divf %1043, %1044 : vector<12x1xf32>
    %1046 = vector.broadcast %1045 : vector<12x1xf32> to vector<12x32xf32>
    %1047 = arith.subf %1041, %1046 : vector<12x32xf32>
    %1048 = arith.mulf %1047, %1047 : vector<12x32xf32>
    %cst_321 = arith.constant dense<0.000000e+00> : vector<12xf32>
    %1049 = vector.multi_reduction <add>, %1048, %cst_321 [1] : vector<12x32xf32> to vector<12xf32>
    %1050 = vector.shape_cast %1049 : vector<12xf32> to vector<12x1xf32>
    %cst_322 = arith.constant 3.200000e+01 : f32
    %1051 = vector.broadcast %cst_322 : f32 to vector<12x1xf32>
    %1052 = arith.divf %1050, %1051 : vector<12x1xf32>
    %1053 = vector.broadcast %1045 : vector<12x1xf32> to vector<12x32xf32>
    %1054 = arith.subf %1041, %1053 : vector<12x32xf32>
    %cst_323 = arith.constant 9.99999974E-6 : f32
    %1055 = vector.broadcast %cst_323 : f32 to vector<12x1xf32>
    %1056 = arith.addf %1052, %1055 : vector<12x1xf32>
    %1057 = math.rsqrt %1056 : vector<12x1xf32>
    %1058 = vector.broadcast %1057 : vector<12x1xf32> to vector<12x32xf32>
    %1059 = arith.mulf %1054, %1058 : vector<12x32xf32>
    %c54 = arith.constant 54 : index
    %c0_324 = arith.constant 0 : index
    %1060 = vector.load %arg7[%c54, %c0_324] : memref<57x128xf32, #tpu.memory_space<vmem>>, vector<1x32xf32>
    %1061 = vector.shape_cast %1060 : vector<1x32xf32> to vector<32xf32>
    %1062 = vector.shape_cast %1061 : vector<32xf32> to vector<1x32xf32>
    %1063 = vector.broadcast %1062 : vector<1x32xf32> to vector<12x32xf32>
    %1064 = arith.mulf %1059, %1063 : vector<12x32xf32>
    %c55 = arith.constant 55 : index
    %c0_325 = arith.constant 0 : index
    %1065 = vector.load %arg7[%c55, %c0_325] : memref<57x128xf32, #tpu.memory_space<vmem>>, vector<1x32xf32>
    %1066 = vector.shape_cast %1065 : vector<1x32xf32> to vector<32xf32>
    %1067 = vector.shape_cast %1066 : vector<32xf32> to vector<1x32xf32>
    %1068 = vector.broadcast %1067 : vector<1x32xf32> to vector<12x32xf32>
    %1069 = arith.addf %1064, %1068 : vector<12x32xf32>
    %c0_326 = arith.constant 0 : index
    %c0_327 = arith.constant 0 : index
    %1070 = vector.load %arg6[%c0_326, %c0_327] : memref<32x128xf32, #tpu.memory_space<vmem>>, vector<32x128xf32>
    %cst_328 = arith.constant dense<0.000000e+00> : vector<12x128xf32>
    %1071 = tpu.matmul %1069, %1070, %cst_328 {dimension_numbers = #tpu.dot_dimension_numbers<[1], [0], [0], [1], [0, 0, 1, 1], [], []>} : vector<12x32xf32>, vector<32x128xf32>, vector<12x128xf32> -> vector<12x128xf32>
    %c56 = arith.constant 56 : index
    %c0_329 = arith.constant 0 : index
    %1072 = vector.load %arg7[%c56, %c0_329] : memref<57x128xf32, #tpu.memory_space<vmem>>, vector<1x128xf32>
    %1073 = vector.shape_cast %1072 : vector<1x128xf32> to vector<128xf32>
    %1074 = vector.shape_cast %1073 : vector<128xf32> to vector<1x128xf32>
    %1075 = vector.broadcast %1074 : vector<1x128xf32> to vector<12x128xf32>
    %1076 = arith.addf %1071, %1075 : vector<12x128xf32>
    %c0_330 = arith.constant 0 : index
    %c0_331 = arith.constant 0 : index
    %1077 = vector.load %arg8[%c0_330, %c0_331] : memref<12x128xf32, #tpu.memory_space<vmem>>, vector<12x128xf32>
    tpu.vector_store %arg8[%c0_330, %c0_331], %1076 {strides = array<i32>} : memref<12x128xf32, #tpu.memory_space<vmem>>, vector<12x128xf32>,
    return
  }
}

</mosaic_0001>

<bundles_post_ra>
// kernel: forward.1
= control target key start
LH: loop header
LB: loop body
LE: loop exit
PB: predicated region body
PF: predicated region fallthrough
CT: control target
= control target key end

     0   :  { %13 = vsyncpa [#allocation3], 0  ;;  %s11596_s27 = smov [#allocation2]   ;;  %s12994_s0 = inlined_call_operand.vmem [shape: s32[16,1], index: 0, kind: input, shape index: {}]   ;;  %s12995_s1 = inlined_call_operand.vmem [shape: s32[12,1], index: 1, kind: input, shape index: {}]   ;;  %s12996_s2 = inlined_call_operand.vmem [shape: f32[192,32], index: 2, kind: input, shape index: {}]   ;;  %s12997_s3 = inlined_call_operand.hbm [shape: f32[24,32,32], index: 3, kind: input, shape index: {}]   ;;  %s12998_s4 = inlined_call_operand.vmem [shape: f32[4,32,64], index: 4, kind: input, shape index: {}]   ;;  %s12999_s5 = inlined_call_operand.vmem [shape: f32[4,64,32], index: 5, kind: input, shape index: {}]   ;;  %s13000_s6 = inlined_call_operand.vmem [shape: f32[32,128], index: 6, kind: input, shape index: {}]   ;;  %s13001_s7 = inlined_call_operand.vmem [shape: f32[57,128], index: 7, kind: input, shape index: {}]   ;;  %s13002_s8 = inlined_call_operand.vmem [shape: f32[12,128], index: 8, kind: output, shape index: {}]  }
   0x1   :  { %s25_s28 = sshll.u32 %s11596_s27, 4  ;;  %s11572_s9 = scalar_lea.hbm %s12997_s3, 12288  ;;  %s26_s28 = int_to_ptr.vmem [resolvable:$true] %s25_s28 }
   0x2   :  { %p11573_p0 = scmp.ne.s32.totalorder %s12997_s3, %s11572_s9  ;;  %p11576_p1 = scmp.lt.u32.totalorder %s11572_s9, %s12997_s3 }
   0x4   :  { %p11578_p2 = pnand %p11576_p1, %p11573_p0 }
   0x6   :  { %11581 = shalt.err (!%p11578_p2)
}
   0x7   :  { %s11582_s14 = scalar_lea.vmem %s26_s28, 12288  ;;  %p11587_p4 = scmp.lt.s32.totalorder %s26_s28, %s26_s28 }
   0x8   :  { %p11583_p3 = scmp.ne.s32.totalorder %s26_s28, %s11582_s14  ;;  %p11588_p5 = scmp.lt.s32.totalorder %s11582_s14, %s11582_s14 }
   0xa   :  { %p11589_p6 = por %p11588_p5, %p11587_p4 }
   0xc   :  { %p11590_p7 = pnand %p11589_p6, %p11583_p3 }
   0xe   :  { %11593 = shalt.err (!%p11590_p7)
}
   0xf   :  { %s11597_s15 = smov 128   ;;  %s11598_s16 = smov 8  }
  0x10   :  { %31 = dma.hbm_to_vmem [thread:$0]  %s12997_s3, 12288, %s26_s28, [#allocation3], %s11597_s15, %s11597_s15, %s11598_s16  }
  0x11   :  { %11594 = dma.done.wait [#allocation3], 12288  }
  0x12   :  { %11595 = vsyncadd [#allocation3], 4294955008  ;;  %v11599_v0 = vmov 0   ;;  %v43_v1 = vld [vmem:[%s12994_s0] sm:$0xff]  ;;  %v74_v3 = vld [vmem:[%s12996_s2 + $0x8] sm:$0xff]  ;;  %v11600_v28 = vmov 0.0|0.0   ;;  %v45_v30 = vlaneseq }
  0x13   :  { %11150 = vset.pattern.permute.xlu0 %v11599_v0  ;;  %11151 = vset.pattern.permute.xlu1 %v11599_v0  ;;  %v73_v2 = vld [vmem:[%s12996_s2] sm:$0xff]  ;;  %v75_v4 = vld [vmem:[%s12996_s2 + $0x10] sm:$0xff]  ;;  %v76_v5 = vld [vmem:[%s12996_s2 + $0x18] sm:$0xff]  ;;  %vm96_vm0 = vcmask 523264   ;;  %v11601_v33 = vmov 0.0   ;;  %vm11602_vm4 = vmmov 0  }
  0x14   :  { %48 = vperm.xlu0 %11150, %v43_v1   ;;  %v44_v6 = vld [vmem:[%s12994_s0 + $0x8] sm:$0xff]  ;;  %v10544_v7 = vpack.c.bf16 %v74_v3, %v73_v2  ;;  %v10548_v8 = vpack.c.bf16 %v76_v5, %v75_v4  ;;  %v77_v9 = vld [vmem:[%s12996_s2 + $0x20] sm:$0xff]  ;;  %v79_v12 = vld [vmem:[%s12996_s2 + $0x30] sm:$0xff]  ;;  %v11728_v31 = vand.u32 127, %v45_v30  ;;  %v11760_v60 = vshrl.u32 %v45_v30, 7  ;;  %s11604_s18 = smov 112  }
  0x15   :  { %v78_v10 = vld [vmem:[%s12996_s2 + $0x28] sm:$0xff]  ;;  %v80_v13 = vld [vmem:[%s12996_s2 + $0x38] sm:$0xff]  ;;  %v59_v14 = vld [vmem:[%s12995_s1] sm:$0xff]  ;;  %v11603_v1 = vmov -1e+09   ;;  %s11605_s19 = smov 120  }
  0x16   :  { %10545 = vmatprep.subr.bf16.mxu0 %v10544_v7  ;;  %v10552_v11 = vpack.c.bf16 %v78_v10, %v77_v9  ;;  %v81_v15 = vld [vmem:[%s12996_s2 + $0x40] sm:$0xff]  ;;  %v10556_v16 = vpack.c.bf16 %v80_v13, %v79_v12  ;;  %62 = vperm.xlu1 %11151, %v59_v14   ;;  %v82_v17 = vld [vmem:[%s12996_s2 + $0x48] sm:$0xff]  ;;  %v83_v18 = vld [vmem:[%s12996_s2 + $0x50] sm:$0xff]  ;;  %vm263_vm6 = vcmp.eq.s32.totalorder %v11728_v31, 0  ;;  %vm433_vm8 = vcmp.ge.s32.totalorder %v11728_v31, 8  ;;  %s11606_s22 = smov 104  }
  0x17   :  { %10547 = vmatpush3.bf16.msra.mxu0 %v10544_v7  ;;  %v84_v19 = vld [vmem:[%s12996_s2 + $0x58] sm:$0xff]  ;;  %v60_v20 = vld [vmem:[%s12995_s1 + $0x8] sm:$0xf]  ;;  %v10560_v21 = vpack.c.bf16 %v82_v17, %v81_v15  ;;  %v85_v23 = vld [vmem:[%s12996_s2 + $0x60] sm:$0xff]  ;;  %v9011_v47 = vsel %vm263_vm6, 1.0, %v11601_v33  ;;  %vm434_vm9 = vcmp.lt.s32.totalorder %v11728_v31, 16  ;;  %vm412_vm14 = vcmp.gt.s32.totalorder %v11728_v31, %v11760_v60 }
  0x18   :  { %51 = vperm.xlu0 %11150, %v44_v6   ;;  %10549 = vmatprep.subr.bf16.mxu0 %v10548_v8  ;;  %v10564_v22 = vpack.c.bf16 %v84_v19, %v83_v18  ;;  %v86_v24 = vld [vmem:[%s12996_s2 + $0x68] sm:$0xff]  ;;  %v87_v26 = vld [vmem:[%s12996_s2 + $0x70] sm:$0xff]  ;;  %v88_v27 = vld [vmem:[%s12996_s2 + $0x78] sm:$0xff]  ;;  %vm453_vm10 = vcmp.lt.s32.totalorder %v11728_v31, 6  ;;  %vm463_vm11 = vcmp.ge.s32.totalorder %v11728_v31, 6  ;;  %v411_v61 = vadd.s32 8, %v11760_v60 }
  0x19   :  { %10561 = vmatprep.subr.bf16.mxu1 %v10560_v21  ;;  %v10568_v25 = vpack.c.bf16 %v86_v24, %v85_v23  ;;  %v10572_v29 = vpack.c.bf16 %v88_v27, %v87_v26  ;;  %v491_v35 = vld [vmem:[#allocation2] sm:$0xff]  ;;  %v492_v36 = vld [vmem:[#allocation2 + $0x8] sm:$0xff]  ;;  %vm11737_vm3 = vmpackc.low %vm96_vm0, %vm96_vm0  ;;  %vm449_vm13 = vcmp.lt.s32.totalorder %v11760_v60, 6  ;;  %vm423_vm6 = vcmp.lt.s32.totalorder %v11728_v31, 8  ;;  %s11607_s23 = smov 16   ;;  %s11608_s24 = smov 24  }
  0x1a   :  { %65 = vperm.xlu1 %11151, %v60_v20   ;;  %10563 = vmatpush3.bf16.msra.mxu1 %v10560_v21  ;;  %v10584_v40 = vpack.c.bf16 %v492_v36, %v491_v35  ;;  %v583_v44 = vld [vmem:[#allocation2 + $0x20] sm:$0xff]  ;;  %v584_v45 = vld [vmem:[#allocation2 + $0x28] sm:$0xff]  ;;  %v493_v51 = vld [vmem:[#allocation2 + $0x10] sm:$0xff]  ;;  %v414_v0 = vsel %vm412_vm14, -1e+09, %v11601_v33  ;;  %v445_v21 = vsub.s32 0, %v11760_v60 }
  0x1b   :  { %10551 = vmatpush3.bf16.msra.mxu0 %v10548_v8  ;;  %10565 = vmatprep.subr.bf16.mxu1 %v10564_v22  ;;  %v10592_v49 = vpack.c.bf16 %v584_v45, %v583_v44  ;;  %v494_v52 = vld [vmem:[#allocation2 + $0x18] sm:$0xff]  ;;  %v585_v54 = vld [vmem:[#allocation2 + $0x30] sm:$0xff]  ;;  %v668_v57 = vld [vmem:[#allocation2 + $0x40] sm:$0xff] }
  0x1c   :  { %10553 = vmatprep.subr.bf16.mxu0 %v10552_v11  ;;  %v10588_v53 = vpack.c.bf16 %v494_v52, %v493_v51  ;;  %v586_v55 = vld [vmem:[#allocation2 + $0x38] sm:$0xff]  ;;  %v669_v58 = vld [vmem:[#allocation2 + $0x48] sm:$0xff]  ;;  %vm11767_vm12 = vmand %vm433_vm8, %vm434_vm9 }
  0x1d   :  { %v10596_v56 = vpack.c.bf16 %v586_v55, %v585_v54  ;;  %v10600_v59 = vpack.c.bf16 %v669_v58, %v668_v57  ;;  %vm455_vm15 = vmand %vm449_vm13, %vm453_vm10  ;;  %v89_v8 = vld [vmem:[%s12996_s2 + $0x80] sm:$0xff]  ;;  %v670_v13 = vld [vmem:[#allocation2 + $0x50] sm:$0xff] }
  0x1e   :  { %10567 = vmatpush3.bf16.msra.mxu1 %v10564_v22  ;;  %vm481_vm10 = vmand %vm449_vm13, %vm423_vm6  ;;  %v671_v14 = vld [vmem:[#allocation2 + $0x58] sm:$0xff]  ;;  %vm500_vm13 = vcmask 261120   ;;  %v9018_v35 = vld [vmem:[%s13001_s7] ss:$0 sm:$0xff] }
  0x1f   :  { %10555 = vmatpush3.bf16.msra.mxu0 %v10552_v11  ;;  %10569 = vmatprep.subr.bf16.mxu1 %v10568_v25  ;;  %v10604_v17 = vpack.c.bf16 %v671_v14, %v670_v13 }
  0x20   :  { %10557 = vmatprep.subr.bf16.mxu0 %v10556_v16 }
  0x22   :  { %10571 = vmatpush3.bf16.msra.mxu1 %v10568_v25 }
  0x23   :  { %10559 = vmatpush3.bf16.msra.mxu0 %v10556_v16  ;;  %10573 = vmatprep.subr.bf16.mxu1 %v10572_v29 }
  0x24   :  { %10576 = vmatprep.subr.bf16.mxu0 %v11600_v28 }
  0x26   :  { %10575 = vmatpush3.bf16.msra.mxu1 %v10572_v29 }
  0x27   :  { %10580 = vmatprep.subr.bf16.mxu1 %v11600_v28 }
  0x93   :  { %v49_v32 = vpop.permute.xlu0 %48 }
  0x94   :  { %vm53_vm1 = vcmp.eq.s32.totalorder %v49_v32, %v11728_v31 }
  0x95   :  { %v9003_v34 = vsel %vm53_vm1, 1.0, %v11601_v33  ;;  %v63_v42 = vpop.permute.xlu1 %62  ;;  %vm457_vm1 = vcmp.ge.s32.totalorder %v11760_v60, 6 }
  0x96   :  { %9777 = vmatprep.mubr.msk.f32.mxu0 %vm96_vm0, %v9003_v34  ;;  %vm67_vm5 = vcmp.eq.s32.totalorder %v63_v42, %v11728_v31 }
  0x97   :  { %v52_v37 = vpop.permute.xlu0 %51  ;;  %v9005_v43 = vsel %vm67_vm5, 1.0, %v11601_v33 }
  0x98   :  { %vm54_vm2 = vcmp.eq.s32.totalorder %v52_v37, %v11728_v31  ;;  %9796 = vmatprep.mubr.msk.f32.mxu1 %vm96_vm0, %v9005_v43 }
  0x99   :  { %v9004_v38 = vsel %vm54_vm2, 1.0, %v11601_v33  ;;  %v66_v46 = vpop.permute.xlu1 %65  ;;  %vm464_vm2 = vcmp.lt.s32.totalorder %v11728_v31, 12 }
  0x9a   :  { %v10577_v41 = vpack.c.bf16 %v9004_v38, %v9003_v34  ;;  %9778 = vmatmul.mubr.msk.f32.vlgmr.msra.gmra.mrb[0].mxu0 %vm96_vm0, %v9004_v38  ;;  %vm68_vm7 = vcmp.eq.s32.totalorder %v66_v46, %v11728_v31  ;;  %vm465_vm5 = vmand %vm463_vm11, %vm464_vm2  ;;  %v9021_v34 = vld [vmem:[%s13001_s7 + $0x1] ss:$0 sm:$0xff]  ;;  %v9024_v46 = vld [vmem:[%s13001_s7 + $0x2] ss:$0 sm:$0xff] }
  0x9b   :  { %9803 = vmatprep.mubr.msk.f32.mxu0 %vm11602_vm4, %v11601_v33  ;;  %v9006_v48 = vsel %vm68_vm7, 1.0, %v11601_v33  ;;  %vm466_vm7 = vmand %vm457_vm1, %vm465_vm5 }
  0x9c   :  { %10579 = vmatpush3.bf16.xpose.msk.msra.mxu0 %vm11737_vm3, %v10577_v41  ;;  %v10581_v50 = vpack.c.bf16 %v9006_v48, %v9005_v43  ;;  %9797 = vmatmul.mubr.msk.f32.vlgmr.msra.gmra.mrb[0].mxu1 %vm96_vm0, %v9006_v48  ;;  %vm468_vm9 = vmor %vm455_vm15, %vm466_vm7 }
  0x9d   :  { %10585 = vmatprep.subr.bf16.mxu0 %v10584_v40  ;;  %9810 = vmatprep.mubr.msk.f32.mxu1 %vm11602_vm4, %v11601_v33  ;;  %vm460_vm4 = vcmp.lt.s32.totalorder %v411_v61, 12  ;;  %v470_v3 = vsel %vm468_vm9, 0.0, %v11603_v1  ;;  %vm483_vm11 = vmand %vm457_vm1, %vm11767_vm12  ;;  %vm800_vm1 = vcmask 64512   ;;  %vm4111_vm9 = vcmask 97280  }
  0x9e   :  { %10583 = vmatpush3.bf16.xpose.msk.msra.mxu1 %vm11737_vm3, %v10581_v50  ;;  %vm413_vm3 = vcmp.gt.s32.totalorder %v11728_v31, %v411_v61  ;;  %vm467_vm8 = vmand %vm460_vm4, %vm465_vm5  ;;  %v472_v5 = vadd.f32 %v470_v3, %v414_v0  ;;  %vm4207_vm5 = vcmask 1043456  }
  0x9f   :  { %10593 = vmatprep.subr.bf16.mxu1 %v10592_v49  ;;  %v415_v63 = vsel %vm413_vm3, -1e+09, %v11601_v33  ;;  %v471_v2 = vsel %vm467_vm8, 0.0, %v11603_v1  ;;  %vm484_vm14 = vmand %vm460_vm4, %vm11767_vm12  ;;  %vm1149_vm3 = vcmask 130048   ;;  %vm94_vm4 = vcmask 1045504  }
  0xa0   :  { %v473_v4 = vadd.f32 %v471_v2, %v415_v63  ;;  %vm485_vm15 = vmor %vm481_vm10, %vm483_vm11  ;;  %v488_v6 = vsel %vm484_vm14, 0.0, %v11603_v1  ;;  %vm4115_vm8 = vcmask 93184   ;;  %vm4660_vm10 = vcmask 257024  }
  0xa1   :  { %v487_v7 = vsel %vm485_vm15, 0.0, %v11603_v1  ;;  %vm11845_vm2 = vmpackc.low %vm800_vm1, %vm800_vm1  ;;  %vm5364_vm11 = vcmask 125952  }
  0xa3   :  { %9804 = vmatmul.mubr.msk.f32.vlgmr.msra.gmra.mrb[2].mxu0 %vm96_vm0, %v9011_v47 }
  0xa4   :  { %10587 = vmatpush3.bf16.msra.mxu0 %v10584_v40 }
  0xa5   :  { %9811 = vmatmul.mubr.msk.f32.vlgmr.msra.gmra.mrb[2].mxu1 %vm96_vm0, %v9011_v47  ;;  %10589 = vmatprep.subr.bf16.mxu0 %v10588_v53 }
  0xa6   :  { %10595 = vmatpush3.bf16.msra.mxu1 %v10592_v49 }
  0xa7   :  { %10597 = vmatprep.subr.bf16.mxu1 %v10596_v56 }
  0xa8   :  { %10591 = vmatpush3.bf16.msra.mxu0 %v10588_v53 }
  0xa9   :  { %10601 = vmatprep.subr.bf16.mxu0 %v10600_v59 }
  0xaa   :  { %10599 = vmatpush3.bf16.msra.mxu1 %v10596_v56 }
 0x16d   :  { %v9779_v9 = vpop.f32.mrb[0].mxu0 }
 0x16e   :  { %v175_v10 = vadd.f32 %v9779_v9, %v89_v8  ;;  %v169_v11 = vpop.f32.mrb[1].mxu0 }
 0x16f   :  { %v170_v12 = vadd.f32 %v169_v11, %v89_v8  ;;  %v11817_v18 = vpop.f32.mrb[0].mxu1  ;;  %v440_v11 = vsel %vm423_vm6, 0.0, %v11603_v1  ;;  %vm11609_vm6 = vmmov 1  }
 0x170   :  { %v11805_v16 = vmul.f32 5.656854, %v175_v10  ;;  %v11819_v20 = vpop.f32.mrb[1].mxu1  ;;  %v441_v10 = vsel %vm11767_vm12, 0.0, %v11603_v1  ;;  %vm1590_vm12 = vcmask 195584   ;;  %vm12280_vm7 = vmpackc.low %vm4207_vm5, %vm11609_vm6 }
 0x171   :  { %v11803_v15 = vmul.f32 5.656854, %v170_v12 }
 0x173   :  { %9821 = vmatprep.mubr.msk.f32.mxu0 %vm500_vm13, %v11803_v15  ;;  %9832 = vmatprep.mubr.msk.f32.mxu1 %vm500_vm13, %v11803_v15 }
 0x174   :  { %9822 = vmatmul.mubr.msk.f32.vlgmr.msra.gmra.mrb[4].mxu0 %vm500_vm13, %v11805_v16  ;;  %9833 = vmatmul.mubr.msk.f32.vlgmr.msra.gmra.mrb[4].mxu1 %vm500_vm13, %v11805_v16 }
 0x175   :  { %10603 = vmatpush3.bf16.msra.mxu0 %v10600_v59  ;;  %9843 = vmatprep.mubr.msk.f32.mxu0 %vm500_vm13, %v11803_v15 }
 0x176   :  { %10605 = vmatprep.subr.bf16.mxu0 %v10604_v17  ;;  %v335_v19 = vpop.f32.mrb[2].mxu0 }
 0x177   :  { %v442_v22 = vmul.f32 -1e+09, %v335_v19  ;;  %v9805_v23 = vpop.f32.mrb[3].mxu0 }
 0x178   :  { %v405_v27 = vpop.f32.mrb[2].mxu1 }
 0x179   :  { %10607 = vmatpush3.bf16.msra.mxu0 %v10604_v17  ;;  %v11822_v24 = vrot.slane %v442_v22, %v445_v21  ;;  %v474_v28 = vmul.f32 -1e+09, %v405_v27  ;;  %v9812_v29 = vpop.f32.mrb[3].mxu1 }
 0x17b   :  { %v11825_v25 = vadd.f32 %v487_v7, %v11822_v24  ;;  %v11828_v26 = vadd.f32 %v488_v6, %v11822_v24  ;;  %v478_v30 = vrot.slane %v474_v28, %v445_v21  ;;  %v11893_v13 = vadd.f32 %v11822_v24, %v441_v10 }
 0x17c   :  { %9844 = vmatmul.mubr.msk.f32.vlgmr.msra.gmra.mrb[6].mxu0 %vm500_vm13, %v11805_v16  ;;  %v11896_v19 = vadd.f32 %v11822_v24, %v440_v11 }
 0x17d   :  { %v11832_v32 = vadd.f32 %v478_v30, %v472_v5  ;;  %v11834_v33 = vadd.f32 %v478_v30, %v473_v4 }
 0x247   :  { %v9823_v36 = vpop.f32.mrb[4].mxu0  ;;  %v9834_v37 = vpop.f32.mrb[4].mxu1 }
 0x248   :  { %v664_v38 = vadd.f32 %v9834_v37, %v9021_v34  ;;  %v573_v39 = vpop.f32.mrb[5].mxu0  ;;  %v658_v40 = vpop.f32.mrb[5].mxu1  ;;  %v579_v51 = vadd.f32 %v9823_v36, %v9018_v35 }
 0x249   :  { %v574_v41 = vadd.f32 %v9018_v35, %v573_v39  ;;  %v659_v42 = vadd.f32 %v9021_v34, %v658_v40 }
 0x24b   :  { %9850 = vmatprep.mubr.msk.f32.mxu1 %vm800_vm1, %v574_v41  ;;  %v11157_v43 = vpack.i.bf16 %v664_v38, %v659_v42  ;;  %v10608_v44 = vpack.c.bf16 %v664_v38, %v659_v42 }
 0x24d   :  { %11158 = vrot.lane.b32.xlu1 %v11157_v43, %s11604_s18  ;;  %11153 = vrot.lane.b32.xlu0 %v11157_v43, %s11605_s19 }
 0x24e   :  { %10610 = vmatprep.subr.msk.bf16.mxu1 %vm11845_vm2, %v10608_v44 }
 0x24f   :  { %v9845_v47 = vpop.f32.mrb[6].mxu0  ;;  %10613 = vmatpush3.bf16.xpose.msk.msra.mxu1 %vm11845_vm2, %v10608_v44 }
 0x250   :  { %v749_v48 = vadd.f32 %v9845_v47, %v9024_v46  ;;  %v743_v49 = vpop.f32.mrb[7].mxu0 }
 0x251   :  { %v744_v50 = vadd.f32 %v9024_v46, %v743_v49  ;;  %11163 = vrot.lane.b32.xlu0 %v11157_v43, %s11606_s22  ;;  %754 = vrot.lane.b32.xlu1 %v574_v41, %s11605_s19 }
 0x253   :  { %v10632_v52 = vpack.c.bf16 %v749_v48, %v744_v50  ;;  %v11860_v53 = vpack.i.bf16 %v749_v48, %v744_v50 }
 0x255   :  { %756 = vrot.lane.b32.xlu0 %v579_v51, %s11605_s19  ;;  %758 = vrot.lane.b32.xlu1 %v574_v41, %s11604_s18 }
 0x256   :  { %9851 = vmatmul.mubr.msk.f32.vlgmr.msra.gmra.mrb[6].mxu1 %vm800_vm1, %v579_v51 }
 0x259   :  { %760 = vrot.lane.b32.xlu0 %v579_v51, %s11604_s18  ;;  %762 = vrot.lane.b32.xlu1 %v574_v41, %s11606_s22 }
 0x25d   :  { %764 = vrot.lane.b32.xlu0 %v579_v51, %s11606_s22 }
 0x2bf   :  { %v11159_v54 = vpop.permute.xlu1 %11158  ;;  %v11154_v55 = vpop.permute.xlu0 %11153 }
 0x2c0   :  { %v11161_v56 = vunpack.i.h.bf16 %v11159_v54  ;;  %v11160_v57 = vunpack.i.l.bf16 %v11159_v54  ;;  %v11156_v58 = vunpack.i.h.bf16 %v11154_v55  ;;  %v11155_v59 = vunpack.i.l.bf16 %v11154_v55 }
 0x2c2   :  { %v10620_v60 = vpack.c.bf16 %v11161_v56, %v11160_v57  ;;  %v10614_v61 = vpack.c.bf16 %v11156_v58, %v11155_v59 }
 0x2c3   :  { %v11164_v63 = vpop.permute.xlu0 %11163  ;;  %v755_v0 = vpop.permute.xlu1 %754 }
 0x2c4   :  { %v11166_v2 = vunpack.i.h.bf16 %v11164_v63  ;;  %v11165_v3 = vunpack.i.l.bf16 %v11164_v63  ;;  %10616 = vmatprep.subr.msk.bf16.mxu0 %vm11845_vm2, %v10614_v61  ;;  %9857 = vmatprep.mubr.msk.f32.mxu0 %vm800_vm1, %v755_v0 }
 0x2c5   :  { %10622 = vmatprep.subr.msk.bf16.mxu1 %vm11845_vm2, %v10620_v60  ;;  %10619 = vmatpush3.bf16.xpose.msk.msra.mxu0 %vm11845_vm2, %v10614_v61 }
 0x2c6   :  { %v10626_v4 = vpack.c.bf16 %v11166_v2, %v11165_v3  ;;  %10625 = vmatpush3.bf16.xpose.msk.msra.mxu1 %vm11845_vm2, %v10620_v60 }
 0x2c7   :  { %10633 = vmatprep.subr.bf16.mxu1 %v10632_v52  ;;  %v757_v5 = vpop.permute.xlu0 %756  ;;  %v759_v6 = vpop.permute.xlu1 %758 }
 0x2c8   :  { %9864 = vmatprep.mubr.msk.f32.mxu1 %vm800_vm1, %v759_v6  ;;  %10628 = vmatprep.subr.msk.bf16.mxu0 %vm11845_vm2, %v10626_v4 }
 0x2cb   :  { %v761_v7 = vpop.permute.xlu0 %760  ;;  %v763_v8 = vpop.permute.xlu1 %762 }
 0x2cc   :  { %9858 = vmatmul.mubr.msk.f32.vlgmr.msra.gmra.mrb[8].mxu0 %vm800_vm1, %v757_v5 }
 0x2cd   :  { %9865 = vmatmul.mubr.msk.f32.vlgmr.msra.gmra.mrb[8].mxu1 %vm800_vm1, %v761_v7  ;;  %10631 = vmatpush3.bf16.xpose.msk.msra.mxu0 %vm11845_vm2, %v10626_v4 }
 0x2ce   :  { %9871 = vmatprep.mubr.msk.f32.mxu0 %vm800_vm1, %v763_v8  ;;  %10635 = vmatpush3.bf16.msra.mxu1 %v10632_v52 }
 0x2cf   :  { %v765_v9 = vpop.permute.xlu0 %764 }
 0x2d4   :  { %9872 = vmatmul.mubr.msk.f32.vlgmr.msra.gmra.mrb[10].mxu0 %vm800_vm1, %v765_v9 }
 0x329   :  { %v9852_v12 = vpop.f32.mrb[6].mxu1 }
 0x32a   :  { %v1134_v14 = vmul.f32 0.35355338, %v9852_v12  ;;  %v875_v17 = vpop.f32.mrb[7].mxu1 }
 0x32b   :  { %v1133_v21 = vmul.f32 0.35355338, %v875_v17 }
 0x32c   :  { %v1142_v22 = vadd.f32 %v1134_v14, %v11893_v13 }
 0x32d   :  { %v1141_v62 = vadd.f32 %v1133_v21, %v11896_v19 }
 0x32e   :  { %v1153_v23 = vsel %vm1149_vm3, %v1142_v22, -inf }
 0x32f   :  { %1154 = vmax.xlane.f32.xlu0 %v1153_v23  ;;  %v1150_v31 = vsel %vm1149_vm3, %v1141_v62, -inf }
 0x330   :  { %1151 = vmax.xlane.f32.xlu1 %v1150_v31 }
 0x39f   :  { %v9859_v1 = vpop.f32.mrb[8].mxu0 }
 0x3a0   :  { %v1136_v27 = vmul.f32 0.35355338, %v9859_v1  ;;  %v9866_v28 = vpop.f32.mrb[8].mxu1  ;;  %v958_v29 = vpop.f32.mrb[9].mxu0 }
 0x3a1   :  { %v1138_v30 = vmul.f32 0.35355338, %v9866_v28  ;;  %v1135_v34 = vmul.f32 0.35355338, %v958_v29  ;;  %v1041_v24 = vpop.f32.mrb[9].mxu1 }
 0x3a2   :  { %v1137_v35 = vmul.f32 0.35355338, %v1041_v24  ;;  %v1144_v36 = vadd.f32 %v1136_v27, %v11893_v13 }
 0x3a3   :  { %v1143_v37 = vadd.f32 %v1135_v34, %v11896_v19  ;;  %v1146_v39 = vadd.f32 %v1138_v30, %v11893_v13 }
 0x3a4   :  { %v1159_v38 = vsel %vm1149_vm3, %v1144_v36, -inf  ;;  %v1145_v41 = vadd.f32 %v1137_v35, %v11896_v19 }
 0x3a5   :  { %1160 = vmax.xlane.f32.xlu1 %v1159_v38  ;;  %v1156_v40 = vsel %vm1149_vm3, %v1143_v37, -inf  ;;  %v1165_v46 = vsel %vm1149_vm3, %v1146_v39, -inf }
 0x3a6   :  { %1157 = vmax.xlane.f32.xlu0 %v1156_v40  ;;  %v1162_v48 = vsel %vm1149_vm3, %v1145_v41, -inf }
 0x3a7   :  { %v9873_v42 = vpop.f32.mrb[10].mxu0 }
 0x3a8   :  { %v1140_v43 = vmul.f32 0.35355338, %v9873_v42  ;;  %v1124_v44 = vpop.f32.mrb[11].mxu0 }
 0x3a9   :  { %v1139_v47 = vmul.f32 0.35355338, %v1124_v44  ;;  %1166 = vmax.xlane.f32.xlu1 %v1165_v46 }
 0x3aa   :  { %1163 = vmax.xlane.f32.xlu0 %v1162_v48  ;;  %v1148_v49 = vadd.f32 %v1140_v43, %v11893_v13 }
 0x3ab   :  { %v1147_v50 = vadd.f32 %v1139_v47, %v11896_v19 }
 0x3ac   :  { %v1171_v51 = vsel %vm1149_vm3, %v1148_v49, -inf }
 0x3ad   :  { %1172 = vmax.xlane.f32.xlu1 %v1171_v51  ;;  %v1168_v52 = vsel %vm1149_vm3, %v1147_v50, -inf }
 0x3ae   :  { %1169 = vmax.xlane.f32.xlu0 %v1168_v52 }
 0x3bc   :  { %v1155_v54 = vpop.xlane.xlu0 %1154 }
 0x3bd   :  { %v1175_v55 = vsub.f32 %v1142_v22, %v1155_v54  ;;  %v1152_v56 = vpop.xlane.xlu1 %1151 }
 0x3be   :  { %v1174_v57 = vsub.f32 %v1141_v62, %v1152_v56 }
 0x3bf   :  { %v1184_v58 = vmul.f32 1.442695, %v1175_v55 }
 0x3c0   :  { %v1182_v59 = vmul.f32 1.442695, %v1174_v57 }
 0x3c1   :  { %11332 = vpow2.f32 %v1184_v58 }
 0x3c2   :  { %11334 = vpow2.f32 %v1182_v59 }
 0x3cb   :  { %v11333_v60 = vpop.eup %11332 }
 0x3cc   :  { %v11335_v61 = vpop.eup %11334  ;;  %v1201_v63 = vsel %vm1149_vm3, %v11333_v60, 0.0 }
 0x3cd   :  { %1202 = vadd.xlane.f32.xlu1 %v1201_v63  ;;  %v1198_v0 = vsel %vm1149_vm3, %v11335_v61, 0.0 }
 0x3ce   :  { %1199 = vadd.xlane.f32.xlu0 %v1198_v0 }
 0x432   :  { %v1161_v2 = vpop.xlane.xlu1 %1160 }
 0x433   :  { %v1177_v3 = vsub.f32 %v1144_v36, %v1161_v2  ;;  %v1158_v4 = vpop.xlane.xlu0 %1157 }
 0x434   :  { %v1176_v5 = vsub.f32 %v1143_v37, %v1158_v4 }
 0x435   :  { %v1188_v6 = vmul.f32 1.442695, %v1177_v3 }
 0x436   :  { %v1186_v7 = vmul.f32 1.442695, %v1176_v5  ;;  %v1167_v8 = vpop.xlane.xlu1 %1166 }
 0x437   :  { %11336 = vpow2.f32 %v1188_v6  ;;  %v1179_v9 = vsub.f32 %v1146_v39, %v1167_v8  ;;  %v1164_v10 = vpop.xlane.xlu0 %1163 }
 0x438   :  { %11338 = vpow2.f32 %v1186_v7  ;;  %v1178_v11 = vsub.f32 %v1145_v41, %v1164_v10 }
 0x439   :  { %v1192_v12 = vmul.f32 1.442695, %v1179_v9 }
 0x43a   :  { %v1190_v14 = vmul.f32 1.442695, %v1178_v11  ;;  %v1173_v17 = vpop.xlane.xlu1 %1172 }
 0x43b   :  { %11340 = vpow2.f32 %v1192_v12  ;;  %v1181_v21 = vsub.f32 %v1148_v49, %v1173_v17  ;;  %v1170_v22 = vpop.xlane.xlu0 %1169 }
 0x43c   :  { %11342 = vpow2.f32 %v1190_v14  ;;  %v1180_v62 = vsub.f32 %v1147_v50, %v1170_v22 }
 0x43d   :  { %v1196_v23 = vmul.f32 1.442695, %v1181_v21 }
 0x43e   :  { %v1194_v31 = vmul.f32 1.442695, %v1180_v62  ;;  %v1594_v62 = vld [vmem:[#allocation2 + $0x60] sm:$0xff] }
 0x43f   :  { %11344 = vpow2.f32 %v1196_v23  ;;  %v1595_v23 = vld [vmem:[#allocation2 + $0x68] sm:$0xff] }
 0x440   :  { %11346 = vpow2.f32 %v1194_v31  ;;  %v10648_v31 = vpack.c.bf16 %v1595_v23, %v1594_v62  ;;  %v1823_v62 = vld [vmem:[%s12999_s5 + $0x20] sm:$0xff]  ;;  %v1824_v23 = vld [vmem:[%s12999_s5 + $0x28] sm:$0xff] }
 0x441   :  { %v11337_v1 = vpop.eup %11336 }
 0x442   :  { %v11339_v27 = vpop.eup %11338  ;;  %v1207_v28 = vsel %vm1149_vm3, %v11337_v1, 0.0  ;;  %10649 = vmatprep.subr.bf16.mxu0 %v10648_v31 }
 0x443   :  { %1208 = vadd.xlane.f32.xlu1 %v1207_v28  ;;  %v1204_v29 = vsel %vm1149_vm3, %v11339_v27, 0.0  ;;  %10651 = vmatpush3.bf16.msra.mxu0 %v10648_v31  ;;  %v10672_v31 = vpack.c.bf16 %v1824_v23, %v1823_v62 }
 0x444   :  { %1205 = vadd.xlane.f32.xlu0 %v1204_v29 }
 0x445   :  { %v11918_v30 = vpop.eup %11340 }
 0x446   :  { %v11343_v34 = vpop.eup %11342  ;;  %v1213_v24 = vsel %vm1149_vm3, %v11918_v30, 0.0 }
 0x447   :  { %1214 = vadd.xlane.f32.xlu1 %v1213_v24  ;;  %v1210_v35 = vsel %vm1149_vm3, %v11343_v34, 0.0 }
 0x448   :  { %1211 = vadd.xlane.f32.xlu0 %v1210_v35 }
 0x449   :  { %v11923_v36 = vpop.eup %11344 }
 0x44a   :  { %v11347_v37 = vpop.eup %11346  ;;  %v1219_v38 = vsel %vm1149_vm3, %v11923_v36, 0.0 }
 0x44b   :  { %1220 = vadd.xlane.f32.xlu1 %v1219_v38  ;;  %v1216_v39 = vsel %vm1149_vm3, %v11347_v37, 0.0 }
 0x44c   :  { %1217 = vadd.xlane.f32.xlu0 %v1216_v39 }
 0x45a   :  { %v1203_v40 = vpop.xlane.xlu1 %1202 }
 0x45b   :  { %11348 = vrcp.f32 %v1203_v40  ;;  %v1200_v41 = vpop.xlane.xlu0 %1199 }
 0x45c   :  { %11350 = vrcp.f32 %v1200_v41  ;;  %11173 = vrot.lane.b32.xlu1 %v11860_v53, %s11604_s18 }
 0x460   :  { %11178 = vrot.lane.b32.xlu1 %v11860_v53, %s11606_s22 }
 0x462   :  { %11168 = vrot.lane.b32.xlu0 %v11860_v53, %s11605_s19 }
 0x465   :  { %v11349_v42 = vpop.eup %11348 }
 0x466   :  { %v11351_v43 = vpop.eup %11350  ;;  %v1231_v46 = vmul.f32 %v11349_v42, %v11333_v60 }
 0x467   :  { %v1230_v44 = vmul.f32 %v11351_v43, %v11335_v61 }
 0x469   :  { %9878 = vmatprep.mubr.msk.f32.mxu1 %vm1149_vm3, %v1230_v44 }
 0x46a   :  { %9879 = vmatmul.mubr.msk.f32.vlgmr.msra.gmra.mrb[10].mxu1 %vm1149_vm3, %v1231_v46 }
 0x4d0   :  { %v1209_v47 = vpop.xlane.xlu1 %1208 }
 0x4d1   :  { %v1206_v48 = vpop.xlane.xlu0 %1205 }
 0x4d2   :  { %11352 = vrcp.f32 %v1206_v48 }
 0x4d3   :  { %11354 = vrcp.f32 %v1209_v47 }
 0x4d4   :  { %v1215_v49 = vpop.xlane.xlu1 %1214 }
 0x4d5   :  { %v1212_v50 = vpop.xlane.xlu0 %1211 }
 0x4d6   :  { %11356 = vrcp.f32 %v1212_v50  ;;  %v9051_v50 = vld [vmem:[%s13001_s7 + $0x3] ss:$0 sm:$0xff] }
 0x4d7   :  { %11358 = vrcp.f32 %v1215_v49 }
 0x4d8   :  { %v1221_v51 = vpop.xlane.xlu1 %1220 }
 0x4d9   :  { %v1218_v52 = vpop.xlane.xlu0 %1217 }
 0x4da   :  { %11360 = vrcp.f32 %v1218_v52 }
 0x4db   :  { %11362 = vrcp.f32 %v1221_v51 }
 0x4dc   :  { %v11353_v54 = vpop.eup %11352  ;;  %v11174_v53 = vpop.permute.xlu1 %11173 }
 0x4dd   :  { %v11169_v55 = vpop.permute.xlu0 %11168  ;;  %v1232_v56 = vmul.f32 %v11353_v54, %v11339_v27  ;;  %v11176_v57 = vunpack.i.h.bf16 %v11174_v53  ;;  %v11175_v58 = vunpack.i.l.bf16 %v11174_v53  ;;  %v11355_v0 = vpop.eup %11354  ;;  %v1597_v27 = vld [vmem:[#allocation2 + $0x78] sm:$0xff] }
 0x4de   :  { %v11171_v59 = vunpack.i.h.bf16 %v11169_v55  ;;  %v11170_v60 = vunpack.i.l.bf16 %v11169_v55  ;;  %v1233_v6 = vmul.f32 %v11355_v0, %v11337_v1  ;;  %v1596_v1 = vld [vmem:[#allocation2 + $0x70] sm:$0xff] }
 0x4df   :  { %9885 = vmatprep.mubr.msk.f32.mxu1 %vm1149_vm3, %v1232_v56  ;;  %v10640_v5 = vpack.c.bf16 %v11176_v57, %v11175_v58  ;;  %v10652_v28 = vpack.c.bf16 %v1597_v27, %v1596_v1 }
 0x4e0   :  { %v11179_v61 = vpop.permute.xlu1 %11178  ;;  %v10636_v63 = vpack.c.bf16 %v11171_v59, %v11170_v60  ;;  %v11357_v2 = vpop.eup %11356 }
 0x4e1   :  { %v11181_v3 = vunpack.i.h.bf16 %v11179_v61  ;;  %v11180_v4 = vunpack.i.l.bf16 %v11179_v61  ;;  %v11359_v7 = vpop.eup %11358  ;;  %v1234_v8 = vmul.f32 %v11357_v2, %v11343_v34  ;;  %10653 = vmatprep.subr.bf16.mxu0 %v10652_v28 }
 0x4e2   :  { %10637 = vmatprep.subr.bf16.mxu1 %v10636_v63  ;;  %v1235_v11 = vmul.f32 %v11359_v7, %v11918_v30  ;;  %10655 = vmatpush3.bf16.msra.mxu0 %v10652_v28  ;;  %v1729_v7 = vld [vmem:[%s12998_s4 + $0x10] sm:$0xff] }
 0x4e3   :  { %10639 = vmatpush3.bf16.msra.mxu1 %v10636_v63  ;;  %v10644_v10 = vpack.c.bf16 %v11181_v3, %v11180_v4 }
 0x4e4   :  { %10641 = vmatprep.subr.bf16.mxu1 %v10640_v5  ;;  %v11361_v9 = vpop.eup %11360 }
 0x4e5   :  { %v11363_v12 = vpop.eup %11362  ;;  %v1236_v14 = vmul.f32 %v11361_v9, %v11347_v37  ;;  %v1730_v9 = vld [vmem:[%s12998_s4 + $0x18] sm:$0xff] }
 0x4e6   :  { %9886 = vmatmul.mubr.msk.f32.vlgmr.msra.gmra.mrb[12].mxu1 %vm1149_vm3, %v1233_v6  ;;  %v1237_v17 = vmul.f32 %v11363_v12, %v11923_v36  ;;  %v1728_v6 = vld [vmem:[%s12998_s4 + $0x8] sm:$0xff] }
 0x4e7   :  { %10643 = vmatpush3.bf16.msra.mxu1 %v10640_v5  ;;  %9892 = vmatprep.mubr.msk.f32.mxu1 %vm1149_vm3, %v1234_v8  ;;  %v1820_v12 = vld [vmem:[%s12999_s5 + $0x8] sm:$0xff] }
 0x4e8   :  { %10645 = vmatprep.subr.bf16.mxu1 %v10644_v10 }
 0x4ea   :  { %9893 = vmatmul.mubr.msk.f32.vlgmr.msra.gmra.mrb[14].mxu1 %vm1149_vm3, %v1235_v11  ;;  %v1819_v11 = vld [vmem:[%s12999_s5] sm:$0xff] }
 0x4eb   :  { %10647 = vmatpush3.bf16.msra.mxu1 %v10644_v10  ;;  %9899 = vmatprep.mubr.msk.f32.mxu1 %vm1149_vm3, %v1236_v14  ;;  %v10660_v10 = vpack.c.bf16 %v1730_v9, %v1729_v7  ;;  %v1821_v14 = vld [vmem:[%s12999_s5 + $0x10] sm:$0xff] }
 0x4ee   :  { %9900 = vmatmul.mubr.msk.f32.vlgmr.msra.gmra.mrb[16].mxu1 %vm1149_vm3, %v1237_v17  ;;  %v10664_v17 = vpack.c.bf16 %v1820_v12, %v1819_v11  ;;  %v1957_v11 = vld [vmem:[#allocation2 + $0x88] sm:$0xff]  ;;  %v2132_v12 = vld [vmem:[#allocation2 + $0xc0] sm:$0xff] }
 0x4f0   :  { %10665 = vmatprep.subr.bf16.mxu0 %v10664_v17 }
 0x53d   :  { %v9880_v21 = vpop.f32.mrb[10].mxu1 }
 0x53e   :  { %v1310_v22 = vpop.f32.mrb[11].mxu1 }
 0x5b9   :  { %v9887_v29 = vpop.f32.mrb[12].mxu1 }
 0x5ba   :  { %1566 = vrot.lane.b32.xlu1 %v9887_v29, %s11598_s16  ;;  %v1391_v30 = vpop.f32.mrb[13].mxu1 }
 0x5bb   :  { %1564 = vrot.lane.b32.xlu0 %v1391_v30, %s11598_s16 }
 0x5bd   :  { %v9894_v34 = vpop.f32.mrb[14].mxu1 }
 0x5be   :  { %1574 = vrot.lane.b32.xlu1 %v9894_v34, %s11607_s23  ;;  %v1472_v24 = vpop.f32.mrb[15].mxu1 }
 0x5bf   :  { %1572 = vrot.lane.b32.xlu0 %v1472_v24, %s11607_s23 }
 0x5c1   :  { %v9901_v35 = vpop.f32.mrb[16].mxu1 }
 0x5c2   :  { %1582 = vrot.lane.b32.xlu1 %v9901_v35, %s11608_s24  ;;  %v1553_v36 = vpop.f32.mrb[17].mxu1  ;;  %v9054_v35 = vld [vmem:[%s13001_s7 + $0x4] ss:$0 sm:$0xff] }
 0x5c3   :  { %1580 = vrot.lane.b32.xlu0 %v1553_v36, %s11608_s24 }
 0x62c   :  { %v1567_v37 = vpop.permute.xlu1 %1566 }
 0x62d   :  { %v1565_v38 = vpop.permute.xlu0 %1564  ;;  %v1587_v43 = vsel %vm800_vm1, %v9880_v21, %v1567_v37  ;;  %v1822_v21 = vld [vmem:[%s12999_s5 + $0x18] sm:$0xff]  ;;  %v9055_v37 = vld [vmem:[%s13001_s7 + $0x5] ss:$0 sm:$0xff] }
 0x62e   :  { %v1586_v41 = vsel %vm800_vm1, %v1310_v22, %v1565_v38  ;;  %v10668_v22 = vpack.c.bf16 %v1822_v21, %v1821_v14  ;;  %v1958_v21 = vld [vmem:[#allocation2 + $0x90] sm:$0xff] }
 0x630   :  { %v1575_v39 = vpop.permute.xlu1 %1574 }
 0x631   :  { %v1573_v40 = vpop.permute.xlu0 %1572  ;;  %v1589_v47 = vsel %vm1149_vm3, %v1587_v43, %v1575_v39 }
 0x632   :  { %v1588_v44 = vsel %vm1149_vm3, %v1586_v41, %v1573_v40 }
 0x634   :  { %v1583_v42 = vpop.permute.xlu1 %1582 }
 0x635   :  { %v1581_v46 = vpop.permute.xlu0 %1580  ;;  %v1592_v49 = vsel %vm1590_vm12, %v1589_v47, %v1583_v42 }
 0x636   :  { %v1591_v48 = vsel %vm1590_vm12, %v1588_v44, %v1581_v46  ;;  %v1825_v44 = vld [vmem:[%s12999_s5 + $0x30] sm:$0xff]  ;;  %v1826_v46 = vld [vmem:[%s12999_s5 + $0x38] sm:$0xff] }
 0x637   :  { %9910 = vmatprep.mubr.msk.f32.mxu0 %vm500_vm13, %v1591_v48  ;;  %v10676_v47 = vpack.c.bf16 %v1826_v46, %v1825_v44  ;;  %v9056_v48 = vld [vmem:[%s13001_s7 + $0x6] ss:$0 sm:$0xff]  ;;  %v9063_v46 = vld [vmem:[%s13001_s7 + $0x9] ss:$0 sm:$0xff] }
 0x638   :  { %9911 = vmatmul.mubr.msk.f32.vlgmr.msra.gmra.mrb[12].mxu0 %vm500_vm13, %v1592_v49 }
 0x639   :  { %10667 = vmatpush3.bf16.msra.mxu0 %v10664_v17  ;;  %v2133_v17 = vld [vmem:[#allocation2 + $0xc8] sm:$0xff] }
 0x63a   :  { %10669 = vmatprep.subr.bf16.mxu0 %v10668_v22  ;;  %v10696_v62 = vpack.c.bf16 %v2133_v17, %v2132_v12 }
 0x63d   :  { %10671 = vmatpush3.bf16.msra.mxu0 %v10668_v22  ;;  %v1959_v22 = vld [vmem:[#allocation2 + $0x98] sm:$0xff] }
 0x63e   :  { %10673 = vmatprep.subr.bf16.mxu0 %v10672_v31  ;;  %v10684_v23 = vpack.c.bf16 %v1959_v22, %v1958_v21 }
 0x641   :  { %10675 = vmatpush3.bf16.msra.mxu0 %v10672_v31  ;;  %v2134_v31 = vld [vmem:[#allocation2 + $0xd0] sm:$0xff] }
 0x642   :  { %10677 = vmatprep.subr.bf16.mxu0 %v10676_v47 }
 0x645   :  { %10679 = vmatpush3.bf16.msra.mxu0 %v10676_v47 }
 0x646   :  { %10697 = vmatprep.subr.bf16.mxu0 %v10696_v62 }
 0x70b   :  { %v9912_v51 = vpop.f32.mrb[12].mxu0 }
 0x70c   :  { %v1681_v52 = vadd.f32 %v9912_v51, %v9051_v50  ;;  %v1675_v54 = vpop.f32.mrb[13].mxu0 }
 0x70d   :  { %v1676_v53 = vadd.f32 %v9051_v50, %v1675_v54 }
 0x70e   :  { %v1685_v55 = vadd.f32 %v1681_v52, %v11805_v16 }
 0x70f   :  { %v1684_v56 = vadd.f32 %v1676_v53, %v11803_v15  ;;  %v1727_v15 = vld [vmem:[%s12998_s4] sm:$0xff] }
 0x710   :  { %v1689_v57 = vsel %vm500_vm13, %v1685_v55, 0.0  ;;  %v10656_v8 = vpack.c.bf16 %v1728_v6, %v1727_v15 }
 0x711   :  { %1690 = vadd.xlane.f32.xlu1 %v1689_v57  ;;  %v1686_v58 = vsel %vm500_vm13, %v1684_v56, 0.0 }
 0x712   :  { %1687 = vadd.xlane.f32.xlu0 %v1686_v58  ;;  %10657 = vmatprep.subr.bf16.mxu1 %v10656_v8 }
 0x713   :  { %10659 = vmatpush3.bf16.msra.mxu1 %v10656_v8 }
 0x714   :  { %10661 = vmatprep.subr.bf16.mxu1 %v10660_v10 }
 0x717   :  { %10663 = vmatpush3.bf16.msra.mxu1 %v10660_v10  ;;  %v1956_v10 = vld [vmem:[#allocation2 + $0x80] sm:$0xff] }
 0x718   :  { %v10680_v14 = vpack.c.bf16 %v1957_v11, %v1956_v10 }
 0x71a   :  { %10681 = vmatprep.subr.bf16.mxu1 %v10680_v14 }
 0x79e   :  { %v1691_v59 = vpop.xlane.xlu1 %1690 }
 0x79f   :  { %v1694_v60 = vmul.f32 0.03125, %v1691_v59  ;;  %v1688_v61 = vpop.xlane.xlu0 %1687 }
 0x7a0   :  { %v1693_v63 = vmul.f32 0.03125, %v1688_v61 }
 0x7a1   :  { %v1696_v0 = vsub.f32 %v1685_v55, %v1694_v60  ;;  %v9059_v55 = vld [vmem:[%s13001_s7 + $0x7] ss:$0 sm:$0xff] }
 0x7a2   :  { %v1695_v2 = vsub.f32 %v1684_v56, %v1693_v63 }
 0x7a3   :  { %v1698_v5 = vmul.f32 %v1696_v0, %v1696_v0 }
 0x7a4   :  { %v1697_v3 = vmul.f32 %v1695_v2, %v1695_v2 }
 0x7a5   :  { %v1702_v16 = vsel %vm500_vm13, %v1698_v5, 0.0 }
 0x7a6   :  { %v1699_v4 = vsel %vm500_vm13, %v1697_v3, 0.0 }
 0x7a7   :  { %1700 = vadd.xlane.f32.xlu0 %v1699_v4 }
 0x7ab   :  { %1703 = vadd.xlane.f32.xlu0 %v1702_v16 }
 0x834   :  { %v1701_v1 = vpop.xlane.xlu0 %1700 }
 0x835   :  { %v1705_v27 = vmul.f32 0.03125, %v1701_v1  ;;  %v2135_v1 = vld [vmem:[#allocation2 + $0xd8] sm:$0xff] }
 0x837   :  { %v1707_v28 = vadd.f32 1e-05, %v1705_v27  ;;  %v10700_v27 = vpack.c.bf16 %v2135_v1, %v2134_v31 }
 0x838   :  { %v1704_v29 = vpop.xlane.xlu0 %1703 }
 0x839   :  { %11364 = vrsqrt.f32 %v1707_v28  ;;  %v1706_v30 = vmul.f32 0.03125, %v1704_v29  ;;  %v2047_v28 = vld [vmem:[#allocation2 + $0xa0] sm:$0xff]  ;;  %v2048_v29 = vld [vmem:[#allocation2 + $0xa8] sm:$0xff] }
 0x83b   :  { %v1708_v34 = vadd.f32 1e-05, %v1706_v30  ;;  %v10688_v30 = vpack.c.bf16 %v2048_v29, %v2047_v28 }
 0x83d   :  { %11366 = vrsqrt.f32 %v1708_v34 }
 0x843   :  { %v11365_v24 = vpop.eup %11364 }
 0x844   :  { %v1711_v36 = vmul.f32 %v11365_v24, %v1695_v2 }
 0x846   :  { %v1718_v38 = vmul.f32 %v9054_v35, %v1711_v36 }
 0x847   :  { %v11367_v39 = vpop.eup %11366 }
 0x848   :  { %v1712_v40 = vmul.f32 %v11367_v39, %v1696_v0  ;;  %v1725_v41 = vadd.f32 %v9055_v37, %v1718_v38 }
 0x84a   :  { %v1719_v42 = vmul.f32 %v9054_v35, %v1712_v40  ;;  %9921 = vmatprep.mubr.msk.f32.mxu1 %vm500_vm13, %v1725_v41  ;;  %v9062_v40 = vld [vmem:[%s13001_s7 + $0x8] ss:$0 sm:$0xff] }
 0x84c   :  { %v1726_v43 = vadd.f32 %v9055_v37, %v1719_v42 }
 0x84e   :  { %9922 = vmatmul.mubr.msk.f32.vlgmr.msra.gmra.mrb[18].mxu1 %vm500_vm13, %v1726_v43 }
 0x84f   :  { %10683 = vmatpush3.bf16.msra.mxu1 %v10680_v14 }
 0x850   :  { %10685 = vmatprep.subr.bf16.mxu1 %v10684_v23 }
 0x853   :  { %10687 = vmatpush3.bf16.msra.mxu1 %v10684_v23 }
 0x854   :  { %10689 = vmatprep.subr.bf16.mxu1 %v10688_v30 }
 0x921   :  { %v9923_v49 = vpop.f32.mrb[18].mxu1 }
 0x922   :  { %v1814_v50 = vadd.f32 %v9923_v49, %v9056_v48  ;;  %v1808_v51 = vpop.f32.mrb[19].mxu1  ;;  %v2050_v49 = vld [vmem:[#allocation2 + $0xb8] sm:$0xff] }
 0x923   :  { %v1809_v52 = vadd.f32 %v9056_v48, %v1808_v51  ;;  %v2049_v48 = vld [vmem:[#allocation2 + $0xb0] sm:$0xff] }
 0x924   :  { %v1818_v53 = vmax.f32 %v1814_v50, 0.0 }
 0x925   :  { %v1817_v54 = vmax.f32 %v1809_v52, 0.0  ;;  %v10692_v52 = vpack.c.bf16 %v2050_v49, %v2049_v48 }
 0x927   :  { %9940 = vmatprep.mubr.msk.f32.mxu0 %vm96_vm0, %v1817_v54  ;;  %v9070_v54 = vld [vmem:[%s13001_s7 + $0xc] ss:$0 sm:$0xff] }
 0x928   :  { %9941 = vmatmul.mubr.msk.f32.vlgmr.msra.gmra.mrb[14].mxu0 %vm96_vm0, %v1818_v53  ;;  %v9064_v53 = vld [vmem:[%s13001_s7 + $0xa] ss:$0 sm:$0xff] }
 0x929   :  { %10699 = vmatpush3.bf16.msra.mxu0 %v10696_v62 }
 0x92a   :  { %10701 = vmatprep.subr.bf16.mxu0 %v10700_v27 }
 0x92d   :  { %10703 = vmatpush3.bf16.msra.mxu0 %v10700_v27 }
 0x9fb   :  { %v9942_v56 = vpop.f32.mrb[14].mxu0 }
 0x9fc   :  { %v1910_v57 = vadd.f32 %v9942_v56, %v9059_v55  ;;  %v1904_v58 = vpop.f32.mrb[15].mxu0 }
 0x9fd   :  { %v1905_v59 = vadd.f32 %v9059_v55, %v1904_v58 }
 0x9fe   :  { %v1914_v60 = vadd.f32 %v1910_v57, %v1726_v43 }
 0x9ff   :  { %v1913_v61 = vadd.f32 %v1905_v59, %v1725_v41 }
 0xa00   :  { %v1918_v63 = vsel %vm500_vm13, %v1914_v60, 0.0 }
 0xa01   :  { %1919 = vadd.xlane.f32.xlu0 %v1918_v63  ;;  %v1915_v0 = vsel %vm500_vm13, %v1913_v61, 0.0 }
 0xa02   :  { %1916 = vadd.xlane.f32.xlu1 %v1915_v0 }
 0xa8e   :  { %v1920_v2 = vpop.xlane.xlu0 %1919 }
 0xa8f   :  { %v1922_v3 = vmul.f32 0.03125, %v1920_v2  ;;  %v1917_v4 = vpop.xlane.xlu1 %1916  ;;  %v9067_v2 = vld [vmem:[%s13001_s7 + $0xb] ss:$0 sm:$0xff] }
 0xa90   :  { %v1921_v5 = vmul.f32 0.03125, %v1917_v4 }
 0xa91   :  { %v1924_v16 = vsub.f32 %v1914_v60, %v1922_v3 }
 0xa92   :  { %v1923_v15 = vsub.f32 %v1913_v61, %v1921_v5 }
 0xa93   :  { %v1926_v6 = vmul.f32 %v1924_v16, %v1924_v16 }
 0xa94   :  { %v1925_v7 = vmul.f32 %v1923_v15, %v1923_v15 }
 0xa95   :  { %v1930_v8 = vsel %vm500_vm13, %v1926_v6, 0.0 }
 0xa96   :  { %1931 = vadd.xlane.f32.xlu0 %v1930_v8  ;;  %v1927_v9 = vsel %vm500_vm13, %v1925_v7, 0.0 }
 0xa97   :  { %1928 = vadd.xlane.f32.xlu1 %v1927_v9 }
 0xb23   :  { %v1932_v34 = vpop.xlane.xlu0 %1931 }
 0xb24   :  { %v1934_v24 = vmul.f32 0.03125, %v1932_v34  ;;  %v1929_v35 = vpop.xlane.xlu1 %1928 }
 0xb25   :  { %v1933_v36 = vmul.f32 0.03125, %v1929_v35 }
 0xb26   :  { %v1936_v37 = vadd.f32 1e-05, %v1934_v24 }
 0xb27   :  { %v1935_v38 = vadd.f32 1e-05, %v1933_v36 }
 0xb28   :  { %11368 = vrsqrt.f32 %v1936_v37 }
 0xb29   :  { %11370 = vrsqrt.f32 %v1935_v38 }
 0xb32   :  { %v11369_v39 = vpop.eup %11368 }
 0xb33   :  { %v11371_v41 = vpop.eup %11370  ;;  %v1940_v42 = vmul.f32 %v11369_v39, %v1924_v16 }
 0xb34   :  { %v1939_v43 = vmul.f32 %v11371_v41, %v1923_v15 }
 0xb35   :  { %v1947_v44 = vmul.f32 %v9062_v40, %v1940_v42 }
 0xb36   :  { %v1946_v47 = vmul.f32 %v9062_v40, %v1939_v43 }
 0xb37   :  { %v12031_v51 = vadd.f32 %v9063_v46, %v1947_v44 }
 0xb38   :  { %v12029_v50 = vadd.f32 %v9063_v46, %v1946_v47 }
 0xb3a   :  { %9951 = vmatprep.mubr.msk.f32.mxu1 %vm500_vm13, %v12029_v50  ;;  %9973 = vmatprep.mubr.msk.f32.mxu0 %vm500_vm13, %v12029_v50 }
 0xb3b   :  { %9952 = vmatmul.mubr.msk.f32.vlgmr.msra.gmra.mrb[20].mxu1 %vm500_vm13, %v12031_v51  ;;  %9974 = vmatmul.mubr.msk.f32.vlgmr.msra.gmra.mrb[16].mxu0 %vm500_vm13, %v12031_v51 }
 0xb3c   :  { %10691 = vmatpush3.bf16.msra.mxu1 %v10688_v30  ;;  %9962 = vmatprep.mubr.msk.f32.mxu1 %vm500_vm13, %v12029_v50 }
 0xb3d   :  { %10693 = vmatprep.subr.bf16.mxu1 %v10692_v52 }
 0xb40   :  { %10695 = vmatpush3.bf16.msra.mxu1 %v10692_v52 }
 0xb43   :  { %9963 = vmatmul.mubr.msk.f32.vlgmr.msra.gmra.mrb[22].mxu1 %vm500_vm13, %v12031_v51 }
 0xc0e   :  { %v9953_v55 = vpop.f32.mrb[20].mxu1  ;;  %v9975_v56 = vpop.f32.mrb[16].mxu0 }
 0xc0f   :  { %v2213_v57 = vadd.f32 %v9975_v56, %v9070_v54  ;;  %v2037_v58 = vpop.f32.mrb[21].mxu1  ;;  %v2207_v59 = vpop.f32.mrb[17].mxu0  ;;  %v2043_v7 = vadd.f32 %v9953_v55, %v9064_v53 }
 0xc10   :  { %v2038_v60 = vadd.f32 %v9064_v53, %v2037_v58  ;;  %v2208_v61 = vadd.f32 %v9070_v54, %v2207_v59 }
 0xc12   :  { %9980 = vmatprep.mubr.msk.f32.mxu1 %vm800_vm1, %v2038_v60  ;;  %v10728_v63 = vpack.c.bf16 %v2213_v57, %v2208_v61  ;;  %v12052_v0 = vpack.i.bf16 %v2213_v57, %v2208_v61 }
 0xc16   :  { %v9964_v3 = vpop.f32.mrb[22].mxu1 }
 0xc17   :  { %v2128_v4 = vadd.f32 %v9964_v3, %v9067_v2  ;;  %v2122_v5 = vpop.f32.mrb[23].mxu1 }
 0xc18   :  { %v2123_v16 = vadd.f32 %v9067_v2, %v2122_v5 }
 0xc1a   :  { %v11187_v15 = vpack.i.bf16 %v2128_v4, %v2123_v16  ;;  %v10704_v6 = vpack.c.bf16 %v2128_v4, %v2123_v16 }
 0xc1c   :  { %11188 = vrot.lane.b32.xlu0 %v11187_v15, %s11604_s18  ;;  %11183 = vrot.lane.b32.xlu1 %v11187_v15, %s11605_s19 }
 0xc1d   :  { %10706 = vmatprep.subr.msk.bf16.mxu1 %vm11845_vm2, %v10704_v6 }
 0xc1e   :  { %10709 = vmatpush3.bf16.xpose.msk.msra.mxu1 %vm11845_vm2, %v10704_v6 }
 0xc20   :  { %2220 = vrot.lane.b32.xlu0 %v2043_v7, %s11605_s19  ;;  %11193 = vrot.lane.b32.xlu1 %v11187_v15, %s11606_s22 }
 0xc24   :  { %2224 = vrot.lane.b32.xlu0 %v2043_v7, %s11604_s18  ;;  %2218 = vrot.lane.b32.xlu1 %v2038_v60, %s11605_s19 }
 0xc25   :  { %9981 = vmatmul.mubr.msk.f32.vlgmr.msra.gmra.mrb[24].mxu1 %vm800_vm1, %v2043_v7 }
 0xc28   :  { %2228 = vrot.lane.b32.xlu0 %v2043_v7, %s11606_s22  ;;  %2222 = vrot.lane.b32.xlu1 %v2038_v60, %s11604_s18 }
 0xc2c   :  { %2226 = vrot.lane.b32.xlu1 %v2038_v60, %s11606_s22 }
 0xc8e   :  { %v11189_v8 = vpop.permute.xlu0 %11188  ;;  %v11184_v9 = vpop.permute.xlu1 %11183 }
 0xc8f   :  { %v11191_v10 = vunpack.i.h.bf16 %v11189_v8  ;;  %v11190_v11 = vunpack.i.l.bf16 %v11189_v8  ;;  %v11186_v12 = vunpack.i.h.bf16 %v11184_v9  ;;  %v11185_v14 = vunpack.i.l.bf16 %v11184_v9 }
 0xc91   :  { %v10716_v17 = vpack.c.bf16 %v11191_v10, %v11190_v11  ;;  %v10710_v21 = vpack.c.bf16 %v11186_v12, %v11185_v14 }
 0xc92   :  { %v11194_v22 = vpop.permute.xlu1 %11193  ;;  %v2221_v31 = vpop.permute.xlu0 %2220 }
 0xc93   :  { %v11196_v62 = vunpack.i.h.bf16 %v11194_v22  ;;  %v11195_v23 = vunpack.i.l.bf16 %v11194_v22  ;;  %10712 = vmatprep.subr.msk.bf16.mxu0 %vm11845_vm2, %v10710_v21  ;;  %10718 = vmatprep.subr.msk.bf16.mxu1 %vm11845_vm2, %v10716_v17 }
 0xc94   :  { %10715 = vmatpush3.bf16.xpose.msk.msra.mxu0 %vm11845_vm2, %v10710_v21  ;;  %10721 = vmatpush3.bf16.xpose.msk.msra.mxu1 %vm11845_vm2, %v10716_v17 }
 0xc95   :  { %v10722_v1 = vpack.c.bf16 %v11196_v62, %v11195_v23  ;;  %10729 = vmatprep.subr.bf16.mxu1 %v10728_v63 }
 0xc96   :  { %v2219_v27 = vpop.permute.xlu1 %2218  ;;  %v2225_v29 = vpop.permute.xlu0 %2224 }
 0xc97   :  { %9987 = vmatprep.mubr.msk.f32.mxu0 %vm800_vm1, %v2219_v27  ;;  %10724 = vmatprep.subr.msk.bf16.mxu0 %vm11845_vm2, %v10722_v1 }
 0xc9a   :  { %v2223_v28 = vpop.permute.xlu1 %2222  ;;  %v2229_v34 = vpop.permute.xlu0 %2228 }
 0xc9b   :  { %9988 = vmatmul.mubr.msk.f32.vlgmr.msra.gmra.mrb[18].mxu0 %vm800_vm1, %v2221_v31  ;;  %9994 = vmatprep.mubr.msk.f32.mxu1 %vm800_vm1, %v2223_v28 }
 0xc9c   :  { %9995 = vmatmul.mubr.msk.f32.vlgmr.msra.gmra.mrb[26].mxu1 %vm800_vm1, %v2225_v29  ;;  %10727 = vmatpush3.bf16.xpose.msk.msra.mxu0 %vm11845_vm2, %v10722_v1 }
 0xc9d   :  { %10731 = vmatpush3.bf16.msra.mxu1 %v10728_v63 }
 0xc9e   :  { %v2227_v30 = vpop.permute.xlu1 %2226 }
 0xc9f   :  { %10001 = vmatprep.mubr.msk.f32.mxu0 %vm800_vm1, %v2227_v30 }
 0xca3   :  { %10002 = vmatmul.mubr.msk.f32.vlgmr.msra.gmra.mrb[20].mxu0 %vm800_vm1, %v2229_v34 }
 0xcf8   :  { %v9982_v24 = vpop.f32.mrb[24].mxu1 }
 0xcf9   :  { %v2597_v35 = vmul.f32 0.35355338, %v9982_v24  ;;  %v2338_v36 = vpop.f32.mrb[25].mxu1 }
 0xcfa   :  { %v2596_v37 = vmul.f32 0.35355338, %v2338_v36 }
 0xcfb   :  { %v2605_v38 = vadd.f32 %v2597_v35, %v11893_v13 }
 0xcfc   :  { %v2604_v39 = vadd.f32 %v2596_v37, %v11896_v19 }
 0xcfd   :  { %v2615_v40 = vsel %vm1149_vm3, %v2605_v38, -inf }
 0xcfe   :  { %2616 = vmax.xlane.f32.xlu0 %v2615_v40  ;;  %v2612_v41 = vsel %vm1149_vm3, %v2604_v39, -inf }
 0xcff   :  { %2613 = vmax.xlane.f32.xlu1 %v2612_v41 }
 0xd6e   :  { %v9989_v42 = vpop.f32.mrb[18].mxu0 }
 0xd6f   :  { %v2599_v43 = vmul.f32 0.35355338, %v9989_v42  ;;  %v2421_v44 = vpop.f32.mrb[19].mxu0  ;;  %v9996_v46 = vpop.f32.mrb[26].mxu1 }
 0xd70   :  { %v2598_v47 = vmul.f32 0.35355338, %v2421_v44  ;;  %v2601_v48 = vmul.f32 0.35355338, %v9996_v46  ;;  %v2504_v49 = vpop.f32.mrb[27].mxu1 }
 0xd71   :  { %v2600_v52 = vmul.f32 0.35355338, %v2504_v49  ;;  %v2607_v54 = vadd.f32 %v2599_v43, %v11893_v13 }
 0xd72   :  { %v2606_v53 = vadd.f32 %v2598_v47, %v11896_v19  ;;  %v2609_v56 = vadd.f32 %v2601_v48, %v11893_v13 }
 0xd73   :  { %v2621_v55 = vsel %vm1149_vm3, %v2607_v54, -inf  ;;  %v2608_v58 = vadd.f32 %v2600_v52, %v11896_v19 }
 0xd74   :  { %2622 = vmax.xlane.f32.xlu1 %v2621_v55  ;;  %v2618_v57 = vsel %vm1149_vm3, %v2606_v53, -inf  ;;  %v2627_v63 = vsel %vm1149_vm3, %v2609_v56, -inf }
 0xd75   :  { %2619 = vmax.xlane.f32.xlu0 %v2618_v57  ;;  %v2624_v3 = vsel %vm1149_vm3, %v2608_v58, -inf }
 0xd76   :  { %v10003_v59 = vpop.f32.mrb[20].mxu0 }
 0xd77   :  { %v2603_v60 = vmul.f32 0.35355338, %v10003_v59  ;;  %v2587_v61 = vpop.f32.mrb[21].mxu0 }
 0xd78   :  { %v2602_v2 = vmul.f32 0.35355338, %v2587_v61  ;;  %2628 = vmax.xlane.f32.xlu1 %v2627_v63 }
 0xd79   :  { %2625 = vmax.xlane.f32.xlu0 %v2624_v3  ;;  %v2611_v4 = vadd.f32 %v2603_v60, %v11893_v13 }
 0xd7a   :  { %v2610_v5 = vadd.f32 %v2602_v2, %v11896_v19 }
 0xd7b   :  { %v2633_v16 = vsel %vm1149_vm3, %v2611_v4, -inf }
 0xd7c   :  { %2634 = vmax.xlane.f32.xlu1 %v2633_v16  ;;  %v2630_v15 = vsel %vm1149_vm3, %v2610_v5, -inf }
 0xd7d   :  { %2631 = vmax.xlane.f32.xlu0 %v2630_v15 }
 0xd8b   :  { %v2617_v6 = vpop.xlane.xlu0 %2616 }
 0xd8c   :  { %v2637_v7 = vsub.f32 %v2605_v38, %v2617_v6  ;;  %v2614_v8 = vpop.xlane.xlu1 %2613 }
 0xd8d   :  { %v2636_v9 = vsub.f32 %v2604_v39, %v2614_v8 }
 0xd8e   :  { %v2646_v10 = vmul.f32 1.442695, %v2637_v7 }
 0xd8f   :  { %v2644_v11 = vmul.f32 1.442695, %v2636_v9 }
 0xd90   :  { %11372 = vpow2.f32 %v2646_v10 }
 0xd91   :  { %11374 = vpow2.f32 %v2644_v11 }
 0xd9a   :  { %v11373_v12 = vpop.eup %11372 }
 0xd9b   :  { %v11375_v14 = vpop.eup %11374  ;;  %v2663_v13 = vsel %vm1149_vm3, %v11373_v12, 0.0 }
 0xd9c   :  { %2664 = vadd.xlane.f32.xlu1 %v2663_v13  ;;  %v2660_v19 = vsel %vm1149_vm3, %v11375_v14, 0.0 }
 0xd9d   :  { %2661 = vadd.xlane.f32.xlu0 %v2660_v19 }
 0xe01   :  { %v2623_v17 = vpop.xlane.xlu1 %2622 }
 0xe02   :  { %v2639_v21 = vsub.f32 %v2607_v54, %v2623_v17  ;;  %v2620_v22 = vpop.xlane.xlu0 %2619 }
 0xe03   :  { %v2638_v62 = vsub.f32 %v2606_v53, %v2620_v22 }
 0xe04   :  { %v2650_v23 = vmul.f32 1.442695, %v2639_v21 }
 0xe05   :  { %v2648_v31 = vmul.f32 1.442695, %v2638_v62  ;;  %v2629_v1 = vpop.xlane.xlu1 %2628 }
 0xe06   :  { %11376 = vpow2.f32 %v2650_v23  ;;  %v2641_v27 = vsub.f32 %v2609_v56, %v2629_v1  ;;  %v2626_v28 = vpop.xlane.xlu0 %2625 }
 0xe07   :  { %11378 = vpow2.f32 %v2648_v31  ;;  %v2640_v29 = vsub.f32 %v2608_v58, %v2626_v28 }
 0xe08   :  { %v2654_v30 = vmul.f32 1.442695, %v2641_v27 }
 0xe09   :  { %v2652_v34 = vmul.f32 1.442695, %v2640_v29  ;;  %v2635_v24 = vpop.xlane.xlu1 %2634 }
 0xe0a   :  { %11380 = vpow2.f32 %v2654_v30  ;;  %v2643_v35 = vsub.f32 %v2611_v4, %v2635_v24  ;;  %v2632_v36 = vpop.xlane.xlu0 %2631 }
 0xe0b   :  { %11382 = vpow2.f32 %v2652_v34  ;;  %v2642_v37 = vsub.f32 %v2610_v5, %v2632_v36  ;;  %v3056_v36 = vld [vmem:[#allocation2 + $0xe8] sm:$0xff] }
 0xe0c   :  { %v2658_v38 = vmul.f32 1.442695, %v2643_v35  ;;  %v3055_v35 = vld [vmem:[#allocation2 + $0xe0] sm:$0xff] }
 0xe0d   :  { %v2656_v39 = vmul.f32 1.442695, %v2642_v37  ;;  %v10744_v37 = vpack.c.bf16 %v3056_v36, %v3055_v35  ;;  %v9113_v36 = vld [vmem:[%s12999_s5 + $0x60] sm:$0xff] }
 0xe0e   :  { %11384 = vpow2.f32 %v2658_v38  ;;  %v3057_v38 = vld [vmem:[#allocation2 + $0xf0] sm:$0xff] }
 0xe0f   :  { %11386 = vpow2.f32 %v2656_v39  ;;  %v3058_v39 = vld [vmem:[#allocation2 + $0xf8] sm:$0xff] }
 0xe10   :  { %v12107_v40 = vpop.eup %11376 }
 0xe11   :  { %v11379_v41 = vpop.eup %11378  ;;  %v2669_v42 = vsel %vm1149_vm3, %v12107_v40, 0.0 }
 0xe12   :  { %2670 = vadd.xlane.f32.xlu1 %v2669_v42  ;;  %v2666_v43 = vsel %vm1149_vm3, %v11379_v41, 0.0 }
 0xe13   :  { %2667 = vadd.xlane.f32.xlu0 %v2666_v43 }
 0xe14   :  { %v11381_v44 = vpop.eup %11380 }
 0xe15   :  { %v11383_v46 = vpop.eup %11382  ;;  %v2675_v47 = vsel %vm1149_vm3, %v11381_v44, 0.0 }
 0xe16   :  { %2676 = vadd.xlane.f32.xlu1 %v2675_v47  ;;  %v2672_v48 = vsel %vm1149_vm3, %v11383_v46, 0.0 }
 0xe17   :  { %2673 = vadd.xlane.f32.xlu0 %v2672_v48 }
 0xe18   :  { %v12114_v49 = vpop.eup %11384 }
 0xe19   :  { %v11387_v52 = vpop.eup %11386  ;;  %v2681_v54 = vsel %vm1149_vm3, %v12114_v49, 0.0 }
 0xe1a   :  { %2682 = vadd.xlane.f32.xlu1 %v2681_v54  ;;  %v2678_v53 = vsel %vm1149_vm3, %v11387_v52, 0.0 }
 0xe1b   :  { %2679 = vadd.xlane.f32.xlu0 %v2678_v53 }
 0xe29   :  { %v2665_v55 = vpop.xlane.xlu1 %2664 }
 0xe2a   :  { %11388 = vrcp.f32 %v2665_v55  ;;  %v2662_v56 = vpop.xlane.xlu0 %2661 }
 0xe2b   :  { %11390 = vrcp.f32 %v2662_v56  ;;  %11203 = vrot.lane.b32.xlu1 %v12052_v0, %s11604_s18 }
 0xe2f   :  { %11208 = vrot.lane.b32.xlu1 %v12052_v0, %s11606_s22 }
 0xe31   :  { %11198 = vrot.lane.b32.xlu0 %v12052_v0, %s11605_s19 }
 0xe34   :  { %v11389_v57 = vpop.eup %11388 }
 0xe35   :  { %v11391_v58 = vpop.eup %11390  ;;  %v2693_v60 = vmul.f32 %v11389_v57, %v11373_v12 }
 0xe36   :  { %v2692_v59 = vmul.f32 %v11391_v58, %v11375_v14 }
 0xe38   :  { %10008 = vmatprep.mubr.msk.f32.mxu1 %vm1149_vm3, %v2692_v59 }
 0xe39   :  { %10009 = vmatmul.mubr.msk.f32.vlgmr.msra.gmra.mrb[28].mxu1 %vm1149_vm3, %v2693_v60 }
 0xe9f   :  { %v2671_v61 = vpop.xlane.xlu1 %2670 }
 0xea0   :  { %v2668_v63 = vpop.xlane.xlu0 %2667 }
 0xea1   :  { %11392 = vrcp.f32 %v2668_v63  ;;  %v9097_v63 = vld [vmem:[%s13001_s7 + $0xd] ss:$0 sm:$0xff] }
 0xea3   :  { %v2677_v2 = vpop.xlane.xlu1 %2676 }
 0xea4   :  { %11394 = vrcp.f32 %v2677_v2  ;;  %v2674_v3 = vpop.xlane.xlu0 %2673 }
 0xea5   :  { %11396 = vrcp.f32 %v2674_v3 }
 0xea6   :  { %11398 = vrcp.f32 %v2671_v61 }
 0xea7   :  { %v2683_v4 = vpop.xlane.xlu1 %2682 }
 0xea8   :  { %v2680_v5 = vpop.xlane.xlu0 %2679 }
 0xea9   :  { %11400 = vrcp.f32 %v2680_v5 }
 0xeaa   :  { %11402 = vrcp.f32 %v2683_v4 }
 0xeab   :  { %v11393_v0 = vpop.eup %11392  ;;  %v11204_v16 = vpop.permute.xlu1 %11203 }
 0xeac   :  { %v11206_v15 = vunpack.i.h.bf16 %v11204_v16  ;;  %v11205_v6 = vunpack.i.l.bf16 %v11204_v16  ;;  %v11199_v7 = vpop.permute.xlu0 %11198  ;;  %v2694_v8 = vmul.f32 %v11393_v0, %v11379_v41 }
 0xead   :  { %v11201_v9 = vunpack.i.h.bf16 %v11199_v7  ;;  %v11200_v10 = vunpack.i.l.bf16 %v11199_v7 }
 0xeae   :  { %v11395_v11 = vpop.eup %11394  ;;  %10015 = vmatprep.mubr.msk.f32.mxu1 %vm1149_vm3, %v2694_v8  ;;  %v10736_v12 = vpack.c.bf16 %v11206_v15, %v11205_v6 }
 0xeaf   :  { %v11397_v14 = vpop.eup %11396  ;;  %v11209_v13 = vpop.permute.xlu1 %11208  ;;  %v10732_v19 = vpack.c.bf16 %v11201_v9, %v11200_v10  ;;  %v2697_v23 = vmul.f32 %v11395_v11, %v11381_v44 }
 0xeb0   :  { %v11399_v17 = vpop.eup %11398  ;;  %v11211_v21 = vunpack.i.h.bf16 %v11209_v13  ;;  %v11210_v22 = vunpack.i.l.bf16 %v11209_v13  ;;  %10737 = vmatprep.subr.bf16.mxu0 %v10736_v12  ;;  %v2696_v62 = vmul.f32 %v11397_v14, %v11383_v46 }
 0xeb1   :  { %10733 = vmatprep.subr.bf16.mxu1 %v10732_v19  ;;  %10739 = vmatpush3.bf16.msra.mxu0 %v10736_v12  ;;  %v2695_v27 = vmul.f32 %v11399_v17, %v12107_v40  ;;  %v10748_v40 = vpack.c.bf16 %v3058_v39, %v3057_v38  ;;  %v9103_v17 = vld [vmem:[%s12998_s4 + $0x28] sm:$0xff] }
 0xeb2   :  { %10735 = vmatpush3.bf16.msra.mxu1 %v10732_v19  ;;  %10022 = vmatprep.mubr.msk.f32.mxu0 %vm1149_vm3, %v2696_v62  ;;  %v10740_v31 = vpack.c.bf16 %v11211_v21, %v11210_v22  ;;  %v9104_v21 = vld [vmem:[%s12998_s4 + $0x30] sm:$0xff]  ;;  %v9105_v62 = vld [vmem:[%s12998_s4 + $0x38] sm:$0xff] }
 0xeb3   :  { %v11401_v1 = vpop.eup %11400  ;;  %10745 = vmatprep.subr.bf16.mxu0 %v10744_v37 }
 0xeb4   :  { %v11403_v28 = vpop.eup %11402  ;;  %10023 = vmatmul.mubr.msk.f32.vlgmr.msra.gmra.mrb[22].mxu0 %vm1149_vm3, %v2697_v23  ;;  %10741 = vmatprep.subr.bf16.mxu1 %v10740_v31  ;;  %v2698_v29 = vmul.f32 %v11401_v1, %v11387_v52  ;;  %v10756_v23 = vpack.c.bf16 %v9105_v62, %v9104_v21  ;;  %v3459_v1 = vld [vmem:[#allocation2 + $0x108] sm:$0xff]  ;;  %v3636_v21 = vld [vmem:[#allocation2 + $0x150] sm:$0xff] }
 0xeb5   :  { %10016 = vmatmul.mubr.msk.f32.vlgmr.msra.gmra.mrb[30].mxu1 %vm1149_vm3, %v2695_v27  ;;  %v2699_v30 = vmul.f32 %v11403_v28, %v12114_v49  ;;  %10747 = vmatpush3.bf16.msra.mxu0 %v10744_v37  ;;  %v9109_v28 = vld [vmem:[%s12999_s5 + $0x40] sm:$0xff]  ;;  %v9114_v37 = vld [vmem:[%s12999_s5 + $0x68] sm:$0xff] }
 0xeb6   :  { %10743 = vmatpush3.bf16.msra.mxu1 %v10740_v31  ;;  %10029 = vmatprep.mubr.msk.f32.mxu1 %vm1149_vm3, %v2698_v29  ;;  %v3458_v31 = vld [vmem:[#allocation2 + $0x100] sm:$0xff]  ;;  %v9110_v29 = vld [vmem:[%s12999_s5 + $0x48] sm:$0xff]  ;;  %v10768_v38 = vpack.c.bf16 %v9114_v37, %v9113_v36 }
 0xeb7   :  { %10749 = vmatprep.subr.bf16.mxu0 %v10748_v40  ;;  %v10776_v27 = vpack.c.bf16 %v3459_v1, %v3458_v31  ;;  %v9124_v1 = vld [vmem:[%s13001_s7 + $0x16] ss:$0 sm:$0xff] }
 0xeb9   :  { %10030 = vmatmul.mubr.msk.f32.vlgmr.msra.gmra.mrb[32].mxu1 %vm1149_vm3, %v2699_v30  ;;  %10751 = vmatpush3.bf16.msra.mxu0 %v10748_v40  ;;  %v9111_v30 = vld [vmem:[%s12999_s5 + $0x50] sm:$0xff] }
 0xf0c   :  { %v10010_v34 = vpop.f32.mrb[28].mxu1 }
 0xf0d   :  { %v2772_v24 = vpop.f32.mrb[29].mxu1 }
 0xf87   :  { %v10024_v41 = vpop.f32.mrb[22].mxu0 }
 0xf88   :  { %v10017_v42 = vpop.f32.mrb[30].mxu1  ;;  %v2934_v43 = vpop.f32.mrb[23].mxu0 }
 0xf89   :  { %3028 = vrot.lane.b32.xlu1 %v10017_v42, %s11598_s16  ;;  %v2853_v44 = vpop.f32.mrb[31].mxu1 }
 0xf8a   :  { %3026 = vrot.lane.b32.xlu0 %v2853_v44, %s11598_s16 }
 0xf8c   :  { %v10031_v46 = vpop.f32.mrb[32].mxu1 }
 0xf8d   :  { %3036 = vrot.lane.b32.xlu1 %v10024_v41, %s11607_s23  ;;  %v3015_v47 = vpop.f32.mrb[33].mxu1 }
 0xf8e   :  { %3034 = vrot.lane.b32.xlu0 %v2934_v43, %s11607_s23 }
 0xf91   :  { %3044 = vrot.lane.b32.xlu1 %v10031_v46, %s11608_s24  ;;  %v90_v46 = vld [vmem:[%s12996_s2 + $0x80] sm:$0x3f] }
 0xf92   :  { %3042 = vrot.lane.b32.xlu0 %v3015_v47, %s11608_s24  ;;  %v92_v47 = vrot.slane %v90_v46, 2 }
 0xffb   :  { %v3029_v48 = vpop.permute.xlu1 %3028 }
 0xffc   :  { %v3027_v49 = vpop.permute.xlu0 %3026  ;;  %v3049_v56 = vsel %vm800_vm1, %v10010_v34, %v3029_v48  ;;  %v10760_v34 = vpack.c.bf16 %v9110_v29, %v9109_v28 }
 0xffd   :  { %v3048_v53 = vsel %vm800_vm1, %v2772_v24, %v3027_v49  ;;  %v9112_v24 = vld [vmem:[%s12999_s5 + $0x58] sm:$0xff]  ;;  %v9100_v49 = vld [vmem:[%s13001_s7 + $0xe] ss:$0 sm:$0xff] }
 0xffe   :  { %v10764_v35 = vpack.c.bf16 %v9112_v24, %v9111_v30  ;;  %10761 = vmatprep.subr.bf16.mxu0 %v10760_v34  ;;  %v9127_v30 = vld [vmem:[%s13001_s7 + $0x17] ss:$0 sm:$0xff] }
 0xfff   :  { %v3037_v52 = vpop.permute.xlu1 %3036 }
0x1000   :  { %v3035_v54 = vpop.permute.xlu0 %3034  ;;  %v3051_v59 = vsel %vm1149_vm3, %v3049_v56, %v3037_v52 }
0x1001   :  { %v3050_v57 = vsel %vm1149_vm3, %v3048_v53, %v3035_v54  ;;  %v9101_v54 = vld [vmem:[%s13001_s7 + $0xf] ss:$0 sm:$0xff]  ;;  %v95_v53 = vsel %vm94_vm4, %v90_v46, %v92_v47 }
0x1003   :  { %v3045_v55 = vpop.permute.xlu1 %3044 }
0x1004   :  { %v3043_v58 = vpop.permute.xlu0 %3042  ;;  %v3053_v61 = vsel %vm1590_vm12, %v3051_v59, %v3045_v55  ;;  %v253_v59 = vadd.f32 %v11819_v20, %v95_v53  ;;  %v258_v20 = vadd.f32 %v11817_v18, %v92_v47  ;;  %v9115_v18 = vld [vmem:[%s12999_s5 + $0x70] sm:$0xff] }
0x1005   :  { %v3052_v60 = vsel %vm1590_vm12, %v3050_v57, %v3043_v58 }
0x1006   :  { %10040 = vmatprep.mubr.msk.f32.mxu0 %vm500_vm13, %v3052_v60  ;;  %v3460_v60 = vld [vmem:[#allocation2 + $0x110] sm:$0xff] }
0x1007   :  { %10041 = vmatmul.mubr.msk.f32.vlgmr.msra.gmra.mrb[24].mxu0 %vm500_vm13, %v3053_v61  ;;  %v3461_v61 = vld [vmem:[#allocation2 + $0x118] sm:$0xff] }
0x1008   :  { %10763 = vmatpush3.bf16.msra.mxu0 %v10760_v34 }
0x1009   :  { %10765 = vmatprep.subr.bf16.mxu0 %v10764_v35 }
0x100c   :  { %10767 = vmatpush3.bf16.msra.mxu0 %v10764_v35 }
0x100d   :  { %10769 = vmatprep.subr.bf16.mxu0 %v10768_v38 }
0x1010   :  { %10771 = vmatpush3.bf16.msra.mxu0 %v10768_v38 }
0x10da   :  { %v10042_v2 = vpop.f32.mrb[24].mxu0 }
0x10db   :  { %v3142_v3 = vadd.f32 %v10042_v2, %v9097_v63  ;;  %v3136_v4 = vpop.f32.mrb[25].mxu0 }
0x10dc   :  { %v3137_v5 = vadd.f32 %v9097_v63, %v3136_v4  ;;  %v12204_v4 = vmul.f32 5.656854, %v253_v59 }
0x10dd   :  { %v3146_v0 = vadd.f32 %v3142_v3, %v12031_v51  ;;  %v10780_v3 = vpack.c.bf16 %v3461_v61, %v3460_v60 }
0x10de   :  { %v3145_v16 = vadd.f32 %v3137_v5, %v12029_v50  ;;  %v9102_v50 = vld [vmem:[%s12998_s4 + $0x20] sm:$0xff] }
0x10df   :  { %v3150_v15 = vsel %vm500_vm13, %v3146_v0, 0.0  ;;  %v10752_v22 = vpack.c.bf16 %v9103_v17, %v9102_v50  ;;  %v3549_v5 = vld [vmem:[#allocation2 + $0x120] sm:$0xff] }
0x10e0   :  { %3151 = vadd.xlane.f32.xlu1 %v3150_v15  ;;  %v3147_v6 = vsel %vm500_vm13, %v3145_v16, 0.0  ;;  %v3551_v15 = vld [vmem:[#allocation2 + $0x130] sm:$0xff] }
0x10e1   :  { %3148 = vadd.xlane.f32.xlu0 %v3147_v6  ;;  %10753 = vmatprep.subr.bf16.mxu1 %v10752_v22  ;;  %v3552_v6 = vld [vmem:[#allocation2 + $0x138] sm:$0xff] }
0x10e2   :  { %10755 = vmatpush3.bf16.msra.mxu1 %v10752_v22  ;;  %v3637_v22 = vld [vmem:[#allocation2 + $0x158] sm:$0xff] }
0x10e3   :  { %10757 = vmatprep.subr.bf16.mxu1 %v10756_v23  ;;  %v10796_v31 = vpack.c.bf16 %v3637_v22, %v3636_v21 }
0x10e6   :  { %10759 = vmatpush3.bf16.msra.mxu1 %v10756_v23 }
0x10e7   :  { %10777 = vmatprep.subr.bf16.mxu1 %v10776_v27 }
0x116d   :  { %v3152_v7 = vpop.xlane.xlu1 %3151 }
0x116e   :  { %v3154_v8 = vmul.f32 0.03125, %v3152_v7  ;;  %v3149_v9 = vpop.xlane.xlu0 %3148  ;;  %v12211_v7 = vmul.f32 5.656854, %v258_v20 }
0x116f   :  { %v3153_v10 = vmul.f32 0.03125, %v3149_v9  ;;  %v9116_v9 = vld [vmem:[%s12999_s5 + $0x78] sm:$0xff] }
0x1170   :  { %v3156_v11 = vsub.f32 %v3146_v0, %v3154_v8  ;;  %v3550_v0 = vld [vmem:[#allocation2 + $0x128] sm:$0xff]  ;;  %v10788_v8 = vpack.c.bf16 %v3552_v6, %v3551_v15  ;;  %v7496_v6 = vld [vmem:[#allocation2 + $0x2a0] sm:$0xff] }
0x1171   :  { %v3155_v12 = vsub.f32 %v3145_v16, %v3153_v10  ;;  %v10784_v16 = vpack.c.bf16 %v3550_v0, %v3549_v5  ;;  %v10772_v10 = vpack.c.bf16 %v9116_v9, %v9115_v18  ;;  %v9130_v5 = vld [vmem:[%s13001_s7 + $0x18] ss:$0 sm:$0xff] }
0x1172   :  { %v3158_v19 = vmul.f32 %v3156_v11, %v3156_v11 }
0x1173   :  { %v3157_v14 = vmul.f32 %v3155_v12, %v3155_v12  ;;  %10773 = vmatprep.subr.bf16.mxu0 %v10772_v10 }
0x1174   :  { %v3162_v51 = vsel %vm500_vm13, %v3158_v19, 0.0  ;;  %10775 = vmatpush3.bf16.msra.mxu0 %v10772_v10 }
0x1175   :  { %v3159_v13 = vsel %vm500_vm13, %v3157_v14, 0.0 }
0x1176   :  { %3160 = vadd.xlane.f32.xlu0 %v3159_v13  ;;  %v9106_v13 = vld [vmem:[%s13001_s7 + $0x10] ss:$0 sm:$0xff] }
0x117a   :  { %3163 = vadd.xlane.f32.xlu0 %v3162_v51 }
0x1203   :  { %v3161_v39 = vpop.xlane.xlu0 %3160 }
0x1204   :  { %v3165_v40 = vmul.f32 0.03125, %v3161_v39 }
0x1206   :  { %v3167_v41 = vadd.f32 1e-05, %v3165_v40 }
0x1207   :  { %v3164_v42 = vpop.xlane.xlu0 %3163 }
0x1208   :  { %11404 = vrsqrt.f32 %v3167_v41  ;;  %v3166_v43 = vmul.f32 0.03125, %v3164_v42 }
0x120a   :  { %v3168_v44 = vadd.f32 1e-05, %v3166_v43 }
0x120c   :  { %11406 = vrsqrt.f32 %v3168_v44 }
0x1212   :  { %v11405_v48 = vpop.eup %11404 }
0x1213   :  { %v3171_v52 = vmul.f32 %v11405_v48, %v3155_v12  ;;  %v3635_v12 = vld [vmem:[#allocation2 + $0x148] sm:$0xff] }
0x1215   :  { %v3178_v55 = vmul.f32 %v9100_v49, %v3171_v52 }
0x1216   :  { %v11407_v56 = vpop.eup %11406 }
0x1217   :  { %v3172_v57 = vmul.f32 %v11407_v56, %v3156_v11  ;;  %v12197_v58 = vadd.f32 %v9101_v54, %v3178_v55  ;;  %v3634_v11 = vld [vmem:[#allocation2 + $0x140] sm:$0xff] }
0x1218   :  { %v10792_v14 = vpack.c.bf16 %v3635_v12, %v3634_v11 }
0x1219   :  { %v3179_v63 = vmul.f32 %v9100_v49, %v3172_v57  ;;  %10051 = vmatprep.mubr.msk.f32.mxu1 %vm500_vm13, %v12197_v58 }
0x121a   :  { %10793 = vmatprep.subr.bf16.mxu0 %v10792_v14 }
0x121b   :  { %v12202_v2 = vadd.f32 %v9101_v54, %v3179_v63 }
0x121d   :  { %10052 = vmatmul.mubr.msk.f32.vlgmr.msra.gmra.mrb[34].mxu1 %vm500_vm13, %v12202_v2 }
0x121e   :  { %10779 = vmatpush3.bf16.msra.mxu1 %v10776_v27  ;;  %10081 = vmatprep.mubr.msk.f32.mxu1 %vm500_vm13, %v12204_v4 }
0x121f   :  { %10781 = vmatprep.subr.bf16.mxu1 %v10780_v3 }
0x1222   :  { %10783 = vmatpush3.bf16.msra.mxu1 %v10780_v3 }
0x1223   :  { %10785 = vmatprep.subr.bf16.mxu1 %v10784_v16 }
0x1225   :  { %10082 = vmatmul.mubr.msk.f32.vlgmr.msra.gmra.mrb[36].mxu1 %vm500_vm13, %v12211_v7 }
0x1226   :  { %10787 = vmatpush3.bf16.msra.mxu1 %v10784_v16  ;;  %10092 = vmatprep.mubr.msk.f32.mxu1 %vm500_vm13, %v12204_v4 }
0x1227   :  { %10789 = vmatprep.subr.bf16.mxu1 %v10788_v8 }
0x122a   :  { %10791 = vmatpush3.bf16.msra.mxu1 %v10788_v8 }
0x122d   :  { %10093 = vmatmul.mubr.msk.f32.vlgmr.msra.gmra.mrb[38].mxu1 %vm500_vm13, %v12211_v7 }
0x12f0   :  { %v10053_v19 = vpop.f32.mrb[34].mxu1 }
0x12f1   :  { %v3275_v51 = vadd.f32 %v10053_v19, %v9106_v13  ;;  %v3269_v50 = vpop.f32.mrb[35].mxu1 }
0x12f2   :  { %v3270_v17 = vadd.f32 %v9106_v13, %v3269_v50 }
0x12f3   :  { %v3279_v23 = vmax.f32 %v3275_v51, 0.0 }
0x12f4   :  { %v3278_v62 = vmax.f32 %v3270_v17, 0.0 }
0x12f6   :  { %10070 = vmatprep.mubr.msk.f32.mxu0 %vm96_vm0, %v3278_v62 }
0x12f7   :  { %10071 = vmatmul.mubr.msk.f32.vlgmr.msra.gmra.mrb[26].mxu0 %vm96_vm0, %v3279_v23 }
0x12f8   :  { %v10083_v27 = vpop.f32.mrb[36].mxu1  ;;  %10795 = vmatpush3.bf16.msra.mxu0 %v10792_v14  ;;  %10103 = vmatprep.mubr.msk.f32.mxu0 %vm500_vm13, %v12204_v4 }
0x12f9   :  { %v3539_v28 = vpop.f32.mrb[37].mxu1  ;;  %10797 = vmatprep.subr.bf16.mxu0 %v10796_v31  ;;  %v3545_v39 = vadd.f32 %v10083_v27, %v9124_v1 }
0x12fa   :  { %v3540_v29 = vadd.f32 %v9124_v1, %v3539_v28 }
0x12fc   :  { %10799 = vmatpush3.bf16.msra.mxu0 %v10796_v31  ;;  %10110 = vmatprep.mubr.msk.f32.mxu1 %vm800_vm1, %v3540_v29 }
0x12ff   :  { %10104 = vmatmul.mubr.msk.f32.vlgmr.msra.gmra.mrb[28].mxu0 %vm500_vm13, %v12211_v7 }
0x1300   :  { %v10094_v34 = vpop.f32.mrb[38].mxu1 }
0x1301   :  { %v3630_v24 = vadd.f32 %v10094_v34, %v9127_v30  ;;  %v3624_v35 = vpop.f32.mrb[39].mxu1 }
0x1302   :  { %v3625_v36 = vadd.f32 %v9127_v30, %v3624_v35 }
0x1304   :  { %v11217_v37 = vpack.i.bf16 %v3630_v24, %v3625_v36  ;;  %v10800_v38 = vpack.c.bf16 %v3630_v24, %v3625_v36 }
0x1306   :  { %11218 = vrot.lane.b32.xlu0 %v11217_v37, %s11604_s18  ;;  %11213 = vrot.lane.b32.xlu1 %v11217_v37, %s11605_s19 }
0x1307   :  { %10802 = vmatprep.subr.msk.bf16.mxu1 %vm11845_vm2, %v10800_v38 }
0x1308   :  { %10805 = vmatpush3.bf16.xpose.msk.msra.mxu1 %vm11845_vm2, %v10800_v38 }
0x130a   :  { %3722 = vrot.lane.b32.xlu0 %v3545_v39, %s11605_s19  ;;  %11223 = vrot.lane.b32.xlu1 %v11217_v37, %s11606_s22 }
0x130e   :  { %3726 = vrot.lane.b32.xlu0 %v3545_v39, %s11604_s18  ;;  %3720 = vrot.lane.b32.xlu1 %v3540_v29, %s11605_s19 }
0x130f   :  { %10111 = vmatmul.mubr.msk.f32.vlgmr.msra.gmra.mrb[40].mxu1 %vm800_vm1, %v3545_v39 }
0x1312   :  { %3730 = vrot.lane.b32.xlu0 %v3545_v39, %s11606_s22  ;;  %3724 = vrot.lane.b32.xlu1 %v3540_v29, %s11604_s18 }
0x1316   :  { %3728 = vrot.lane.b32.xlu1 %v3540_v29, %s11606_s22 }
0x1378   :  { %v11219_v40 = vpop.permute.xlu0 %11218  ;;  %v11214_v41 = vpop.permute.xlu1 %11213 }
0x1379   :  { %v11221_v42 = vunpack.i.h.bf16 %v11219_v40  ;;  %v11220_v43 = vunpack.i.l.bf16 %v11219_v40  ;;  %v11216_v44 = vunpack.i.h.bf16 %v11214_v41  ;;  %v11215_v46 = vunpack.i.l.bf16 %v11214_v41 }
0x137b   :  { %v10812_v47 = vpack.c.bf16 %v11221_v42, %v11220_v43  ;;  %v10806_v48 = vpack.c.bf16 %v11216_v44, %v11215_v46 }
0x137c   :  { %v11224_v49 = vpop.permute.xlu1 %11223  ;;  %v3723_v53 = vpop.permute.xlu0 %3722 }
0x137d   :  { %v11226_v52 = vunpack.i.h.bf16 %v11224_v49  ;;  %v11225_v54 = vunpack.i.l.bf16 %v11224_v49  ;;  %10808 = vmatprep.subr.msk.bf16.mxu0 %vm11845_vm2, %v10806_v48  ;;  %10814 = vmatprep.subr.msk.bf16.mxu1 %vm11845_vm2, %v10812_v47 }
0x137e   :  { %10811 = vmatpush3.bf16.xpose.msk.msra.mxu0 %vm11845_vm2, %v10806_v48  ;;  %10817 = vmatpush3.bf16.xpose.msk.msra.mxu1 %vm11845_vm2, %v10812_v47 }
0x137f   :  { %v10818_v55 = vpack.c.bf16 %v11226_v52, %v11225_v54 }
0x1380   :  { %v3721_v56 = vpop.permute.xlu1 %3720  ;;  %v3727_v59 = vpop.permute.xlu0 %3726 }
0x1381   :  { %10117 = vmatprep.mubr.msk.f32.mxu0 %vm800_vm1, %v3721_v56  ;;  %10820 = vmatprep.subr.msk.bf16.mxu0 %vm11845_vm2, %v10818_v55 }
0x1384   :  { %v3725_v57 = vpop.permute.xlu1 %3724  ;;  %v3731_v61 = vpop.permute.xlu0 %3730 }
0x1385   :  { %10118 = vmatmul.mubr.msk.f32.vlgmr.msra.gmra.mrb[30].mxu0 %vm800_vm1, %v3723_v53  ;;  %10124 = vmatprep.mubr.msk.f32.mxu1 %vm800_vm1, %v3725_v57 }
0x1386   :  { %10125 = vmatmul.mubr.msk.f32.vlgmr.msra.gmra.mrb[42].mxu1 %vm800_vm1, %v3727_v59  ;;  %10823 = vmatpush3.bf16.xpose.msk.msra.mxu0 %vm11845_vm2, %v10818_v55 }
0x1388   :  { %v3729_v60 = vpop.permute.xlu1 %3728 }
0x1389   :  { %10131 = vmatprep.mubr.msk.f32.mxu0 %vm800_vm1, %v3729_v60 }
0x138d   :  { %10132 = vmatmul.mubr.msk.f32.vlgmr.msra.gmra.mrb[32].mxu0 %vm800_vm1, %v3731_v61 }
0x13ca   :  { %v12273_v63 = vpop.f32.mrb[26].mxu0 }
0x13cb   :  { %v12275_v3 = vpop.f32.mrb[27].mxu0 }
0x13d2   :  { %v10105_v0 = vpop.f32.mrb[28].mxu0 }
0x13d3   :  { %v3715_v20 = vadd.f32 %v10105_v0, %v9130_v5  ;;  %v3709_v16 = vpop.f32.mrb[29].mxu0 }
0x13d4   :  { %v3710_v15 = vadd.f32 %v9130_v5, %v3709_v16 }
0x13d6   :  { %v10824_v8 = vpack.c.bf16 %v3715_v20, %v3710_v15  ;;  %v12284_v18 = vpack.i.bf16 %v3715_v20, %v3710_v15 }
0x13d8   :  { %10826 = vmatprep.subr.msk.bf16.mxu1 %vm12280_vm7, %v10824_v8 }
0x13d9   :  { %10829 = vmatpush3.bf16.msk.msra.mxu1 %vm12280_vm7, %v10824_v8 }
0x13e2   :  { %v10112_v9 = vpop.f32.mrb[40].mxu1 }
0x13e3   :  { %v4096_v10 = vmul.f32 0.35355338, %v10112_v9  ;;  %v3837_v11 = vpop.f32.mrb[41].mxu1 }
0x13e4   :  { %v4095_v12 = vmul.f32 0.35355338, %v3837_v11 }
0x13e5   :  { %v4104_v14 = vadd.f32 %v4096_v10, %v11834_v33 }
0x13e6   :  { %v4103_v13 = vadd.f32 %v4095_v12, %v11832_v32 }
0x13e7   :  { %v4116_v19 = vsel %vm4115_vm8, %v4104_v14, -inf }
0x13e8   :  { %4117 = vmax.xlane.f32.xlu0 %v4116_v19  ;;  %v4112_v51 = vsel %vm4111_vm9, %v4103_v13, -inf }
0x13e9   :  { %4113 = vmax.xlane.f32.xlu1 %v4112_v51 }
0x1458   :  { %v10119_v50 = vpop.f32.mrb[30].mxu0 }
0x1459   :  { %v4098_v17 = vmul.f32 0.35355338, %v10119_v50  ;;  %v3920_v21 = vpop.f32.mrb[31].mxu0  ;;  %v10126_v22 = vpop.f32.mrb[42].mxu1 }
0x145a   :  { %v4097_v62 = vmul.f32 0.35355338, %v3920_v21  ;;  %v4100_v23 = vmul.f32 0.35355338, %v10126_v22  ;;  %v4003_v31 = vpop.f32.mrb[43].mxu1 }
0x145b   :  { %v4099_v1 = vmul.f32 0.35355338, %v4003_v31  ;;  %v4106_v27 = vadd.f32 %v4098_v17, %v11834_v33 }
0x145c   :  { %v4105_v28 = vadd.f32 %v4097_v62, %v11832_v32  ;;  %v4108_v30 = vadd.f32 %v4100_v23, %v11834_v33 }
0x145d   :  { %v4122_v29 = vsel %vm4115_vm8, %v4106_v27, -inf  ;;  %v4107_v34 = vadd.f32 %v4099_v1, %v11832_v32 }
0x145e   :  { %4123 = vmax.xlane.f32.xlu1 %v4122_v29  ;;  %v4119_v24 = vsel %vm4111_vm9, %v4105_v28, -inf  ;;  %v4128_v38 = vsel %vm4115_vm8, %v4108_v30, -inf }
0x145f   :  { %4120 = vmax.xlane.f32.xlu0 %v4119_v24  ;;  %v4125_v40 = vsel %vm4111_vm9, %v4107_v34, -inf }
0x1460   :  { %v10133_v35 = vpop.f32.mrb[32].mxu0 }
0x1461   :  { %v4102_v36 = vmul.f32 0.35355338, %v10133_v35  ;;  %v4086_v37 = vpop.f32.mrb[33].mxu0 }
0x1462   :  { %v4101_v39 = vmul.f32 0.35355338, %v4086_v37  ;;  %4129 = vmax.xlane.f32.xlu1 %v4128_v38 }
0x1463   :  { %v4110_v41 = vadd.f32 %v4102_v36, %v11834_v33  ;;  %4126 = vmax.xlane.f32.xlu0 %v4125_v40 }
0x1464   :  { %v4109_v42 = vadd.f32 %v4101_v39, %v11832_v32 }
0x1465   :  { %v4134_v43 = vsel %vm4115_vm8, %v4110_v41, -inf }
0x1466   :  { %4135 = vmax.xlane.f32.xlu1 %v4134_v43  ;;  %v4131_v44 = vsel %vm4111_vm9, %v4109_v42, -inf }
0x1467   :  { %4132 = vmax.xlane.f32.xlu0 %v4131_v44 }
0x1475   :  { %v4118_v46 = vpop.xlane.xlu0 %4117 }
0x1476   :  { %v4138_v47 = vsub.f32 %v4104_v14, %v4118_v46  ;;  %v4114_v48 = vpop.xlane.xlu1 %4113 }
0x1477   :  { %v4137_v49 = vsub.f32 %v4103_v13, %v4114_v48 }
0x1478   :  { %v4147_v52 = vmul.f32 1.442695, %v4138_v47 }
0x1479   :  { %v4145_v54 = vmul.f32 1.442695, %v4137_v49 }
0x147a   :  { %11408 = vpow2.f32 %v4147_v52 }
0x147b   :  { %11410 = vpow2.f32 %v4145_v54 }
0x1484   :  { %v11409_v53 = vpop.eup %11408 }
0x1485   :  { %v11411_v55 = vpop.eup %11410  ;;  %v4164_v56 = vsel %vm4115_vm8, %v11409_v53, 0.0 }
0x1486   :  { %4165 = vadd.xlane.f32.xlu1 %v4164_v56  ;;  %v4161_v57 = vsel %vm4111_vm9, %v11411_v55, 0.0 }
0x1487   :  { %4162 = vadd.xlane.f32.xlu0 %v4161_v57 }
0x14eb   :  { %v4124_v59 = vpop.xlane.xlu1 %4123 }
0x14ec   :  { %v4140_v60 = vsub.f32 %v4106_v27, %v4124_v59  ;;  %v4121_v61 = vpop.xlane.xlu0 %4120 }
0x14ed   :  { %v4139_v5 = vsub.f32 %v4105_v28, %v4121_v61 }
0x14ee   :  { %v4151_v0 = vmul.f32 1.442695, %v4140_v60 }
0x14ef   :  { %v4149_v20 = vmul.f32 1.442695, %v4139_v5  ;;  %v4130_v16 = vpop.xlane.xlu1 %4129 }
0x14f0   :  { %11412 = vpow2.f32 %v4151_v0  ;;  %v4142_v15 = vsub.f32 %v4108_v30, %v4130_v16  ;;  %v4127_v8 = vpop.xlane.xlu0 %4126 }
0x14f1   :  { %11414 = vpow2.f32 %v4149_v20  ;;  %v4141_v9 = vsub.f32 %v4107_v34, %v4127_v8 }
0x14f2   :  { %v4155_v10 = vmul.f32 1.442695, %v4142_v15 }
0x14f3   :  { %v4153_v11 = vmul.f32 1.442695, %v4141_v9  ;;  %v4136_v12 = vpop.xlane.xlu1 %4135 }
0x14f4   :  { %11416 = vpow2.f32 %v4155_v10  ;;  %v4144_v14 = vsub.f32 %v4110_v41, %v4136_v12  ;;  %v4133_v13 = vpop.xlane.xlu0 %4132 }
0x14f5   :  { %11418 = vpow2.f32 %v4153_v11  ;;  %v4143_v19 = vsub.f32 %v4109_v42, %v4133_v13 }
0x14f6   :  { %v4159_v51 = vmul.f32 1.442695, %v4144_v14 }
0x14f7   :  { %v4157_v50 = vmul.f32 1.442695, %v4143_v19 }
0x14f8   :  { %11420 = vpow2.f32 %v4159_v51  ;;  %v4565_v51 = vld [vmem:[#allocation2 + $0x160] sm:$0xff] }
0x14f9   :  { %11422 = vpow2.f32 %v4157_v50  ;;  %v4566_v50 = vld [vmem:[#allocation2 + $0x168] sm:$0xff] }
0x14fa   :  { %v12308_v17 = vpop.eup %11412 }
0x14fb   :  { %v11415_v21 = vpop.eup %11414  ;;  %v4170_v22 = vsel %vm4115_vm8, %v12308_v17, 0.0 }
0x14fc   :  { %4171 = vadd.xlane.f32.xlu1 %v4170_v22  ;;  %v4167_v62 = vsel %vm4111_vm9, %v11415_v21, 0.0  ;;  %v4568_v22 = vld [vmem:[#allocation2 + $0x178] sm:$0xff] }
0x14fd   :  { %4168 = vadd.xlane.f32.xlu0 %v4167_v62 }
0x14fe   :  { %v11417_v23 = vpop.eup %11416 }
0x14ff   :  { %v11419_v31 = vpop.eup %11418  ;;  %v4176_v1 = vsel %vm4115_vm8, %v11417_v23, 0.0 }
0x1500   :  { %4177 = vadd.xlane.f32.xlu1 %v4176_v1  ;;  %v4173_v27 = vsel %vm4111_vm9, %v11419_v31, 0.0 }
0x1501   :  { %4174 = vadd.xlane.f32.xlu0 %v4173_v27 }
0x1502   :  { %v12315_v28 = vpop.eup %11420 }
0x1503   :  { %v11423_v29 = vpop.eup %11422  ;;  %v4182_v30 = vsel %vm4115_vm8, %v12315_v28, 0.0 }
0x1504   :  { %4183 = vadd.xlane.f32.xlu1 %v4182_v30  ;;  %v4179_v34 = vsel %vm4111_vm9, %v11423_v29, 0.0  ;;  %v9117_v30 = vld [vmem:[%s13001_s7 + $0x11] ss:$0 sm:$0xff] }
0x1505   :  { %4180 = vadd.xlane.f32.xlu0 %v4179_v34  ;;  %v3367_v34 = vadd.f32 %v9117_v30, %v12275_v3 }
0x1513   :  { %v4166_v24 = vpop.xlane.xlu1 %4165 }
0x1514   :  { %11424 = vrcp.f32 %v4166_v24  ;;  %v4163_v35 = vpop.xlane.xlu0 %4162  ;;  %v3372_v24 = vadd.f32 %v12273_v63, %v9117_v30 }
0x1515   :  { %11426 = vrcp.f32 %v4163_v35  ;;  %11233 = vrot.lane.b32.xlu1 %v12284_v18, %s11604_s18  ;;  %v3375_v35 = vadd.f32 %v3367_v34, %v12197_v58 }
0x1519   :  { %11238 = vrot.lane.b32.xlu1 %v12284_v18, %s11606_s22 }
0x151b   :  { %11228 = vrot.lane.b32.xlu0 %v12284_v18, %s11605_s19 }
0x151e   :  { %v11425_v36 = vpop.eup %11424 }
0x151f   :  { %v11427_v37 = vpop.eup %11426  ;;  %v4194_v39 = vmul.f32 %v11425_v36, %v11409_v53  ;;  %v3376_v36 = vadd.f32 %v3372_v24, %v12202_v2 }
0x1520   :  { %v4193_v38 = vmul.f32 %v11427_v37, %v11411_v55  ;;  %v3377_v37 = vsel %vm500_vm13, %v3375_v35, 0.0 }
0x1522   :  { %10138 = vmatprep.mubr.msk.f32.mxu1 %vm4111_vm9, %v4193_v38  ;;  %v3380_v38 = vsel %vm500_vm13, %v3376_v36, 0.0 }
0x1523   :  { %10139 = vmatmul.mubr.msk.f32.vlgmr.msra.gmra.mrb[44].mxu1 %vm4111_vm9, %v4194_v39 }
0x1589   :  { %v4172_v40 = vpop.xlane.xlu1 %4171 }
0x158a   :  { %v4169_v41 = vpop.xlane.xlu0 %4168 }
0x158b   :  { %11428 = vrcp.f32 %v4169_v41 }
0x158d   :  { %v4178_v42 = vpop.xlane.xlu1 %4177 }
0x158e   :  { %11430 = vrcp.f32 %v4178_v42  ;;  %v4175_v43 = vpop.xlane.xlu0 %4174 }
0x158f   :  { %11432 = vrcp.f32 %v4175_v43 }
0x1590   :  { %11434 = vrcp.f32 %v4172_v40 }
0x1591   :  { %v4184_v44 = vpop.xlane.xlu1 %4183 }
0x1592   :  { %v4181_v46 = vpop.xlane.xlu0 %4180 }
0x1593   :  { %11436 = vrcp.f32 %v4181_v46 }
0x1594   :  { %11438 = vrcp.f32 %v4184_v44 }
0x1595   :  { %v11429_v18 = vpop.eup %11428  ;;  %v11234_v47 = vpop.permute.xlu1 %11233 }
0x1596   :  { %v11236_v48 = vunpack.i.h.bf16 %v11234_v47  ;;  %v11235_v49 = vunpack.i.l.bf16 %v11234_v47  ;;  %v11229_v52 = vpop.permute.xlu0 %11228  ;;  %v4195_v54 = vmul.f32 %v11429_v18, %v11415_v21  ;;  %v4567_v21 = vld [vmem:[#allocation2 + $0x170] sm:$0xff] }
0x1597   :  { %v11231_v53 = vunpack.i.h.bf16 %v11229_v52  ;;  %v11230_v55 = vunpack.i.l.bf16 %v11229_v52  ;;  %v10852_v62 = vpack.c.bf16 %v4568_v22, %v4567_v21 }
0x1598   :  { %v11431_v56 = vpop.eup %11430  ;;  %v10836_v57 = vpack.c.bf16 %v11236_v48, %v11235_v49  ;;  %10145 = vmatprep.mubr.msk.f32.mxu1 %vm4111_vm9, %v4195_v54 }
0x1599   :  { %v11433_v59 = vpop.eup %11432  ;;  %v10830_v60 = vpack.c.bf16 %v11231_v53, %v11230_v55  ;;  %v11239_v61 = vpop.permute.xlu1 %11238  ;;  %v4198_v8 = vmul.f32 %v11431_v56, %v11417_v23 }
0x159a   :  { %v11435_v5 = vpop.eup %11434  ;;  %v11241_v0 = vunpack.i.h.bf16 %v11239_v61  ;;  %v11240_v20 = vunpack.i.l.bf16 %v11239_v61  ;;  %10838 = vmatprep.subr.msk.bf16.mxu0 %vm12280_vm7, %v10836_v57  ;;  %v4197_v16 = vmul.f32 %v11433_v59, %v11419_v31 }
0x159b   :  { %10832 = vmatprep.subr.msk.bf16.mxu1 %vm12280_vm7, %v10830_v60  ;;  %10841 = vmatpush3.bf16.msk.msra.mxu0 %vm12280_vm7, %v10836_v57  ;;  %v4196_v10 = vmul.f32 %v11435_v5, %v12308_v17  ;;  %v10848_v17 = vpack.c.bf16 %v4566_v50, %v4565_v51 }
0x159c   :  { %v10842_v15 = vpack.c.bf16 %v11241_v0, %v11240_v20  ;;  %10835 = vmatpush3.bf16.msk.msra.mxu1 %vm12280_vm7, %v10830_v60  ;;  %10152 = vmatprep.mubr.msk.f32.mxu0 %vm4111_vm9, %v4197_v16 }
0x159d   :  { %v11437_v9 = vpop.eup %11436  ;;  %10849 = vmatprep.subr.bf16.mxu0 %v10848_v17 }
0x159e   :  { %v11439_v11 = vpop.eup %11438  ;;  %10153 = vmatmul.mubr.msk.f32.vlgmr.msra.gmra.mrb[34].mxu0 %vm4111_vm9, %v4198_v8  ;;  %10844 = vmatprep.subr.msk.bf16.mxu1 %vm12280_vm7, %v10842_v15  ;;  %v4199_v12 = vmul.f32 %v11437_v9, %v11423_v29 }
0x159f   :  { %10146 = vmatmul.mubr.msk.f32.vlgmr.msra.gmra.mrb[46].mxu1 %vm4111_vm9, %v4196_v10  ;;  %v4200_v14 = vmul.f32 %v11439_v11, %v12315_v28  ;;  %10851 = vmatpush3.bf16.msra.mxu0 %v10848_v17  ;;  %v9161_v10 = vld [vmem:[%s13001_s7 + $0x19] ss:$0 sm:$0xff]  ;;  %v9120_v11 = vld [vmem:[%s13001_s7 + $0x12] ss:$0 sm:$0xff] }
0x15a0   :  { %10847 = vmatpush3.bf16.msk.msra.mxu1 %vm12280_vm7, %v10842_v15  ;;  %10159 = vmatprep.mubr.msk.f32.mxu1 %vm4111_vm9, %v4199_v12 }
0x15a1   :  { %10853 = vmatprep.subr.bf16.mxu0 %v10852_v62 }
0x15a3   :  { %10160 = vmatmul.mubr.msk.f32.vlgmr.msra.gmra.mrb[48].mxu1 %vm4111_vm9, %v4200_v14  ;;  %10855 = vmatpush3.bf16.msra.mxu0 %v10852_v62  ;;  %v9121_v14 = vld [vmem:[%s13001_s7 + $0x13] ss:$0 sm:$0xff] }
0x15f6   :  { %v10140_v13 = vpop.f32.mrb[44].mxu1 }
0x15f7   :  { %v4276_v19 = vpop.f32.mrb[45].mxu1 }
0x1671   :  { %v10154_v23 = vpop.f32.mrb[34].mxu0 }
0x1672   :  { %v10147_v31 = vpop.f32.mrb[46].mxu1  ;;  %v4442_v1 = vpop.f32.mrb[35].mxu0 }
0x1673   :  { %4538 = vrot.lane.b32.xlu1 %v10147_v31, %s11598_s16  ;;  %v4359_v27 = vpop.f32.mrb[47].mxu1 }
0x1674   :  { %4536 = vrot.lane.b32.xlu0 %v4359_v27, %s11598_s16 }
0x1676   :  { %v10161_v28 = vpop.f32.mrb[48].mxu1 }
0x1677   :  { %4546 = vrot.lane.b32.xlu1 %v10154_v23, %s11607_s23  ;;  %v4525_v29 = vpop.f32.mrb[49].mxu1 }
0x1678   :  { %4544 = vrot.lane.b32.xlu0 %v4442_v1, %s11607_s23 }
0x167b   :  { %4554 = vrot.lane.b32.xlu1 %v10161_v28, %s11608_s24 }
0x167c   :  { %4552 = vrot.lane.b32.xlu0 %v4525_v29, %s11608_s24 }
0x169b   :  { %3378 = vadd.xlane.f32.xlu0 %v3377_v37 }
0x169f   :  { %3381 = vadd.xlane.f32.xlu1 %v3380_v38 }
0x16e5   :  { %v4539_v39 = vpop.permute.xlu1 %4538 }
0x16e6   :  { %v4537_v40 = vpop.permute.xlu0 %4536  ;;  %v4559_v3 = vsel %vm800_vm1, %v10140_v13, %v4539_v39 }
0x16e7   :  { %v4558_v43 = vsel %vm800_vm1, %v4276_v19, %v4537_v40 }
0x16e9   :  { %v4547_v41 = vpop.permute.xlu1 %4546 }
0x16ea   :  { %v4545_v42 = vpop.permute.xlu0 %4544  ;;  %v4561_v2 = vsel %vm1149_vm3, %v4559_v3, %v4547_v41 }
0x16eb   :  { %v4560_v63 = vsel %vm1149_vm3, %v4558_v43, %v4545_v42 }
0x16ed   :  { %v4555_v44 = vpop.permute.xlu1 %4554 }
0x16ee   :  { %v4553_v58 = vpop.permute.xlu0 %4552  ;;  %v4563_v18 = vsel %vm1590_vm12, %v4561_v2, %v4555_v44 }
0x16ef   :  { %v4562_v46 = vsel %vm1590_vm12, %v4560_v63, %v4553_v58 }
0x16f0   :  { %10170 = vmatprep.mubr.msk.f32.mxu0 %vm500_vm13, %v4562_v46 }
0x16f1   :  { %10171 = vmatmul.mubr.msk.f32.vlgmr.msra.gmra.mrb[36].mxu0 %vm500_vm13, %v4563_v18  ;;  %v4790_v18 = vld [vmem:[#allocation2 + $0x1a0] sm:$0xff] }
0x1728   :  { %v3379_v47 = vpop.xlane.xlu0 %3378 }
0x1729   :  { %v3383_v48 = vmul.f32 0.03125, %v3379_v47  ;;  %v4791_v47 = vld [vmem:[#allocation2 + $0x1a8] sm:$0xff] }
0x172b   :  { %v3385_v49 = vsub.f32 %v3375_v35, %v3383_v48  ;;  %v4699_v48 = vld [vmem:[#allocation2 + $0x180] sm:$0xff] }
0x172c   :  { %v3382_v52 = vpop.xlane.xlu1 %3381 }
0x172d   :  { %v3384_v54 = vmul.f32 0.03125, %v3382_v52  ;;  %v3387_v53 = vmul.f32 %v3385_v49, %v3385_v49  ;;  %v4700_v52 = vld [vmem:[#allocation2 + $0x188] sm:$0xff] }
0x172f   :  { %v3386_v55 = vsub.f32 %v3376_v36, %v3384_v54  ;;  %v3389_v56 = vsel %vm500_vm13, %v3387_v53, 0.0  ;;  %v4792_v54 = vld [vmem:[#allocation2 + $0x1b0] sm:$0xff]  ;;  %v4793_v53 = vld [vmem:[#allocation2 + $0x1b8] sm:$0xff] }
0x1730   :  { %3390 = vadd.xlane.f32.xlu0 %v3389_v56  ;;  %v10868_v56 = vpack.c.bf16 %v4793_v53, %v4792_v54 }
0x1731   :  { %v3388_v57 = vmul.f32 %v3386_v55, %v3386_v55 }
0x1733   :  { %v3392_v59 = vsel %vm500_vm13, %v3388_v57, 0.0  ;;  %v4701_v57 = vld [vmem:[#allocation2 + $0x190] sm:$0xff] }
0x1734   :  { %3393 = vadd.xlane.f32.xlu0 %v3392_v59  ;;  %v4702_v59 = vld [vmem:[#allocation2 + $0x198] sm:$0xff] }
0x17bd   :  { %v3391_v60 = vpop.xlane.xlu0 %3390 }
0x17be   :  { %v3395_v61 = vmul.f32 0.03125, %v3391_v60  ;;  %v10860_v60 = vpack.c.bf16 %v4702_v59, %v4701_v57 }
0x17c0   :  { %v3397_v5 = vadd.f32 1e-05, %v3395_v61  ;;  %v4881_v61 = vld [vmem:[#allocation2 + $0x1c0] sm:$0xff] }
0x17c1   :  { %v3394_v0 = vpop.xlane.xlu0 %3393 }
0x17c2   :  { %11440 = vrsqrt.f32 %v3397_v5  ;;  %v3396_v20 = vmul.f32 0.03125, %v3394_v0  ;;  %v4882_v5 = vld [vmem:[#allocation2 + $0x1c8] sm:$0xff] }
0x17c3   :  { %v10872_v0 = vpack.c.bf16 %v4882_v5, %v4881_v61 }
0x17c4   :  { %v3398_v16 = vadd.f32 1e-05, %v3396_v20  ;;  %v10172_v15 = vpop.f32.mrb[36].mxu0 }
0x17c5   :  { %v4646_v8 = vpop.f32.mrb[37].mxu0  ;;  %v4652_v21 = vadd.f32 %v10172_v15, %v9161_v10 }
0x17c6   :  { %11442 = vrsqrt.f32 %v3398_v16  ;;  %v4647_v13 = vadd.f32 %v9161_v10, %v4646_v8 }
0x17c7   :  { %v4656_v1 = vadd.f32 %v4652_v21, %v12211_v7 }
0x17c8   :  { %v4655_v22 = vadd.f32 %v4647_v13, %v12204_v4 }
0x17c9   :  { %v4661_v29 = vsel %vm4660_vm10, %v4656_v1, 0.0 }
0x17ca   :  { %v4657_v27 = vsel %vm500_vm13, %v4655_v22, 0.0 }
0x17cc   :  { %v11441_v9 = vpop.eup %11440 }
0x17cd   :  { %v3401_v12 = vmul.f32 %v11441_v9, %v3385_v49  ;;  %v10864_v49 = vpack.c.bf16 %v4791_v47, %v4790_v18 }
0x17cf   :  { %v3408_v19 = vmul.f32 %v9120_v11, %v3401_v12  ;;  %10865 = vmatprep.subr.bf16.mxu0 %v10864_v49 }
0x17d0   :  { %v11443_v51 = vpop.eup %11442  ;;  %10867 = vmatpush3.bf16.msra.mxu0 %v10864_v49 }
0x17d1   :  { %v3415_v50 = vadd.f32 %v9121_v14, %v3408_v19  ;;  %v3402_v17 = vmul.f32 %v11443_v51, %v3386_v55  ;;  %v10856_v55 = vpack.c.bf16 %v4700_v52, %v4699_v48  ;;  %10869 = vmatprep.subr.bf16.mxu0 %v10868_v56  ;;  %v9172_v52 = vld [vmem:[%s13001_s7 + $0x1e] ss:$0 sm:$0xff] }
0x17d3   :  { %v3417_v62 = vsel %vm500_vm13, %v3415_v50, 0.0  ;;  %v3409_v23 = vmul.f32 %v9120_v11, %v3402_v17  ;;  %10857 = vmatprep.subr.bf16.mxu1 %v10856_v55  ;;  %v9122_v17 = vld [vmem:[%s13001_s7 + $0x14] ss:$0 sm:$0xff] }
0x17d4   :  { %3418 = vadd.xlane.f32.xlu1 %v3417_v62  ;;  %10859 = vmatpush3.bf16.msra.mxu1 %v10856_v55 }
0x17d5   :  { %v3416_v31 = vadd.f32 %v9121_v14, %v3409_v23  ;;  %10871 = vmatpush3.bf16.msra.mxu0 %v10868_v56  ;;  %10861 = vmatprep.subr.bf16.mxu1 %v10860_v60 }
0x17d7   :  { %v3420_v28 = vsel %vm500_vm13, %v3416_v31, 0.0 }
0x17d8   :  { %4658 = vadd.xlane.f32.xlu1 %v4657_v27  ;;  %3421 = vadd.xlane.f32.xlu0 %v3420_v28 }
0x17d9   :  { %10863 = vmatpush3.bf16.msra.mxu1 %v10860_v60 }
0x17da   :  { %10873 = vmatprep.subr.bf16.mxu1 %v10872_v0 }
0x17dc   :  { %4662 = vadd.xlane.f32.xlu0 %v4661_v29 }
0x1861   :  { %v3419_v30 = vpop.xlane.xlu1 %3418 }
0x1862   :  { %v3423_v34 = vmul.f32 0.03125, %v3419_v30  ;;  %v9165_v30 = vld [vmem:[%s13001_s7 + $0x1b] ss:$0 sm:$0xff] }
0x1864   :  { %v12388_v4 = vsub.f32 %v3415_v50, %v3423_v34 }
0x1865   :  { %v4659_v24 = vpop.xlane.xlu1 %4658  ;;  %v3422_v35 = vpop.xlane.xlu0 %3421 }
0x1866   :  { %v4664_v36 = vmul.f32 0.03125, %v4659_v24  ;;  %v3424_v37 = vmul.f32 0.03125, %v3422_v35  ;;  %v3427_v7 = vmul.f32 %v12388_v4, %v12388_v4 }
0x1868   :  { %v12392_v38 = vsub.f32 %v4655_v22, %v4664_v36  ;;  %v12394_v39 = vsub.f32 %v3416_v31, %v3424_v37  ;;  %v3429_v40 = vsel %vm500_vm13, %v3427_v7, 0.0  ;;  %v9123_v22 = vld [vmem:[%s13001_s7 + $0x15] ss:$0 sm:$0xff]  ;;  %v9164_v31 = vld [vmem:[%s13001_s7 + $0x1a] ss:$0 sm:$0xff] }
0x1869   :  { %3430 = vadd.xlane.f32.xlu1 %v3429_v40  ;;  %v4663_v41 = vpop.xlane.xlu0 %4662  ;;  %v4883_v7 = vld [vmem:[#allocation2 + $0x1d0] sm:$0xff] }
0x186a   :  { %v4665_v42 = vmul.f32 0.03125, %v4663_v41  ;;  %v4668_v43 = vmul.f32 %v12392_v38, %v12392_v38  ;;  %v3428_v44 = vmul.f32 %v12394_v39, %v12394_v39 }
0x186c   :  { %v12401_v3 = vsub.f32 %v4656_v1, %v4665_v42  ;;  %v4670_v63 = vsel %vm500_vm13, %v4668_v43, 0.0  ;;  %v3432_v58 = vsel %vm500_vm13, %v3428_v44, 0.0  ;;  %v9169_v42 = vld [vmem:[%s13001_s7 + $0x1d] ss:$0 sm:$0xff] }
0x186d   :  { %4671 = vadd.xlane.f32.xlu1 %v4670_v63  ;;  %3433 = vadd.xlane.f32.xlu0 %v3432_v58  ;;  %v9166_v58 = vld [vmem:[%s13001_s7 + $0x1c] ss:$0 sm:$0xff] }
0x186e   :  { %v4669_v2 = vmul.f32 %v12401_v3, %v12401_v3 }
0x1870   :  { %v4673_v46 = vsel %vm4660_vm10, %v4669_v2, 0.0 }
0x1871   :  { %4674 = vadd.xlane.f32.xlu0 %v4673_v46 }
0x18f6   :  { %v3431_v20 = vpop.xlane.xlu1 %3430 }
0x18f7   :  { %v3435_v16 = vmul.f32 0.03125, %v3431_v20 }
0x18f9   :  { %v3437_v15 = vadd.f32 1e-05, %v3435_v16 }
0x18fa   :  { %v4672_v8 = vpop.xlane.xlu1 %4671  ;;  %v3434_v9 = vpop.xlane.xlu0 %3433 }
0x18fb   :  { %11444 = vrsqrt.f32 %v3437_v15  ;;  %v4676_v10 = vmul.f32 0.03125, %v4672_v8  ;;  %v3436_v11 = vmul.f32 0.03125, %v3434_v9 }
0x18fd   :  { %v4678_v12 = vadd.f32 1e-05, %v4676_v10  ;;  %v3438_v14 = vadd.f32 1e-05, %v3436_v11 }
0x18fe   :  { %v4675_v13 = vpop.xlane.xlu0 %4674 }
0x18ff   :  { %11446 = vrsqrt.f32 %v4678_v12  ;;  %v4677_v19 = vmul.f32 0.03125, %v4675_v13 }
0x1900   :  { %11448 = vrsqrt.f32 %v3438_v14 }
0x1901   :  { %v4679_v51 = vadd.f32 1e-05, %v4677_v19 }
0x1903   :  { %11450 = vrsqrt.f32 %v4679_v51 }
0x1905   :  { %v11445_v50 = vpop.eup %11444 }
0x1906   :  { %v3441_v21 = vmul.f32 %v11445_v50, %v12388_v4 }
0x1908   :  { %v3448_v62 = vmul.f32 %v9122_v17, %v3441_v21 }
0x1909   :  { %v11447_v23 = vpop.eup %11446 }
0x190a   :  { %v11449_v1 = vpop.eup %11448  ;;  %v12418_v27 = vadd.f32 %v9123_v22, %v3448_v62  ;;  %v4682_v28 = vmul.f32 %v11447_v23, %v12392_v38  ;;  %v4884_v38 = vld [vmem:[#allocation2 + $0x1d8] sm:$0xff] }
0x190b   :  { %v3442_v29 = vmul.f32 %v11449_v1, %v12394_v39  ;;  %v10876_v41 = vpack.c.bf16 %v4884_v38, %v4883_v7 }
0x190c   :  { %10192 = vmatprep.mubr.msk.f32.mxu0 %vm500_vm13, %v12418_v27  ;;  %v4689_v34 = vmul.f32 %v9164_v31, %v4682_v28 }
0x190d   :  { %v11451_v4 = vpop.eup %11450  ;;  %v3449_v24 = vmul.f32 %v9122_v17, %v3442_v29 }
0x190e   :  { %v4683_v35 = vmul.f32 %v11451_v4, %v12401_v3  ;;  %v12428_v36 = vadd.f32 %v9165_v30, %v4689_v34 }
0x190f   :  { %v12430_v37 = vadd.f32 %v9123_v22, %v3449_v24 }
0x1910   :  { %v4690_v40 = vmul.f32 %v9164_v31, %v4683_v35  ;;  %10181 = vmatprep.mubr.msk.f32.mxu1 %vm500_vm13, %v12428_v36 }
0x1911   :  { %10193 = vmatmul.mubr.msk.f32.vlgmr.msra.gmra.mrb[38].mxu0 %vm500_vm13, %v12430_v37 }
0x1912   :  { %v12436_v39 = vadd.f32 %v9165_v30, %v4690_v40 }
0x1914   :  { %10182 = vmatmul.mubr.msk.f32.vlgmr.msra.gmra.mrb[50].mxu1 %vm500_vm13, %v12436_v39 }
0x1915   :  { %10875 = vmatpush3.bf16.msra.mxu1 %v10872_v0  ;;  %10203 = vmatprep.mubr.msk.f32.mxu1 %vm500_vm13, %v12418_v27 }
0x1916   :  { %10877 = vmatprep.subr.bf16.mxu1 %v10876_v41 }
0x1919   :  { %10879 = vmatpush3.bf16.msra.mxu1 %v10876_v41 }
0x191c   :  { %10204 = vmatmul.mubr.msk.f32.vlgmr.msra.gmra.mrb[52].mxu1 %vm500_vm13, %v12430_v37 }
0x19e4   :  { %v10194_v43 = vpop.f32.mrb[38].mxu0 }
0x19e5   :  { %v4877_v44 = vadd.f32 %v10194_v43, %v9169_v42  ;;  %v4871_v3 = vpop.f32.mrb[39].mxu0 }
0x19e6   :  { %v4872_v63 = vadd.f32 %v9169_v42, %v4871_v3 }
0x19e7   :  { %v10183_v2 = vpop.f32.mrb[50].mxu1 }
0x19e8   :  { %v4780_v46 = vpop.f32.mrb[51].mxu1  ;;  %v11247_v18 = vpack.i.bf16 %v4877_v44, %v4872_v63  ;;  %v10880_v47 = vpack.c.bf16 %v4877_v44, %v4872_v63  ;;  %v4786_v49 = vadd.f32 %v10183_v2, %v9166_v58 }
0x19e9   :  { %v4781_v48 = vadd.f32 %v9166_v58, %v4780_v46 }
0x19ea   :  { %11248 = vrot.lane.b32.xlu0 %v11247_v18, %s11604_s18  ;;  %11243 = vrot.lane.b32.xlu1 %v11247_v18, %s11605_s19 }
0x19eb   :  { %10882 = vmatprep.subr.msk.bf16.mxu0 %vm11845_vm2, %v10880_v47  ;;  %10210 = vmatprep.mubr.msk.f32.mxu0 %vm800_vm1, %v4781_v48 }
0x19ec   :  { %10885 = vmatpush3.bf16.xpose.msk.msra.mxu0 %vm11845_vm2, %v10880_v47 }
0x19ee   :  { %11253 = vrot.lane.b32.xlu1 %v11247_v18, %s11606_s22  ;;  %4969 = vrot.lane.b32.xlu0 %v4786_v49, %s11605_s19 }
0x19ef   :  { %v10205_v54 = vpop.f32.mrb[52].mxu1 }
0x19f0   :  { %v4962_v53 = vadd.f32 %v10205_v54, %v9172_v52  ;;  %v4956_v55 = vpop.f32.mrb[53].mxu1 }
0x19f1   :  { %v4957_v56 = vadd.f32 %v9172_v52, %v4956_v55 }
0x19f2   :  { %4973 = vrot.lane.b32.xlu0 %v4786_v49, %s11604_s18  ;;  %4967 = vrot.lane.b32.xlu1 %v4781_v48, %s11605_s19 }
0x19f3   :  { %10211 = vmatmul.mubr.msk.f32.vlgmr.msra.gmra.mrb[40].mxu0 %vm800_vm1, %v4786_v49  ;;  %v10904_v57 = vpack.c.bf16 %v4962_v53, %v4957_v56  ;;  %v12465_v59 = vpack.i.bf16 %v4962_v53, %v4957_v56 }
0x19f6   :  { %4977 = vrot.lane.b32.xlu0 %v4786_v49, %s11606_s22  ;;  %4971 = vrot.lane.b32.xlu1 %v4781_v48, %s11604_s18 }
0x19fa   :  { %4975 = vrot.lane.b32.xlu1 %v4781_v48, %s11606_s22 }
0x1a5c   :  { %v11244_v60 = vpop.permute.xlu1 %11243  ;;  %v11249_v61 = vpop.permute.xlu0 %11248 }
0x1a5d   :  { %v11246_v5 = vunpack.i.h.bf16 %v11244_v60  ;;  %v11245_v0 = vunpack.i.l.bf16 %v11244_v60  ;;  %v11251_v20 = vunpack.i.h.bf16 %v11249_v61  ;;  %v11250_v16 = vunpack.i.l.bf16 %v11249_v61 }
0x1a5f   :  { %v10886_v15 = vpack.c.bf16 %v11246_v5, %v11245_v0  ;;  %v10892_v8 = vpack.c.bf16 %v11251_v20, %v11250_v16 }
0x1a60   :  { %v11254_v9 = vpop.permute.xlu1 %11253  ;;  %v4970_v14 = vpop.permute.xlu0 %4969 }
0x1a61   :  { %v11256_v10 = vunpack.i.h.bf16 %v11254_v9  ;;  %v11255_v11 = vunpack.i.l.bf16 %v11254_v9  ;;  %10888 = vmatprep.subr.msk.bf16.mxu1 %vm11845_vm2, %v10886_v15  ;;  %10894 = vmatprep.subr.msk.bf16.mxu0 %vm11845_vm2, %v10892_v8 }
0x1a62   :  { %10891 = vmatpush3.bf16.xpose.msk.msra.mxu1 %vm11845_vm2, %v10886_v15  ;;  %10897 = vmatpush3.bf16.xpose.msk.msra.mxu0 %vm11845_vm2, %v10892_v8 }
0x1a63   :  { %v10898_v12 = vpack.c.bf16 %v11256_v10, %v11255_v11  ;;  %10905 = vmatprep.subr.bf16.mxu0 %v10904_v57 }
0x1a64   :  { %v4968_v13 = vpop.permute.xlu1 %4967  ;;  %v4974_v51 = vpop.permute.xlu0 %4973 }
0x1a65   :  { %10217 = vmatprep.mubr.msk.f32.mxu1 %vm800_vm1, %v4968_v13  ;;  %10900 = vmatprep.subr.msk.bf16.mxu1 %vm11845_vm2, %v10898_v12 }
0x1a68   :  { %v4972_v19 = vpop.permute.xlu1 %4971  ;;  %v4978_v17 = vpop.permute.xlu0 %4977 }
0x1a69   :  { %10218 = vmatmul.mubr.msk.f32.vlgmr.msra.gmra.mrb[54].mxu1 %vm800_vm1, %v4970_v14  ;;  %10224 = vmatprep.mubr.msk.f32.mxu0 %vm800_vm1, %v4972_v19 }
0x1a6a   :  { %10225 = vmatmul.mubr.msk.f32.vlgmr.msra.gmra.mrb[42].mxu0 %vm800_vm1, %v4974_v51  ;;  %10903 = vmatpush3.bf16.xpose.msk.msra.mxu1 %vm11845_vm2, %v10898_v12 }
0x1a6b   :  { %10907 = vmatpush3.bf16.msra.mxu0 %v10904_v57 }
0x1a6c   :  { %v4976_v50 = vpop.permute.xlu1 %4975 }
0x1a6d   :  { %10231 = vmatprep.mubr.msk.f32.mxu1 %vm800_vm1, %v4976_v50 }
0x1a71   :  { %10232 = vmatmul.mubr.msk.f32.vlgmr.msra.gmra.mrb[56].mxu1 %vm800_vm1, %v4978_v17 }
0x1ac6   :  { %v10212_v21 = vpop.f32.mrb[40].mxu0 }
0x1ac7   :  { %v5346_v22 = vmul.f32 0.35355338, %v10212_v21  ;;  %v5087_v62 = vpop.f32.mrb[41].mxu0 }
0x1ac8   :  { %v5345_v23 = vmul.f32 0.35355338, %v5087_v62 }
0x1ac9   :  { %v5354_v31 = vadd.f32 %v5346_v22, %v11828_v26 }
0x1aca   :  { %v5353_v1 = vadd.f32 %v5345_v23, %v11825_v25 }
0x1acb   :  { %v5365_v28 = vsel %vm5364_vm11, %v5354_v31, -inf }
0x1acc   :  { %5366 = vmax.xlane.f32.xlu0 %v5365_v28  ;;  %v5361_v29 = vsel %vm1149_vm3, %v5353_v1, -inf }
0x1acd   :  { %5362 = vmax.xlane.f32.xlu1 %v5361_v29 }
0x1b3c   :  { %v10219_v30 = vpop.f32.mrb[54].mxu1 }
0x1b3d   :  { %v5348_v34 = vmul.f32 0.35355338, %v10219_v30  ;;  %v5170_v4 = vpop.f32.mrb[55].mxu1  ;;  %v10226_v24 = vpop.f32.mrb[42].mxu0 }
0x1b3e   :  { %v5347_v35 = vmul.f32 0.35355338, %v5170_v4  ;;  %v5350_v7 = vmul.f32 0.35355338, %v10226_v24  ;;  %v5253_v38 = vpop.f32.mrb[43].mxu0 }
0x1b3f   :  { %v5356_v40 = vadd.f32 %v5348_v34, %v11828_v26  ;;  %v5349_v41 = vmul.f32 0.35355338, %v5253_v38 }
0x1b40   :  { %v5355_v42 = vadd.f32 %v5347_v35, %v11825_v25  ;;  %v5358_v43 = vadd.f32 %v5350_v7, %v11828_v26 }
0x1b41   :  { %v5371_v44 = vsel %vm5364_vm11, %v5356_v40, -inf  ;;  %v5357_v3 = vadd.f32 %v5349_v41, %v11825_v25 }
0x1b42   :  { %5372 = vmax.xlane.f32.xlu1 %v5371_v44  ;;  %v5368_v63 = vsel %vm1149_vm3, %v5355_v42, -inf  ;;  %v5377_v18 = vsel %vm5364_vm11, %v5358_v43, -inf }
0x1b43   :  { %5369 = vmax.xlane.f32.xlu0 %v5368_v63  ;;  %v5374_v48 = vsel %vm1149_vm3, %v5357_v3, -inf }
0x1b44   :  { %v10233_v58 = vpop.f32.mrb[56].mxu1 }
0x1b45   :  { %v5352_v2 = vmul.f32 0.35355338, %v10233_v58  ;;  %v5336_v46 = vpop.f32.mrb[57].mxu1 }
0x1b46   :  { %v5351_v47 = vmul.f32 0.35355338, %v5336_v46  ;;  %5378 = vmax.xlane.f32.xlu1 %v5377_v18 }
0x1b47   :  { %v5360_v49 = vadd.f32 %v5352_v2, %v11828_v26  ;;  %5375 = vmax.xlane.f32.xlu0 %v5374_v48 }
0x1b48   :  { %v5359_v52 = vadd.f32 %v5351_v47, %v11825_v25 }
0x1b49   :  { %v5383_v54 = vsel %vm5364_vm11, %v5360_v49, -inf }
0x1b4a   :  { %5384 = vmax.xlane.f32.xlu1 %v5383_v54  ;;  %v5380_v53 = vsel %vm1149_vm3, %v5359_v52, -inf }
0x1b4b   :  { %5381 = vmax.xlane.f32.xlu0 %v5380_v53 }
0x1b59   :  { %v5367_v55 = vpop.xlane.xlu0 %5366 }
0x1b5a   :  { %v5387_v56 = vsub.f32 %v5354_v31, %v5367_v55  ;;  %v5363_v57 = vpop.xlane.xlu1 %5362 }
0x1b5b   :  { %v5386_v60 = vsub.f32 %v5353_v1, %v5363_v57 }
0x1b5c   :  { %v5396_v61 = vmul.f32 1.442695, %v5387_v56 }
0x1b5d   :  { %v5394_v5 = vmul.f32 1.442695, %v5386_v60 }
0x1b5e   :  { %11452 = vpow2.f32 %v5396_v61 }
0x1b5f   :  { %11454 = vpow2.f32 %v5394_v5 }
0x1b68   :  { %v11453_v0 = vpop.eup %11452 }
0x1b69   :  { %v11455_v20 = vpop.eup %11454  ;;  %v5413_v16 = vsel %vm5364_vm11, %v11453_v0, 0.0 }
0x1b6a   :  { %5414 = vadd.xlane.f32.xlu1 %v5413_v16  ;;  %v5410_v15 = vsel %vm1149_vm3, %v11455_v20, 0.0 }
0x1b6b   :  { %5411 = vadd.xlane.f32.xlu0 %v5410_v15 }
0x1bcf   :  { %v5373_v8 = vpop.xlane.xlu1 %5372 }
0x1bd0   :  { %v5389_v9 = vsub.f32 %v5356_v40, %v5373_v8  ;;  %v5370_v10 = vpop.xlane.xlu0 %5369 }
0x1bd1   :  { %v5388_v11 = vsub.f32 %v5355_v42, %v5370_v10 }
0x1bd2   :  { %v5400_v12 = vmul.f32 1.442695, %v5389_v9 }
0x1bd3   :  { %v5398_v14 = vmul.f32 1.442695, %v5388_v11  ;;  %v5379_v13 = vpop.xlane.xlu1 %5378 }
0x1bd4   :  { %11456 = vpow2.f32 %v5400_v12  ;;  %v5391_v19 = vsub.f32 %v5358_v43, %v5379_v13  ;;  %v5376_v51 = vpop.xlane.xlu0 %5375 }
0x1bd5   :  { %11458 = vpow2.f32 %v5398_v14  ;;  %v5390_v50 = vsub.f32 %v5357_v3, %v5376_v51 }
0x1bd6   :  { %v5404_v17 = vmul.f32 1.442695, %v5391_v19 }
0x1bd7   :  { %v5402_v21 = vmul.f32 1.442695, %v5390_v50  ;;  %v5385_v22 = vpop.xlane.xlu1 %5384 }
0x1bd8   :  { %11460 = vpow2.f32 %v5404_v17  ;;  %v5393_v62 = vsub.f32 %v5360_v49, %v5385_v22  ;;  %v5382_v23 = vpop.xlane.xlu0 %5381 }
0x1bd9   :  { %11462 = vpow2.f32 %v5402_v21  ;;  %v5392_v31 = vsub.f32 %v5359_v52, %v5382_v23  ;;  %v5805_v23 = vld [vmem:[#allocation2 + $0x1e0] sm:$0xff] }
0x1bda   :  { %v5408_v1 = vmul.f32 1.442695, %v5393_v62 }
0x1bdb   :  { %v5406_v28 = vmul.f32 1.442695, %v5392_v31  ;;  %v5806_v31 = vld [vmem:[#allocation2 + $0x1e8] sm:$0xff] }
0x1bdc   :  { %11464 = vpow2.f32 %v5408_v1  ;;  %v10920_v1 = vpack.c.bf16 %v5806_v31, %v5805_v23  ;;  %v9216_v23 = vld [vmem:[%s12999_s5 + $0xa8] sm:$0xff] }
0x1bdd   :  { %11466 = vpow2.f32 %v5406_v28  ;;  %v5807_v28 = vld [vmem:[#allocation2 + $0x1f0] sm:$0xff] }
0x1bde   :  { %v12506_v29 = vpop.eup %11456 }
0x1bdf   :  { %v11459_v30 = vpop.eup %11458  ;;  %v5419_v34 = vsel %vm5364_vm11, %v12506_v29, 0.0 }
0x1be0   :  { %5420 = vadd.xlane.f32.xlu1 %v5419_v34  ;;  %v5416_v4 = vsel %vm1149_vm3, %v11459_v30, 0.0 }
0x1be1   :  { %5417 = vadd.xlane.f32.xlu0 %v5416_v4 }
0x1be2   :  { %v11461_v24 = vpop.eup %11460 }
0x1be3   :  { %v11463_v35 = vpop.eup %11462  ;;  %v5425_v7 = vsel %vm5364_vm11, %v11461_v24, 0.0 }
0x1be4   :  { %5426 = vadd.xlane.f32.xlu1 %v5425_v7  ;;  %v5422_v38 = vsel %vm1149_vm3, %v11463_v35, 0.0 }
0x1be5   :  { %5423 = vadd.xlane.f32.xlu0 %v5422_v38 }
0x1be6   :  { %v12513_v40 = vpop.eup %11464 }
0x1be7   :  { %v11467_v41 = vpop.eup %11466  ;;  %v5431_v42 = vsel %vm5364_vm11, %v12513_v40, 0.0 }
0x1be8   :  { %5432 = vadd.xlane.f32.xlu1 %v5431_v42  ;;  %v5428_v43 = vsel %vm1149_vm3, %v11467_v41, 0.0 }
0x1be9   :  { %5429 = vadd.xlane.f32.xlu0 %v5428_v43 }
0x1bf7   :  { %v5415_v44 = vpop.xlane.xlu1 %5414 }
0x1bf8   :  { %11468 = vrcp.f32 %v5415_v44  ;;  %v5412_v3 = vpop.xlane.xlu0 %5411 }
0x1bf9   :  { %11470 = vrcp.f32 %v5412_v3  ;;  %11263 = vrot.lane.b32.xlu1 %v12465_v59, %s11604_s18 }
0x1bfd   :  { %11268 = vrot.lane.b32.xlu1 %v12465_v59, %s11606_s22 }
0x1bff   :  { %11258 = vrot.lane.b32.xlu0 %v12465_v59, %s11605_s19 }
0x1c02   :  { %v11469_v63 = vpop.eup %11468 }
0x1c03   :  { %v11471_v58 = vpop.eup %11470  ;;  %v5443_v46 = vmul.f32 %v11469_v63, %v11453_v0 }
0x1c04   :  { %v5442_v2 = vmul.f32 %v11471_v58, %v11455_v20 }
0x1c06   :  { %10238 = vmatprep.mubr.msk.f32.mxu0 %vm1149_vm3, %v5442_v2 }
0x1c07   :  { %10239 = vmatmul.mubr.msk.f32.vlgmr.msra.gmra.mrb[44].mxu0 %vm1149_vm3, %v5443_v46 }
0x1c6d   :  { %v5421_v18 = vpop.xlane.xlu1 %5420 }
0x1c6e   :  { %v5418_v47 = vpop.xlane.xlu0 %5417 }
0x1c6f   :  { %11472 = vrcp.f32 %v5418_v47 }
0x1c71   :  { %v5427_v48 = vpop.xlane.xlu1 %5426 }
0x1c72   :  { %11474 = vrcp.f32 %v5427_v48  ;;  %v5424_v49 = vpop.xlane.xlu0 %5423  ;;  %v9199_v48 = vld [vmem:[%s13001_s7 + $0x1f] ss:$0 sm:$0xff] }
0x1c73   :  { %11476 = vrcp.f32 %v5424_v49 }
0x1c74   :  { %11478 = vrcp.f32 %v5421_v18 }
0x1c75   :  { %v5433_v52 = vpop.xlane.xlu1 %5432 }
0x1c76   :  { %v5430_v54 = vpop.xlane.xlu0 %5429 }
0x1c77   :  { %11480 = vrcp.f32 %v5430_v54 }
0x1c78   :  { %11482 = vrcp.f32 %v5433_v52 }
0x1c79   :  { %v11473_v59 = vpop.eup %11472  ;;  %v11264_v53 = vpop.permute.xlu1 %11263 }
0x1c7a   :  { %v11266_v55 = vunpack.i.h.bf16 %v11264_v53  ;;  %v11265_v56 = vunpack.i.l.bf16 %v11264_v53  ;;  %v11259_v57 = vpop.permute.xlu0 %11258  ;;  %v5444_v60 = vmul.f32 %v11473_v59, %v11459_v30 }
0x1c7b   :  { %v11261_v61 = vunpack.i.h.bf16 %v11259_v57  ;;  %v11260_v5 = vunpack.i.l.bf16 %v11259_v57 }
0x1c7c   :  { %v11475_v0 = vpop.eup %11474  ;;  %10245 = vmatprep.mubr.msk.f32.mxu1 %vm1149_vm3, %v5444_v60  ;;  %v10912_v20 = vpack.c.bf16 %v11266_v55, %v11265_v56 }
0x1c7d   :  { %v11477_v16 = vpop.eup %11476  ;;  %v11269_v15 = vpop.permute.xlu1 %11268  ;;  %v10908_v8 = vpack.c.bf16 %v11261_v61, %v11260_v5  ;;  %v5447_v13 = vmul.f32 %v11475_v0, %v11461_v24 }
0x1c7e   :  { %v11479_v9 = vpop.eup %11478  ;;  %v11271_v10 = vunpack.i.h.bf16 %v11269_v15  ;;  %v11270_v11 = vunpack.i.l.bf16 %v11269_v15  ;;  %10913 = vmatprep.subr.bf16.mxu0 %v10912_v20  ;;  %v5446_v12 = vmul.f32 %v11477_v16, %v11463_v35 }
0x1c7f   :  { %10909 = vmatprep.subr.bf16.mxu1 %v10908_v8  ;;  %10915 = vmatpush3.bf16.msra.mxu0 %v10912_v20  ;;  %v5445_v51 = vmul.f32 %v11479_v9, %v12506_v29  ;;  %v5808_v29 = vld [vmem:[#allocation2 + $0x1f8] sm:$0xff] }
0x1c80   :  { %v10916_v14 = vpack.c.bf16 %v11271_v10, %v11270_v11  ;;  %10911 = vmatpush3.bf16.msra.mxu1 %v10908_v8  ;;  %10252 = vmatprep.mubr.msk.f32.mxu0 %vm1149_vm3, %v5446_v12  ;;  %v10924_v30 = vpack.c.bf16 %v5808_v29, %v5807_v28  ;;  %v9205_v10 = vld [vmem:[%s12998_s4 + $0x48] sm:$0xff]  ;;  %v9206_v12 = vld [vmem:[%s12998_s4 + $0x50] sm:$0xff] }
0x1c81   :  { %v11481_v19 = vpop.eup %11480  ;;  %10921 = vmatprep.subr.bf16.mxu0 %v10920_v1 }
0x1c82   :  { %v11483_v50 = vpop.eup %11482  ;;  %10253 = vmatmul.mubr.msk.f32.vlgmr.msra.gmra.mrb[46].mxu0 %vm1149_vm3, %v5447_v13  ;;  %10917 = vmatprep.subr.bf16.mxu1 %v10916_v14  ;;  %v5448_v17 = vmul.f32 %v11481_v19, %v11467_v41  ;;  %v9211_v19 = vld [vmem:[%s12999_s5 + $0x80] sm:$0xff] }
0x1c83   :  { %10246 = vmatmul.mubr.msk.f32.vlgmr.msra.gmra.mrb[58].mxu1 %vm1149_vm3, %v5445_v51  ;;  %v5449_v21 = vmul.f32 %v11483_v50, %v12513_v40  ;;  %10923 = vmatpush3.bf16.msra.mxu0 %v10920_v1  ;;  %v9212_v51 = vld [vmem:[%s12999_s5 + $0x88] sm:$0xff]  ;;  %v9213_v50 = vld [vmem:[%s12999_s5 + $0x90] sm:$0xff] }
0x1c84   :  { %10919 = vmatpush3.bf16.msra.mxu1 %v10916_v14  ;;  %10259 = vmatprep.mubr.msk.f32.mxu1 %vm1149_vm3, %v5448_v17  ;;  %v9207_v14 = vld [vmem:[%s12998_s4 + $0x58] sm:$0xff]  ;;  %v10936_v17 = vpack.c.bf16 %v9212_v51, %v9211_v19  ;;  %v6344_v51 = vld [vmem:[#allocation2 + $0x240] sm:$0xff] }
0x1c85   :  { %10925 = vmatprep.subr.bf16.mxu0 %v10924_v30  ;;  %v10932_v13 = vpack.c.bf16 %v9207_v14, %v9206_v12  ;;  %v6168_v14 = vld [vmem:[#allocation2 + $0x200] sm:$0xff] }
0x1c87   :  { %10260 = vmatmul.mubr.msk.f32.vlgmr.msra.gmra.mrb[60].mxu1 %vm1149_vm3, %v5449_v21  ;;  %10927 = vmatpush3.bf16.msra.mxu0 %v10924_v30  ;;  %v9214_v21 = vld [vmem:[%s12999_s5 + $0x98] sm:$0xff] }
0x1c88   :  { %10937 = vmatprep.subr.bf16.mxu0 %v10936_v17 }
0x1cda   :  { %v10240_v22 = vpop.f32.mrb[44].mxu0 }
0x1cdb   :  { %v5522_v62 = vpop.f32.mrb[45].mxu0 }
0x1d55   :  { %v10254_v34 = vpop.f32.mrb[46].mxu0 }
0x1d56   :  { %v10247_v4 = vpop.f32.mrb[58].mxu1  ;;  %v5684_v24 = vpop.f32.mrb[47].mxu0 }
0x1d57   :  { %5778 = vrot.lane.b32.xlu1 %v10247_v4, %s11598_s16  ;;  %v5603_v35 = vpop.f32.mrb[59].mxu1 }
0x1d58   :  { %5776 = vrot.lane.b32.xlu0 %v5603_v35, %s11598_s16  ;;  %v9202_v35 = vld [vmem:[%s13001_s7 + $0x20] ss:$0 sm:$0xff] }
0x1d5a   :  { %v10261_v7 = vpop.f32.mrb[60].mxu1 }
0x1d5b   :  { %5786 = vrot.lane.b32.xlu1 %v10254_v34, %s11607_s23  ;;  %v5765_v38 = vpop.f32.mrb[61].mxu1 }
0x1d5c   :  { %5784 = vrot.lane.b32.xlu0 %v5684_v24, %s11607_s23 }
0x1d5f   :  { %5794 = vrot.lane.b32.xlu1 %v10261_v7, %s11608_s24 }
0x1d60   :  { %5792 = vrot.lane.b32.xlu0 %v5765_v38, %s11608_s24  ;;  %v9203_v38 = vld [vmem:[%s13001_s7 + $0x21] ss:$0 sm:$0xff] }
0x1dc9   :  { %v5779_v40 = vpop.permute.xlu1 %5778 }
0x1dca   :  { %v5777_v41 = vpop.permute.xlu0 %5776  ;;  %v5799_v63 = vsel %vm800_vm1, %v10240_v22, %v5779_v40  ;;  %v10940_v22 = vpack.c.bf16 %v9214_v21, %v9213_v50  ;;  %v6345_v50 = vld [vmem:[#allocation2 + $0x248] sm:$0xff]  ;;  %v6170_v21 = vld [vmem:[#allocation2 + $0x210] sm:$0xff] }
0x1dcb   :  { %v5798_v44 = vsel %vm800_vm1, %v5522_v62, %v5777_v41  ;;  %v9215_v62 = vld [vmem:[%s12999_s5 + $0xa0] sm:$0xff] }
0x1dcc   :  { %v10944_v31 = vpack.c.bf16 %v9216_v23, %v9215_v62  ;;  %v6346_v62 = vld [vmem:[#allocation2 + $0x250] sm:$0xff] }
0x1dcd   :  { %v5787_v42 = vpop.permute.xlu1 %5786 }
0x1dce   :  { %v5785_v43 = vpop.permute.xlu0 %5784  ;;  %v5801_v46 = vsel %vm1149_vm3, %v5799_v63, %v5787_v42  ;;  %v9217_v63 = vld [vmem:[%s12999_s5 + $0xb0] sm:$0xff] }
0x1dcf   :  { %v5800_v58 = vsel %vm1149_vm3, %v5798_v44, %v5785_v43 }
0x1dd1   :  { %v5795_v3 = vpop.permute.xlu1 %5794 }
0x1dd2   :  { %v5793_v2 = vpop.permute.xlu0 %5792  ;;  %v5803_v47 = vsel %vm1590_vm12, %v5801_v46, %v5795_v3  ;;  %v9208_v46 = vld [vmem:[%s13001_s7 + $0x22] ss:$0 sm:$0xff] }
0x1dd3   :  { %v5802_v18 = vsel %vm1590_vm12, %v5800_v58, %v5793_v2  ;;  %v9218_v58 = vld [vmem:[%s12999_s5 + $0xb8] sm:$0xff] }
0x1dd4   :  { %10270 = vmatprep.mubr.msk.f32.mxu0 %vm500_vm13, %v5802_v18  ;;  %v10948_v2 = vpack.c.bf16 %v9218_v58, %v9217_v63  ;;  %v9223_v63 = vld [vmem:[%s13001_s7 + $0x25] ss:$0 sm:$0xff] }
0x1dd5   :  { %10271 = vmatmul.mubr.msk.f32.vlgmr.msra.gmra.mrb[48].mxu0 %vm500_vm13, %v5803_v47 }
0x1dd6   :  { %10939 = vmatpush3.bf16.msra.mxu0 %v10936_v17  ;;  %v10968_v17 = vpack.c.bf16 %v6345_v50, %v6344_v51 }
0x1dd7   :  { %10941 = vmatprep.subr.bf16.mxu0 %v10940_v22 }
0x1dda   :  { %10943 = vmatpush3.bf16.msra.mxu0 %v10940_v22  ;;  %v6171_v22 = vld [vmem:[#allocation2 + $0x218] sm:$0xff] }
0x1ddb   :  { %10945 = vmatprep.subr.bf16.mxu0 %v10944_v31  ;;  %v10956_v23 = vpack.c.bf16 %v6171_v22, %v6170_v21 }
0x1dde   :  { %10947 = vmatpush3.bf16.msra.mxu0 %v10944_v31  ;;  %v6347_v31 = vld [vmem:[#allocation2 + $0x258] sm:$0xff] }
0x1ddf   :  { %10949 = vmatprep.subr.bf16.mxu0 %v10948_v2 }
0x1de2   :  { %10951 = vmatpush3.bf16.msra.mxu0 %v10948_v2  ;;  %v6261_v2 = vld [vmem:[#allocation2 + $0x230] sm:$0xff] }
0x1de3   :  { %10969 = vmatprep.subr.bf16.mxu0 %v10968_v17 }
0x1ea8   :  { %v10272_v49 = vpop.f32.mrb[48].mxu0 }
0x1ea9   :  { %v5892_v52 = vadd.f32 %v10272_v49, %v9199_v48  ;;  %v5886_v54 = vpop.f32.mrb[49].mxu0 }
0x1eaa   :  { %v5887_v59 = vadd.f32 %v9199_v48, %v5886_v54 }
0x1eab   :  { %v5896_v53 = vadd.f32 %v5892_v52, %v12436_v39 }
0x1eac   :  { %v5895_v55 = vadd.f32 %v5887_v59, %v12428_v36  ;;  %v9204_v36 = vld [vmem:[%s12998_s4 + $0x40] sm:$0xff] }
0x1ead   :  { %v5900_v56 = vsel %vm4660_vm10, %v5896_v53, 0.0  ;;  %v10928_v11 = vpack.c.bf16 %v9205_v10, %v9204_v36  ;;  %v9219_v59 = vld [vmem:[%s13001_s7 + $0x23] ss:$0 sm:$0xff] }
0x1eae   :  { %5901 = vadd.xlane.f32.xlu1 %v5900_v56  ;;  %v5897_v57 = vsel %vm500_vm13, %v5895_v55, 0.0 }
0x1eaf   :  { %5898 = vadd.xlane.f32.xlu0 %v5897_v57  ;;  %10929 = vmatprep.subr.bf16.mxu1 %v10928_v11 }
0x1eb0   :  { %10931 = vmatpush3.bf16.msra.mxu1 %v10928_v11 }
0x1eb1   :  { %10933 = vmatprep.subr.bf16.mxu1 %v10932_v13 }
0x1eb4   :  { %10935 = vmatpush3.bf16.msra.mxu1 %v10932_v13  ;;  %v6169_v13 = vld [vmem:[#allocation2 + $0x208] sm:$0xff] }
0x1eb5   :  { %v10952_v19 = vpack.c.bf16 %v6169_v13, %v6168_v14 }
0x1eb7   :  { %10953 = vmatprep.subr.bf16.mxu1 %v10952_v19 }
0x1f3b   :  { %v5902_v60 = vpop.xlane.xlu1 %5901 }
0x1f3c   :  { %v5904_v61 = vmul.f32 0.03125, %v5902_v60  ;;  %v5899_v5 = vpop.xlane.xlu0 %5898 }
0x1f3d   :  { %v5903_v0 = vmul.f32 0.03125, %v5899_v5 }
0x1f3e   :  { %v5906_v20 = vsub.f32 %v5896_v53, %v5904_v61 }
0x1f3f   :  { %v5905_v16 = vsub.f32 %v5895_v55, %v5903_v0 }
0x1f40   :  { %v5908_v9 = vmul.f32 %v5906_v20, %v5906_v20 }
0x1f41   :  { %v5907_v15 = vmul.f32 %v5905_v16, %v5905_v16 }
0x1f42   :  { %v5912_v39 = vsel %vm4660_vm10, %v5908_v9, 0.0 }
0x1f43   :  { %v5909_v8 = vsel %vm500_vm13, %v5907_v15, 0.0 }
0x1f44   :  { %5910 = vadd.xlane.f32.xlu0 %v5909_v8 }
0x1f48   :  { %5913 = vadd.xlane.f32.xlu0 %v5912_v39 }
0x1fd1   :  { %v5911_v1 = vpop.xlane.xlu0 %5910 }
0x1fd2   :  { %v5915_v28 = vmul.f32 0.03125, %v5911_v1  ;;  %v10972_v1 = vpack.c.bf16 %v6347_v31, %v6346_v62 }
0x1fd4   :  { %v5917_v29 = vadd.f32 1e-05, %v5915_v28  ;;  %v6259_v28 = vld [vmem:[#allocation2 + $0x220] sm:$0xff] }
0x1fd5   :  { %v5914_v30 = vpop.xlane.xlu0 %5913 }
0x1fd6   :  { %11484 = vrsqrt.f32 %v5917_v29  ;;  %v5916_v34 = vmul.f32 0.03125, %v5914_v30  ;;  %v6260_v29 = vld [vmem:[#allocation2 + $0x228] sm:$0xff] }
0x1fd7   :  { %v10960_v30 = vpack.c.bf16 %v6260_v29, %v6259_v28 }
0x1fd8   :  { %v5918_v4 = vadd.f32 1e-05, %v5916_v34 }
0x1fda   :  { %11486 = vrsqrt.f32 %v5918_v4 }
0x1fe0   :  { %v11485_v24 = vpop.eup %11484 }
0x1fe1   :  { %v5921_v7 = vmul.f32 %v11485_v24, %v5905_v16 }
0x1fe3   :  { %v5928_v40 = vmul.f32 %v9202_v35, %v5921_v7 }
0x1fe4   :  { %v11487_v41 = vpop.eup %11486 }
0x1fe5   :  { %v5922_v42 = vmul.f32 %v11487_v41, %v5906_v20  ;;  %v5935_v43 = vadd.f32 %v9203_v38, %v5928_v40  ;;  %v9222_v41 = vld [vmem:[%s13001_s7 + $0x24] ss:$0 sm:$0xff] }
0x1fe7   :  { %v5929_v44 = vmul.f32 %v9202_v35, %v5922_v42  ;;  %10281 = vmatprep.mubr.msk.f32.mxu1 %vm500_vm13, %v5935_v43 }
0x1fe9   :  { %v5936_v3 = vadd.f32 %v9203_v38, %v5929_v44 }
0x1feb   :  { %10282 = vmatmul.mubr.msk.f32.vlgmr.msra.gmra.mrb[62].mxu1 %vm500_vm13, %v5936_v3 }
0x1fec   :  { %10955 = vmatpush3.bf16.msra.mxu1 %v10952_v19 }
0x1fed   :  { %10957 = vmatprep.subr.bf16.mxu1 %v10956_v23 }
0x1ff0   :  { %10959 = vmatpush3.bf16.msra.mxu1 %v10956_v23 }
0x1ff1   :  { %10961 = vmatprep.subr.bf16.mxu1 %v10960_v30 }
0x20be   :  { %v10283_v18 = vpop.f32.mrb[62].mxu1 }
0x20bf   :  { %v6025_v47 = vadd.f32 %v10283_v18, %v9208_v46  ;;  %v6019_v48 = vpop.f32.mrb[63].mxu1 }
0x20c0   :  { %v6020_v49 = vadd.f32 %v9208_v46, %v6019_v48  ;;  %v6262_v46 = vld [vmem:[#allocation2 + $0x238] sm:$0xff] }
0x20c1   :  { %v6029_v54 = vmax.f32 %v6025_v47, 0.0  ;;  %v10964_v48 = vpack.c.bf16 %v6262_v46, %v6261_v2 }
0x20c2   :  { %v6028_v52 = vmax.f32 %v6020_v49, 0.0  ;;  %v9230_v49 = vld [vmem:[%s13001_s7 + $0x28] ss:$0 sm:$0xff] }
0x20c4   :  { %10300 = vmatprep.mubr.msk.f32.mxu0 %vm96_vm0, %v6028_v52  ;;  %v9224_v52 = vld [vmem:[%s13001_s7 + $0x26] ss:$0 sm:$0xff] }
0x20c5   :  { %10301 = vmatmul.mubr.msk.f32.vlgmr.msra.gmra.mrb[50].mxu0 %vm96_vm0, %v6029_v54 }
0x20c6   :  { %10971 = vmatpush3.bf16.msra.mxu0 %v10968_v17 }
0x20c7   :  { %10973 = vmatprep.subr.bf16.mxu0 %v10972_v1 }
0x20ca   :  { %10975 = vmatpush3.bf16.msra.mxu0 %v10972_v1 }
0x2198   :  { %v10302_v53 = vpop.f32.mrb[50].mxu0 }
0x2199   :  { %v6122_v55 = vadd.f32 %v10302_v53, %v9219_v59  ;;  %v6116_v56 = vpop.f32.mrb[51].mxu0 }
0x219a   :  { %v6117_v57 = vadd.f32 %v9219_v59, %v6116_v56 }
0x219b   :  { %v6126_v60 = vadd.f32 %v6122_v55, %v5936_v3 }
0x219c   :  { %v6125_v61 = vadd.f32 %v6117_v57, %v5935_v43 }
0x219d   :  { %v6130_v5 = vsel %vm4660_vm10, %v6126_v60, 0.0 }
0x219e   :  { %6131 = vadd.xlane.f32.xlu0 %v6130_v5  ;;  %v6127_v0 = vsel %vm500_vm13, %v6125_v61, 0.0 }
0x219f   :  { %6128 = vadd.xlane.f32.xlu1 %v6127_v0  ;;  %v9227_v0 = vld [vmem:[%s13001_s7 + $0x27] ss:$0 sm:$0xff] }
0x222b   :  { %v6132_v20 = vpop.xlane.xlu0 %6131 }
0x222c   :  { %v6134_v16 = vmul.f32 0.03125, %v6132_v20  ;;  %v6129_v15 = vpop.xlane.xlu1 %6128 }
0x222d   :  { %v6133_v8 = vmul.f32 0.03125, %v6129_v15 }
0x222e   :  { %v6136_v9 = vsub.f32 %v6126_v60, %v6134_v16 }
0x222f   :  { %v6135_v39 = vsub.f32 %v6125_v61, %v6133_v8 }
0x2230   :  { %v6138_v36 = vmul.f32 %v6136_v9, %v6136_v9 }
0x2231   :  { %v6137_v10 = vmul.f32 %v6135_v39, %v6135_v39 }
0x2232   :  { %v6142_v11 = vsel %vm4660_vm10, %v6138_v36, 0.0 }
0x2233   :  { %6143 = vadd.xlane.f32.xlu0 %v6142_v11  ;;  %v6139_v12 = vsel %vm500_vm13, %v6137_v10, 0.0 }
0x2234   :  { %6140 = vadd.xlane.f32.xlu1 %v6139_v12 }
0x22c0   :  { %v6144_v34 = vpop.xlane.xlu0 %6143 }
0x22c1   :  { %v6146_v4 = vmul.f32 0.03125, %v6144_v34  ;;  %v6141_v24 = vpop.xlane.xlu1 %6140 }
0x22c2   :  { %v6145_v35 = vmul.f32 0.03125, %v6141_v24 }
0x22c3   :  { %v6148_v7 = vadd.f32 1e-05, %v6146_v4 }
0x22c4   :  { %v6147_v38 = vadd.f32 1e-05, %v6145_v35 }
0x22c5   :  { %11488 = vrsqrt.f32 %v6148_v7 }
0x22c6   :  { %11490 = vrsqrt.f32 %v6147_v38 }
0x22cf   :  { %v11489_v40 = vpop.eup %11488 }
0x22d0   :  { %v11491_v42 = vpop.eup %11490  ;;  %v6152_v43 = vmul.f32 %v11489_v40, %v6136_v9 }
0x22d1   :  { %v6151_v44 = vmul.f32 %v11491_v42, %v6135_v39 }
0x22d2   :  { %v6159_v3 = vmul.f32 %v9222_v41, %v6152_v43 }
0x22d3   :  { %v6158_v58 = vmul.f32 %v9222_v41, %v6151_v44 }
0x22d4   :  { %v12621_v47 = vadd.f32 %v9223_v63, %v6159_v3 }
0x22d5   :  { %v12619_v18 = vadd.f32 %v9223_v63, %v6158_v58 }
0x22d7   :  { %10311 = vmatprep.mubr.msk.f32.mxu1 %vm500_vm13, %v12619_v18  ;;  %10333 = vmatprep.mubr.msk.f32.mxu0 %vm500_vm13, %v12619_v18 }
0x22d8   :  { %10312 = vmatmul.mubr.msk.f32.vlgmr.msra.gmra.mrb[64].mxu1 %vm500_vm13, %v12621_v47  ;;  %10334 = vmatmul.mubr.msk.f32.vlgmr.msra.gmra.mrb[52].mxu0 %vm500_vm13, %v12621_v47 }
0x22d9   :  { %10963 = vmatpush3.bf16.msra.mxu1 %v10960_v30  ;;  %10322 = vmatprep.mubr.msk.f32.mxu1 %vm500_vm13, %v12619_v18 }
0x22da   :  { %10965 = vmatprep.subr.bf16.mxu1 %v10964_v48 }
0x22dd   :  { %10967 = vmatpush3.bf16.msra.mxu1 %v10964_v48 }
0x22e0   :  { %10323 = vmatmul.mubr.msk.f32.vlgmr.msra.gmra.mrb[66].mxu1 %vm500_vm13, %v12621_v47 }
0x23ab   :  { %v10313_v54 = vpop.f32.mrb[64].mxu1  ;;  %v10335_v59 = vpop.f32.mrb[52].mxu0 }
0x23ac   :  { %v6425_v53 = vadd.f32 %v10335_v59, %v9230_v49  ;;  %v6249_v55 = vpop.f32.mrb[65].mxu1  ;;  %v6419_v56 = vpop.f32.mrb[53].mxu0  ;;  %v6255_v36 = vadd.f32 %v10313_v54, %v9224_v52 }
0x23ad   :  { %v6250_v57 = vadd.f32 %v9224_v52, %v6249_v55  ;;  %v6420_v60 = vadd.f32 %v9230_v49, %v6419_v56 }
0x23af   :  { %10340 = vmatprep.mubr.msk.f32.mxu1 %vm800_vm1, %v6250_v57  ;;  %v11000_v61 = vpack.c.bf16 %v6425_v53, %v6420_v60  ;;  %v12642_v5 = vpack.i.bf16 %v6425_v53, %v6420_v60 }
0x23b3   :  { %v10324_v20 = vpop.f32.mrb[66].mxu1 }
0x23b4   :  { %v6340_v16 = vadd.f32 %v10324_v20, %v9227_v0  ;;  %v6334_v15 = vpop.f32.mrb[67].mxu1 }
0x23b5   :  { %v6335_v8 = vadd.f32 %v9227_v0, %v6334_v15 }
0x23b7   :  { %v11277_v9 = vpack.i.bf16 %v6340_v16, %v6335_v8  ;;  %v10976_v39 = vpack.c.bf16 %v6340_v16, %v6335_v8 }
0x23b9   :  { %11278 = vrot.lane.b32.xlu0 %v11277_v9, %s11604_s18  ;;  %11273 = vrot.lane.b32.xlu1 %v11277_v9, %s11605_s19 }
0x23ba   :  { %10978 = vmatprep.subr.msk.bf16.mxu1 %vm11845_vm2, %v10976_v39 }
0x23bb   :  { %10981 = vmatpush3.bf16.xpose.msk.msra.mxu1 %vm11845_vm2, %v10976_v39 }
0x23bd   :  { %6432 = vrot.lane.b32.xlu0 %v6255_v36, %s11605_s19  ;;  %11283 = vrot.lane.b32.xlu1 %v11277_v9, %s11606_s22 }
0x23c1   :  { %6436 = vrot.lane.b32.xlu0 %v6255_v36, %s11604_s18  ;;  %6430 = vrot.lane.b32.xlu1 %v6250_v57, %s11605_s19 }
0x23c2   :  { %10341 = vmatmul.mubr.msk.f32.vlgmr.msra.gmra.mrb[68].mxu1 %vm800_vm1, %v6255_v36 }
0x23c5   :  { %6440 = vrot.lane.b32.xlu0 %v6255_v36, %s11606_s22  ;;  %6434 = vrot.lane.b32.xlu1 %v6250_v57, %s11604_s18 }
0x23c9   :  { %6438 = vrot.lane.b32.xlu1 %v6250_v57, %s11606_s22 }
0x242b   :  { %v11279_v10 = vpop.permute.xlu0 %11278  ;;  %v11274_v11 = vpop.permute.xlu1 %11273 }
0x242c   :  { %v11281_v12 = vunpack.i.h.bf16 %v11279_v10  ;;  %v11280_v14 = vunpack.i.l.bf16 %v11279_v10  ;;  %v11276_v13 = vunpack.i.h.bf16 %v11274_v11  ;;  %v11275_v19 = vunpack.i.l.bf16 %v11274_v11 }
0x242e   :  { %v10988_v51 = vpack.c.bf16 %v11281_v12, %v11280_v14  ;;  %v10982_v50 = vpack.c.bf16 %v11276_v13, %v11275_v19 }
0x242f   :  { %v11284_v17 = vpop.permute.xlu1 %11283  ;;  %v6433_v62 = vpop.permute.xlu0 %6432 }
0x2430   :  { %v11286_v21 = vunpack.i.h.bf16 %v11284_v17  ;;  %v11285_v22 = vunpack.i.l.bf16 %v11284_v17  ;;  %10984 = vmatprep.subr.msk.bf16.mxu0 %vm11845_vm2, %v10982_v50  ;;  %10990 = vmatprep.subr.msk.bf16.mxu1 %vm11845_vm2, %v10988_v51 }
0x2431   :  { %10987 = vmatpush3.bf16.xpose.msk.msra.mxu0 %vm11845_vm2, %v10982_v50  ;;  %10993 = vmatpush3.bf16.xpose.msk.msra.mxu1 %vm11845_vm2, %v10988_v51 }
0x2432   :  { %v10994_v23 = vpack.c.bf16 %v11286_v21, %v11285_v22  ;;  %11002 = vmatprep.subr.msk.bf16.mxu1 %vm12280_vm7, %v11000_v61 }
0x2433   :  { %v6431_v31 = vpop.permute.xlu1 %6430  ;;  %v6437_v28 = vpop.permute.xlu0 %6436 }
0x2434   :  { %10347 = vmatprep.mubr.msk.f32.mxu0 %vm800_vm1, %v6431_v31  ;;  %10996 = vmatprep.subr.msk.bf16.mxu0 %vm11845_vm2, %v10994_v23 }
0x2437   :  { %v6435_v1 = vpop.permute.xlu1 %6434  ;;  %v6441_v30 = vpop.permute.xlu0 %6440 }
0x2438   :  { %10348 = vmatmul.mubr.msk.f32.vlgmr.msra.gmra.mrb[54].mxu0 %vm800_vm1, %v6433_v62  ;;  %10354 = vmatprep.mubr.msk.f32.mxu1 %vm800_vm1, %v6435_v1 }
0x2439   :  { %10355 = vmatmul.mubr.msk.f32.vlgmr.msra.gmra.mrb[70].mxu1 %vm800_vm1, %v6437_v28  ;;  %10999 = vmatpush3.bf16.xpose.msk.msra.mxu0 %vm11845_vm2, %v10994_v23 }
0x243a   :  { %11005 = vmatpush3.bf16.msk.msra.mxu1 %vm12280_vm7, %v11000_v61 }
0x243b   :  { %v6439_v29 = vpop.permute.xlu1 %6438 }
0x243c   :  { %10361 = vmatprep.mubr.msk.f32.mxu0 %vm800_vm1, %v6439_v29 }
0x2440   :  { %10362 = vmatmul.mubr.msk.f32.vlgmr.msra.gmra.mrb[56].mxu0 %vm800_vm1, %v6441_v30 }
0x2495   :  { %v10342_v34 = vpop.f32.mrb[68].mxu1 }
0x2496   :  { %v6806_v4 = vmul.f32 0.35355338, %v10342_v34  ;;  %v6547_v24 = vpop.f32.mrb[69].mxu1 }
0x2497   :  { %v6805_v35 = vmul.f32 0.35355338, %v6547_v24 }
0x2498   :  { %v6814_v7 = vadd.f32 %v6806_v4, %v11834_v33 }
0x2499   :  { %v6813_v38 = vadd.f32 %v6805_v35, %v11832_v32 }
0x249a   :  { %v6824_v40 = vsel %vm4115_vm8, %v6814_v7, -inf }
0x249b   :  { %6825 = vmax.xlane.f32.xlu0 %v6824_v40  ;;  %v6821_v41 = vsel %vm4111_vm9, %v6813_v38, -inf }
0x249c   :  { %6822 = vmax.xlane.f32.xlu1 %v6821_v41 }
0x250b   :  { %v10349_v42 = vpop.f32.mrb[54].mxu0 }
0x250c   :  { %v6808_v43 = vmul.f32 0.35355338, %v10349_v42  ;;  %v6630_v44 = vpop.f32.mrb[55].mxu0  ;;  %v10356_v3 = vpop.f32.mrb[70].mxu1 }
0x250d   :  { %v6807_v63 = vmul.f32 0.35355338, %v6630_v44  ;;  %v6810_v58 = vmul.f32 0.35355338, %v10356_v3  ;;  %v6713_v2 = vpop.f32.mrb[71].mxu1 }
0x250e   :  { %v6816_v46 = vadd.f32 %v6808_v43, %v11834_v33  ;;  %v6809_v48 = vmul.f32 0.35355338, %v6713_v2 }
0x250f   :  { %v6815_v49 = vadd.f32 %v6807_v63, %v11832_v32  ;;  %v6818_v52 = vadd.f32 %v6810_v58, %v11834_v33 }
0x2510   :  { %v6830_v54 = vsel %vm4115_vm8, %v6816_v46, -inf  ;;  %v6817_v59 = vadd.f32 %v6809_v48, %v11832_v32 }
0x2511   :  { %6831 = vmax.xlane.f32.xlu1 %v6830_v54  ;;  %v6827_v53 = vsel %vm4111_vm9, %v6815_v49, -inf  ;;  %v6836_v60 = vsel %vm4115_vm8, %v6818_v52, -inf }
0x2512   :  { %6828 = vmax.xlane.f32.xlu0 %v6827_v53  ;;  %v6833_v0 = vsel %vm4111_vm9, %v6817_v59, -inf }
0x2513   :  { %v10363_v55 = vpop.f32.mrb[56].mxu0 }
0x2514   :  { %v6812_v56 = vmul.f32 0.35355338, %v10363_v55  ;;  %v6796_v57 = vpop.f32.mrb[57].mxu0 }
0x2515   :  { %v6811_v61 = vmul.f32 0.35355338, %v6796_v57  ;;  %6837 = vmax.xlane.f32.xlu1 %v6836_v60 }
0x2516   :  { %v6820_v20 = vadd.f32 %v6812_v56, %v11834_v33  ;;  %6834 = vmax.xlane.f32.xlu0 %v6833_v0 }
0x2517   :  { %v6819_v16 = vadd.f32 %v6811_v61, %v11832_v32 }
0x2518   :  { %v6842_v15 = vsel %vm4115_vm8, %v6820_v20, -inf }
0x2519   :  { %6843 = vmax.xlane.f32.xlu1 %v6842_v15  ;;  %v6839_v8 = vsel %vm4111_vm9, %v6819_v16, -inf }
0x251a   :  { %6840 = vmax.xlane.f32.xlu0 %v6839_v8 }
0x2528   :  { %v6826_v9 = vpop.xlane.xlu0 %6825 }
0x2529   :  { %v6846_v39 = vsub.f32 %v6814_v7, %v6826_v9  ;;  %v6823_v36 = vpop.xlane.xlu1 %6822 }
0x252a   :  { %v6845_v10 = vsub.f32 %v6813_v38, %v6823_v36 }
0x252b   :  { %v6855_v11 = vmul.f32 1.442695, %v6846_v39 }
0x252c   :  { %v6853_v12 = vmul.f32 1.442695, %v6845_v10 }
0x252d   :  { %11492 = vpow2.f32 %v6855_v11 }
0x252e   :  { %11494 = vpow2.f32 %v6853_v12 }
0x2537   :  { %v11493_v14 = vpop.eup %11492 }
0x2538   :  { %v11495_v13 = vpop.eup %11494  ;;  %v6872_v33 = vsel %vm4115_vm8, %v11493_v14, 0.0 }
0x2539   :  { %6873 = vadd.xlane.f32.xlu1 %v6872_v33  ;;  %v6869_v32 = vsel %vm4111_vm9, %v11495_v13, 0.0 }
0x253a   :  { %6870 = vadd.xlane.f32.xlu0 %v6869_v32 }
0x259e   :  { %v6832_v19 = vpop.xlane.xlu1 %6831 }
0x259f   :  { %v6848_v51 = vsub.f32 %v6816_v46, %v6832_v19  ;;  %v6829_v50 = vpop.xlane.xlu0 %6828 }
0x25a0   :  { %v6847_v17 = vsub.f32 %v6815_v49, %v6829_v50 }
0x25a1   :  { %v6859_v21 = vmul.f32 1.442695, %v6848_v51 }
0x25a2   :  { %v6857_v22 = vmul.f32 1.442695, %v6847_v17  ;;  %v6838_v62 = vpop.xlane.xlu1 %6837 }
0x25a3   :  { %11496 = vpow2.f32 %v6859_v21  ;;  %v6850_v23 = vsub.f32 %v6818_v52, %v6838_v62  ;;  %v6835_v31 = vpop.xlane.xlu0 %6834 }
0x25a4   :  { %11498 = vpow2.f32 %v6857_v22  ;;  %v6849_v1 = vsub.f32 %v6817_v59, %v6835_v31 }
0x25a5   :  { %v6863_v28 = vmul.f32 1.442695, %v6850_v23 }
0x25a6   :  { %v6861_v29 = vmul.f32 1.442695, %v6849_v1  ;;  %v6844_v30 = vpop.xlane.xlu1 %6843 }
0x25a7   :  { %11500 = vpow2.f32 %v6863_v28  ;;  %v6852_v34 = vsub.f32 %v6820_v20, %v6844_v30  ;;  %v6841_v4 = vpop.xlane.xlu0 %6840  ;;  %v7272_v30 = vld [vmem:[#allocation2 + $0x260] sm:$0xff] }
0x25a8   :  { %11502 = vpow2.f32 %v6861_v29  ;;  %v6851_v24 = vsub.f32 %v6819_v16, %v6841_v4 }
0x25a9   :  { %v6867_v35 = vmul.f32 1.442695, %v6852_v34  ;;  %v7273_v34 = vld [vmem:[#allocation2 + $0x268] sm:$0xff] }
0x25aa   :  { %v6865_v7 = vmul.f32 1.442695, %v6851_v24  ;;  %v11024_v4 = vpack.c.bf16 %v7273_v34, %v7272_v30  ;;  %v7274_v24 = vld [vmem:[#allocation2 + $0x270] sm:$0xff]  ;;  %v7408_v34 = vld [vmem:[#allocation2 + $0x298] sm:$0xff] }
0x25ab   :  { %11504 = vpow2.f32 %v6867_v35  ;;  %v7275_v35 = vld [vmem:[#allocation2 + $0x278] sm:$0xff]  ;;  %v7407_v30 = vld [vmem:[#allocation2 + $0x290] sm:$0xff] }
0x25ac   :  { %11506 = vpow2.f32 %v6865_v7  ;;  %v11028_v7 = vpack.c.bf16 %v7275_v35, %v7274_v24  ;;  %v7581_v24 = vld [vmem:[#allocation2 + $0x2c0] sm:$0xff]  ;;  %v7582_v35 = vld [vmem:[#allocation2 + $0x2c8] sm:$0xff] }
0x25ad   :  { %v12701_v38 = vpop.eup %11496 }
0x25ae   :  { %v11499_v40 = vpop.eup %11498  ;;  %v6878_v41 = vsel %vm4115_vm8, %v12701_v38, 0.0 }
0x25af   :  { %6879 = vadd.xlane.f32.xlu1 %v6878_v41  ;;  %v6875_v42 = vsel %vm4111_vm9, %v11499_v40, 0.0 }
0x25b0   :  { %6876 = vadd.xlane.f32.xlu0 %v6875_v42 }
0x25b1   :  { %v11501_v43 = vpop.eup %11500 }
0x25b2   :  { %v11503_v44 = vpop.eup %11502  ;;  %v6884_v3 = vsel %vm4115_vm8, %v11501_v43, 0.0 }
0x25b3   :  { %6885 = vadd.xlane.f32.xlu1 %v6884_v3  ;;  %v6881_v63 = vsel %vm4111_vm9, %v11503_v44, 0.0 }
0x25b4   :  { %6882 = vadd.xlane.f32.xlu0 %v6881_v63 }
0x25b5   :  { %v12708_v58 = vpop.eup %11504 }
0x25b6   :  { %v11507_v2 = vpop.eup %11506  ;;  %v6890_v46 = vsel %vm4115_vm8, %v12708_v58, 0.0 }
0x25b7   :  { %6891 = vadd.xlane.f32.xlu1 %v6890_v46  ;;  %v6887_v48 = vsel %vm4111_vm9, %v11507_v2, 0.0 }
0x25b8   :  { %6888 = vadd.xlane.f32.xlu0 %v6887_v48 }
0x25c6   :  { %v6874_v49 = vpop.xlane.xlu1 %6873 }
0x25c7   :  { %11508 = vrcp.f32 %v6874_v49  ;;  %v6871_v52 = vpop.xlane.xlu0 %6870  ;;  %v7498_v49 = vld [vmem:[#allocation2 + $0x2b0] sm:$0xff] }
0x25c8   :  { %11510 = vrcp.f32 %v6871_v52  ;;  %11293 = vrot.lane.b32.xlu1 %v12642_v5, %s11604_s18  ;;  %v7499_v52 = vld [vmem:[#allocation2 + $0x2b8] sm:$0xff] }
0x25cc   :  { %11298 = vrot.lane.b32.xlu1 %v12642_v5, %s11606_s22 }
0x25ce   :  { %11288 = vrot.lane.b32.xlu0 %v12642_v5, %s11605_s19 }
0x25d1   :  { %v11509_v54 = vpop.eup %11508 }
0x25d2   :  { %v11511_v59 = vpop.eup %11510  ;;  %v6902_v55 = vmul.f32 %v11509_v54, %v11493_v14 }
0x25d3   :  { %v6901_v53 = vmul.f32 %v11511_v59, %v11495_v13 }
0x25d5   :  { %10368 = vmatprep.mubr.msk.f32.mxu1 %vm4111_vm9, %v6901_v53 }
0x25d6   :  { %10369 = vmatmul.mubr.msk.f32.vlgmr.msra.gmra.mrb[72].mxu1 %vm4111_vm9, %v6902_v55 }
0x263c   :  { %v6880_v56 = vpop.xlane.xlu1 %6879 }
0x263d   :  { %v6877_v57 = vpop.xlane.xlu0 %6876 }
0x263e   :  { %11512 = vrcp.f32 %v6877_v57 }
0x2640   :  { %v6886_v60 = vpop.xlane.xlu1 %6885 }
0x2641   :  { %11514 = vrcp.f32 %v6886_v60  ;;  %v6883_v61 = vpop.xlane.xlu0 %6882 }
0x2642   :  { %11516 = vrcp.f32 %v6883_v61  ;;  %v11044_v61 = vpack.c.bf16 %v7499_v52, %v7498_v49  ;;  %v9265_v49 = vld [vmem:[%s13001_s7 + $0x2b] ss:$0 sm:$0xff] }
0x2643   :  { %11518 = vrcp.f32 %v6880_v56 }
0x2644   :  { %v6892_v0 = vpop.xlane.xlu1 %6891 }
0x2645   :  { %v6889_v20 = vpop.xlane.xlu0 %6888 }
0x2646   :  { %11520 = vrcp.f32 %v6889_v20  ;;  %v9261_v20 = vld [vmem:[%s13001_s7 + $0x29] ss:$0 sm:$0xff] }
0x2647   :  { %11522 = vrcp.f32 %v6892_v0 }
0x2648   :  { %v11513_v5 = vpop.eup %11512  ;;  %v11294_v16 = vpop.permute.xlu1 %11293 }
0x2649   :  { %v11296_v15 = vunpack.i.h.bf16 %v11294_v16  ;;  %v11295_v8 = vunpack.i.l.bf16 %v11294_v16  ;;  %v11289_v9 = vpop.permute.xlu0 %11288  ;;  %v6903_v39 = vmul.f32 %v11513_v5, %v11499_v40 }
0x264a   :  { %v11291_v36 = vunpack.i.h.bf16 %v11289_v9  ;;  %v11290_v10 = vunpack.i.l.bf16 %v11289_v9 }
0x264b   :  { %v11515_v11 = vpop.eup %11514  ;;  %v11012_v12 = vpack.c.bf16 %v11296_v15, %v11295_v8  ;;  %10375 = vmatprep.mubr.msk.f32.mxu1 %vm4111_vm9, %v6903_v39 }
0x264c   :  { %v11517_v14 = vpop.eup %11516  ;;  %v11006_v13 = vpack.c.bf16 %v11291_v36, %v11290_v10  ;;  %v11299_v33 = vpop.permute.xlu1 %11298  ;;  %v6906_v17 = vmul.f32 %v11515_v11, %v11501_v43  ;;  %v9269_v10 = vld [vmem:[%s13001_s7 + $0x2d] ss:$0 sm:$0xff] }
0x264d   :  { %v11519_v32 = vpop.eup %11518  ;;  %v11301_v19 = vunpack.i.h.bf16 %v11299_v33  ;;  %v11300_v51 = vunpack.i.l.bf16 %v11299_v33  ;;  %11014 = vmatprep.subr.msk.bf16.mxu0 %vm12280_vm7, %v11012_v12  ;;  %v6905_v50 = vmul.f32 %v11517_v14, %v11503_v44 }
0x264e   :  { %11008 = vmatprep.subr.msk.bf16.mxu1 %vm12280_vm7, %v11006_v13  ;;  %11017 = vmatpush3.bf16.msk.msra.mxu0 %vm12280_vm7, %v11012_v12  ;;  %v6904_v62 = vmul.f32 %v11519_v32, %v12701_v38  ;;  %v7497_v38 = vld [vmem:[#allocation2 + $0x2a8] sm:$0xff] }
0x264f   :  { %v11018_v21 = vpack.c.bf16 %v11301_v19, %v11300_v51  ;;  %11011 = vmatpush3.bf16.msk.msra.mxu1 %vm12280_vm7, %v11006_v13  ;;  %10382 = vmatprep.mubr.msk.f32.mxu0 %vm4111_vm9, %v6905_v50  ;;  %v11040_v40 = vpack.c.bf16 %v7497_v38, %v7496_v6 }
0x2650   :  { %v11521_v22 = vpop.eup %11520  ;;  %11025 = vmatprep.subr.bf16.mxu0 %v11024_v4 }
0x2651   :  { %v11523_v23 = vpop.eup %11522  ;;  %10383 = vmatmul.mubr.msk.f32.vlgmr.msra.gmra.mrb[58].mxu0 %vm4111_vm9, %v6906_v17  ;;  %11020 = vmatprep.subr.msk.bf16.mxu1 %vm12280_vm7, %v11018_v21  ;;  %v6907_v31 = vmul.f32 %v11521_v22, %v11507_v2 }
0x2652   :  { %10376 = vmatmul.mubr.msk.f32.vlgmr.msra.gmra.mrb[74].mxu1 %vm4111_vm9, %v6904_v62  ;;  %v6908_v1 = vmul.f32 %v11523_v23, %v12708_v58  ;;  %11027 = vmatpush3.bf16.msra.mxu0 %v11024_v4  ;;  %v11036_v4 = vpack.c.bf16 %v7408_v34, %v7407_v30 }
0x2653   :  { %11023 = vmatpush3.bf16.msk.msra.mxu1 %vm12280_vm7, %v11018_v21  ;;  %10389 = vmatprep.mubr.msk.f32.mxu1 %vm4111_vm9, %v6907_v31 }
0x2654   :  { %11029 = vmatprep.subr.bf16.mxu0 %v11028_v7 }
0x2656   :  { %10390 = vmatmul.mubr.msk.f32.vlgmr.msra.gmra.mrb[76].mxu1 %vm4111_vm9, %v6908_v1  ;;  %11031 = vmatpush3.bf16.msra.mxu0 %v11028_v7  ;;  %v7405_v1 = vld [vmem:[#allocation2 + $0x280] sm:$0xff]  ;;  %v11048_v7 = vpack.c.bf16 %v7582_v35, %v7581_v24 }
0x2657   :  { %11041 = vmatprep.subr.bf16.mxu0 %v11040_v40 }
0x26a9   :  { %v10370_v28 = vpop.f32.mrb[72].mxu1 }
0x26aa   :  { %v6983_v29 = vpop.f32.mrb[73].mxu1 }
0x2724   :  { %v10384_v41 = vpop.f32.mrb[58].mxu0 }
0x2725   :  { %v10377_v42 = vpop.f32.mrb[74].mxu1  ;;  %v7149_v43 = vpop.f32.mrb[59].mxu0 }
0x2726   :  { %7245 = vrot.lane.b32.xlu1 %v10377_v42, %s11598_s16  ;;  %v7066_v44 = vpop.f32.mrb[75].mxu1 }
0x2727   :  { %7243 = vrot.lane.b32.xlu0 %v7066_v44, %s11598_s16 }
0x2729   :  { %v10391_v3 = vpop.f32.mrb[76].mxu1 }
0x272a   :  { %7253 = vrot.lane.b32.xlu1 %v10384_v41, %s11607_s23  ;;  %v7232_v63 = vpop.f32.mrb[77].mxu1 }
0x272b   :  { %7251 = vrot.lane.b32.xlu0 %v7149_v43, %s11607_s23 }
0x272e   :  { %7261 = vrot.lane.b32.xlu1 %v10391_v3, %s11608_s24 }
0x272f   :  { %7259 = vrot.lane.b32.xlu0 %v7232_v63, %s11608_s24 }
0x2798   :  { %v7246_v58 = vpop.permute.xlu1 %7245 }
0x2799   :  { %v7244_v2 = vpop.permute.xlu0 %7243  ;;  %v7266_v53 = vsel %vm800_vm1, %v10370_v28, %v7246_v58  ;;  %v7406_v28 = vld [vmem:[#allocation2 + $0x288] sm:$0xff] }
0x279a   :  { %v7265_v54 = vsel %vm800_vm1, %v6983_v29, %v7244_v2  ;;  %v11032_v29 = vpack.c.bf16 %v7406_v28, %v7405_v1 }
0x279c   :  { %v7254_v46 = vpop.permute.xlu1 %7253  ;;  %11033 = vmatprep.subr.bf16.mxu1 %v11032_v29 }
0x279d   :  { %v7252_v48 = vpop.permute.xlu0 %7251  ;;  %v7268_v57 = vsel %vm1149_vm3, %v7266_v53, %v7254_v46  ;;  %11035 = vmatpush3.bf16.msra.mxu1 %v11032_v29  ;;  %v9264_v46 = vld [vmem:[%s13001_s7 + $0x2a] ss:$0 sm:$0xff] }
0x279e   :  { %v7267_v55 = vsel %vm1149_vm3, %v7265_v54, %v7252_v48  ;;  %11037 = vmatprep.subr.bf16.mxu1 %v11036_v4 }
0x27a0   :  { %v7262_v59 = vpop.permute.xlu1 %7261 }
0x27a1   :  { %v7260_v56 = vpop.permute.xlu0 %7259  ;;  %v7270_v0 = vsel %vm1590_vm12, %v7268_v57, %v7262_v59  ;;  %11039 = vmatpush3.bf16.msra.mxu1 %v11036_v4 }
0x27a2   :  { %v7269_v60 = vsel %vm1590_vm12, %v7267_v55, %v7260_v56  ;;  %11049 = vmatprep.subr.bf16.mxu1 %v11048_v7  ;;  %v7583_v55 = vld [vmem:[#allocation2 + $0x2d0] sm:$0xff]  ;;  %v7584_v56 = vld [vmem:[#allocation2 + $0x2d8] sm:$0xff] }
0x27a3   :  { %10400 = vmatprep.mubr.msk.f32.mxu0 %vm500_vm13, %v7269_v60 }
0x27a4   :  { %10401 = vmatmul.mubr.msk.f32.vlgmr.msra.gmra.mrb[60].mxu0 %vm500_vm13, %v7270_v0  ;;  %v11052_v0 = vpack.c.bf16 %v7584_v56, %v7583_v55 }
0x27a5   :  { %11043 = vmatpush3.bf16.msra.mxu0 %v11040_v40  ;;  %10422 = vmatprep.mubr.msk.f32.mxu0 %vm500_vm13, %v12418_v27 }
0x27a6   :  { %11045 = vmatprep.subr.bf16.mxu0 %v11044_v61 }
0x27a9   :  { %11047 = vmatpush3.bf16.msra.mxu0 %v11044_v61 }
0x27ac   :  { %10423 = vmatmul.mubr.msk.f32.vlgmr.msra.gmra.mrb[62].mxu0 %vm500_vm13, %v12430_v37 }
0x2877   :  { %v10402_v5 = vpop.f32.mrb[60].mxu0 }
0x2878   :  { %v7359_v16 = vadd.f32 %v10402_v5, %v9261_v20  ;;  %v7353_v15 = vpop.f32.mrb[61].mxu0 }
0x2879   :  { %v7354_v8 = vadd.f32 %v9261_v20, %v7353_v15 }
0x287a   :  { %v7363_v9 = vadd.f32 %v7359_v16, %v12621_v47 }
0x287b   :  { %v7362_v39 = vadd.f32 %v7354_v8, %v12619_v18 }
0x287c   :  { %v7367_v36 = vsel %vm4660_vm10, %v7363_v9, 0.0 }
0x287d   :  { %7368 = vadd.xlane.f32.xlu1 %v7367_v36  ;;  %v7364_v11 = vsel %vm500_vm13, %v7362_v39, 0.0 }
0x287e   :  { %7365 = vadd.xlane.f32.xlu0 %v7364_v11 }
0x287f   :  { %v10424_v12 = vpop.f32.mrb[62].mxu0 }
0x2880   :  { %v7577_v14 = vadd.f32 %v10424_v12, %v9269_v10  ;;  %v7571_v13 = vpop.f32.mrb[63].mxu0 }
0x2881   :  { %v7572_v33 = vadd.f32 %v9269_v10, %v7571_v13 }
0x2883   :  { %v11056_v32 = vpack.c.bf16 %v7577_v14, %v7572_v33  ;;  %v11302_v19 = vpack.i.bf16 %v7577_v14, %v7572_v33 }
0x2885   :  { %11058 = vmatprep.subr.msk.bf16.mxu0 %vm11845_vm2, %v11056_v32 }
0x2886   :  { %11061 = vmatpush3.bf16.xpose.msk.msra.mxu0 %vm11845_vm2, %v11056_v32 }
0x288e   :  { %11303 = vrot.lane.b32.xlu1 %v11302_v19, %s11605_s19 }
0x2892   :  { %11313 = vrot.lane.b32.xlu1 %v11302_v19, %s11606_s22 }
0x290a   :  { %v7369_v18 = vpop.xlane.xlu1 %7368 }
0x290b   :  { %v7371_v47 = vmul.f32 0.03125, %v7369_v18  ;;  %v7366_v51 = vpop.xlane.xlu0 %7365 }
0x290c   :  { %v7370_v50 = vmul.f32 0.03125, %v7366_v51 }
0x290d   :  { %v7373_v17 = vsub.f32 %v7363_v9, %v7371_v47 }
0x290e   :  { %v7372_v21 = vsub.f32 %v7362_v39, %v7370_v50  ;;  %v11304_v60 = vpop.permute.xlu1 %11303 }
0x290f   :  { %v7375_v23 = vmul.f32 %v7373_v17, %v7373_v17  ;;  %v11306_v20 = vunpack.i.h.bf16 %v11304_v60  ;;  %v11305_v5 = vunpack.i.l.bf16 %v11304_v60 }
0x2910   :  { %v7374_v22 = vmul.f32 %v7372_v21, %v7372_v21 }
0x2911   :  { %v7379_v31 = vsel %vm4660_vm10, %v7375_v23, 0.0  ;;  %v11062_v16 = vpack.c.bf16 %v11306_v20, %v11305_v5 }
0x2912   :  { %v7376_v62 = vsel %vm500_vm13, %v7374_v22, 0.0  ;;  %v11314_v15 = vpop.permute.xlu1 %11313 }
0x2913   :  { %7377 = vadd.xlane.f32.xlu0 %v7376_v62  ;;  %v11316_v8 = vunpack.i.h.bf16 %v11314_v15  ;;  %v11315_v9 = vunpack.i.l.bf16 %v11314_v15 }
0x2915   :  { %v11074_v39 = vpack.c.bf16 %v11316_v8, %v11315_v9 }
0x2917   :  { %7380 = vadd.xlane.f32.xlu0 %v7379_v31 }
0x292d   :  { %11308 = vrot.lane.b32.xlu0 %v11302_v19, %s11604_s18 }
0x29a0   :  { %v7378_v6 = vpop.xlane.xlu0 %7377 }
0x29a1   :  { %v7382_v38 = vmul.f32 0.03125, %v7378_v6 }
0x29a3   :  { %v7384_v40 = vadd.f32 1e-05, %v7382_v38 }
0x29a4   :  { %v7381_v41 = vpop.xlane.xlu0 %7380 }
0x29a5   :  { %11524 = vrsqrt.f32 %v7384_v40  ;;  %v7383_v42 = vmul.f32 0.03125, %v7381_v41 }
0x29a7   :  { %v7385_v43 = vadd.f32 1e-05, %v7383_v42 }
0x29a8   :  { %v11309_v44 = vpop.permute.xlu0 %11308 }
0x29a9   :  { %11526 = vrsqrt.f32 %v7385_v43  ;;  %v11311_v3 = vunpack.i.h.bf16 %v11309_v44  ;;  %v11310_v63 = vunpack.i.l.bf16 %v11309_v44 }
0x29ab   :  { %v11068_v58 = vpack.c.bf16 %v11311_v3, %v11310_v63 }
0x29ad   :  { %11070 = vmatprep.subr.msk.bf16.mxu0 %vm11845_vm2, %v11068_v58 }
0x29af   :  { %v11525_v2 = vpop.eup %11524 }
0x29b0   :  { %v7388_v48 = vmul.f32 %v11525_v2, %v7372_v21 }
0x29b2   :  { %v7395_v52 = vmul.f32 %v9264_v46, %v7388_v48 }
0x29b3   :  { %v11527_v54 = vpop.eup %11526 }
0x29b4   :  { %v7389_v59 = vmul.f32 %v11527_v54, %v7373_v17  ;;  %v12786_v53 = vadd.f32 %v9265_v49, %v7395_v52 }
0x29b6   :  { %v7396_v57 = vmul.f32 %v9264_v46, %v7389_v59  ;;  %10411 = vmatprep.mubr.msk.f32.mxu1 %vm500_vm13, %v12786_v53 }
0x29b8   :  { %v12790_v61 = vadd.f32 %v9265_v49, %v7396_v57 }
0x29ba   :  { %10412 = vmatmul.mubr.msk.f32.vlgmr.msra.gmra.mrb[78].mxu1 %vm500_vm13, %v12790_v61 }
0x29bb   :  { %11051 = vmatpush3.bf16.msra.mxu1 %v11048_v7  ;;  %10433 = vmatprep.mubr.msk.f32.mxu1 %vm500_vm13, %v12418_v27  ;;  %v9266_v27 = vld [vmem:[%s13001_s7 + $0x2c] ss:$0 sm:$0xff] }
0x29bc   :  { %11053 = vmatprep.subr.bf16.mxu1 %v11052_v0 }
0x29bf   :  { %11055 = vmatpush3.bf16.msra.mxu1 %v11052_v0 }
0x29c0   :  { %11064 = vmatprep.subr.msk.bf16.mxu1 %vm11845_vm2, %v11062_v16 }
0x29c2   :  { %10434 = vmatmul.mubr.msk.f32.vlgmr.msra.gmra.mrb[80].mxu1 %vm500_vm13, %v12430_v37  ;;  %v9272_v37 = vld [vmem:[%s13001_s7 + $0x2e] ss:$0 sm:$0xff] }
0x29c8   :  { %11067 = vmatpush3.bf16.xpose.msk.msra.mxu1 %vm11845_vm2, %v11062_v16 }
0x29c9   :  { %11076 = vmatprep.subr.msk.bf16.mxu1 %vm11845_vm2, %v11074_v39 }
0x2a8d   :  { %v10413_v36 = vpop.f32.mrb[78].mxu1 }
0x2a8e   :  { %v7492_v10 = vadd.f32 %v10413_v36, %v9266_v27  ;;  %v7486_v11 = vpop.f32.mrb[79].mxu1 }
0x2a8f   :  { %v7487_v12 = vadd.f32 %v9266_v27, %v7486_v11 }
0x2a90   :  { %7669 = vrot.lane.b32.xlu0 %v7492_v10, %s11605_s19 }
0x2a91   :  { %7667 = vrot.lane.b32.xlu1 %v7487_v12, %s11605_s19  ;;  %10440 = vmatprep.mubr.msk.f32.mxu0 %vm800_vm1, %v7487_v12 }
0x2a92   :  { %10441 = vmatmul.mubr.msk.f32.vlgmr.msra.gmra.mrb[64].mxu0 %vm800_vm1, %v7492_v10 }
0x2a93   :  { %11073 = vmatpush3.bf16.xpose.msk.msra.mxu0 %vm11845_vm2, %v11068_v58 }
0x2a94   :  { %7673 = vrot.lane.b32.xlu0 %v7492_v10, %s11604_s18 }
0x2a95   :  { %v10435_v14 = vpop.f32.mrb[80].mxu1  ;;  %7671 = vrot.lane.b32.xlu1 %v7487_v12, %s11604_s18 }
0x2a96   :  { %v7662_v13 = vadd.f32 %v10435_v14, %v9272_v37  ;;  %v7656_v33 = vpop.f32.mrb[81].mxu1 }
0x2a97   :  { %v7657_v32 = vadd.f32 %v9272_v37, %v7656_v33 }
0x2a98   :  { %7677 = vrot.lane.b32.xlu0 %v7492_v10, %s11606_s22 }
0x2a99   :  { %7675 = vrot.lane.b32.xlu1 %v7487_v12, %s11606_s22  ;;  %v11080_v19 = vpack.c.bf16 %v7662_v13, %v7657_v32  ;;  %v12820_v18 = vpack.i.bf16 %v7662_v13, %v7657_v32 }
0x2a9b   :  { %11081 = vmatprep.subr.bf16.mxu0 %v11080_v19 }
0x2b02   :  { %v7670_v47 = vpop.permute.xlu0 %7669 }
0x2b03   :  { %v7668_v51 = vpop.permute.xlu1 %7667 }
0x2b04   :  { %10447 = vmatprep.mubr.msk.f32.mxu1 %vm800_vm1, %v7668_v51 }
0x2b05   :  { %10448 = vmatmul.mubr.msk.f32.vlgmr.msra.gmra.mrb[82].mxu1 %vm800_vm1, %v7670_v47 }
0x2b06   :  { %11079 = vmatpush3.bf16.xpose.msk.msra.mxu1 %vm11845_vm2, %v11074_v39  ;;  %v7674_v50 = vpop.permute.xlu0 %7673 }
0x2b07   :  { %v7672_v17 = vpop.permute.xlu1 %7671 }
0x2b08   :  { %10454 = vmatprep.mubr.msk.f32.mxu0 %vm800_vm1, %v7672_v17 }
0x2b09   :  { %10455 = vmatmul.mubr.msk.f32.vlgmr.msra.gmra.mrb[66].mxu0 %vm800_vm1, %v7674_v50 }
0x2b0a   :  { %11083 = vmatpush3.bf16.msra.mxu0 %v11080_v19  ;;  %v7678_v22 = vpop.permute.xlu0 %7677 }
0x2b0b   :  { %v7676_v21 = vpop.permute.xlu1 %7675 }
0x2b0c   :  { %10461 = vmatprep.mubr.msk.f32.mxu1 %vm800_vm1, %v7676_v21 }
0x2b0d   :  { %10462 = vmatmul.mubr.msk.f32.vlgmr.msra.gmra.mrb[84].mxu1 %vm800_vm1, %v7678_v22 }
0x2b65   :  { %v10442_v62 = vpop.f32.mrb[64].mxu0 }
0x2b66   :  { %v8046_v23 = vmul.f32 0.35355338, %v10442_v62  ;;  %v7787_v31 = vpop.f32.mrb[65].mxu0 }
0x2b67   :  { %v8045_v1 = vmul.f32 0.35355338, %v7787_v31 }
0x2b68   :  { %v8054_v45 = vadd.f32 %v8046_v23, %v11828_v26 }
0x2b69   :  { %v8053_v28 = vadd.f32 %v8045_v1, %v11825_v25 }
0x2b6a   :  { %v8064_v29 = vsel %vm5364_vm11, %v8054_v45, -inf }
0x2b6b   :  { %8065 = vmax.xlane.f32.xlu0 %v8064_v29  ;;  %v8061_v30 = vsel %vm1149_vm3, %v8053_v28, -inf }
0x2b6c   :  { %8062 = vmax.xlane.f32.xlu1 %v8061_v30 }
0x2bd8   :  { %v10449_v34 = vpop.f32.mrb[82].mxu1 }
0x2bd9   :  { %v8048_v4 = vmul.f32 0.35355338, %v10449_v34  ;;  %v7870_v24 = vpop.f32.mrb[83].mxu1 }
0x2bda   :  { %v8047_v35 = vmul.f32 0.35355338, %v7870_v24 }
0x2bdb   :  { %v8056_v7 = vadd.f32 %v8048_v4, %v11828_v26 }
0x2bdc   :  { %v8055_v6 = vadd.f32 %v8047_v35, %v11825_v25  ;;  %v10456_v38 = vpop.f32.mrb[66].mxu0 }
0x2bdd   :  { %v8050_v40 = vmul.f32 0.35355338, %v10456_v38  ;;  %v7953_v41 = vpop.f32.mrb[67].mxu0  ;;  %v8070_v42 = vsel %vm5364_vm11, %v8056_v7, -inf }
0x2bde   :  { %v8049_v43 = vmul.f32 0.35355338, %v7953_v41  ;;  %8071 = vmax.xlane.f32.xlu1 %v8070_v42  ;;  %v8067_v44 = vsel %vm1149_vm3, %v8055_v6, -inf }
0x2bdf   :  { %v8058_v3 = vadd.f32 %v8050_v40, %v11828_v26  ;;  %8068 = vmax.xlane.f32.xlu0 %v8067_v44 }
0x2be0   :  { %v8057_v63 = vadd.f32 %v8049_v43, %v11825_v25  ;;  %v10463_v58 = vpop.f32.mrb[84].mxu1 }
0x2be1   :  { %v8052_v2 = vmul.f32 0.35355338, %v10463_v58  ;;  %v8036_v46 = vpop.f32.mrb[85].mxu1  ;;  %v8076_v48 = vsel %vm5364_vm11, %v8058_v3, -inf }
0x2be2   :  { %v8051_v49 = vmul.f32 0.35355338, %v8036_v46  ;;  %8077 = vmax.xlane.f32.xlu1 %v8076_v48  ;;  %v8073_v52 = vsel %vm1149_vm3, %v8057_v63, -inf }
0x2be3   :  { %v8060_v54 = vadd.f32 %v8052_v2, %v11828_v26  ;;  %8074 = vmax.xlane.f32.xlu0 %v8073_v52 }
0x2be4   :  { %v8059_v59 = vadd.f32 %v8051_v49, %v11825_v25 }
0x2be5   :  { %v8082_v55 = vsel %vm5364_vm11, %v8060_v54, -inf }
0x2be6   :  { %8083 = vmax.xlane.f32.xlu1 %v8082_v55  ;;  %v8079_v56 = vsel %vm1149_vm3, %v8059_v59, -inf }
0x2be7   :  { %8080 = vmax.xlane.f32.xlu0 %v8079_v56 }
0x2bf8   :  { %v8066_v57 = vpop.xlane.xlu0 %8065 }
0x2bf9   :  { %v8086_v60 = vsub.f32 %v8054_v45, %v8066_v57  ;;  %v8063_v0 = vpop.xlane.xlu1 %8062 }
0x2bfa   :  { %v8085_v20 = vsub.f32 %v8053_v28, %v8063_v0 }
0x2bfb   :  { %v8095_v5 = vmul.f32 1.442695, %v8086_v60 }
0x2bfc   :  { %v8093_v16 = vmul.f32 1.442695, %v8085_v20 }
0x2bfd   :  { %11528 = vpow2.f32 %v8095_v5 }
0x2bfe   :  { %11530 = vpow2.f32 %v8093_v16 }
0x2c07   :  { %v11529_v15 = vpop.eup %11528 }
0x2c08   :  { %v11531_v8 = vpop.eup %11530  ;;  %v8112_v26 = vsel %vm5364_vm11, %v11529_v15, 0.0 }
0x2c09   :  { %8113 = vadd.xlane.f32.xlu1 %v8112_v26  ;;  %v8109_v25 = vsel %vm1149_vm3, %v11531_v8, 0.0 }
0x2c0a   :  { %8110 = vadd.xlane.f32.xlu0 %v8109_v25 }
0x2c6b   :  { %v8072_v9 = vpop.xlane.xlu1 %8071 }
0x2c6c   :  { %v8088_v39 = vsub.f32 %v8056_v7, %v8072_v9  ;;  %v8069_v27 = vpop.xlane.xlu0 %8068 }
0x2c6d   :  { %v8087_v36 = vsub.f32 %v8055_v6, %v8069_v27 }
0x2c6e   :  { %v8099_v10 = vmul.f32 1.442695, %v8088_v39 }
0x2c6f   :  { %v8097_v11 = vmul.f32 1.442695, %v8087_v36  ;;  %v8078_v12 = vpop.xlane.xlu1 %8077 }
0x2c70   :  { %11532 = vpow2.f32 %v8099_v10  ;;  %v8090_v37 = vsub.f32 %v8058_v3, %v8078_v12  ;;  %v8075_v14 = vpop.xlane.xlu0 %8074  ;;  %v8504_v12 = vld [vmem:[#allocation2 + $0x2e0] sm:$0xff] }
0x2c71   :  { %11534 = vpow2.f32 %v8097_v11  ;;  %v8089_v13 = vsub.f32 %v8057_v63, %v8075_v14 }
0x2c72   :  { %v8103_v33 = vmul.f32 1.442695, %v8090_v37  ;;  %v8505_v37 = vld [vmem:[#allocation2 + $0x2e8] sm:$0xff] }
0x2c73   :  { %v8101_v32 = vmul.f32 1.442695, %v8089_v13  ;;  %v8084_v19 = vpop.xlane.xlu1 %8083  ;;  %v11096_v14 = vpack.c.bf16 %v8505_v37, %v8504_v12  ;;  %v8506_v13 = vld [vmem:[#allocation2 + $0x2f0] sm:$0xff] }
0x2c74   :  { %11536 = vpow2.f32 %v8103_v33  ;;  %v8092_v47 = vsub.f32 %v8060_v54, %v8084_v19  ;;  %v8081_v51 = vpop.xlane.xlu0 %8080  ;;  %v8507_v33 = vld [vmem:[#allocation2 + $0x2f8] sm:$0xff]  ;;  %v9302_v37 = vld [vmem:[%s13001_s7 + $0x30] ss:$0 sm:$0xff] }
0x2c75   :  { %11538 = vpow2.f32 %v8101_v32  ;;  %v8091_v50 = vsub.f32 %v8059_v59, %v8081_v51  ;;  %v11100_v32 = vpack.c.bf16 %v8507_v33, %v8506_v13  ;;  %v9303_v13 = vld [vmem:[%s13001_s7 + $0x31] ss:$0 sm:$0xff] }
0x2c76   :  { %v8107_v17 = vmul.f32 1.442695, %v8092_v47 }
0x2c77   :  { %v8105_v21 = vmul.f32 1.442695, %v8091_v50 }
0x2c78   :  { %11540 = vpow2.f32 %v8107_v17 }
0x2c79   :  { %11542 = vpow2.f32 %v8105_v21 }
0x2c7a   :  { %v12848_v22 = vpop.eup %11532 }
0x2c7b   :  { %v11535_v62 = vpop.eup %11534  ;;  %v8118_v23 = vsel %vm5364_vm11, %v12848_v22, 0.0 }
0x2c7c   :  { %8119 = vadd.xlane.f32.xlu1 %v8118_v23  ;;  %v8115_v31 = vsel %vm1149_vm3, %v11535_v62, 0.0 }
0x2c7d   :  { %8116 = vadd.xlane.f32.xlu0 %v8115_v31 }
0x2c7e   :  { %v11537_v1 = vpop.eup %11536 }
0x2c7f   :  { %v11539_v45 = vpop.eup %11538  ;;  %v8124_v28 = vsel %vm5364_vm11, %v11537_v1, 0.0 }
0x2c80   :  { %8125 = vadd.xlane.f32.xlu1 %v8124_v28  ;;  %v8121_v29 = vsel %vm1149_vm3, %v11539_v45, 0.0 }
0x2c81   :  { %8122 = vadd.xlane.f32.xlu0 %v8121_v29 }
0x2c82   :  { %v12855_v30 = vpop.eup %11540 }
0x2c83   :  { %v11543_v34 = vpop.eup %11542  ;;  %v8130_v4 = vsel %vm5364_vm11, %v12855_v30, 0.0 }
0x2c84   :  { %8131 = vadd.xlane.f32.xlu1 %v8130_v4  ;;  %v8127_v24 = vsel %vm1149_vm3, %v11543_v34, 0.0 }
0x2c85   :  { %8128 = vadd.xlane.f32.xlu0 %v8127_v24 }
0x2c95   :  { %11323 = vrot.lane.b32.xlu1 %v12820_v18, %s11604_s18 }
0x2c96   :  { %v8114_v35 = vpop.xlane.xlu1 %8113 }
0x2c97   :  { %11544 = vrcp.f32 %v8114_v35  ;;  %v8111_v7 = vpop.xlane.xlu0 %8110  ;;  %v9299_v35 = vld [vmem:[%s13001_s7 + $0x2f] ss:$0 sm:$0xff] }
0x2c98   :  { %11546 = vrcp.f32 %v8111_v7 }
0x2c99   :  { %11328 = vrot.lane.b32.xlu1 %v12820_v18, %s11606_s22 }
0x2c9b   :  { %11318 = vrot.lane.b32.xlu0 %v12820_v18, %s11605_s19 }
0x2ca1   :  { %v11545_v6 = vpop.eup %11544 }
0x2ca2   :  { %v11547_v38 = vpop.eup %11546  ;;  %v8142_v41 = vmul.f32 %v11545_v6, %v11529_v15 }
0x2ca3   :  { %v8141_v40 = vmul.f32 %v11547_v38, %v11531_v8 }
0x2ca5   :  { %10468 = vmatprep.mubr.msk.f32.mxu0 %vm1149_vm3, %v8141_v40 }
0x2ca6   :  { %10469 = vmatmul.mubr.msk.f32.vlgmr.msra.gmra.mrb[68].mxu0 %vm1149_vm3, %v8142_v41 }
0x2d09   :  { %v8120_v42 = vpop.xlane.xlu1 %8119 }
0x2d0a   :  { %v8117_v43 = vpop.xlane.xlu0 %8116 }
0x2d0b   :  { %11548 = vrcp.f32 %v8117_v43 }
0x2d0d   :  { %v8126_v44 = vpop.xlane.xlu1 %8125 }
0x2d0e   :  { %11550 = vrcp.f32 %v8126_v44  ;;  %v8123_v3 = vpop.xlane.xlu0 %8122 }
0x2d0f   :  { %11552 = vrcp.f32 %v8123_v3 }
0x2d10   :  { %11554 = vrcp.f32 %v8120_v42 }
0x2d11   :  { %v8132_v63 = vpop.xlane.xlu1 %8131 }
0x2d12   :  { %v8129_v58 = vpop.xlane.xlu0 %8128 }
0x2d13   :  { %11556 = vrcp.f32 %v8129_v58 }
0x2d14   :  { %11558 = vrcp.f32 %v8132_v63 }
0x2d15   :  { %v11549_v18 = vpop.eup %11548  ;;  %v11324_v2 = vpop.permute.xlu1 %11323 }
0x2d16   :  { %v11326_v46 = vunpack.i.h.bf16 %v11324_v2  ;;  %v11325_v48 = vunpack.i.l.bf16 %v11324_v2  ;;  %v11319_v49 = vpop.permute.xlu0 %11318  ;;  %v8143_v52 = vmul.f32 %v11549_v18, %v11535_v62 }
0x2d17   :  { %v11321_v54 = vunpack.i.h.bf16 %v11319_v49  ;;  %v11320_v59 = vunpack.i.l.bf16 %v11319_v49 }
0x2d18   :  { %v11551_v55 = vpop.eup %11550  ;;  %v11088_v56 = vpack.c.bf16 %v11326_v46, %v11325_v48  ;;  %10475 = vmatprep.mubr.msk.f32.mxu1 %vm1149_vm3, %v8143_v52 }
0x2d19   :  { %v11553_v57 = vpop.eup %11552  ;;  %v11084_v60 = vpack.c.bf16 %v11321_v54, %v11320_v59  ;;  %v11329_v0 = vpop.permute.xlu1 %11328  ;;  %v8146_v8 = vmul.f32 %v11551_v55, %v11537_v1  ;;  %v9305_v54 = vld [vmem:[%s12998_s4 + $0x68] sm:$0xff]  ;;  %v9306_v55 = vld [vmem:[%s12998_s4 + $0x70] sm:$0xff] }
0x2d1a   :  { %v11555_v20 = vpop.eup %11554  ;;  %v11331_v5 = vunpack.i.h.bf16 %v11329_v0  ;;  %v11330_v16 = vunpack.i.l.bf16 %v11329_v0  ;;  %11089 = vmatprep.subr.bf16.mxu0 %v11088_v56  ;;  %v8145_v15 = vmul.f32 %v11553_v57, %v11539_v45  ;;  %v9312_v0 = vld [vmem:[%s12999_s5 + $0xc8] sm:$0xff] }
0x2d1b   :  { %11085 = vmatprep.subr.bf16.mxu1 %v11084_v60  ;;  %11091 = vmatpush3.bf16.msra.mxu0 %v11088_v56  ;;  %v8144_v9 = vmul.f32 %v11555_v20, %v12848_v22  ;;  %v9307_v56 = vld [vmem:[%s12998_s4 + $0x78] sm:$0xff]  ;;  %v9313_v20 = vld [vmem:[%s12999_s5 + $0xd0] sm:$0xff] }
0x2d1c   :  { %v11092_v26 = vpack.c.bf16 %v11331_v5, %v11330_v16  ;;  %11087 = vmatpush3.bf16.msra.mxu1 %v11084_v60  ;;  %10482 = vmatprep.mubr.msk.f32.mxu0 %vm1149_vm3, %v8145_v15  ;;  %v11108_v57 = vpack.c.bf16 %v9307_v56, %v9306_v55  ;;  %v9311_v60 = vld [vmem:[%s12999_s5 + $0xc0] sm:$0xff]  ;;  %v9314_v16 = vld [vmem:[%s12999_s5 + $0xd8] sm:$0xff]  ;;  %v9322_v55 = vld [vmem:[%s13001_s7 + $0x34] ss:$0 sm:$0xff] }
0x2d1d   :  { %v11557_v25 = vpop.eup %11556  ;;  %11097 = vmatprep.subr.bf16.mxu0 %v11096_v14  ;;  %v11112_v5 = vpack.c.bf16 %v9312_v0, %v9311_v60  ;;  %v11116_v15 = vpack.c.bf16 %v9314_v16, %v9313_v20  ;;  %v9323_v60 = vld [vmem:[%s13001_s7 + $0x35] ss:$0 sm:$0xff] }
0x2d1e   :  { %v11559_v39 = vpop.eup %11558  ;;  %10483 = vmatmul.mubr.msk.f32.vlgmr.msra.gmra.mrb[70].mxu0 %vm1149_vm3, %v8146_v8  ;;  %11093 = vmatprep.subr.bf16.mxu1 %v11092_v26  ;;  %v8147_v27 = vmul.f32 %v11557_v25, %v11543_v34  ;;  %v9315_v8 = vld [vmem:[%s12999_s5 + $0xe0] sm:$0xff] }
0x2d1f   :  { %10476 = vmatmul.mubr.msk.f32.vlgmr.msra.gmra.mrb[86].mxu1 %vm1149_vm3, %v8144_v9  ;;  %v8148_v36 = vmul.f32 %v11559_v39, %v12855_v30  ;;  %11099 = vmatpush3.bf16.msra.mxu0 %v11096_v14 }
0x2d20   :  { %11095 = vmatpush3.bf16.msra.mxu1 %v11092_v26  ;;  %10489 = vmatprep.mubr.msk.f32.mxu1 %vm1149_vm3, %v8147_v27  ;;  %v9316_v26 = vld [vmem:[%s12999_s5 + $0xe8] sm:$0xff] }
0x2d21   :  { %11101 = vmatprep.subr.bf16.mxu0 %v11100_v32  ;;  %v11120_v25 = vpack.c.bf16 %v9316_v26, %v9315_v8 }
0x2d23   :  { %10490 = vmatmul.mubr.msk.f32.vlgmr.msra.gmra.mrb[88].mxu1 %vm1149_vm3, %v8148_v36  ;;  %11103 = vmatpush3.bf16.msra.mxu0 %v11100_v32 }
0x2d24   :  { %11113 = vmatprep.subr.bf16.mxu0 %v11112_v5 }
0x2d79   :  { %v10470_v10 = vpop.f32.mrb[68].mxu0 }
0x2d7a   :  { %v8221_v11 = vpop.f32.mrb[69].mxu0 }
0x2df1   :  { %v10484_v19 = vpop.f32.mrb[70].mxu0 }
0x2df2   :  { %v10477_v47 = vpop.f32.mrb[86].mxu1  ;;  %v8383_v51 = vpop.f32.mrb[71].mxu0 }
0x2df3   :  { %8477 = vrot.lane.b32.xlu1 %v10477_v47, %s11598_s16  ;;  %v8302_v50 = vpop.f32.mrb[87].mxu1 }
0x2df4   :  { %8475 = vrot.lane.b32.xlu0 %v8302_v50, %s11598_s16 }
0x2df6   :  { %v10491_v17 = vpop.f32.mrb[88].mxu1 }
0x2df7   :  { %8485 = vrot.lane.b32.xlu1 %v10484_v19, %s11607_s23  ;;  %v8464_v21 = vpop.f32.mrb[89].mxu1 }
0x2df8   :  { %8483 = vrot.lane.b32.xlu0 %v8383_v51, %s11607_s23 }
0x2dfb   :  { %8493 = vrot.lane.b32.xlu1 %v10491_v17, %s11608_s24  ;;  %v9317_v17 = vld [vmem:[%s12999_s5 + $0xf0] sm:$0xff] }
0x2dfc   :  { %8491 = vrot.lane.b32.xlu0 %v8464_v21, %s11608_s24  ;;  %v9318_v21 = vld [vmem:[%s12999_s5 + $0xf8] sm:$0xff] }
0x2e65   :  { %v8478_v22 = vpop.permute.xlu1 %8477 }
0x2e66   :  { %v8476_v62 = vpop.permute.xlu0 %8475  ;;  %v8498_v28 = vsel %vm800_vm1, %v10470_v10, %v8478_v22  ;;  %v11124_v22 = vpack.c.bf16 %v9318_v21, %v9317_v17 }
0x2e67   :  { %v8497_v1 = vsel %vm800_vm1, %v8221_v11, %v8476_v62  ;;  %v9308_v62 = vld [vmem:[%s13001_s7 + $0x32] ss:$0 sm:$0xff] }
0x2e69   :  { %v8486_v23 = vpop.permute.xlu1 %8485 }
0x2e6a   :  { %v8484_v31 = vpop.permute.xlu0 %8483  ;;  %v8500_v34 = vsel %vm1149_vm3, %v8498_v28, %v8486_v23 }
0x2e6b   :  { %v8499_v29 = vsel %vm1149_vm3, %v8497_v1, %v8484_v31 }
0x2e6d   :  { %v8494_v45 = vpop.permute.xlu1 %8493 }
0x2e6e   :  { %v8492_v30 = vpop.permute.xlu0 %8491  ;;  %v8502_v24 = vsel %vm1590_vm12, %v8500_v34, %v8494_v45 }
0x2e6f   :  { %v8501_v4 = vsel %vm1590_vm12, %v8499_v29, %v8492_v30  ;;  %v9319_v30 = vld [vmem:[%s13001_s7 + $0x33] ss:$0 sm:$0xff] }
0x2e70   :  { %10500 = vmatprep.mubr.msk.f32.mxu0 %vm500_vm13, %v8501_v4 }
0x2e71   :  { %10501 = vmatmul.mubr.msk.f32.vlgmr.msra.gmra.mrb[72].mxu0 %vm500_vm13, %v8502_v24 }
0x2e72   :  { %11115 = vmatpush3.bf16.msra.mxu0 %v11112_v5 }
0x2e73   :  { %11117 = vmatprep.subr.bf16.mxu0 %v11116_v15 }
0x2e76   :  { %11119 = vmatpush3.bf16.msra.mxu0 %v11116_v15 }
0x2e77   :  { %11121 = vmatprep.subr.bf16.mxu0 %v11120_v25 }
0x2e7a   :  { %11123 = vmatpush3.bf16.msra.mxu0 %v11120_v25 }
0x2e7b   :  { %11125 = vmatprep.subr.bf16.mxu0 %v11124_v22 }
0x2e7e   :  { %11127 = vmatpush3.bf16.msra.mxu0 %v11124_v22 }
0x2f44   :  { %v10502_v7 = vpop.f32.mrb[72].mxu0 }
0x2f45   :  { %v8591_v6 = vadd.f32 %v10502_v7, %v9299_v35  ;;  %v8585_v38 = vpop.f32.mrb[73].mxu0 }
0x2f46   :  { %v8586_v40 = vadd.f32 %v9299_v35, %v8585_v38 }
0x2f47   :  { %v8595_v41 = vadd.f32 %v8591_v6, %v12790_v61 }
0x2f48   :  { %v8594_v42 = vadd.f32 %v8586_v40, %v12786_v53  ;;  %v9304_v53 = vld [vmem:[%s12998_s4 + $0x60] sm:$0xff] }
0x2f49   :  { %v8599_v43 = vsel %vm4660_vm10, %v8595_v41, 0.0  ;;  %v11104_v59 = vpack.c.bf16 %v9305_v54, %v9304_v53 }
0x2f4a   :  { %8600 = vadd.xlane.f32.xlu1 %v8599_v43  ;;  %v8596_v44 = vsel %vm500_vm13, %v8594_v42, 0.0 }
0x2f4b   :  { %8597 = vadd.xlane.f32.xlu0 %v8596_v44  ;;  %11105 = vmatprep.subr.bf16.mxu1 %v11104_v59 }
0x2f4c   :  { %11107 = vmatpush3.bf16.msra.mxu1 %v11104_v59 }
0x2f4d   :  { %11109 = vmatprep.subr.bf16.mxu1 %v11108_v57 }
0x2f50   :  { %11111 = vmatpush3.bf16.msra.mxu1 %v11108_v57 }
0x2fd7   :  { %v8601_v3 = vpop.xlane.xlu1 %8600 }
0x2fd8   :  { %v8603_v63 = vmul.f32 0.03125, %v8601_v3  ;;  %v8598_v58 = vpop.xlane.xlu0 %8597 }
0x2fd9   :  { %v8602_v18 = vmul.f32 0.03125, %v8598_v58 }
0x2fda   :  { %v8605_v2 = vsub.f32 %v8595_v41, %v8603_v63 }
0x2fdb   :  { %v8604_v46 = vsub.f32 %v8594_v42, %v8602_v18 }
0x2fdc   :  { %v8607_v52 = vmul.f32 %v8605_v2, %v8605_v2 }
0x2fdd   :  { %v8606_v48 = vmul.f32 %v8604_v46, %v8604_v46 }
0x2fde   :  { %v8611_v61 = vsel %vm4660_vm10, %v8607_v52, 0.0 }
0x2fdf   :  { %v8608_v49 = vsel %vm500_vm13, %v8606_v48, 0.0 }
0x2fe0   :  { %8609 = vadd.xlane.f32.xlu0 %v8608_v49 }
0x2fe4   :  { %8612 = vadd.xlane.f32.xlu0 %v8611_v61 }
0x306d   :  { %v8610_v9 = vpop.xlane.xlu0 %8609 }
0x306e   :  { %v8614_v39 = vmul.f32 0.03125, %v8610_v9 }
0x3070   :  { %v8616_v27 = vadd.f32 1e-05, %v8614_v39 }
0x3071   :  { %v8613_v36 = vpop.xlane.xlu0 %8612 }
0x3072   :  { %11560 = vrsqrt.f32 %v8616_v27  ;;  %v8615_v10 = vmul.f32 0.03125, %v8613_v36 }
0x3074   :  { %v8617_v11 = vadd.f32 1e-05, %v8615_v10 }
0x3076   :  { %11562 = vrsqrt.f32 %v8617_v11 }
0x307c   :  { %v11561_v12 = vpop.eup %11560 }
0x307d   :  { %v8620_v14 = vmul.f32 %v11561_v12, %v8604_v46 }
0x307f   :  { %v8627_v33 = vmul.f32 %v9302_v37, %v8620_v14 }
0x3080   :  { %v11563_v32 = vpop.eup %11562 }
0x3081   :  { %v8621_v19 = vmul.f32 %v11563_v32, %v8605_v2  ;;  %v8634_v47 = vadd.f32 %v9303_v13, %v8627_v33  ;;  %v8907_v33 = vld [vmem:[%s13000_s6 + $0x8] sm:$0xff] }
0x3083   :  { %v8628_v51 = vmul.f32 %v9302_v37, %v8621_v19  ;;  %10511 = vmatprep.mubr.msk.f32.mxu1 %vm500_vm13, %v8634_v47  ;;  %v8908_v19 = vld [vmem:[%s13000_s6 + $0x10] sm:$0xff] }
0x3085   :  { %v8635_v50 = vadd.f32 %v9303_v13, %v8628_v51  ;;  %v8906_v13 = vld [vmem:[%s13000_s6] sm:$0xff] }
0x3086   :  { %v11128_v32 = vpack.c.bf16 %v8907_v33, %v8906_v13 }
0x3087   :  { %10512 = vmatmul.mubr.msk.f32.vlgmr.msra.gmra.mrb[90].mxu1 %vm500_vm13, %v8635_v50 }
0x3088   :  { %11129 = vmatprep.subr.bf16.mxu1 %v11128_v32 }
0x3089   :  { %11131 = vmatpush3.bf16.msra.mxu1 %v11128_v32 }
0x315a   :  { %v10513_v23 = vpop.f32.mrb[90].mxu1 }
0x315b   :  { %v8724_v31 = vadd.f32 %v10513_v23, %v9308_v62  ;;  %v8718_v1 = vpop.f32.mrb[91].mxu1 }
0x315c   :  { %v8719_v45 = vadd.f32 %v9308_v62, %v8718_v1  ;;  %v9324_v1 = vld [vmem:[%s13001_s7 + $0x36] ss:$0 sm:$0xff] }
0x315d   :  { %v8728_v29 = vmax.f32 %v8724_v31, 0.0 }
0x315e   :  { %v8727_v28 = vmax.f32 %v8719_v45, 0.0 }
0x3160   :  { %10530 = vmatprep.mubr.msk.f32.mxu0 %vm96_vm0, %v8727_v28 }
0x3161   :  { %10531 = vmatmul.mubr.msk.f32.vlgmr.msra.gmra.mrb[74].mxu0 %vm96_vm0, %v8728_v29 }
0x3234   :  { %v10532_v34 = vpop.f32.mrb[74].mxu0 }
0x3235   :  { %v8821_v4 = vadd.f32 %v10532_v34, %v9319_v30  ;;  %v8815_v24 = vpop.f32.mrb[75].mxu0  ;;  %v9325_v34 = vld [vmem:[%s13001_s7 + $0x37] ss:$0 sm:$0xff] }
0x3236   :  { %v8816_v35 = vadd.f32 %v9319_v30, %v8815_v24 }
0x3237   :  { %v8825_v7 = vadd.f32 %v8821_v4, %v8635_v50 }
0x3238   :  { %v8824_v6 = vadd.f32 %v8816_v35, %v8634_v47  ;;  %v8909_v47 = vld [vmem:[%s13000_s6 + $0x18] sm:$0xff] }
0x3239   :  { %v8829_v38 = vsel %vm4660_vm10, %v8825_v7, 0.0  ;;  %v11132_v51 = vpack.c.bf16 %v8909_v47, %v8908_v19 }
0x323a   :  { %8830 = vadd.xlane.f32.xlu0 %v8829_v38  ;;  %v8826_v40 = vsel %vm500_vm13, %v8824_v6, 0.0 }
0x323b   :  { %8827 = vadd.xlane.f32.xlu1 %v8826_v40  ;;  %11133 = vmatprep.subr.bf16.mxu1 %v11132_v51 }
0x323c   :  { %11135 = vmatpush3.bf16.msra.mxu1 %v11132_v51 }
0x32c7   :  { %v8831_v41 = vpop.xlane.xlu0 %8830 }
0x32c8   :  { %v8833_v42 = vmul.f32 0.03125, %v8831_v41  ;;  %v8828_v43 = vpop.xlane.xlu1 %8827 }
0x32c9   :  { %v8832_v44 = vmul.f32 0.03125, %v8828_v43 }
0x32ca   :  { %v8835_v3 = vsub.f32 %v8825_v7, %v8833_v42  ;;  %v9326_v7 = vld [vmem:[%s13001_s7 + $0x38] ss:$0 sm:$0xff] }
0x32cb   :  { %v8834_v63 = vsub.f32 %v8824_v6, %v8832_v44 }
0x32cc   :  { %v8837_v58 = vmul.f32 %v8835_v3, %v8835_v3 }
0x32cd   :  { %v8836_v18 = vmul.f32 %v8834_v63, %v8834_v63 }
0x32ce   :  { %v8841_v2 = vsel %vm4660_vm10, %v8837_v58, 0.0 }
0x32cf   :  { %8842 = vadd.xlane.f32.xlu0 %v8841_v2  ;;  %v8838_v46 = vsel %vm500_vm13, %v8836_v18, 0.0 }
0x32d0   :  { %8839 = vadd.xlane.f32.xlu1 %v8838_v46 }
0x335c   :  { %v8843_v48 = vpop.xlane.xlu0 %8842 }
0x335d   :  { %v8845_v49 = vmul.f32 0.03125, %v8843_v48  ;;  %v8840_v52 = vpop.xlane.xlu1 %8839 }
0x335e   :  { %v8844_v61 = vmul.f32 0.03125, %v8840_v52 }
0x335f   :  { %v8847_v53 = vadd.f32 1e-05, %v8845_v49 }
0x3360   :  { %v8846_v54 = vadd.f32 1e-05, %v8844_v61 }
0x3361   :  { %11564 = vrsqrt.f32 %v8847_v53 }
0x3362   :  { %11566 = vrsqrt.f32 %v8846_v54 }
0x336b   :  { %v11565_v59 = vpop.eup %11564 }
0x336c   :  { %v11567_v56 = vpop.eup %11566  ;;  %v8851_v57 = vmul.f32 %v11565_v59, %v8835_v3 }
0x336d   :  { %v8850_v0 = vmul.f32 %v11567_v56, %v8834_v63 }
0x336e   :  { %v8858_v20 = vmul.f32 %v9322_v55, %v8851_v57 }
0x336f   :  { %v8857_v5 = vmul.f32 %v9322_v55, %v8850_v0 }
0x3370   :  { %v8865_v16 = vadd.f32 %v9323_v60, %v8858_v20 }
0x3371   :  { %v8864_v15 = vadd.f32 %v9323_v60, %v8857_v5 }
0x3372   :  { %v8869_v8 = vsel %vm4660_vm10, %v8865_v16, 0.0 }
0x3373   :  { %8870 = vadd.xlane.f32.xlu0 %v8869_v8  ;;  %v8866_v26 = vsel %vm500_vm13, %v8864_v15, 0.0 }
0x3374   :  { %8867 = vadd.xlane.f32.xlu1 %v8866_v26 }
0x3400   :  { %v8871_v25 = vpop.xlane.xlu0 %8870 }
0x3401   :  { %v8873_v9 = vmul.f32 0.03125, %v8871_v25  ;;  %v8868_v39 = vpop.xlane.xlu1 %8867 }
0x3402   :  { %v8872_v27 = vmul.f32 0.03125, %v8868_v39 }
0x3403   :  { %v8875_v36 = vsub.f32 %v8865_v16, %v8873_v9 }
0x3404   :  { %v8874_v10 = vsub.f32 %v8864_v15, %v8872_v27 }
0x3405   :  { %v8877_v11 = vmul.f32 %v8875_v36, %v8875_v36 }
0x3406   :  { %v8876_v12 = vmul.f32 %v8874_v10, %v8874_v10 }
0x3407   :  { %v8881_v37 = vsel %vm4660_vm10, %v8877_v11, 0.0 }
0x3408   :  { %8882 = vadd.xlane.f32.xlu0 %v8881_v37  ;;  %v8878_v14 = vsel %vm500_vm13, %v8876_v12, 0.0 }
0x3409   :  { %8879 = vadd.xlane.f32.xlu1 %v8878_v14 }
0x3495   :  { %v8883_v50 = vpop.xlane.xlu0 %8882 }
0x3496   :  { %v8885_v17 = vmul.f32 0.03125, %v8883_v50  ;;  %v8880_v21 = vpop.xlane.xlu1 %8879 }
0x3497   :  { %v8884_v22 = vmul.f32 0.03125, %v8880_v21 }
0x3498   :  { %v8887_v62 = vadd.f32 1e-05, %v8885_v17 }
0x3499   :  { %v8886_v23 = vadd.f32 1e-05, %v8884_v22 }
0x349a   :  { %11568 = vrsqrt.f32 %v8887_v62 }
0x349b   :  { %11570 = vrsqrt.f32 %v8886_v23 }
0x34a4   :  { %v11569_v31 = vpop.eup %11568 }
0x34a5   :  { %v11571_v45 = vpop.eup %11570  ;;  %v8891_v28 = vmul.f32 %v11569_v31, %v8875_v36 }
0x34a6   :  { %v8890_v29 = vmul.f32 %v11571_v45, %v8874_v10 }
0x34a7   :  { %v8898_v30 = vmul.f32 %v9324_v1, %v8891_v28 }
0x34a8   :  { %v8897_v4 = vmul.f32 %v9324_v1, %v8890_v29 }
0x34a9   :  { %v8905_v35 = vadd.f32 %v9325_v34, %v8898_v30 }
0x34aa   :  { %v8904_v24 = vadd.f32 %v9325_v34, %v8897_v4 }
0x34ac   :  { %10541 = vmatprep.mubr.msk.f32.mxu1 %vm500_vm13, %v8904_v24 }
0x34ad   :  { %10542 = vmatmul.mubr.msk.f32.vlgmr.msra.gmra.mrb[92].mxu1 %vm500_vm13, %v8905_v35 }
0x3580   :  { %v10543_v6 = vpop.f32.mrb[92].mxu1 }
0x3581   :  { %v8993_v38 = vadd.f32 %v10543_v6, %v9326_v7  ;;  %v8987_v40 = vpop.f32.mrb[93].mxu1 }
0x3582   :  { %v8988_v41 = vadd.f32 %v9326_v7, %v8987_v40 }
0x3583   :  { %8997 = vst [vmem:[%s13002_s8 + $0x8] sm:$0xf] %v8993_v38 }
0x3584   :  { %8996 = vst [vmem:[%s13002_s8] sm:$0xff] %v8988_v41 }
0x3585   :  { %9002 = vsyncpa [#allocation3], 1 }

</bundles_post_ra>
